<compile_context>
chip_gen: v6e
topology: v6e:2x2x1
jax: 0.10.0
libtpu: 0.0.40
codegen_flags: <defaults>
</compile_context>

<pallas_src>
import jax
import jax.numpy as jnp
import numpy as np
from jax.experimental import pallas as pl
from jax.experimental.pallas import tpu as pltpu

NUM_CLASSES = 2
IN_FEATURES = 32 * 32 * 3          # 3072
HIDDEN = 1536
BN_EPS = 1e-5
TK = 1536                          # reduction tile over the 3072 input features


def catdognet_kernel(x_ref, w1_ref, b1_ref, gamma_ref, beta_ref,
                     w2_ref, b2_ref, out_ref, h_acc):
    """Grid axis 0 tiles the first-matmul reduction dim (3072 // TK steps).

    x (B, 3072) bf16 is resident in VMEM; W1 is streamed as (TK, 1536) bf16
    tiles.  h_acc (B, 1536) f32 accumulates x @ W1.  On the last step we add
    the bias, apply training-mode BatchNorm1d (batch mean / biased variance,
    matching torch's normalization path), then do the tiny second matmul.
    """
    k = pl.program_id(0)

    @pl.when(k == 0)
    def _():
        h_acc[...] = jnp.zeros_like(h_acc)

    # Slice the current K tile out of the resident x (128-lane-aligned offset).
    x_tile = x_ref[:, pl.ds(pl.multiple_of(k * TK, TK), TK)]
    h_acc[...] += jnp.dot(x_tile, w1_ref[...],
                          preferred_element_type=jnp.float32)

    @pl.when(k == pl.num_programs(0) - 1)
    def _():
        h = h_acc[...] + b1_ref[...]                       # (B, 1536) f32
        mean = jnp.mean(h, axis=0, keepdims=True)          # batch stats (train mode)
        var = jnp.mean((h - mean) ** 2, axis=0, keepdims=True)
        hn = (h - mean) * jax.lax.rsqrt(var + BN_EPS)
        hn = hn * gamma_ref[...] + beta_ref[...]
        out = jnp.dot(hn, w2_ref[...], preferred_element_type=jnp.float32)
        out_ref[...] = (out + b2_ref[...]).astype(out_ref.dtype)


def catdognet_forward(x_nchw, params):
    w1, b1, gamma, beta, w2, b2 = params                   # w1 is already bf16
    B = x_nchw.shape[0]
    # torch .view(-1, 3072); stream activations in bf16 too (f32 accumulate).
    x = x_nchw.reshape(B, IN_FEATURES).astype(jnp.bfloat16)

    n_k = IN_FEATURES // TK                                # 2 K-steps
    grid_spec = pltpu.PrefetchScalarGridSpec(
        num_scalar_prefetch=0,
        grid=(n_k,),
        in_specs=[
            pl.BlockSpec((B, IN_FEATURES), lambda k: (0, 0)),       # x, resident
            pl.BlockSpec((TK, HIDDEN), lambda k: (k, 0)),           # W1 tile (bf16)
            pl.BlockSpec((1, HIDDEN), lambda k: (0, 0)),            # b1
            pl.BlockSpec((1, HIDDEN), lambda k: (0, 0)),            # gamma
            pl.BlockSpec((1, HIDDEN), lambda k: (0, 0)),            # beta
            pl.BlockSpec((HIDDEN, NUM_CLASSES), lambda k: (0, 0)),  # W2 (full)
            pl.BlockSpec((1, NUM_CLASSES), lambda k: (0, 0)),       # b2
        ],
        out_specs=pl.BlockSpec((B, NUM_CLASSES), lambda k: (0, 0)),
        scratch_shapes=[pltpu.VMEM((B, HIDDEN), jnp.float32)],
    )

    return pl.pallas_call(
        catdognet_kernel,
        out_shape=jax.ShapeDtypeStruct((B, NUM_CLASSES), jnp.float32),
        grid_spec=grid_spec,
        compiler_params=pltpu.CompilerParams(
            dimension_semantics=("arbitrary",)),
    )(x, w1, b1, gamma, beta, w2, b2)


def init_params(key):
    """Deterministic init matching torch nn.Linear default (U[-1/sqrt(fan_in), +]).

    W1 is cast to bf16 once here (parameter-creation time), not per call.
    """
    k1, k2, k3, k4 = jax.random.split(key, 4)
    bound1 = 1.0 / np.sqrt(IN_FEATURES)
    w1 = jax.random.uniform(k1, (IN_FEATURES, HIDDEN), jnp.float32,
                            minval=-bound1, maxval=bound1).astype(jnp.bfloat16)
    b1 = jax.random.uniform(k2, (1, HIDDEN), jnp.float32,
                            minval=-bound1, maxval=bound1)
    gamma = jnp.ones((1, HIDDEN), jnp.float32)
    beta = jnp.zeros((1, HIDDEN), jnp.float32)
    bound2 = 1.0 / np.sqrt(HIDDEN)
    w2 = jax.random.uniform(k3, (HIDDEN, NUM_CLASSES), jnp.float32,
                            minval=-bound2, maxval=bound2)
    b2 = jax.random.uniform(k4, (1, NUM_CLASSES), jnp.float32,
                            minval=-bound2, maxval=bound2)
    return (w1, b1, gamma, beta, w2, b2)


def reference_forward(x_nchw, params):
    """Pure-JAX reference using the same bf16-in / f32-accumulate numerics."""
    w1, b1, gamma, beta, w2, b2 = params
    x = x_nchw.reshape(x_nchw.shape[0], IN_FEATURES).astype(jnp.bfloat16)
    h = jnp.dot(x, w1, preferred_element_type=jnp.float32) + b1
    mean = jnp.mean(h, axis=0, keepdims=True)
    var = jnp.mean((h - mean) ** 2, axis=0, keepdims=True)
    hn = (h - mean) * jax.lax.rsqrt(var + BN_EPS) * gamma + beta
    return jnp.dot(hn, w2, preferred_element_type=jnp.float32) + b2


if __name__ == "__main__":
    key = jax.random.PRNGKey(0)
    kx, kp = jax.random.split(key)
    # torch input is NCHW: (batch, 3, 32, 32); batch=8 (>1, needed for BatchNorm stats)
    x = jax.random.normal(kx, (8, 3, 32, 32), jnp.float32)
    params = init_params(kp)

    out = catdognet_forward(x, params)
    out = jax.block_until_ready(out)

    ref = reference_forward(x, params)
    np.testing.assert_allclose(np.asarray(out), np.asarray(ref),
                               rtol=1e-2, atol=1e-2)
    print("KERNEL_OK")
</pallas_src>

<mosaic_0001>
module attributes {stable_mosaic.version = 11 : i64} {
  func.func @catdognet_kernel(%arg0: i32, %arg1: memref<8x3072xbf16, #tpu.memory_space<vmem>>, %arg2: memref<1536x1536xbf16, #tpu.memory_space<vmem>>, %arg3: memref<1x1536xf32, #tpu.memory_space<vmem>>, %arg4: memref<1x1536xf32, #tpu.memory_space<vmem>>, %arg5: memref<1x1536xf32, #tpu.memory_space<vmem>>, %arg6: memref<1536x2xf32, #tpu.memory_space<vmem>>, %arg7: memref<1x2xf32, #tpu.memory_space<vmem>>, %arg8: memref<8x2xf32, #tpu.memory_space<vmem>>, %arg9: memref<8x1536xf32, #tpu.memory_space<vmem>>) attributes {dimension_semantics = [#tpu.dimension_semantics<arbitrary>], iteration_bounds = array<i64: 2>, scalar_prefetch = 0 : i64, scratch_operands = 1 : i64, tpu.core_type = #tpu.core_type<tc>, window_params = [{pipeline_mode = #tpu.pipeline_mode<synchronous>, transform_indices = @transform_0, window_bounds = array<i64: 8, 3072>}, {transform_indices = @transform_1, window_bounds = array<i64: 1536, 1536>}, {pipeline_mode = #tpu.pipeline_mode<synchronous>, transform_indices = @transform_2, window_bounds = array<i64: 1, 1536>}, {pipeline_mode = #tpu.pipeline_mode<synchronous>, transform_indices = @transform_3, window_bounds = array<i64: 1, 1536>}, {pipeline_mode = #tpu.pipeline_mode<synchronous>, transform_indices = @transform_4, window_bounds = array<i64: 1, 1536>}, {pipeline_mode = #tpu.pipeline_mode<synchronous>, transform_indices = @transform_5, window_bounds = array<i64: 1536, 2>}, {pipeline_mode = #tpu.pipeline_mode<synchronous>, transform_indices = @transform_6, window_bounds = array<i64: 1, 2>}, {pipeline_mode = #tpu.pipeline_mode<synchronous>, transform_indices = @transform_7, window_bounds = array<i64: 8, 2>}]} {
    %c0_i32 = arith.constant 0 : i32
    %0 = arith.cmpi eq, %arg0, %c0_i32 : i32
    %1 = arith.extui %0 : i1 to i32
    %c0_i32_0 = arith.constant 0 : i32
    %2 = arith.cmpi ne, %1, %c0_i32_0 : i32
    scf.if %2 {
      %cst_8 = arith.constant 0.000000e+00 : f32
      %15 = vector.broadcast %cst_8 : f32 to vector<8x1536xf32>
      %c0_9 = arith.constant 0 : index
      %c0_10 = arith.constant 0 : index
      %16 = vector.load %arg9[%c0_9, %c0_10] : memref<8x1536xf32, #tpu.memory_space<vmem>>, vector<8x1536xf32>
      tpu.vector_store %arg9[%c0_9, %c0_10], %15 {strides = array<i32>} : memref<8x1536xf32, #tpu.memory_space<vmem>>, vector<8x1536xf32>,
    } else {
    }
    %c1536_i32 = arith.constant 1536 : i32
    %3 = arith.muli %arg0, %c1536_i32 : i32
    %4 = tpu.assume_multiple %3, 1536 : i32
    %c0 = arith.constant 0 : index
    %5 = arith.index_cast %4 : i32 to index
    %6 = vector.load %arg1[%c0, %5] : memref<8x3072xbf16, #tpu.memory_space<vmem>>, vector<8x1536xbf16>
    %c0_1 = arith.constant 0 : index
    %c0_2 = arith.constant 0 : index
    %7 = vector.load %arg9[%c0_1, %c0_2] : memref<8x1536xf32, #tpu.memory_space<vmem>>, vector<8x1536xf32>
    %c0_3 = arith.constant 0 : index
    %c0_4 = arith.constant 0 : index
    %8 = vector.load %arg2[%c0_3, %c0_4] : memref<1536x1536xbf16, #tpu.memory_space<vmem>>, vector<1536x1536xbf16>
    %cst = arith.constant dense<0.000000e+00> : vector<8x1536xf32>
    %9 = tpu.matmul %6, %8, %cst {dimension_numbers = #tpu.dot_dimension_numbers<[1], [0], [0], [1], [0, 0, 1, 1], [], []>} : vector<8x1536xbf16>, vector<1536x1536xbf16>, vector<8x1536xf32> -> vector<8x1536xf32>
    %10 = arith.addf %7, %9 : vector<8x1536xf32>
    %c0_5 = arith.constant 0 : index
    %c0_6 = arith.constant 0 : index
    %11 = vector.load %arg9[%c0_5, %c0_6] : memref<8x1536xf32, #tpu.memory_space<vmem>>, vector<8x1536xf32>
    tpu.vector_store %arg9[%c0_5, %c0_6], %10 {strides = array<i32>} : memref<8x1536xf32, #tpu.memory_space<vmem>>, vector<8x1536xf32>,
    %c1_i32 = arith.constant 1 : i32
    %12 = arith.cmpi eq, %arg0, %c1_i32 : i32
    %13 = arith.extui %12 : i1 to i32
    %c0_i32_7 = arith.constant 0 : i32
    %14 = arith.cmpi ne, %13, %c0_i32_7 : i32
    scf.if %14 {
      %c0_8 = arith.constant 0 : index
      %c0_9 = arith.constant 0 : index
      %15 = vector.load %arg9[%c0_8, %c0_9] : memref<8x1536xf32, #tpu.memory_space<vmem>>, vector<8x1536xf32>
      %c0_10 = arith.constant 0 : index
      %c0_11 = arith.constant 0 : index
      %16 = vector.load %arg3[%c0_10, %c0_11] : memref<1x1536xf32, #tpu.memory_space<vmem>>, vector<1x1536xf32>
      %17 = vector.broadcast %16 : vector<1x1536xf32> to vector<8x1536xf32>
      %18 = arith.addf %15, %17 : vector<8x1536xf32>
      %cst_12 = arith.constant dense<0.000000e+00> : vector<1536xf32>
      %19 = vector.multi_reduction <add>, %18, %cst_12 [0] : vector<8x1536xf32> to vector<1536xf32>
      %20 = vector.shape_cast %19 : vector<1536xf32> to vector<1x1536xf32>
      %cst_13 = arith.constant 8.000000e+00 : f32
      %21 = vector.broadcast %cst_13 : f32 to vector<1x1536xf32>
      %22 = arith.divf %20, %21 : vector<1x1536xf32>
      %23 = vector.broadcast %22 : vector<1x1536xf32> to vector<8x1536xf32>
      %24 = arith.subf %18, %23 : vector<8x1536xf32>
      %25 = arith.mulf %24, %24 : vector<8x1536xf32>
      %cst_14 = arith.constant dense<0.000000e+00> : vector<1536xf32>
      %26 = vector.multi_reduction <add>, %25, %cst_14 [0] : vector<8x1536xf32> to vector<1536xf32>
      %27 = vector.shape_cast %26 : vector<1536xf32> to vector<1x1536xf32>
      %cst_15 = arith.constant 8.000000e+00 : f32
      %28 = vector.broadcast %cst_15 : f32 to vector<1x1536xf32>
      %29 = arith.divf %27, %28 : vector<1x1536xf32>
      %30 = vector.broadcast %22 : vector<1x1536xf32> to vector<8x1536xf32>
      %31 = arith.subf %18, %30 : vector<8x1536xf32>
      %cst_16 = arith.constant 9.99999974E-6 : f32
      %32 = vector.broadcast %cst_16 : f32 to vector<1x1536xf32>
      %33 = arith.addf %29, %32 : vector<1x1536xf32>
      %34 = math.rsqrt %33 : vector<1x1536xf32>
      %35 = vector.broadcast %34 : vector<1x1536xf32> to vector<8x1536xf32>
      %36 = arith.mulf %31, %35 : vector<8x1536xf32>
      %c0_17 = arith.constant 0 : index
      %c0_18 = arith.constant 0 : index
      %37 = vector.load %arg4[%c0_17, %c0_18] : memref<1x1536xf32, #tpu.memory_space<vmem>>, vector<1x1536xf32>
      %38 = vector.broadcast %37 : vector<1x1536xf32> to vector<8x1536xf32>
      %39 = arith.mulf %36, %38 : vector<8x1536xf32>
      %c0_19 = arith.constant 0 : index
      %c0_20 = arith.constant 0 : index
      %40 = vector.load %arg5[%c0_19, %c0_20] : memref<1x1536xf32, #tpu.memory_space<vmem>>, vector<1x1536xf32>
      %41 = vector.broadcast %40 : vector<1x1536xf32> to vector<8x1536xf32>
      %42 = arith.addf %39, %41 : vector<8x1536xf32>
      %c0_21 = arith.constant 0 : index
      %c0_22 = arith.constant 0 : index
      %43 = vector.load %arg6[%c0_21, %c0_22] : memref<1536x2xf32, #tpu.memory_space<vmem>>, vector<1536x2xf32>
      %cst_23 = arith.constant dense<0.000000e+00> : vector<8x2xf32>
      %44 = tpu.matmul %42, %43, %cst_23 {dimension_numbers = #tpu.dot_dimension_numbers<[1], [0], [0], [1], [0, 0, 1, 1], [], []>} : vector<8x1536xf32>, vector<1536x2xf32>, vector<8x2xf32> -> vector<8x2xf32>
      %c0_24 = arith.constant 0 : index
      %c0_25 = arith.constant 0 : index
      %45 = vector.load %arg7[%c0_24, %c0_25] : memref<1x2xf32, #tpu.memory_space<vmem>>, vector<1x2xf32>
      %46 = vector.broadcast %45 : vector<1x2xf32> to vector<8x2xf32>
      %47 = arith.addf %44, %46 : vector<8x2xf32>
      %c0_26 = arith.constant 0 : index
      %c0_27 = arith.constant 0 : index
      %48 = vector.load %arg8[%c0_26, %c0_27] : memref<8x2xf32, #tpu.memory_space<vmem>>, vector<8x2xf32>
      tpu.vector_store %arg8[%c0_26, %c0_27], %47 {strides = array<i32>} : memref<8x2xf32, #tpu.memory_space<vmem>>, vector<8x2xf32>,
    } else {
    }
    return
  }
  func.func @transform_0(%arg0: i32) -> (i32, i32) {
    %c0_i32 = arith.constant 0 : i32
    %c0_i32_0 = arith.constant 0 : i32
    %c0_i32_1 = arith.constant 0 : i32
    return %c0_i32, %c0_i32_0 : i32, i32
  }
  func.func @transform_1(%arg0: i32) -> (i32, i32) {
    %c0_i32 = arith.constant 0 : i32
    %c0_i32_0 = arith.constant 0 : i32
    return %arg0, %c0_i32 : i32, i32
  }
  func.func @transform_2(%arg0: i32) -> (i32, i32) {
    %c0_i32 = arith.constant 0 : i32
    %c0_i32_0 = arith.constant 0 : i32
    %c0_i32_1 = arith.constant 0 : i32
    return %c0_i32, %c0_i32_0 : i32, i32
  }
  func.func @transform_3(%arg0: i32) -> (i32, i32) {
    %c0_i32 = arith.constant 0 : i32
    %c0_i32_0 = arith.constant 0 : i32
    %c0_i32_1 = arith.constant 0 : i32
    return %c0_i32, %c0_i32_0 : i32, i32
  }
  func.func @transform_4(%arg0: i32) -> (i32, i32) {
    %c0_i32 = arith.constant 0 : i32
    %c0_i32_0 = arith.constant 0 : i32
    %c0_i32_1 = arith.constant 0 : i32
    return %c0_i32, %c0_i32_0 : i32, i32
  }
  func.func @transform_5(%arg0: i32) -> (i32, i32) {
    %c0_i32 = arith.constant 0 : i32
    %c0_i32_0 = arith.constant 0 : i32
    %c0_i32_1 = arith.constant 0 : i32
    return %c0_i32, %c0_i32_0 : i32, i32
  }
  func.func @transform_6(%arg0: i32) -> (i32, i32) {
    %c0_i32 = arith.constant 0 : i32
    %c0_i32_0 = arith.constant 0 : i32
    %c0_i32_1 = arith.constant 0 : i32
    return %c0_i32, %c0_i32_0 : i32, i32
  }
  func.func @transform_7(%arg0: i32) -> (i32, i32) {
    %c0_i32 = arith.constant 0 : i32
    %c0_i32_0 = arith.constant 0 : i32
    %c0_i32_1 = arith.constant 0 : i32
    return %c0_i32, %c0_i32_0 : i32, i32
  }
}

</mosaic_0001>

<bundles_post_ra>
// kernel: tpu_custom_call.1
= control target key start
LH: loop header
LB: loop body
LE: loop exit
PB: predicated region body
PF: predicated region fallthrough
CT: control target
= control target key end

     0   :  { %12 = vsyncpa [#allocation4], 0  ;;  %s15877_s0 = inlined_call_operand.hbm [shape: bf16[8,3072], index: 0, kind: input, shape index: {}]   ;;  %s15878_s1 = inlined_call_operand.hbm [shape: bf16[3072,1536], index: 1, kind: input, shape index: {}]   ;;  %s15879_s2 = inlined_call_operand.hbm [shape: f32[1,1536], index: 2, kind: input, shape index: {}]   ;;  %s15880_s3 = inlined_call_operand.hbm [shape: f32[1,1536], index: 3, kind: input, shape index: {}]   ;;  %s15881_s4 = inlined_call_operand.hbm [shape: f32[1,1536], index: 4, kind: input, shape index: {}]   ;;  %s15882_s5 = inlined_call_operand.vmem [shape: f32[1536,2], index: 5, kind: input, shape index: {}]   ;;  %s15883_s6 = inlined_call_operand.hbm [shape: f32[1,2], index: 6, kind: input, shape index: {}]   ;;  %s15884_s7 = inlined_call_operand.vmem [shape: f32[8,2], index: 7, kind: output, shape index: {}]  }
   0x1   :  { %13 = vsyncpa [#allocation6], 0 }
   0x2   :  { %15 = vsyncpa [#allocation6 + $0x1], 0 }
   0x3   :  { %16 = vsyncpa [#allocation9], 0 }
   0x4   :  { %17 = vsyncpa [#allocation12], 0  ;;  %s13542_s24 = smov 0   ;;  %s13544_s25 = smov 0  }
   0x5   :  { %s13546_s26 = smov 0   ;;  %s13548_s27 = smov 0  }
   0x6 LB: > { %s13561_s28 = sadd.s32 4294967295, %s13491_s27   ;;  %p64_p0 = scmp.ne.s32.totalorder %s13483_s25, %s13479_s24  ;;  %s13491_s27 = sphi %s13548_s27, %s15907_s27   ;;  %s13487_s26 = sphi %s13546_s26, %s15906_s26   ;;  %s13483_s25 = sphi %s13544_s25, %s15905_s25   ;;  %s13479_s24 = sphi %s13542_s24, %s15904_s24  }
   0x7   : > { %p15885_p1 = scmp.eq.s32.totalorder %s13561_s28, 0  ;;  %p10028_p2 = scmp.ge.s32.totalorder %s13491_s27, 1 }
   0x8   : > { %p201_p3 = scmp.lt.s32.totalorder %s13491_s27, 3  ;;  %s13493_s8 = smov [#allocation7]  }
   0x9   : > { %p13570_p5 = por %p15885_p1, %p64_p0  ;;  %s225_s9 = sshll.u32 %s13493_s8, 4  ;;  %s226_s9 = int_to_ptr.vmem [resolvable:$true] %s225_s9 }
   0xa   : > { %p13574_p6 = pnand %p10028_p2, %p201_p3  ;;  %s13494_s11 = smov [#allocation8]  }
   0xb   : > { %s15888_s29 = scalar_select %p13570_p5, 1, 0 }
   0xc   : > { %s15889_s30 = scalar_select %p13574_p6, 1, 0 }
   0xd   : > { %p11447_p7 = pneg %p13574_p6  ;;  %s236_s12 = sshll.u32 %s13494_s11, 4  ;;  %s237_s12 = int_to_ptr.vmem [resolvable:$true] %s236_s12 }
   0xe   : > { %s13495_s13 = smov [#allocation3]   ;;  %s13294_s16 = scalar_lea.vmem %s226_s9, 192 }
   0xf   : > { %p13582_p8 = pnand %p11447_p7, %p15885_p1  ;;  %s214_s14 = sshll.u32 %s13495_s13, 4  ;;  %s13586_s14 = int_to_ptr.vmem [resolvable:$true] %s214_s14 }
  0x10   : > { %p13295_p10 = scmp.ne.s32.totalorder %s226_s9, %s13294_s16  ;;  %p13302_p13 = scmp.lt.s32.totalorder %s226_s9, %s226_s9 }
  0x11   : > { %p13590_p9 = pneg %p13582_p8  ;;  %p13303_p0 = scmp.lt.s32.totalorder %s13294_s16, %s13294_s16 }
  0x13   : > { %p13297_p11 = pnand %p13295_p10, %p13590_p9  ;;  %p13304_p2 = por %p13303_p0, %p13302_p13 }
  0x15   : > { %p13298_p12 = pneg %p13297_p11 }
  0x17   : > { %p13305_p3 = pnand %p13304_p2, %p13298_p12 }
  0x19   : > { %13308 = shalt.err (!%p13305_p3)
}
  0x1a   : > { %11453 = dma.hbm_to_vmem [thread:$0]  (!%p13582_p8), %s15879_s2, 192, %s226_s9, [#allocation6]  }
  0x1b   : > { %s13320_s19 = scalar_lea.vmem %s237_s12, 192  ;;  %p13328_p5 = scmp.lt.s32.totalorder %s237_s12, %s237_s12 }
  0x1c   : > { %p13321_p7 = scmp.ne.s32.totalorder %s237_s12, %s13320_s19  ;;  %p13329_p10 = scmp.lt.s32.totalorder %s13320_s19, %s13320_s19 }
  0x1e   : > { %p13323_p4 = pnand %p13321_p7, %p13590_p9  ;;  %p13330_p11 = por %p13329_p10, %p13328_p5 }
  0x20   : > { %p13324_p1 = pneg %p13323_p4 }
  0x22   : > { %p13331_p6 = pnand %p13330_p11, %p13324_p1 }
  0x24   : > { %13334 = shalt.err (!%p13331_p6)
}
  0x25   : > { %11456 = dma.hbm_to_vmem [thread:$0]  (!%p13582_p8), %s15880_s3, 192, %s237_s12, [#allocation9]  }
  0x26   : > { %s13346_s22 = scalar_lea.vmem %s13586_s14, 1536  ;;  %p13354_p0 = scmp.lt.s32.totalorder %s13586_s14, %s13586_s14 }
  0x27   : > { %p13347_p12 = scmp.ne.s32.totalorder %s13586_s14, %s13346_s22  ;;  %p13355_p5 = scmp.lt.s32.totalorder %s13346_s22, %s13346_s22 }
  0x29   : > { %p13349_p13 = pnand %p13347_p12, %p13590_p9  ;;  %p13356_p1 = por %p13355_p5, %p13354_p0 }
  0x2b   : > { %p13350_p4 = pneg %p13349_p13 }
  0x2d   : > { %p13357_p6 = pnand %p13356_p1, %p13350_p4 }
  0x2f   : > { %13360 = shalt.err (!%p13357_p6)
}
  0x30   : > { %11450 = dma.hbm_to_vmem [thread:$0]  (!%p13582_p8), %s15877_s0, 1536, %s13586_s14, [#allocation4]  }
  0x31   : > { %s13496_s8 = smov [#allocation10]   ;;  %s13497_s11 = smov [#allocation11]  }
  0x32   : > { %s247_s9 = sshll.u32 %s13496_s8, 4  ;;  %s261_s12 = sshll.u32 %s13497_s11, 4  ;;  %s248_s9 = int_to_ptr.vmem [resolvable:$true] %s247_s9  ;;  %s262_s12 = int_to_ptr.vmem [resolvable:$true] %s261_s12 }
  0x33   : > { %s13372_s13 = scalar_lea.vmem %s248_s9, 192  ;;  %p13380_p10 = scmp.lt.s32.totalorder %s248_s9, %s248_s9 }
  0x34   : > { %p13373_p2 = scmp.ne.s32.totalorder %s248_s9, %s13372_s13  ;;  %p13381_p11 = scmp.lt.s32.totalorder %s13372_s13, %s13372_s13 }
  0x36   : > { %p13375_p3 = pnand %p13373_p2, %p13590_p9  ;;  %p13382_p12 = por %p13381_p11, %p13380_p10 }
  0x38   : > { %p13376_p7 = pneg %p13375_p3 }
  0x3a   : > { %p13383_p13 = pnand %p13382_p12, %p13376_p7 }
  0x3c   : > { %13386 = shalt.err (!%p13383_p13)
}
  0x3d   : > { %11459 = dma.hbm_to_vmem [thread:$0]  (!%p13582_p8), %s15881_s4, 192, %s248_s9, [#allocation9]  }
  0x3e   : > { %s13398_s17 = scalar_lea.vmem %s262_s12, 16  ;;  %s13405_s18 = scalar_lea.vmem %s262_s12, 32 }
  0x3f   : > { %p13399_p4 = scmp.ne.s32.totalorder %s262_s12, %s13398_s17  ;;  %p13406_p1 = scmp.lt.s32.totalorder %s262_s12, %s262_s12 }
  0x40   : > { %p13407_p6 = scmp.lt.s32.totalorder %s13405_s18, %s13398_s17 }
  0x41   : > { %p13401_p0 = pnand %p13399_p4, %p13590_p9 }
  0x42   : > { %p13408_p2 = por %p13407_p6, %p13406_p1 }
  0x43   : > { %p13402_p5 = pneg %p13401_p0 }
  0x45   : > { %p13409_p3 = pnand %p13408_p2, %p13402_p5 }
  0x47   : > { %13412 = shalt.err (!%p13409_p3)
}
  0x48   : > { %11462 = dma.hbm_to_vmem [thread:$0]  (!%p13582_p8), %s15883_s6, 16, %s262_s12, [#allocation12]  }
  0x49   : > { %s13635_s15 = sadd.s32 1, %s13491_s27   ;;  %s51_s10 = sadd.s32 1, %s13487_s26 }
  0x4a   : > { %s48_s21 = ssub.s32 %s13491_s27, %s13635_s15  ;;  %p58_p7 = scmp.ne.s32.totalorder %s13487_s26, %s13483_s25 }
  0x4b   : > { %p49_p9 = scmp.eq.s32.totalorder %s48_s21, 0  ;;  %p59_p10 = scmp.eq.s32.totalorder %s13491_s27, 0 }
  0x4c   : > { %p11472_p12 = scmp.lt.s32.totalorder %s13491_s27, 2  ;;  %s272_s23 = sand.u32 1, %s13491_s27  }
  0x4d   : > { %s13644_s22 = scalar_select %p49_p9, %s13487_s26, %s51_s10  }
  0x4e   : > { %p60_p11 = por %p59_p10, %p58_p7  ;;  %s274_s24 = sand.u32 1, %s13487_s26  }
  0x4f   : > { %s11422_s8 = smul.u32 9216, %s274_s24  ;;  %s13661_s18 = scalar_lea.sflag [#allocation6], %s272_s23 }
  0x50   : > { %s11473_s9 = smul.u32 147456, %s13491_s27  ;;  %p13650_p13 = pnand %p11472_p12, %p60_p11 }
  0x51   : > { %s276_s14 = scalar_lea.vmem [#allocation5], %s11422_s8  ;;  %s13418_s21 = scalar_lea.hbm %s15878_s1, 294912 }
  0x52   : > { %s13657_s16 = scalar_lea.hbm %s15878_s1, %s11473_s9  ;;  %s284_s17 = sshll.u32 %s276_s14, 4  ;;  %s13659_s17 = int_to_ptr.vmem [resolvable:$true] %s284_s17 }
  0x53   : > { %s13413_s27 = scalar_lea.hbm %s13657_s16, 147456  ;;  %p13415_p4 = pneg %p13650_p13 }
  0x54   : > { %p13414_p8 = scmp.ne.s32.totalorder %s13657_s16, %s13413_s27  ;;  %p13419_p1 = scmp.lt.s32.totalorder %s13657_s16, %s15878_s1 }
  0x55   : > { %p13420_p6 = scmp.lt.s32.totalorder %s13418_s21, %s13413_s27 }
  0x56   : > { %p13416_p0 = pnand %p13415_p4, %p13414_p8 }
  0x57   : > { %p13421_p2 = por %p13420_p6, %p13419_p1 }
  0x58   : > { %p13417_p5 = pneg %p13416_p0 }
  0x5a   : > { %p13422_p3 = pnand %p13421_p2, %p13417_p5 }
  0x5c   : > { %13425 = shalt.err (!%p13422_p3)
}
  0x5d   : > { %s13426_s23 = scalar_lea.vmem %s13659_s17, 147456  ;;  %s13498_s8 = smov [#allocation5]  }
  0x5e   : > { %p13427_p9 = scmp.ne.s32.totalorder %s13659_s17, %s13426_s23  ;;  %s13431_s9 = sshll.u32 %s13498_s8, 4  ;;  %s13432_s9 = int_to_ptr.vmem [resolvable:$false] %s13431_s9 }
  0x5f   : > { %s13433_s12 = scalar_lea.vmem %s13432_s9, 294912  ;;  %p13434_p11 = scmp.lt.s32.totalorder %s13659_s17, %s13432_s9 }
  0x60   : > { %p13429_p7 = pnand %p13427_p9, %p13415_p4  ;;  %p13435_p12 = scmp.lt.s32.totalorder %s13433_s12, %s13426_s23 }
  0x62   : > { %p13430_p10 = pneg %p13429_p7  ;;  %p13436_p8 = por %p13435_p12, %p13434_p11 }
  0x64   : > { %p13437_p0 = pnand %p13436_p8, %p13430_p10 }
  0x66   : > { %13440 = shalt.err (!%p13437_p0)
}
  0x67   : > { %s13499_s13 = smov 768   ;;  %s13500_s14 = smov 48  }
  0x68   : > { %11466 = dma.hbm_to_vmem [thread:$0]  (!%p13650_p13), %s13657_s16, 147456, %s13659_s17, %s13661_s18, %s13499_s13, %s13499_s13, %s13500_s14  }
  0x69   : > { %p15893_p4 = scmp.ne.s32.totalorder %s15889_s30, 0 }
  0x6a   : > { %p15894_p5 = scmp.eq.s32.totalorder (!%p15893_p4), %s13561_s28, 0 }
  0x6b   : > { %296 = sbr.rel (%p15893_p4) target bundleno = 1843 (0x733), region = 48 }
  0x70   : > { %13458 = dma.done.wait (%p15894_p5), [#allocation4], 1536   ;;  %p15895_p1 = pmov %p15894_p5 }
  0x71   : > { %s302_s27 = sand.u32 1, %s13561_s28   ;;  %s304_s19 = sand.u32 1, %s13483_s25  }
  0x72   : > { %13460 = vsyncadd (%p15895_p1), [#allocation4], 4294965760  ;;  %s11424_s20 = smul.u32 9216, %s304_s19  ;;  %s303_s21 = scalar_lea.sflag [#allocation6], %s302_s27 }
  0x73   : > { %p15896_p6 = scmp.ne.s32.totalorder %s15888_s29, 0 }
  0x74   : > { %s13690_s10 = scalar_lea.vmem [#allocation5], %s11424_s20 }
  0x75   : > { %13462 = dma.done.wait (%p15896_p6), %s303_s21, 147456  }
  0x76   : > { %13464 = vsyncadd (%p15896_p6), %s303_s21, 4294819840  ;;  %p15897_p13 = pmov %p15895_p1 }
  0x77   : > { %p15898_p2 = pmov %p15895_p1 }
  0x78   : > { %13466 = dma.done.wait (%p15897_p13), [#allocation6], 192  }
  0x79   : > { %13468 = vsyncadd (%p15898_p2), [#allocation6], 4294967104  ;;  %p15899_p3 = pmov %p15895_p1 }
  0x7a   : > { %p15900_p9 = pmov %p15895_p1 }
  0x7b   : > { %13470 = dma.done.wait (%p15899_p3), [#allocation9], 384  }
  0x7c   : > { %13472 = vsyncadd (%p15900_p9), [#allocation9], 4294966912  ;;  %p15901_p7 = pmov %p15895_p1 }
  0x7d   : > { %p15902_p10 = pmov %p15895_p1 }
  0x7e   : > { %13474 = dma.done.wait (%p15901_p7), [#allocation12], 16  }
  0x7f   : > { %13476 = vsyncadd (%p15902_p10), [#allocation12], 4294967280  ;;  %p15903_p11 = scmp.ne.s32.totalorder %s13561_s28, 0 }
  0x81   : > { %352 = sbr.rel (%p15903_p11) target bundleno = 141 (0x8d), region = 76 }
  0x86   : > { %v13501_v0 = vmov 0.0  }
  0x87   : > { %353 = vst [vmem:[#allocation2 + $0x30] sm:$0xff] %v13501_v0  ;;  %354 = vst [vmem:[#allocation2] sm:$0xff] %v13501_v0 }
  0x88   : > { %355 = vst [vmem:[#allocation2 + $0x58] sm:$0xff] %v13501_v0  ;;  %356 = vst [vmem:[#allocation2 + $0x18] sm:$0xff] %v13501_v0 }
  0x89   : > { %357 = vst [vmem:[#allocation2 + $0x50] sm:$0xff] %v13501_v0  ;;  %358 = vst [vmem:[#allocation2 + $0x20] sm:$0xff] %v13501_v0 }
  0x8a   : > { %359 = vst [vmem:[#allocation2 + $0x8] sm:$0xff] %v13501_v0  ;;  %360 = vst [vmem:[#allocation2 + $0x38] sm:$0xff] %v13501_v0 }
  0x8b   : > { %361 = vst [vmem:[#allocation2 + $0x28] sm:$0xff] %v13501_v0  ;;  %362 = vst [vmem:[#allocation2 + $0x48] sm:$0xff] %v13501_v0 }
  0x8c   : > { %363 = vst [vmem:[#allocation2 + $0x10] sm:$0xff] %v13501_v0  ;;  %364 = vst [vmem:[#allocation2 + $0x40] sm:$0xff] %v13501_v0 }
  0x8d PF: > { %v11519_v1 = vld [vmem:[%s13690_s10 + $0x2a4] ss:$48 sps:$4 sm:$0xff]   ;;  %v11523_v3 = vld [vmem:[%s13690_s10 + $0x2a0] ss:$48 sps:$4 sm:$0xff]   ;;  %s365_s29 = smul.u32 1536, %s13561_s28  ;;  %p11208_p12 = scmp.ne.s32.totalorder %s13561_s28, 1 }
  0x8e   : > { %v11521_v2 = vld [vmem:[%s13690_s10 + $0x8a4] ss:$48 sps:$4 sm:$0xff]   ;;  %7342 = vmatprep.subr.bf16.mxu0 %v11519_v1  ;;  %v11524_v4 = vld [vmem:[%s13690_s10 + $0x8a0] ss:$48 sps:$4 sm:$0xff]  }
  0x8f   : > { %7383 = vmatprep.subr.bf16.mxu1 %v11521_v2  ;;  %v11525_v5 = vld [vmem:[%s13690_s10 + $0x244] ss:$48 sps:$4 sm:$0xff]   ;;  %7343 = vmatpush1.bf16.msra.mxu0 %v11523_v3  ;;  %v11529_v7 = vld [vmem:[%s13690_s10 + $0x240] ss:$48 sps:$4 sm:$0xff]   ;;  %s366_s30 = sshra.s32 %s365_s29, 7 }
  0x90   : > { %7384 = vmatpush1.bf16.msra.mxu1 %v11524_v4  ;;  %v11527_v6 = vld [vmem:[%s13690_s10 + $0x844] ss:$48 sps:$4 sm:$0xff]   ;;  %7344 = vmatprep.subr.bf16.mxu0 %v11525_v5  ;;  %v11530_v8 = vld [vmem:[%s13690_s10 + $0x840] ss:$48 sps:$4 sm:$0xff]   ;;  %s10043_s11 = sshll.u32 %s366_s30, 2 }
  0x91   : > { %7385 = vmatprep.subr.bf16.mxu1 %v11527_v6  ;;  %v11531_v9 = vld [vmem:[%s13690_s10 + $0x1e4] ss:$48 sps:$4 sm:$0xff]   ;;  %v11535_v11 = vld [vmem:[%s13690_s10 + $0x1e0] ss:$48 sps:$4 sm:$0xff]   ;;  %s13757_s16 = scalar_lea.vmem [#allocation3], %s10043_s11 }
  0x92   : > { %v11533_v10 = vld [vmem:[%s13690_s10 + $0x7e4] ss:$48 sps:$4 sm:$0xff]   ;;  %v11536_v12 = vld [vmem:[%s13690_s10 + $0x7e0] ss:$48 sps:$4 sm:$0xff]   ;;  %v371_v49 = vld [vmem:[%s13757_s16 + $0x8] sm:$0xff] }
  0x93   : > { %7345 = vmatpush1.bf16.msra.mxu0 %v11529_v7  ;;  %v11537_v13 = vld [vmem:[%s13690_s10 + $0x184] ss:$48 sps:$4 sm:$0xff]   ;;  %v11541_v15 = vld [vmem:[%s13690_s10 + $0x180] ss:$48 sps:$4 sm:$0xff]   ;;  %v13765_v52 = vcombine.high %v371_v49, %v371_v49 }
  0x94   : > { %7386 = vmatpush1.bf16.msra.mxu1 %v11530_v8  ;;  %7346 = vmatprep.subr.bf16.mxu0 %v11531_v9  ;;  %v11539_v14 = vld [vmem:[%s13690_s10 + $0x784] ss:$48 sps:$4 sm:$0xff]   ;;  %v11542_v16 = vld [vmem:[%s13690_s10 + $0x780] ss:$48 sps:$4 sm:$0xff]   ;;  %v13789_v8 = vcombine.low %v371_v49, %v371_v49 }
  0x95   : > { %7387 = vmatprep.subr.bf16.mxu1 %v11533_v10  ;;  %v11543_v17 = vld [vmem:[%s13690_s10 + $0x124] ss:$48 sps:$4 sm:$0xff]   ;;  %v11547_v19 = vld [vmem:[%s13690_s10 + $0x120] ss:$48 sps:$4 sm:$0xff]   ;;  %7415 = vmatprep.mubr.bf16.mxu1 %v13765_v52 }
  0x96   : > { %v11545_v18 = vld [vmem:[%s13690_s10 + $0x724] ss:$48 sps:$4 sm:$0xff]   ;;  %v11548_v20 = vld [vmem:[%s13690_s10 + $0x720] ss:$48 sps:$4 sm:$0xff]  }
  0x97   : > { %7347 = vmatpush1.bf16.msra.mxu0 %v11535_v11  ;;  %v11549_v21 = vld [vmem:[%s13690_s10 + $0xc4] ss:$48 sps:$4 sm:$0xff]   ;;  %v11553_v23 = vld [vmem:[%s13690_s10 + $0xc0] ss:$48 sps:$4 sm:$0xff]  }
  0x98   : > { %7388 = vmatpush1.bf16.msra.mxu1 %v11536_v12  ;;  %7348 = vmatprep.subr.bf16.mxu0 %v11537_v13  ;;  %v11551_v22 = vld [vmem:[%s13690_s10 + $0x6c4] ss:$48 sps:$4 sm:$0xff]   ;;  %v11554_v24 = vld [vmem:[%s13690_s10 + $0x6c0] ss:$48 sps:$4 sm:$0xff]  }
  0x99   : > { %7389 = vmatprep.subr.bf16.mxu1 %v11539_v14  ;;  %v11555_v25 = vld [vmem:[%s13690_s10 + $0x64] ss:$48 sps:$4 sm:$0xff]   ;;  %v11559_v27 = vld [vmem:[%s13690_s10 + $0x60] ss:$48 sps:$4 sm:$0xff]  }
  0x9a   : > { %v11557_v26 = vld [vmem:[%s13690_s10 + $0x664] ss:$48 sps:$4 sm:$0xff]   ;;  %v11560_v28 = vld [vmem:[%s13690_s10 + $0x660] ss:$48 sps:$4 sm:$0xff]  }
  0x9b   : > { %7349 = vmatpush1.bf16.msra.mxu0 %v11541_v15  ;;  %v11561_v29 = vld [vmem:[%s13690_s10 + $0x4] ss:$48 sps:$4 sm:$0xff]   ;;  %v11565_v31 = vld [vmem:[%s13690_s10] ss:$48 sps:$4 sm:$0xff]  }
  0x9c   : > { %7390 = vmatpush1.bf16.msra.mxu1 %v11542_v16  ;;  %7350 = vmatprep.subr.bf16.mxu0 %v11543_v17  ;;  %v11563_v30 = vld [vmem:[%s13690_s10 + $0x604] ss:$48 sps:$4 sm:$0xff]   ;;  %v11566_v32 = vld [vmem:[%s13690_s10 + $0x600] ss:$48 sps:$4 sm:$0xff]  }
  0x9d   : > { %7391 = vmatprep.subr.bf16.mxu1 %v11545_v18  ;;  %v11567_v33 = vld [vmem:[%s13690_s10 + $0x5a4] ss:$48 sps:$4 sm:$0xff]   ;;  %v11571_v35 = vld [vmem:[%s13690_s10 + $0x5a0] ss:$48 sps:$4 sm:$0xff]  }
  0x9e   : > { %v11569_v34 = vld [vmem:[%s13690_s10 + $0xba4] ss:$48 sps:$4 sm:$0xff]   ;;  %v11572_v36 = vld [vmem:[%s13690_s10 + $0xba0] ss:$48 sps:$4 sm:$0xff]  }
  0x9f   : > { %7351 = vmatpush1.bf16.msra.mxu0 %v11547_v19  ;;  %v11573_v37 = vld [vmem:[%s13690_s10 + $0x544] ss:$48 sps:$4 sm:$0xff]   ;;  %v11577_v39 = vld [vmem:[%s13690_s10 + $0x540] ss:$48 sps:$4 sm:$0xff]  }
  0xa0   : > { %7392 = vmatpush1.bf16.msra.mxu1 %v11548_v20  ;;  %7352 = vmatprep.subr.bf16.mxu0 %v11549_v21  ;;  %v11575_v38 = vld [vmem:[%s13690_s10 + $0xb44] ss:$48 sps:$4 sm:$0xff]   ;;  %v11578_v40 = vld [vmem:[%s13690_s10 + $0xb40] ss:$48 sps:$4 sm:$0xff]  }
  0xa1   : > { %7393 = vmatprep.subr.bf16.mxu1 %v11551_v22  ;;  %v11579_v41 = vld [vmem:[%s13690_s10 + $0x4e4] ss:$48 sps:$4 sm:$0xff]   ;;  %v11583_v43 = vld [vmem:[%s13690_s10 + $0x4e0] ss:$48 sps:$4 sm:$0xff]  }
  0xa2   : > { %v11581_v42 = vld [vmem:[%s13690_s10 + $0xae4] ss:$48 sps:$4 sm:$0xff]   ;;  %v11584_v44 = vld [vmem:[%s13690_s10 + $0xae0] ss:$48 sps:$4 sm:$0xff]  }
  0xa3   : > { %7353 = vmatpush1.bf16.msra.mxu0 %v11553_v23  ;;  %v11585_v45 = vld [vmem:[%s13690_s10 + $0x484] ss:$48 sps:$4 sm:$0xff]   ;;  %v11589_v50 = vld [vmem:[%s13690_s10 + $0x480] ss:$48 sps:$4 sm:$0xff]  }
  0xa4   : > { %7394 = vmatpush1.bf16.msra.mxu1 %v11554_v24  ;;  %7354 = vmatprep.subr.bf16.mxu0 %v11555_v25  ;;  %v11587_v46 = vld [vmem:[%s13690_s10 + $0xa84] ss:$48 sps:$4 sm:$0xff]   ;;  %v11590_v51 = vld [vmem:[%s13690_s10 + $0xa80] ss:$48 sps:$4 sm:$0xff]  }
  0xa5   : > { %7395 = vmatprep.subr.bf16.mxu1 %v11557_v26  ;;  %v370_v47 = vld [vmem:[%s13757_s16] sm:$0xff] }
  0xa6   : > { %v13760_v48 = vcombine.high %v370_v47, %v370_v47  ;;  %v11591_v53 = vld [vmem:[%s13690_s10 + $0x424] ss:$48 sps:$4 sm:$0xff]   ;;  %v11595_v55 = vld [vmem:[%s13690_s10 + $0x420] ss:$48 sps:$4 sm:$0xff]   ;;  %v13787_v7 = vcombine.low %v370_v47, %v370_v47 }
  0xa7   : > { %7355 = vmatpush1.bf16.msra.mxu0 %v11559_v27  ;;  %v11593_v54 = vld [vmem:[%s13690_s10 + $0xa24] ss:$48 sps:$4 sm:$0xff]   ;;  %v11596_v56 = vld [vmem:[%s13690_s10 + $0xa20] ss:$48 sps:$4 sm:$0xff]  }
  0xa8   : > { %7396 = vmatpush1.bf16.msra.mxu1 %v11560_v28  ;;  %7356 = vmatprep.subr.bf16.mxu0 %v11561_v29  ;;  %v11597_v57 = vld [vmem:[%s13690_s10 + $0x3c4] ss:$48 sps:$4 sm:$0xff]   ;;  %v11601_v59 = vld [vmem:[%s13690_s10 + $0x3c0] ss:$48 sps:$4 sm:$0xff]  }
  0xa9   : > { %7397 = vmatprep.subr.bf16.mxu1 %v11563_v30  ;;  %7374 = vmatprep.mubr.bf16.mxu0 %v13760_v48  ;;  %v11599_v58 = vld [vmem:[%s13690_s10 + $0x9c4] ss:$48 sps:$4 sm:$0xff]   ;;  %v11602_v60 = vld [vmem:[%s13690_s10 + $0x9c0] ss:$48 sps:$4 sm:$0xff]  }
  0xaa   : > { %v11603_v61 = vld [vmem:[%s13690_s10 + $0x364] ss:$48 sps:$4 sm:$0xff]   ;;  %v11607_v63 = vld [vmem:[%s13690_s10 + $0x360] ss:$48 sps:$4 sm:$0xff]  }
  0xab   : > { %7357 = vmatpush1.bf16.msra.mxu0 %v11565_v31  ;;  %v11605_v62 = vld [vmem:[%s13690_s10 + $0x964] ss:$48 sps:$4 sm:$0xff]   ;;  %v11608_v0 = vld [vmem:[%s13690_s10 + $0x960] ss:$48 sps:$4 sm:$0xff]  }
  0xac   : > { %7398 = vmatpush1.bf16.msra.mxu1 %v11566_v32  ;;  %7358 = vmatprep.subr.bf16.mxu0 %v11567_v33  ;;  %v11609_v1 = vld [vmem:[%s13690_s10 + $0x304] ss:$48 sps:$4 sm:$0xff]   ;;  %v11613_v3 = vld [vmem:[%s13690_s10 + $0x300] ss:$48 sps:$4 sm:$0xff]  }
  0xad   : > { %7399 = vmatprep.subr.bf16.mxu1 %v11569_v34  ;;  %v11611_v2 = vld [vmem:[%s13690_s10 + $0x904] ss:$48 sps:$4 sm:$0xff]   ;;  %v11614_v4 = vld [vmem:[%s13690_s10 + $0x900] ss:$48 sps:$4 sm:$0xff]   ;;  %v13821_v34 = vld [vmem:[%s13757_s16 + $0x18] sm:$0xff] }
  0xae   : > { %v11621_v5 = vld [vmem:[%s13690_s10 + $0xea4] ss:$48 sps:$4 sm:$0xff]   ;;  %v11619_v9 = vld [vmem:[%s13690_s10 + $0xea0] ss:$48 sps:$4 sm:$0xff]  }
  0xaf   : > { %7359 = vmatpush2.bf16.msra.mxu0 %v11571_v35  ;;  %v11624_v6 = vld [vmem:[%s13690_s10 + $0x14a4] ss:$48 sps:$4 sm:$0xff]   ;;  %v11622_v10 = vld [vmem:[%s13690_s10 + $0x14a0] ss:$48 sps:$4 sm:$0xff]  }
  0xb0   : > { %7400 = vmatpush2.bf16.msra.mxu1 %v11572_v36  ;;  %7360 = vmatprep.subr.bf16.mxu0 %v11573_v37  ;;  %v11627_v11 = vld [vmem:[%s13690_s10 + $0xe44] ss:$48 sps:$4 sm:$0xff]   ;;  %v11625_v13 = vld [vmem:[%s13690_s10 + $0xe40] ss:$48 sps:$4 sm:$0xff]  }
  0xb1   : > { %7401 = vmatprep.subr.bf16.mxu1 %v11575_v38  ;;  %v11630_v12 = vld [vmem:[%s13690_s10 + $0x1444] ss:$48 sps:$4 sm:$0xff]   ;;  %v11628_v14 = vld [vmem:[%s13690_s10 + $0x1440] ss:$48 sps:$4 sm:$0xff]   ;;  %v13831_v38 = vcombine.high %v13821_v34, %v13821_v34 }
  0xb2   : > { %v11633_v15 = vld [vmem:[%s13690_s10 + $0xde4] ss:$48 sps:$4 sm:$0xff]   ;;  %v11631_v17 = vld [vmem:[%s13690_s10 + $0xde0] ss:$48 sps:$4 sm:$0xff]  }
  0xb3   : > { %7361 = vmatpush2.bf16.msra.mxu0 %v11577_v39  ;;  %v11636_v16 = vld [vmem:[%s13690_s10 + $0x13e4] ss:$48 sps:$4 sm:$0xff]   ;;  %v11634_v18 = vld [vmem:[%s13690_s10 + $0x13e0] ss:$48 sps:$4 sm:$0xff]  }
  0xb4   : > { %7402 = vmatpush2.bf16.msra.mxu1 %v11578_v40  ;;  %7362 = vmatprep.subr.bf16.mxu0 %v11579_v41  ;;  %v11639_v19 = vld [vmem:[%s13690_s10 + $0xd84] ss:$48 sps:$4 sm:$0xff]   ;;  %v11637_v21 = vld [vmem:[%s13690_s10 + $0xd80] ss:$48 sps:$4 sm:$0xff]  }
  0xb5   : > { %7403 = vmatprep.subr.bf16.mxu1 %v11581_v42  ;;  %v11642_v20 = vld [vmem:[%s13690_s10 + $0x1384] ss:$48 sps:$4 sm:$0xff]   ;;  %v11640_v22 = vld [vmem:[%s13690_s10 + $0x1380] ss:$48 sps:$4 sm:$0xff]  }
  0xb6   : > { %v11645_v23 = vld [vmem:[%s13690_s10 + $0xd24] ss:$48 sps:$4 sm:$0xff]   ;;  %v11643_v25 = vld [vmem:[%s13690_s10 + $0xd20] ss:$48 sps:$4 sm:$0xff]  }
  0xb7   : > { %7363 = vmatpush2.bf16.msra.mxu0 %v11583_v43  ;;  %v11648_v24 = vld [vmem:[%s13690_s10 + $0x1324] ss:$48 sps:$4 sm:$0xff]   ;;  %v11646_v26 = vld [vmem:[%s13690_s10 + $0x1320] ss:$48 sps:$4 sm:$0xff]  }
  0xb8   : > { %7404 = vmatpush2.bf16.msra.mxu1 %v11584_v44  ;;  %7364 = vmatprep.subr.bf16.mxu0 %v11585_v45  ;;  %v11651_v27 = vld [vmem:[%s13690_s10 + $0xcc4] ss:$48 sps:$4 sm:$0xff]   ;;  %v11649_v29 = vld [vmem:[%s13690_s10 + $0xcc0] ss:$48 sps:$4 sm:$0xff]  }
  0xb9   : > { %7405 = vmatprep.subr.bf16.mxu1 %v11587_v46  ;;  %v11654_v28 = vld [vmem:[%s13690_s10 + $0x12c4] ss:$48 sps:$4 sm:$0xff]   ;;  %v11652_v30 = vld [vmem:[%s13690_s10 + $0x12c0] ss:$48 sps:$4 sm:$0xff]  }
  0xba   : > { %v11657_v31 = vld [vmem:[%s13690_s10 + $0xc64] ss:$48 sps:$4 sm:$0xff]   ;;  %v11655_v35 = vld [vmem:[%s13690_s10 + $0xc60] ss:$48 sps:$4 sm:$0xff]  }
  0xbb   : > { %7365 = vmatpush2.bf16.msra.mxu0 %v11589_v50  ;;  %v11660_v32 = vld [vmem:[%s13690_s10 + $0x1264] ss:$48 sps:$4 sm:$0xff]   ;;  %v11658_v36 = vld [vmem:[%s13690_s10 + $0x1260] ss:$48 sps:$4 sm:$0xff]  }
  0xbc   : > { %7406 = vmatpush2.bf16.msra.mxu1 %v11590_v51  ;;  %7366 = vmatprep.subr.bf16.mxu0 %v11591_v53  ;;  %v13818_v33 = vld [vmem:[%s13757_s16 + $0x10] sm:$0xff] }
  0xbd   : > { %7407 = vmatprep.subr.bf16.mxu1 %v11593_v54  ;;  %v13827_v37 = vcombine.high %v13818_v33, %v13818_v33  ;;  %v11663_v39 = vld [vmem:[%s13690_s10 + $0xc04] ss:$48 sps:$4 sm:$0xff]   ;;  %v11661_v41 = vld [vmem:[%s13690_s10 + $0xc00] ss:$48 sps:$4 sm:$0xff]  }
  0xbe   : > { %v11666_v40 = vld [vmem:[%s13690_s10 + $0x1204] ss:$48 sps:$4 sm:$0xff]   ;;  %v11664_v42 = vld [vmem:[%s13690_s10 + $0x1200] ss:$48 sps:$4 sm:$0xff]  }
  0xbf   : > { %7367 = vmatpush2.bf16.msra.mxu0 %v11595_v55  ;;  %v11669_v43 = vld [vmem:[%s13690_s10 + $0x11a4] ss:$48 sps:$4 sm:$0xff]   ;;  %v11667_v45 = vld [vmem:[%s13690_s10 + $0x11a0] ss:$48 sps:$4 sm:$0xff]  }
  0xc0   : > { %7408 = vmatpush2.bf16.msra.mxu1 %v11596_v56  ;;  %7368 = vmatprep.subr.bf16.mxu0 %v11597_v57  ;;  %v11672_v44 = vld [vmem:[%s13690_s10 + $0x17a4] ss:$48 sps:$4 sm:$0xff]   ;;  %v11670_v46 = vld [vmem:[%s13690_s10 + $0x17a0] ss:$48 sps:$4 sm:$0xff]  }
  0xc1   : > { %7409 = vmatprep.subr.bf16.mxu1 %v11599_v58  ;;  %v11675_v47 = vld [vmem:[%s13690_s10 + $0x1144] ss:$48 sps:$4 sm:$0xff]   ;;  %v11673_v50 = vld [vmem:[%s13690_s10 + $0x1140] ss:$48 sps:$4 sm:$0xff]  }
  0xc2   : > { %v11678_v49 = vld [vmem:[%s13690_s10 + $0x1744] ss:$48 sps:$4 sm:$0xff]   ;;  %v11676_v51 = vld [vmem:[%s13690_s10 + $0x1740] ss:$48 sps:$4 sm:$0xff]  }
  0xc3   : > { %7369 = vmatpush2.bf16.msra.mxu0 %v11601_v59  ;;  %v11681_v53 = vld [vmem:[%s13690_s10 + $0x10e4] ss:$48 sps:$4 sm:$0xff]   ;;  %v11679_v55 = vld [vmem:[%s13690_s10 + $0x10e0] ss:$48 sps:$4 sm:$0xff]  }
  0xc4   : > { %7410 = vmatpush2.bf16.msra.mxu1 %v11602_v60  ;;  %7370 = vmatprep.subr.bf16.mxu0 %v11603_v61  ;;  %v11684_v54 = vld [vmem:[%s13690_s10 + $0x16e4] ss:$48 sps:$4 sm:$0xff]   ;;  %v11682_v56 = vld [vmem:[%s13690_s10 + $0x16e0] ss:$48 sps:$4 sm:$0xff]  }
  0xc5   : > { %7411 = vmatprep.subr.bf16.mxu1 %v11605_v62  ;;  %v11687_v57 = vld [vmem:[%s13690_s10 + $0x1084] ss:$48 sps:$4 sm:$0xff]   ;;  %v11685_v59 = vld [vmem:[%s13690_s10 + $0x1080] ss:$48 sps:$4 sm:$0xff]  }
  0xc6   : > { %v11690_v58 = vld [vmem:[%s13690_s10 + $0x1684] ss:$48 sps:$4 sm:$0xff]   ;;  %v11688_v60 = vld [vmem:[%s13690_s10 + $0x1680] ss:$48 sps:$4 sm:$0xff]  }
  0xc7   : > { %7371 = vmatpush2.bf16.msra.mxu0 %v11607_v63  ;;  %v11693_v61 = vld [vmem:[%s13690_s10 + $0x1024] ss:$48 sps:$4 sm:$0xff]   ;;  %v11691_v63 = vld [vmem:[%s13690_s10 + $0x1020] ss:$48 sps:$4 sm:$0xff]  }
  0xc8   : > { %7412 = vmatpush2.bf16.msra.mxu1 %v11608_v0  ;;  %7372 = vmatprep.subr.bf16.mxu0 %v11609_v1  ;;  %v11696_v62 = vld [vmem:[%s13690_s10 + $0x1624] ss:$48 sps:$4 sm:$0xff]   ;;  %v11694_v0 = vld [vmem:[%s13690_s10 + $0x1620] ss:$48 sps:$4 sm:$0xff]  }
  0xc9   : > { %7413 = vmatprep.subr.bf16.mxu1 %v11611_v2  ;;  %v11699_v1 = vld [vmem:[%s13690_s10 + $0xfc4] ss:$48 sps:$4 sm:$0xff]  }
  0xca   : > { %v11702_v2 = vld [vmem:[%s13690_s10 + $0x15c4] ss:$48 sps:$4 sm:$0xff]  }
  0xcb   : > { %7373 = vmatpush2.bf16.msra.mxu0 %v11613_v3  ;;  %v11697_v3 = vld [vmem:[%s13690_s10 + $0xfc0] ss:$48 sps:$4 sm:$0xff]  }
  0xcc   : > { %7414 = vmatpush2.bf16.msra.mxu1 %v11614_v4  ;;  %7424 = vmatprep.subr.bf16.mxu0 %v11621_v5  ;;  %v11700_v4 = vld [vmem:[%s13690_s10 + $0x15c0] ss:$48 sps:$4 sm:$0xff]   ;;  %v11705_v5 = vld [vmem:[%s13690_s10 + $0xf64] ss:$48 sps:$4 sm:$0xff]  }
  0xcd   : > { %7465 = vmatprep.subr.bf16.mxu1 %v11624_v6  ;;  %v11708_v6 = vld [vmem:[%s13690_s10 + $0x1564] ss:$48 sps:$4 sm:$0xff]  }
  0xce   : > { %7375 = vmatmul.mubr.bf16.vlgmr.msra.gmra.mxu0 %v13787_v7 }
  0xcf   : > { %7416 = vmatmul.mubr.bf16.vlgmr.msra.gmra.mxu1 %v13789_v8  ;;  %7425 = vmatpush1.bf16.msra.mxu0 %v11619_v9  ;;  %v11703_v9 = vld [vmem:[%s13690_s10 + $0xf60] ss:$48 sps:$4 sm:$0xff]  }
  0xd0   : > { %7466 = vmatpush1.bf16.msra.mxu1 %v11622_v10  ;;  %7426 = vmatprep.subr.bf16.mxu0 %v11627_v11  ;;  %v11706_v10 = vld [vmem:[%s13690_s10 + $0x1560] ss:$48 sps:$4 sm:$0xff]   ;;  %v11711_v11 = vld [vmem:[%s13690_s10 + $0xf04] ss:$48 sps:$4 sm:$0xff]  }
  0xd1   : > { %7467 = vmatprep.subr.bf16.mxu1 %v11630_v12  ;;  %7456 = vmatprep.mubr.bf16.mxu0 %v13827_v37  ;;  %v11714_v12 = vld [vmem:[%s13690_s10 + $0x1504] ss:$48 sps:$4 sm:$0xff]  }
  0xd2   : > { %7497 = vmatprep.mubr.bf16.mxu1 %v13831_v38 }
  0xd3   : > { %7427 = vmatpush1.bf16.msra.mxu0 %v11625_v13  ;;  %v11709_v13 = vld [vmem:[%s13690_s10 + $0xf00] ss:$48 sps:$4 sm:$0xff]  }
  0xd4   : > { %7468 = vmatpush1.bf16.msra.mxu1 %v11628_v14  ;;  %7428 = vmatprep.subr.bf16.mxu0 %v11633_v15  ;;  %v11712_v14 = vld [vmem:[%s13690_s10 + $0x1500] ss:$48 sps:$4 sm:$0xff]   ;;  %v11721_v15 = vld [vmem:[%s13690_s10 + $0x1aa4] ss:$48 sps:$4 sm:$0xff]  }
  0xd5   : > { %7469 = vmatprep.subr.bf16.mxu1 %v11636_v16  ;;  %v11724_v16 = vld [vmem:[%s13690_s10 + $0x20a4] ss:$48 sps:$4 sm:$0xff]  }
  0xd7   : > { %7429 = vmatpush1.bf16.msra.mxu0 %v11631_v17  ;;  %v13875_v17 = vcombine.low %v13818_v33, %v13818_v33  ;;  %v11739_v33 = vld [vmem:[%s13690_s10 + $0x1984] ss:$48 sps:$4 sm:$0xff]  }
  0xd8   : > { %7470 = vmatpush1.bf16.msra.mxu1 %v11634_v18  ;;  %7430 = vmatprep.subr.bf16.mxu0 %v11639_v19  ;;  %v13879_v18 = vcombine.low %v13821_v34, %v13821_v34  ;;  %v11719_v19 = vld [vmem:[%s13690_s10 + $0x1aa0] ss:$48 sps:$4 sm:$0xff]   ;;  %v11742_v34 = vld [vmem:[%s13690_s10 + $0x1f84] ss:$48 sps:$4 sm:$0xff]  }
  0xd9   : > { %7471 = vmatprep.subr.bf16.mxu1 %v11642_v20  ;;  %v11722_v20 = vld [vmem:[%s13690_s10 + $0x20a0] ss:$48 sps:$4 sm:$0xff]  }
  0xdb   : > { %7431 = vmatpush1.bf16.msra.mxu0 %v11637_v21  ;;  %v11727_v21 = vld [vmem:[%s13690_s10 + $0x1a44] ss:$48 sps:$4 sm:$0xff]  }
  0xdc   : > { %7472 = vmatpush1.bf16.msra.mxu1 %v11640_v22  ;;  %7432 = vmatprep.subr.bf16.mxu0 %v11645_v23  ;;  %v11730_v22 = vld [vmem:[%s13690_s10 + $0x2044] ss:$48 sps:$4 sm:$0xff]  }
  0xdd   : > { %7473 = vmatprep.subr.bf16.mxu1 %v11648_v24  ;;  %v13886_v23 = vld [vmem:[%s13757_s16 + $0x20] sm:$0xff]  ;;  %v13889_v24 = vld [vmem:[%s13757_s16 + $0x28] sm:$0xff] }
  0xdf   : > { %7433 = vmatpush1.bf16.msra.mxu0 %v11643_v25  ;;  %v13893_v25 = vcombine.high %v13886_v23, %v13886_v23 }
  0xe0   : > { %7474 = vmatpush1.bf16.msra.mxu1 %v11646_v26  ;;  %7434 = vmatprep.subr.bf16.mxu0 %v11651_v27  ;;  %v13897_v26 = vcombine.high %v13889_v24, %v13889_v24  ;;  %v11725_v27 = vld [vmem:[%s13690_s10 + $0x1a40] ss:$48 sps:$4 sm:$0xff]  }
  0xe1   : > { %7475 = vmatprep.subr.bf16.mxu1 %v11654_v28  ;;  %v11728_v28 = vld [vmem:[%s13690_s10 + $0x2040] ss:$48 sps:$4 sm:$0xff]  }
  0xe3   : > { %7435 = vmatpush1.bf16.msra.mxu0 %v11649_v29  ;;  %v11733_v29 = vld [vmem:[%s13690_s10 + $0x19e4] ss:$48 sps:$4 sm:$0xff]  }
  0xe4   : > { %7476 = vmatpush1.bf16.msra.mxu1 %v11652_v30  ;;  %7436 = vmatprep.subr.bf16.mxu0 %v11657_v31  ;;  %v11736_v30 = vld [vmem:[%s13690_s10 + $0x1fe4] ss:$48 sps:$4 sm:$0xff]   ;;  %v11731_v31 = vld [vmem:[%s13690_s10 + $0x19e0] ss:$48 sps:$4 sm:$0xff]  }
  0xe5   : > { %7477 = vmatprep.subr.bf16.mxu1 %v11660_v32  ;;  %v11734_v32 = vld [vmem:[%s13690_s10 + $0x1fe0] ss:$48 sps:$4 sm:$0xff]  }
  0xe7   : > { %7437 = vmatpush1.bf16.msra.mxu0 %v11655_v35  ;;  %v11737_v35 = vld [vmem:[%s13690_s10 + $0x1980] ss:$48 sps:$4 sm:$0xff]  }
  0xe8   : > { %7478 = vmatpush1.bf16.msra.mxu1 %v11658_v36  ;;  %7438 = vmatprep.subr.bf16.mxu0 %v11663_v39  ;;  %v11740_v36 = vld [vmem:[%s13690_s10 + $0x1f80] ss:$48 sps:$4 sm:$0xff]   ;;  %v11745_v39 = vld [vmem:[%s13690_s10 + $0x1924] ss:$48 sps:$4 sm:$0xff]  }
  0xe9   : > { %7479 = vmatprep.subr.bf16.mxu1 %v11666_v40  ;;  %v11748_v40 = vld [vmem:[%s13690_s10 + $0x1f24] ss:$48 sps:$4 sm:$0xff]  }
  0xeb   : > { %7439 = vmatpush1.bf16.msra.mxu0 %v11661_v41  ;;  %v11743_v41 = vld [vmem:[%s13690_s10 + $0x1920] ss:$48 sps:$4 sm:$0xff]  }
  0xec   : > { %7480 = vmatpush1.bf16.msra.mxu1 %v11664_v42  ;;  %7440 = vmatprep.subr.bf16.mxu0 %v11669_v43  ;;  %v11746_v42 = vld [vmem:[%s13690_s10 + $0x1f20] ss:$48 sps:$4 sm:$0xff]   ;;  %v11751_v43 = vld [vmem:[%s13690_s10 + $0x18c4] ss:$48 sps:$4 sm:$0xff]  }
  0xed   : > { %7481 = vmatprep.subr.bf16.mxu1 %v11672_v44  ;;  %v11754_v44 = vld [vmem:[%s13690_s10 + $0x1ec4] ss:$48 sps:$4 sm:$0xff]  }
  0xef   : > { %7441 = vmatpush2.bf16.msra.mxu0 %v11667_v45  ;;  %v11749_v45 = vld [vmem:[%s13690_s10 + $0x18c0] ss:$48 sps:$4 sm:$0xff]  }
  0xf0   : > { %7482 = vmatpush2.bf16.msra.mxu1 %v11670_v46  ;;  %7442 = vmatprep.subr.bf16.mxu0 %v11675_v47  ;;  %v11752_v46 = vld [vmem:[%s13690_s10 + $0x1ec0] ss:$48 sps:$4 sm:$0xff]   ;;  %v11757_v47 = vld [vmem:[%s13690_s10 + $0x1864] ss:$48 sps:$4 sm:$0xff]  }
  0xf1   : > { %7483 = vmatprep.subr.bf16.mxu1 %v11678_v49  ;;  %v11760_v49 = vld [vmem:[%s13690_s10 + $0x1e64] ss:$48 sps:$4 sm:$0xff]  }
  0xf3   : > { %7443 = vmatpush2.bf16.msra.mxu0 %v11673_v50  ;;  %v11755_v50 = vld [vmem:[%s13690_s10 + $0x1860] ss:$48 sps:$4 sm:$0xff]  }
  0xf4   : > { %7484 = vmatpush2.bf16.msra.mxu1 %v11676_v51  ;;  %7444 = vmatprep.subr.bf16.mxu0 %v11681_v53  ;;  %v11758_v51 = vld [vmem:[%s13690_s10 + $0x1e60] ss:$48 sps:$4 sm:$0xff]   ;;  %v11763_v53 = vld [vmem:[%s13690_s10 + $0x1804] ss:$48 sps:$4 sm:$0xff]  }
  0xf5   : > { %7485 = vmatprep.subr.bf16.mxu1 %v11684_v54  ;;  %v11766_v54 = vld [vmem:[%s13690_s10 + $0x1e04] ss:$48 sps:$4 sm:$0xff]  }
  0xf7   : > { %7445 = vmatpush2.bf16.msra.mxu0 %v11679_v55  ;;  %v11761_v55 = vld [vmem:[%s13690_s10 + $0x1800] ss:$48 sps:$4 sm:$0xff]  }
  0xf8   : > { %7486 = vmatpush2.bf16.msra.mxu1 %v11682_v56  ;;  %7446 = vmatprep.subr.bf16.mxu0 %v11687_v57  ;;  %v11764_v56 = vld [vmem:[%s13690_s10 + $0x1e00] ss:$48 sps:$4 sm:$0xff]   ;;  %v11769_v57 = vld [vmem:[%s13690_s10 + $0x1da4] ss:$48 sps:$4 sm:$0xff]  }
  0xf9   : > { %7487 = vmatprep.subr.bf16.mxu1 %v11690_v58  ;;  %v11772_v58 = vld [vmem:[%s13690_s10 + $0x23a4] ss:$48 sps:$4 sm:$0xff]  }
  0xfb   : > { %7447 = vmatpush2.bf16.msra.mxu0 %v11685_v59  ;;  %v11767_v59 = vld [vmem:[%s13690_s10 + $0x1da0] ss:$48 sps:$4 sm:$0xff]  }
  0xfc   : > { %7488 = vmatpush2.bf16.msra.mxu1 %v11688_v60  ;;  %7448 = vmatprep.subr.bf16.mxu0 %v11693_v61  ;;  %v11770_v60 = vld [vmem:[%s13690_s10 + $0x23a0] ss:$48 sps:$4 sm:$0xff]   ;;  %v11775_v61 = vld [vmem:[%s13690_s10 + $0x1d44] ss:$48 sps:$4 sm:$0xff]  }
  0xfd   : > { %7489 = vmatprep.subr.bf16.mxu1 %v11696_v62  ;;  %v11778_v62 = vld [vmem:[%s13690_s10 + $0x2344] ss:$48 sps:$4 sm:$0xff]  }
  0xff   : > { %7449 = vmatpush2.bf16.msra.mxu0 %v11691_v63  ;;  %v11773_v63 = vld [vmem:[%s13690_s10 + $0x1d40] ss:$48 sps:$4 sm:$0xff]  }
 0x100   : > { %7490 = vmatpush2.bf16.msra.mxu1 %v11694_v0  ;;  %7450 = vmatprep.subr.bf16.mxu0 %v11699_v1  ;;  %v11776_v0 = vld [vmem:[%s13690_s10 + $0x2340] ss:$48 sps:$4 sm:$0xff]   ;;  %v11781_v1 = vld [vmem:[%s13690_s10 + $0x1ce4] ss:$48 sps:$4 sm:$0xff]  }
 0x101   : > { %7491 = vmatprep.subr.bf16.mxu1 %v11702_v2  ;;  %v11784_v2 = vld [vmem:[%s13690_s10 + $0x22e4] ss:$48 sps:$4 sm:$0xff]  }
 0x103   : > { %7451 = vmatpush2.bf16.msra.mxu0 %v11697_v3  ;;  %v11779_v3 = vld [vmem:[%s13690_s10 + $0x1ce0] ss:$48 sps:$4 sm:$0xff]  }
 0x104   : > { %7492 = vmatpush2.bf16.msra.mxu1 %v11700_v4  ;;  %7452 = vmatprep.subr.bf16.mxu0 %v11705_v5  ;;  %v11782_v4 = vld [vmem:[%s13690_s10 + $0x22e0] ss:$48 sps:$4 sm:$0xff]   ;;  %v11787_v5 = vld [vmem:[%s13690_s10 + $0x1c84] ss:$48 sps:$4 sm:$0xff]  }
 0x105   : > { %7493 = vmatprep.subr.bf16.mxu1 %v11708_v6  ;;  %v11790_v6 = vld [vmem:[%s13690_s10 + $0x2284] ss:$48 sps:$4 sm:$0xff]  }
 0x107   : > { %7453 = vmatpush2.bf16.msra.mxu0 %v11703_v9  ;;  %v11785_v9 = vld [vmem:[%s13690_s10 + $0x1c80] ss:$48 sps:$4 sm:$0xff]  }
 0x108   : > { %7494 = vmatpush2.bf16.msra.mxu1 %v11706_v10  ;;  %7454 = vmatprep.subr.bf16.mxu0 %v11711_v11  ;;  %v11788_v10 = vld [vmem:[%s13690_s10 + $0x2280] ss:$48 sps:$4 sm:$0xff]   ;;  %v11793_v11 = vld [vmem:[%s13690_s10 + $0x1c24] ss:$48 sps:$4 sm:$0xff]  }
 0x109   : > { %7495 = vmatprep.subr.bf16.mxu1 %v11714_v12  ;;  %v11796_v12 = vld [vmem:[%s13690_s10 + $0x2224] ss:$48 sps:$4 sm:$0xff]  }
 0x10b   : > { %7455 = vmatpush2.bf16.msra.mxu0 %v11709_v13  ;;  %v11791_v13 = vld [vmem:[%s13690_s10 + $0x1c20] ss:$48 sps:$4 sm:$0xff]  }
 0x10c   : > { %7496 = vmatpush2.bf16.msra.mxu1 %v11712_v14  ;;  %7506 = vmatprep.subr.bf16.mxu0 %v11721_v15  ;;  %v11794_v14 = vld [vmem:[%s13690_s10 + $0x2220] ss:$48 sps:$4 sm:$0xff]   ;;  %v11799_v15 = vld [vmem:[%s13690_s10 + $0x1bc4] ss:$48 sps:$4 sm:$0xff]  }
 0x10d   : > { %7547 = vmatprep.subr.bf16.mxu1 %v11724_v16  ;;  %v11802_v16 = vld [vmem:[%s13690_s10 + $0x21c4] ss:$48 sps:$4 sm:$0xff]  }
 0x10e   : > { %7457 = vmatmul.mubr.bf16.vlgmr.msra.gmra.mxu0 %v13875_v17 }
 0x10f   : > { %7498 = vmatmul.mubr.bf16.vlgmr.msra.gmra.mxu1 %v13879_v18  ;;  %7507 = vmatpush1.bf16.msra.mxu0 %v11719_v19  ;;  %v11797_v19 = vld [vmem:[%s13690_s10 + $0x1bc0] ss:$48 sps:$4 sm:$0xff]  }
 0x110   : > { %7548 = vmatpush1.bf16.msra.mxu1 %v11722_v20  ;;  %7508 = vmatprep.subr.bf16.mxu0 %v11727_v21  ;;  %v11800_v20 = vld [vmem:[%s13690_s10 + $0x21c0] ss:$48 sps:$4 sm:$0xff]   ;;  %v11805_v21 = vld [vmem:[%s13690_s10 + $0x1b64] ss:$48 sps:$4 sm:$0xff]  }
 0x111   : > { %7549 = vmatprep.subr.bf16.mxu1 %v11730_v22  ;;  %7538 = vmatprep.mubr.bf16.mxu0 %v13893_v25  ;;  %v11808_v22 = vld [vmem:[%s13690_s10 + $0x2164] ss:$48 sps:$4 sm:$0xff]  }
 0x112   : > { %7579 = vmatprep.mubr.bf16.mxu1 %v13897_v26 }
 0x113   : > { %7509 = vmatpush1.bf16.msra.mxu0 %v11725_v27  ;;  %v11803_v27 = vld [vmem:[%s13690_s10 + $0x1b60] ss:$48 sps:$4 sm:$0xff]  }
 0x114   : > { %7550 = vmatpush1.bf16.msra.mxu1 %v11728_v28  ;;  %7510 = vmatprep.subr.bf16.mxu0 %v11733_v29  ;;  %v11806_v28 = vld [vmem:[%s13690_s10 + $0x2160] ss:$48 sps:$4 sm:$0xff]   ;;  %v11811_v29 = vld [vmem:[%s13690_s10 + $0x1b04] ss:$48 sps:$4 sm:$0xff]  }
 0x115   : > { %7551 = vmatprep.subr.bf16.mxu1 %v11736_v30  ;;  %v11814_v30 = vld [vmem:[%s13690_s10 + $0x2104] ss:$48 sps:$4 sm:$0xff]  }
 0x117   : > { %7511 = vmatpush1.bf16.msra.mxu0 %v11731_v31  ;;  %v11809_v31 = vld [vmem:[%s13690_s10 + $0x1b00] ss:$48 sps:$4 sm:$0xff]  }
 0x118   : > { %7552 = vmatpush1.bf16.msra.mxu1 %v11734_v32  ;;  %7512 = vmatprep.subr.bf16.mxu0 %v11739_v33  ;;  %v11812_v32 = vld [vmem:[%s13690_s10 + $0x2100] ss:$48 sps:$4 sm:$0xff]   ;;  %v11821_v33 = vld [vmem:[%s13690_s10 + $0x2ac] ss:$48 sps:$4 sm:$0xff]  }
 0x119   : > { %7553 = vmatprep.subr.bf16.mxu1 %v11742_v34  ;;  %v11824_v34 = vld [vmem:[%s13690_s10 + $0x8ac] ss:$48 sps:$4 sm:$0xff]  }
 0x11b   : > { %7513 = vmatpush1.bf16.msra.mxu0 %v11737_v35  ;;  %v13965_v35 = vcombine.low %v13886_v23, %v13886_v23  ;;  %v11825_v23 = vld [vmem:[%s13690_s10 + $0x248] ss:$48 sps:$4 sm:$0xff]  }
 0x11c   : > { %7554 = vmatpush1.bf16.msra.mxu1 %v11740_v36  ;;  %7514 = vmatprep.subr.bf16.mxu0 %v11745_v39  ;;  %v13969_v36 = vcombine.low %v13889_v24, %v13889_v24  ;;  %v11819_v39 = vld [vmem:[%s13690_s10 + $0x2a8] ss:$48 sps:$4 sm:$0xff]  }
 0x11d   : > { %7555 = vmatprep.subr.bf16.mxu1 %v11748_v40  ;;  %v11822_v40 = vld [vmem:[%s13690_s10 + $0x8a8] ss:$48 sps:$4 sm:$0xff]  }
 0x11e   : > { %v11828_v24 = vld [vmem:[%s13690_s10 + $0x848] ss:$48 sps:$4 sm:$0xff]  }
 0x11f   : > { %7515 = vmatpush1.bf16.msra.mxu0 %v11743_v41  ;;  %v11827_v41 = vld [vmem:[%s13690_s10 + $0x24c] ss:$48 sps:$4 sm:$0xff]  }
 0x120   : > { %7556 = vmatpush1.bf16.msra.mxu1 %v11746_v42  ;;  %7516 = vmatprep.subr.bf16.mxu0 %v11751_v43  ;;  %v11830_v42 = vld [vmem:[%s13690_s10 + $0x84c] ss:$48 sps:$4 sm:$0xff]  }
 0x121   : > { %7557 = vmatprep.subr.bf16.mxu1 %v11754_v44  ;;  %v11833_v43 = vld [vmem:[%s13690_s10 + $0x1ec] ss:$48 sps:$4 sm:$0xff]  }
 0x122   : > { %v11836_v44 = vld [vmem:[%s13690_s10 + $0x7ec] ss:$48 sps:$4 sm:$0xff]  }
 0x123   : > { %7517 = vmatpush1.bf16.msra.mxu0 %v11749_v45  ;;  %v11831_v45 = vld [vmem:[%s13690_s10 + $0x1e8] ss:$48 sps:$4 sm:$0xff]  }
 0x124   : > { %7558 = vmatpush1.bf16.msra.mxu1 %v11752_v46  ;;  %7518 = vmatprep.subr.bf16.mxu0 %v11757_v47  ;;  %v11834_v46 = vld [vmem:[%s13690_s10 + $0x7e8] ss:$48 sps:$4 sm:$0xff]   ;;  %v11839_v47 = vld [vmem:[%s13690_s10 + $0x18c] ss:$48 sps:$4 sm:$0xff]  }
 0x125   : > { %7559 = vmatprep.subr.bf16.mxu1 %v11760_v49  ;;  %v11842_v49 = vld [vmem:[%s13690_s10 + $0x78c] ss:$48 sps:$4 sm:$0xff]  }
 0x127   : > { %7519 = vmatpush1.bf16.msra.mxu0 %v11755_v50  ;;  %v11837_v50 = vld [vmem:[%s13690_s10 + $0x188] ss:$48 sps:$4 sm:$0xff]  }
 0x128   : > { %7560 = vmatpush1.bf16.msra.mxu1 %v11758_v51  ;;  %7520 = vmatprep.subr.bf16.mxu0 %v11763_v53  ;;  %v11840_v51 = vld [vmem:[%s13690_s10 + $0x788] ss:$48 sps:$4 sm:$0xff]   ;;  %v11845_v53 = vld [vmem:[%s13690_s10 + $0x12c] ss:$48 sps:$4 sm:$0xff]  }
 0x129   : > { %7561 = vmatprep.subr.bf16.mxu1 %v11766_v54  ;;  %v11848_v54 = vld [vmem:[%s13690_s10 + $0x72c] ss:$48 sps:$4 sm:$0xff]  }
 0x12b   : > { %7521 = vmatpush1.bf16.msra.mxu0 %v11761_v55  ;;  %v11843_v55 = vld [vmem:[%s13690_s10 + $0x128] ss:$48 sps:$4 sm:$0xff]  }
 0x12c   : > { %7562 = vmatpush1.bf16.msra.mxu1 %v11764_v56  ;;  %7522 = vmatprep.subr.bf16.mxu0 %v11769_v57  ;;  %v11846_v56 = vld [vmem:[%s13690_s10 + $0x728] ss:$48 sps:$4 sm:$0xff]   ;;  %v11851_v57 = vld [vmem:[%s13690_s10 + $0xcc] ss:$48 sps:$4 sm:$0xff]  }
 0x12d   : > { %7563 = vmatprep.subr.bf16.mxu1 %v11772_v58  ;;  %v11854_v58 = vld [vmem:[%s13690_s10 + $0x6cc] ss:$48 sps:$4 sm:$0xff]  }
 0x12f   : > { %7523 = vmatpush2.bf16.msra.mxu0 %v11767_v59  ;;  %v11849_v59 = vld [vmem:[%s13690_s10 + $0xc8] ss:$48 sps:$4 sm:$0xff]  }
 0x130   : > { %7564 = vmatpush2.bf16.msra.mxu1 %v11770_v60  ;;  %7524 = vmatprep.subr.bf16.mxu0 %v11775_v61  ;;  %v11852_v60 = vld [vmem:[%s13690_s10 + $0x6c8] ss:$48 sps:$4 sm:$0xff]   ;;  %v11857_v61 = vld [vmem:[%s13690_s10 + $0x6c] ss:$48 sps:$4 sm:$0xff]  }
 0x131   : > { %7565 = vmatprep.subr.bf16.mxu1 %v11778_v62  ;;  %v11860_v62 = vld [vmem:[%s13690_s10 + $0x66c] ss:$48 sps:$4 sm:$0xff]  }
 0x133   : > { %7525 = vmatpush2.bf16.msra.mxu0 %v11773_v63  ;;  %v11855_v63 = vld [vmem:[%s13690_s10 + $0x68] ss:$48 sps:$4 sm:$0xff]  }
 0x134   : > { %7566 = vmatpush2.bf16.msra.mxu1 %v11776_v0  ;;  %7526 = vmatprep.subr.bf16.mxu0 %v11781_v1  ;;  %v11858_v0 = vld [vmem:[%s13690_s10 + $0x668] ss:$48 sps:$4 sm:$0xff]   ;;  %v11863_v1 = vld [vmem:[%s13690_s10 + $0xc] ss:$48 sps:$4 sm:$0xff]  }
 0x135   : > { %7567 = vmatprep.subr.bf16.mxu1 %v11784_v2  ;;  %v11866_v2 = vld [vmem:[%s13690_s10 + $0x60c] ss:$48 sps:$4 sm:$0xff]  }
 0x137   : > { %7527 = vmatpush2.bf16.msra.mxu0 %v11779_v3  ;;  %v11861_v3 = vld [vmem:[%s13690_s10 + $0x8] ss:$48 sps:$4 sm:$0xff]  }
 0x138   : > { %7568 = vmatpush2.bf16.msra.mxu1 %v11782_v4  ;;  %7528 = vmatprep.subr.bf16.mxu0 %v11787_v5  ;;  %v11864_v4 = vld [vmem:[%s13690_s10 + $0x608] ss:$48 sps:$4 sm:$0xff]   ;;  %v11869_v5 = vld [vmem:[%s13690_s10 + $0x5ac] ss:$48 sps:$4 sm:$0xff]  }
 0x139   : > { %7569 = vmatprep.subr.bf16.mxu1 %v11790_v6  ;;  %v11872_v6 = vld [vmem:[%s13690_s10 + $0xbac] ss:$48 sps:$4 sm:$0xff]  }
 0x13b   : > { %7529 = vmatpush2.bf16.msra.mxu0 %v11785_v9  ;;  %v11867_v9 = vld [vmem:[%s13690_s10 + $0x5a8] ss:$48 sps:$4 sm:$0xff]  }
 0x13c   : > { %7570 = vmatpush2.bf16.msra.mxu1 %v11788_v10  ;;  %7530 = vmatprep.subr.bf16.mxu0 %v11793_v11  ;;  %v11870_v10 = vld [vmem:[%s13690_s10 + $0xba8] ss:$48 sps:$4 sm:$0xff]   ;;  %v11875_v11 = vld [vmem:[%s13690_s10 + $0x54c] ss:$48 sps:$4 sm:$0xff]  }
 0x13d   : > { %7571 = vmatprep.subr.bf16.mxu1 %v11796_v12  ;;  %v11878_v12 = vld [vmem:[%s13690_s10 + $0xb4c] ss:$48 sps:$4 sm:$0xff]  }
 0x13f   : > { %7531 = vmatpush2.bf16.msra.mxu0 %v11791_v13  ;;  %v11873_v13 = vld [vmem:[%s13690_s10 + $0x548] ss:$48 sps:$4 sm:$0xff]  }
 0x140   : > { %7572 = vmatpush2.bf16.msra.mxu1 %v11794_v14  ;;  %7532 = vmatprep.subr.bf16.mxu0 %v11799_v15  ;;  %v11876_v14 = vld [vmem:[%s13690_s10 + $0xb48] ss:$48 sps:$4 sm:$0xff]   ;;  %v11881_v15 = vld [vmem:[%s13690_s10 + $0x4ec] ss:$48 sps:$4 sm:$0xff]  }
 0x141   : > { %7573 = vmatprep.subr.bf16.mxu1 %v11802_v16  ;;  %v11884_v16 = vld [vmem:[%s13690_s10 + $0xaec] ss:$48 sps:$4 sm:$0xff]  }
 0x143   : > { %7533 = vmatpush2.bf16.msra.mxu0 %v11797_v19  ;;  %v11879_v19 = vld [vmem:[%s13690_s10 + $0x4e8] ss:$48 sps:$4 sm:$0xff]  }
 0x144   : > { %7574 = vmatpush2.bf16.msra.mxu1 %v11800_v20  ;;  %7534 = vmatprep.subr.bf16.mxu0 %v11805_v21  ;;  %v11882_v20 = vld [vmem:[%s13690_s10 + $0xae8] ss:$48 sps:$4 sm:$0xff]   ;;  %v11887_v21 = vld [vmem:[%s13690_s10 + $0x48c] ss:$48 sps:$4 sm:$0xff]  }
 0x145   : > { %7575 = vmatprep.subr.bf16.mxu1 %v11808_v22  ;;  %v11890_v22 = vld [vmem:[%s13690_s10 + $0xa8c] ss:$48 sps:$4 sm:$0xff]  }
 0x147   : > { %7535 = vmatpush2.bf16.msra.mxu0 %v11803_v27  ;;  %v11885_v27 = vld [vmem:[%s13690_s10 + $0x488] ss:$48 sps:$4 sm:$0xff]  }
 0x148   : > { %7576 = vmatpush2.bf16.msra.mxu1 %v11806_v28  ;;  %7536 = vmatprep.subr.bf16.mxu0 %v11811_v29  ;;  %v11888_v28 = vld [vmem:[%s13690_s10 + $0xa88] ss:$48 sps:$4 sm:$0xff]   ;;  %v11893_v29 = vld [vmem:[%s13690_s10 + $0x42c] ss:$48 sps:$4 sm:$0xff]  }
 0x149   : > { %7577 = vmatprep.subr.bf16.mxu1 %v11814_v30  ;;  %v11896_v30 = vld [vmem:[%s13690_s10 + $0xa2c] ss:$48 sps:$4 sm:$0xff]  }
 0x14b   : > { %7537 = vmatpush2.bf16.msra.mxu0 %v11809_v31  ;;  %v11891_v31 = vld [vmem:[%s13690_s10 + $0x428] ss:$48 sps:$4 sm:$0xff]  }
 0x14c   : > { %7578 = vmatpush2.bf16.msra.mxu1 %v11812_v32  ;;  %7588 = vmatprep.subr.bf16.mxu0 %v11821_v33  ;;  %v11894_v32 = vld [vmem:[%s13690_s10 + $0xa28] ss:$48 sps:$4 sm:$0xff]   ;;  %v11899_v33 = vld [vmem:[%s13690_s10 + $0x3cc] ss:$48 sps:$4 sm:$0xff]  }
 0x14d   : > { %7629 = vmatprep.subr.bf16.mxu1 %v11824_v34  ;;  %v11902_v34 = vld [vmem:[%s13690_s10 + $0x9cc] ss:$48 sps:$4 sm:$0xff]  }
 0x14e   : > { %7539 = vmatmul.mubr.bf16.vlgmr.msra.gmra.mxu0 %v13965_v35 }
 0x14f   : > { %7580 = vmatmul.mubr.bf16.vlgmr.msra.gmra.mxu1 %v13969_v36  ;;  %7589 = vmatpush1.bf16.msra.mxu0 %v11819_v39  ;;  %v11897_v39 = vld [vmem:[%s13690_s10 + $0x3c8] ss:$48 sps:$4 sm:$0xff]  }
 0x150   : > { %7630 = vmatpush1.bf16.msra.mxu1 %v11822_v40  ;;  %7590 = vmatprep.subr.bf16.mxu0 %v11827_v41  ;;  %v11900_v40 = vld [vmem:[%s13690_s10 + $0x9c8] ss:$48 sps:$4 sm:$0xff]   ;;  %v11905_v41 = vld [vmem:[%s13690_s10 + $0x36c] ss:$48 sps:$4 sm:$0xff]  }
 0x151   : > { %7631 = vmatprep.subr.bf16.mxu1 %v11830_v42  ;;  %7620 = vmatprep.mubr.bf16.mxu0 %v13760_v48  ;;  %v11908_v42 = vld [vmem:[%s13690_s10 + $0x96c] ss:$48 sps:$4 sm:$0xff]  }
 0x152   : > { %7661 = vmatprep.mubr.bf16.mxu1 %v13765_v52 }
 0x153   : > { %7591 = vmatpush1.bf16.msra.mxu0 %v11825_v23  ;;  %v11903_v23 = vld [vmem:[%s13690_s10 + $0x368] ss:$48 sps:$4 sm:$0xff]  }
 0x154   : > { %7632 = vmatpush1.bf16.msra.mxu1 %v11828_v24  ;;  %7592 = vmatprep.subr.bf16.mxu0 %v11833_v43  ;;  %v11906_v24 = vld [vmem:[%s13690_s10 + $0x968] ss:$48 sps:$4 sm:$0xff]   ;;  %v11911_v43 = vld [vmem:[%s13690_s10 + $0x30c] ss:$48 sps:$4 sm:$0xff]  }
 0x155   : > { %7633 = vmatprep.subr.bf16.mxu1 %v11836_v44  ;;  %v11914_v44 = vld [vmem:[%s13690_s10 + $0x90c] ss:$48 sps:$4 sm:$0xff]  }
 0x157   : > { %7593 = vmatpush1.bf16.msra.mxu0 %v11831_v45  ;;  %v11909_v45 = vld [vmem:[%s13690_s10 + $0x308] ss:$48 sps:$4 sm:$0xff]  }
 0x158   : > { %7634 = vmatpush1.bf16.msra.mxu1 %v11834_v46  ;;  %7594 = vmatprep.subr.bf16.mxu0 %v11839_v47  ;;  %v11912_v46 = vld [vmem:[%s13690_s10 + $0x908] ss:$48 sps:$4 sm:$0xff]   ;;  %v11917_v47 = vld [vmem:[%s13690_s10 + $0xeac] ss:$48 sps:$4 sm:$0xff]  }
 0x159   : > { %7635 = vmatprep.subr.bf16.mxu1 %v11842_v49  ;;  %v11920_v49 = vld [vmem:[%s13690_s10 + $0x14ac] ss:$48 sps:$4 sm:$0xff]  }
 0x15b   : > { %7595 = vmatpush1.bf16.msra.mxu0 %v11837_v50  ;;  %v11915_v50 = vld [vmem:[%s13690_s10 + $0xea8] ss:$48 sps:$4 sm:$0xff]  }
 0x15c   : > { %7636 = vmatpush1.bf16.msra.mxu1 %v11840_v51  ;;  %7596 = vmatprep.subr.bf16.mxu0 %v11845_v53  ;;  %v11918_v51 = vld [vmem:[%s13690_s10 + $0x14a8] ss:$48 sps:$4 sm:$0xff]   ;;  %v11923_v53 = vld [vmem:[%s13690_s10 + $0xe4c] ss:$48 sps:$4 sm:$0xff]  }
 0x15d   : > { %7637 = vmatprep.subr.bf16.mxu1 %v11848_v54  ;;  %v11926_v54 = vld [vmem:[%s13690_s10 + $0x144c] ss:$48 sps:$4 sm:$0xff]  }
 0x15f   : > { %7597 = vmatpush1.bf16.msra.mxu0 %v11843_v55 }
 0x160   : > { %7638 = vmatpush1.bf16.msra.mxu1 %v11846_v56  ;;  %7598 = vmatprep.subr.bf16.mxu0 %v11851_v57 }
 0x161   : > { %7639 = vmatprep.subr.bf16.mxu1 %v11854_v58  ;;  %v11921_v58 = vld [vmem:[%s13690_s10 + $0xe48] ss:$48 sps:$4 sm:$0xff]  }
 0x163   : > { %7599 = vmatpush1.bf16.msra.mxu0 %v11849_v59  ;;  %v11924_v59 = vld [vmem:[%s13690_s10 + $0x1448] ss:$48 sps:$4 sm:$0xff]  }
 0x164   : > { %7640 = vmatpush1.bf16.msra.mxu1 %v11852_v60  ;;  %7600 = vmatprep.subr.bf16.mxu0 %v11857_v61  ;;  %v11929_v60 = vld [vmem:[%s13690_s10 + $0xdec] ss:$48 sps:$4 sm:$0xff]  }
 0x165   : > { %7641 = vmatprep.subr.bf16.mxu1 %v11860_v62 }
 0x167   : > { %7601 = vmatpush1.bf16.msra.mxu0 %v11855_v63  ;;  %v11932_v63 = vld [vmem:[%s13690_s10 + $0x13ec] ss:$48 sps:$4 sm:$0xff]  }
 0x168   : > { %7642 = vmatpush1.bf16.msra.mxu1 %v11858_v0  ;;  %7602 = vmatprep.subr.bf16.mxu0 %v11863_v1 }
 0x169   : > { %7643 = vmatprep.subr.bf16.mxu1 %v11866_v2 }
 0x16b   : > { %7603 = vmatpush1.bf16.msra.mxu0 %v11861_v3  ;;  %v11927_v3 = vld [vmem:[%s13690_s10 + $0xde8] ss:$48 sps:$4 sm:$0xff]  }
 0x16c   : > { %7644 = vmatpush1.bf16.msra.mxu1 %v11864_v4  ;;  %7604 = vmatprep.subr.bf16.mxu0 %v11869_v5  ;;  %v11930_v4 = vld [vmem:[%s13690_s10 + $0x13e8] ss:$48 sps:$4 sm:$0xff]  }
 0x16d   : > { %7645 = vmatprep.subr.bf16.mxu1 %v11872_v6 }
 0x16f   : > { %7605 = vmatpush2.bf16.msra.mxu0 %v11867_v9  ;;  %v11935_v9 = vld [vmem:[%s13690_s10 + $0xd8c] ss:$48 sps:$4 sm:$0xff]  }
 0x170   : > { %7646 = vmatpush2.bf16.msra.mxu1 %v11870_v10  ;;  %7606 = vmatprep.subr.bf16.mxu0 %v11875_v11  ;;  %v11938_v10 = vld [vmem:[%s13690_s10 + $0x138c] ss:$48 sps:$4 sm:$0xff]   ;;  %v11933_v11 = vld [vmem:[%s13690_s10 + $0xd88] ss:$48 sps:$4 sm:$0xff]  }
 0x171   : > { %7647 = vmatprep.subr.bf16.mxu1 %v11878_v12  ;;  %v11936_v12 = vld [vmem:[%s13690_s10 + $0x1388] ss:$48 sps:$4 sm:$0xff]  }
 0x173   : > { %7607 = vmatpush2.bf16.msra.mxu0 %v11873_v13  ;;  %v11941_v13 = vld [vmem:[%s13690_s10 + $0xd2c] ss:$48 sps:$4 sm:$0xff]  }
 0x174   : > { %7648 = vmatpush2.bf16.msra.mxu1 %v11876_v14  ;;  %7608 = vmatprep.subr.bf16.mxu0 %v11881_v15  ;;  %v11944_v14 = vld [vmem:[%s13690_s10 + $0x132c] ss:$48 sps:$4 sm:$0xff]   ;;  %v11939_v15 = vld [vmem:[%s13690_s10 + $0xd28] ss:$48 sps:$4 sm:$0xff]  }
 0x175   : > { %7649 = vmatprep.subr.bf16.mxu1 %v11884_v16  ;;  %v11942_v16 = vld [vmem:[%s13690_s10 + $0x1328] ss:$48 sps:$4 sm:$0xff]  }
 0x177   : > { %7609 = vmatpush2.bf16.msra.mxu0 %v11879_v19  ;;  %v11947_v19 = vld [vmem:[%s13690_s10 + $0xccc] ss:$48 sps:$4 sm:$0xff]  }
 0x178   : > { %7650 = vmatpush2.bf16.msra.mxu1 %v11882_v20  ;;  %7610 = vmatprep.subr.bf16.mxu0 %v11887_v21  ;;  %v11950_v20 = vld [vmem:[%s13690_s10 + $0x12cc] ss:$48 sps:$4 sm:$0xff]   ;;  %v11945_v21 = vld [vmem:[%s13690_s10 + $0xcc8] ss:$48 sps:$4 sm:$0xff]  }
 0x179   : > { %7651 = vmatprep.subr.bf16.mxu1 %v11890_v22  ;;  %v11948_v22 = vld [vmem:[%s13690_s10 + $0x12c8] ss:$48 sps:$4 sm:$0xff]  }
 0x17b   : > { %7611 = vmatpush2.bf16.msra.mxu0 %v11885_v27  ;;  %v11953_v27 = vld [vmem:[%s13690_s10 + $0xc6c] ss:$48 sps:$4 sm:$0xff]  }
 0x17c   : > { %7652 = vmatpush2.bf16.msra.mxu1 %v11888_v28  ;;  %7612 = vmatprep.subr.bf16.mxu0 %v11893_v29  ;;  %v11956_v28 = vld [vmem:[%s13690_s10 + $0x126c] ss:$48 sps:$4 sm:$0xff]   ;;  %v11951_v29 = vld [vmem:[%s13690_s10 + $0xc68] ss:$48 sps:$4 sm:$0xff]  }
 0x17d   : > { %7653 = vmatprep.subr.bf16.mxu1 %v11896_v30  ;;  %v11954_v30 = vld [vmem:[%s13690_s10 + $0x1268] ss:$48 sps:$4 sm:$0xff]  }
 0x17f   : > { %7613 = vmatpush2.bf16.msra.mxu0 %v11891_v31  ;;  %v11959_v31 = vld [vmem:[%s13690_s10 + $0xc0c] ss:$48 sps:$4 sm:$0xff]  }
 0x180   : > { %7654 = vmatpush2.bf16.msra.mxu1 %v11894_v32  ;;  %7614 = vmatprep.subr.bf16.mxu0 %v11899_v33  ;;  %v11962_v32 = vld [vmem:[%s13690_s10 + $0x120c] ss:$48 sps:$4 sm:$0xff]   ;;  %v11957_v33 = vld [vmem:[%s13690_s10 + $0xc08] ss:$48 sps:$4 sm:$0xff]  }
 0x181   : > { %7655 = vmatprep.subr.bf16.mxu1 %v11902_v34  ;;  %v11960_v34 = vld [vmem:[%s13690_s10 + $0x1208] ss:$48 sps:$4 sm:$0xff]  }
 0x183   : > { %7615 = vmatpush2.bf16.msra.mxu0 %v11897_v39  ;;  %v11965_v39 = vld [vmem:[%s13690_s10 + $0x11ac] ss:$48 sps:$4 sm:$0xff]  }
 0x184   : > { %7656 = vmatpush2.bf16.msra.mxu1 %v11900_v40  ;;  %7616 = vmatprep.subr.bf16.mxu0 %v11905_v41  ;;  %v11968_v40 = vld [vmem:[%s13690_s10 + $0x17ac] ss:$48 sps:$4 sm:$0xff]   ;;  %v11963_v41 = vld [vmem:[%s13690_s10 + $0x11a8] ss:$48 sps:$4 sm:$0xff]  }
 0x185   : > { %7657 = vmatprep.subr.bf16.mxu1 %v11908_v42  ;;  %v11966_v42 = vld [vmem:[%s13690_s10 + $0x17a8] ss:$48 sps:$4 sm:$0xff]  }
 0x187   : > { %7617 = vmatpush2.bf16.msra.mxu0 %v11903_v23  ;;  %v11971_v23 = vld [vmem:[%s13690_s10 + $0x114c] ss:$48 sps:$4 sm:$0xff]  }
 0x188   : > { %7658 = vmatpush2.bf16.msra.mxu1 %v11906_v24  ;;  %7618 = vmatprep.subr.bf16.mxu0 %v11911_v43  ;;  %v11974_v24 = vld [vmem:[%s13690_s10 + $0x174c] ss:$48 sps:$4 sm:$0xff]   ;;  %v11969_v43 = vld [vmem:[%s13690_s10 + $0x1148] ss:$48 sps:$4 sm:$0xff]  }
 0x189   : > { %7659 = vmatprep.subr.bf16.mxu1 %v11914_v44  ;;  %v11972_v44 = vld [vmem:[%s13690_s10 + $0x1748] ss:$48 sps:$4 sm:$0xff]  }
 0x18b   : > { %7619 = vmatpush2.bf16.msra.mxu0 %v11909_v45  ;;  %v11977_v45 = vld [vmem:[%s13690_s10 + $0x10ec] ss:$48 sps:$4 sm:$0xff]  }
 0x18c   : > { %7660 = vmatpush2.bf16.msra.mxu1 %v11912_v46  ;;  %7670 = vmatprep.subr.bf16.mxu0 %v11917_v47  ;;  %v11980_v46 = vld [vmem:[%s13690_s10 + $0x16ec] ss:$48 sps:$4 sm:$0xff]   ;;  %v11975_v47 = vld [vmem:[%s13690_s10 + $0x10e8] ss:$48 sps:$4 sm:$0xff]  }
 0x18d   : > { %7711 = vmatprep.subr.bf16.mxu1 %v11920_v49  ;;  %v11978_v49 = vld [vmem:[%s13690_s10 + $0x16e8] ss:$48 sps:$4 sm:$0xff]  }
 0x18e   : > { %v7376_v55 = vpop.f32.mrf.mxu0  ;;  %7621 = vmatmul.mubr.bf16.vlgmr.msra.gmra.mxu0 %v13787_v7 }
 0x18f   : > { %v7417_v56 = vpop.f32.mrf.mxu1  ;;  %7662 = vmatmul.mubr.bf16.vlgmr.msra.gmra.mxu1 %v13789_v8  ;;  %7671 = vmatpush1.bf16.msra.mxu0 %v11915_v50  ;;  %v11983_v50 = vld [vmem:[%s13690_s10 + $0x108c] ss:$48 sps:$4 sm:$0xff]  }
 0x190   : > { %v14045_v57 = vadd.f32 %v7417_v56, %v7376_v55  ;;  %7712 = vmatpush1.bf16.msra.mxu1 %v11918_v51  ;;  %v7378_v61 = vpop.f32.mrf.mxu0  ;;  %7672 = vmatprep.subr.bf16.mxu0 %v11923_v53  ;;  %v11986_v51 = vld [vmem:[%s13690_s10 + $0x168c] ss:$48 sps:$4 sm:$0xff]   ;;  %v11981_v53 = vld [vmem:[%s13690_s10 + $0x1088] ss:$48 sps:$4 sm:$0xff]  }
 0x191   : > { %v7419_v62 = vpop.f32.mrf.mxu1  ;;  %7713 = vmatprep.subr.bf16.mxu1 %v11926_v54  ;;  %7702 = vmatprep.mubr.bf16.mxu0 %v13827_v37  ;;  %v11984_v54 = vld [vmem:[%s13690_s10 + $0x1688] ss:$48 sps:$4 sm:$0xff]   ;;  %v11989_v55 = vld [vmem:[%s13690_s10 + $0x102c] ss:$48 sps:$4 sm:$0xff]  }
 0x192   : > { %v14051_v0 = vadd.f32 %v7419_v62, %v7378_v61  ;;  %7743 = vmatprep.mubr.bf16.mxu1 %v13831_v38  ;;  %v7380_v1 = vpop.f32.mrf.mxu0  ;;  %v11992_v56 = vld [vmem:[%s13690_s10 + $0x162c] ss:$48 sps:$4 sm:$0xff]   ;;  %v11993_v62 = vld [vmem:[%s13690_s10 + $0xfc8] ss:$48 sps:$4 sm:$0xff]  }
 0x193   : > { %v7421_v2 = vpop.f32.mrf.mxu1  ;;  %7673 = vmatpush1.bf16.msra.mxu0 %v11921_v58  ;;  %v11987_v58 = vld [vmem:[%s13690_s10 + $0x1028] ss:$48 sps:$4 sm:$0xff]   ;;  %v11998_v61 = vld [vmem:[%s13690_s10 + $0x15cc] ss:$48 sps:$4 sm:$0xff]  }
 0x194   : > { %7714 = vmatpush1.bf16.msra.mxu1 %v11924_v59  ;;  %v7381_v5 = vpop.f32.mrf.mxu0  ;;  %7674 = vmatprep.subr.bf16.mxu0 %v11929_v60  ;;  %v11990_v59 = vld [vmem:[%s13690_s10 + $0x1628] ss:$48 sps:$4 sm:$0xff]   ;;  %v11995_v60 = vld [vmem:[%s13690_s10 + $0xfcc] ss:$48 sps:$4 sm:$0xff]  }
 0x195   : > { %v7422_v6 = vpop.f32.mrf.mxu1  ;;  %7715 = vmatprep.subr.bf16.mxu1 %v11932_v63  ;;  %v11996_v63 = vld [vmem:[%s13690_s10 + $0x15c8] ss:$48 sps:$4 sm:$0xff]   ;;  %v12001_v1 = vld [vmem:[%s13690_s10 + $0xf6c] ss:$48 sps:$4 sm:$0xff]  }
 0x196   : > { %v12004_v2 = vld [vmem:[%s13690_s10 + $0x156c] ss:$48 sps:$4 sm:$0xff]  }
 0x197   : > { %7675 = vmatpush1.bf16.msra.mxu0 %v11927_v3  ;;  %v11999_v3 = vld [vmem:[%s13690_s10 + $0xf68] ss:$48 sps:$4 sm:$0xff]   ;;  %v12007_v5 = vld [vmem:[%s13690_s10 + $0xf0c] ss:$48 sps:$4 sm:$0xff]  }
 0x198   : > { %7716 = vmatpush1.bf16.msra.mxu1 %v11930_v4  ;;  %7676 = vmatprep.subr.bf16.mxu0 %v11935_v9  ;;  %v12002_v4 = vld [vmem:[%s13690_s10 + $0x1568] ss:$48 sps:$4 sm:$0xff]   ;;  %v12010_v6 = vld [vmem:[%s13690_s10 + $0x150c] ss:$48 sps:$4 sm:$0xff]  }
 0x199   : > { %7717 = vmatprep.subr.bf16.mxu1 %v11938_v10  ;;  %v12005_v9 = vld [vmem:[%s13690_s10 + $0xf08] ss:$48 sps:$4 sm:$0xff]  }
 0x19a   : > { %v12008_v10 = vld [vmem:[%s13690_s10 + $0x1508] ss:$48 sps:$4 sm:$0xff]  }
 0x19b   : > { %7677 = vmatpush1.bf16.msra.mxu0 %v11933_v11  ;;  %v12013_v11 = vld [vmem:[%s13690_s10 + $0x1aac] ss:$48 sps:$4 sm:$0xff]  }
 0x19c   : > { %7718 = vmatpush1.bf16.msra.mxu1 %v11936_v12  ;;  %7678 = vmatprep.subr.bf16.mxu0 %v11941_v13  ;;  %v12016_v12 = vld [vmem:[%s13690_s10 + $0x20ac] ss:$48 sps:$4 sm:$0xff]   ;;  %v12011_v13 = vld [vmem:[%s13690_s10 + $0x1aa8] ss:$48 sps:$4 sm:$0xff]  }
 0x19d   : > { %7719 = vmatprep.subr.bf16.mxu1 %v11944_v14  ;;  %v12014_v14 = vld [vmem:[%s13690_s10 + $0x20a8] ss:$48 sps:$4 sm:$0xff]  }
 0x19f   : > { %7679 = vmatpush1.bf16.msra.mxu0 %v11939_v15  ;;  %v12019_v15 = vld [vmem:[%s13690_s10 + $0x1a4c] ss:$48 sps:$4 sm:$0xff]  }
 0x1a0   : > { %7720 = vmatpush1.bf16.msra.mxu1 %v11942_v16  ;;  %7680 = vmatprep.subr.bf16.mxu0 %v11947_v19  ;;  %v12022_v16 = vld [vmem:[%s13690_s10 + $0x204c] ss:$48 sps:$4 sm:$0xff]   ;;  %v12017_v19 = vld [vmem:[%s13690_s10 + $0x1a48] ss:$48 sps:$4 sm:$0xff]  }
 0x1a1   : > { %7721 = vmatprep.subr.bf16.mxu1 %v11950_v20  ;;  %v12020_v20 = vld [vmem:[%s13690_s10 + $0x2048] ss:$48 sps:$4 sm:$0xff]  }
 0x1a3   : > { %7681 = vmatpush1.bf16.msra.mxu0 %v11945_v21 }
 0x1a4   : > { %7722 = vmatpush1.bf16.msra.mxu1 %v11948_v22  ;;  %7682 = vmatprep.subr.bf16.mxu0 %v11953_v27 }
 0x1a5   : > { %7723 = vmatprep.subr.bf16.mxu1 %v11956_v28 }
 0x1a7   : > { %7683 = vmatpush1.bf16.msra.mxu0 %v11951_v29  ;;  %v12025_v29 = vld [vmem:[%s13690_s10 + $0x19ec] ss:$48 sps:$4 sm:$0xff]  }
 0x1a8   : > { %7724 = vmatpush1.bf16.msra.mxu1 %v11954_v30  ;;  %7684 = vmatprep.subr.bf16.mxu0 %v11959_v31  ;;  %v12028_v30 = vld [vmem:[%s13690_s10 + $0x1fec] ss:$48 sps:$4 sm:$0xff]   ;;  %v12023_v31 = vld [vmem:[%s13690_s10 + $0x19e8] ss:$48 sps:$4 sm:$0xff]  }
 0x1a9   : > { %7725 = vmatprep.subr.bf16.mxu1 %v11962_v32  ;;  %v12026_v32 = vld [vmem:[%s13690_s10 + $0x1fe8] ss:$48 sps:$4 sm:$0xff]  }
 0x1ab   : > { %7685 = vmatpush1.bf16.msra.mxu0 %v11957_v33 }
 0x1ac   : > { %7726 = vmatpush1.bf16.msra.mxu1 %v11960_v34  ;;  %7686 = vmatprep.subr.bf16.mxu0 %v11965_v39 }
 0x1ad   : > { %7727 = vmatprep.subr.bf16.mxu1 %v11968_v40 }
 0x1af   : > { %7687 = vmatpush2.bf16.msra.mxu0 %v11963_v41  ;;  %v12031_v41 = vld [vmem:[%s13690_s10 + $0x198c] ss:$48 sps:$4 sm:$0xff]  }
 0x1b0   : > { %7728 = vmatpush2.bf16.msra.mxu1 %v11966_v42  ;;  %7688 = vmatprep.subr.bf16.mxu0 %v11971_v23  ;;  %v12034_v42 = vld [vmem:[%s13690_s10 + $0x1f8c] ss:$48 sps:$4 sm:$0xff]   ;;  %v12029_v23 = vld [vmem:[%s13690_s10 + $0x1988] ss:$48 sps:$4 sm:$0xff]  }
 0x1b1   : > { %7729 = vmatprep.subr.bf16.mxu1 %v11974_v24  ;;  %v12032_v24 = vld [vmem:[%s13690_s10 + $0x1f88] ss:$48 sps:$4 sm:$0xff]  }
 0x1b3   : > { %7689 = vmatpush2.bf16.msra.mxu0 %v11969_v43  ;;  %v12037_v43 = vld [vmem:[%s13690_s10 + $0x192c] ss:$48 sps:$4 sm:$0xff]  }
 0x1b4   : > { %7730 = vmatpush2.bf16.msra.mxu1 %v11972_v44  ;;  %7690 = vmatprep.subr.bf16.mxu0 %v11977_v45  ;;  %v12040_v44 = vld [vmem:[%s13690_s10 + $0x1f2c] ss:$48 sps:$4 sm:$0xff]   ;;  %v12035_v45 = vld [vmem:[%s13690_s10 + $0x1928] ss:$48 sps:$4 sm:$0xff]  }
 0x1b5   : > { %7731 = vmatprep.subr.bf16.mxu1 %v11980_v46  ;;  %v12038_v46 = vld [vmem:[%s13690_s10 + $0x1f28] ss:$48 sps:$4 sm:$0xff]  }
 0x1b7   : > { %7691 = vmatpush2.bf16.msra.mxu0 %v11975_v47  ;;  %v12043_v47 = vld [vmem:[%s13690_s10 + $0x18cc] ss:$48 sps:$4 sm:$0xff]  }
 0x1b8   : > { %7732 = vmatpush2.bf16.msra.mxu1 %v11978_v49  ;;  %7692 = vmatprep.subr.bf16.mxu0 %v11983_v50  ;;  %v12046_v49 = vld [vmem:[%s13690_s10 + $0x1ecc] ss:$48 sps:$4 sm:$0xff]   ;;  %v12041_v50 = vld [vmem:[%s13690_s10 + $0x18c8] ss:$48 sps:$4 sm:$0xff]  }
 0x1b9   : > { %7733 = vmatprep.subr.bf16.mxu1 %v11986_v51  ;;  %v12044_v51 = vld [vmem:[%s13690_s10 + $0x1ec8] ss:$48 sps:$4 sm:$0xff]  }
 0x1bb   : > { %7693 = vmatpush2.bf16.msra.mxu0 %v11981_v53  ;;  %v12049_v53 = vld [vmem:[%s13690_s10 + $0x186c] ss:$48 sps:$4 sm:$0xff]  }
 0x1bc   : > { %7734 = vmatpush2.bf16.msra.mxu1 %v11984_v54  ;;  %7694 = vmatprep.subr.bf16.mxu0 %v11989_v55  ;;  %v12052_v54 = vld [vmem:[%s13690_s10 + $0x1e6c] ss:$48 sps:$4 sm:$0xff]   ;;  %v12047_v55 = vld [vmem:[%s13690_s10 + $0x1868] ss:$48 sps:$4 sm:$0xff]  }
 0x1bd   : > { %7735 = vmatprep.subr.bf16.mxu1 %v11992_v56  ;;  %v12050_v56 = vld [vmem:[%s13690_s10 + $0x1e68] ss:$48 sps:$4 sm:$0xff]  }
 0x1bf   : > { %7695 = vmatpush2.bf16.msra.mxu0 %v11987_v58  ;;  %v12055_v58 = vld [vmem:[%s13690_s10 + $0x180c] ss:$48 sps:$4 sm:$0xff]  }
 0x1c0   : > { %7736 = vmatpush2.bf16.msra.mxu1 %v11990_v59  ;;  %7696 = vmatprep.subr.bf16.mxu0 %v11995_v60  ;;  %v12058_v59 = vld [vmem:[%s13690_s10 + $0x1e0c] ss:$48 sps:$4 sm:$0xff]   ;;  %v12053_v60 = vld [vmem:[%s13690_s10 + $0x1808] ss:$48 sps:$4 sm:$0xff]  }
 0x1c1   : > { %7737 = vmatprep.subr.bf16.mxu1 %v11998_v61  ;;  %v12056_v61 = vld [vmem:[%s13690_s10 + $0x1e08] ss:$48 sps:$4 sm:$0xff]  }
 0x1c3   : > { %7697 = vmatpush2.bf16.msra.mxu0 %v11993_v62  ;;  %v12061_v62 = vld [vmem:[%s13690_s10 + $0x1dac] ss:$48 sps:$4 sm:$0xff]  }
 0x1c4   : > { %7738 = vmatpush2.bf16.msra.mxu1 %v11996_v63  ;;  %7698 = vmatprep.subr.bf16.mxu0 %v12001_v1  ;;  %v12064_v63 = vld [vmem:[%s13690_s10 + $0x23ac] ss:$48 sps:$4 sm:$0xff]   ;;  %v12059_v1 = vld [vmem:[%s13690_s10 + $0x1da8] ss:$48 sps:$4 sm:$0xff]  }
 0x1c5   : > { %7739 = vmatprep.subr.bf16.mxu1 %v12004_v2  ;;  %v12062_v2 = vld [vmem:[%s13690_s10 + $0x23a8] ss:$48 sps:$4 sm:$0xff]  }
 0x1c7   : > { %7699 = vmatpush2.bf16.msra.mxu0 %v11999_v3  ;;  %v12067_v3 = vld [vmem:[%s13690_s10 + $0x1d4c] ss:$48 sps:$4 sm:$0xff]  }
 0x1c8   : > { %7740 = vmatpush2.bf16.msra.mxu1 %v12002_v4  ;;  %7700 = vmatprep.subr.bf16.mxu0 %v12007_v5  ;;  %v12070_v4 = vld [vmem:[%s13690_s10 + $0x234c] ss:$48 sps:$4 sm:$0xff]   ;;  %v12065_v5 = vld [vmem:[%s13690_s10 + $0x1d48] ss:$48 sps:$4 sm:$0xff]  }
 0x1c9   : > { %7741 = vmatprep.subr.bf16.mxu1 %v12010_v6  ;;  %v12068_v6 = vld [vmem:[%s13690_s10 + $0x2348] ss:$48 sps:$4 sm:$0xff]  }
 0x1cb   : > { %7701 = vmatpush2.bf16.msra.mxu0 %v12005_v9  ;;  %v12073_v9 = vld [vmem:[%s13690_s10 + $0x1cec] ss:$48 sps:$4 sm:$0xff]  }
 0x1cc   : > { %7742 = vmatpush2.bf16.msra.mxu1 %v12008_v10  ;;  %7752 = vmatprep.subr.bf16.mxu0 %v12013_v11  ;;  %v12076_v10 = vld [vmem:[%s13690_s10 + $0x22ec] ss:$48 sps:$4 sm:$0xff]   ;;  %v12071_v11 = vld [vmem:[%s13690_s10 + $0x1ce8] ss:$48 sps:$4 sm:$0xff]  }
 0x1cd   : > { %7793 = vmatprep.subr.bf16.mxu1 %v12016_v12  ;;  %v12074_v12 = vld [vmem:[%s13690_s10 + $0x22e8] ss:$48 sps:$4 sm:$0xff]  }
 0x1ce   : > { %v14117_v21 = vpop.f32.mrf.mxu0  ;;  %7703 = vmatmul.mubr.bf16.vlgmr.msra.gmra.mxu0 %v13875_v17 }
 0x1cf   : > { %v14119_v22 = vpop.f32.mrf.mxu1  ;;  %7744 = vmatmul.mubr.bf16.vlgmr.msra.gmra.mxu1 %v13879_v18  ;;  %7753 = vmatpush1.bf16.msra.mxu0 %v12011_v13  ;;  %v12079_v13 = vld [vmem:[%s13690_s10 + $0x1c8c] ss:$48 sps:$4 sm:$0xff]  }
 0x1d0   : > { %7794 = vmatpush1.bf16.msra.mxu1 %v12014_v14  ;;  %v14123_v27 = vpop.f32.mrf.mxu0  ;;  %7754 = vmatprep.subr.bf16.mxu0 %v12019_v15  ;;  %v12082_v14 = vld [vmem:[%s13690_s10 + $0x228c] ss:$48 sps:$4 sm:$0xff]   ;;  %v12077_v15 = vld [vmem:[%s13690_s10 + $0x1c88] ss:$48 sps:$4 sm:$0xff]  }
 0x1d1   : > { %v14125_v28 = vpop.f32.mrf.mxu1  ;;  %7795 = vmatprep.subr.bf16.mxu1 %v12022_v16  ;;  %7784 = vmatprep.mubr.bf16.mxu0 %v13893_v25  ;;  %v12080_v16 = vld [vmem:[%s13690_s10 + $0x2288] ss:$48 sps:$4 sm:$0xff]  }
 0x1d2   : > { %7825 = vmatprep.mubr.bf16.mxu1 %v13897_v26  ;;  %v7462_v33 = vpop.f32.mrf.mxu0 }
 0x1d3   : > { %v7503_v34 = vpop.f32.mrf.mxu1  ;;  %7755 = vmatpush1.bf16.msra.mxu0 %v12017_v19  ;;  %v12085_v19 = vld [vmem:[%s13690_s10 + $0x1c2c] ss:$48 sps:$4 sm:$0xff]   ;;  %v12089_v33 = vld [vmem:[%s13690_s10 + $0x1bc8] ss:$48 sps:$4 sm:$0xff]  }
 0x1d4   : > { %7796 = vmatpush1.bf16.msra.mxu1 %v12020_v20  ;;  %v7463_v39 = vpop.f32.mrf.mxu0  ;;  %7756 = vmatprep.subr.bf16.mxu0 %v12025_v29  ;;  %v12088_v20 = vld [vmem:[%s13690_s10 + $0x222c] ss:$48 sps:$4 sm:$0xff]   ;;  %v12083_v29 = vld [vmem:[%s13690_s10 + $0x1c28] ss:$48 sps:$4 sm:$0xff]  }
 0x1d5   : > { %v7504_v40 = vpop.f32.mrf.mxu1  ;;  %7797 = vmatprep.subr.bf16.mxu1 %v12028_v30  ;;  %v12086_v30 = vld [vmem:[%s13690_s10 + $0x2228] ss:$48 sps:$4 sm:$0xff]   ;;  %v12097_v39 = vld [vmem:[%s13690_s10 + $0x1b6c] ss:$48 sps:$4 sm:$0xff]  }
 0x1d6   : > { %v12092_v34 = vld [vmem:[%s13690_s10 + $0x21c8] ss:$48 sps:$4 sm:$0xff]   ;;  %v12100_v40 = vld [vmem:[%s13690_s10 + $0x216c] ss:$48 sps:$4 sm:$0xff]  }
 0x1d7   : > { %7757 = vmatpush1.bf16.msra.mxu0 %v12023_v31  ;;  %v12091_v31 = vld [vmem:[%s13690_s10 + $0x1bcc] ss:$48 sps:$4 sm:$0xff]  }
 0x1d8   : > { %7798 = vmatpush1.bf16.msra.mxu1 %v12026_v32  ;;  %7758 = vmatprep.subr.bf16.mxu0 %v12031_v41  ;;  %v12094_v32 = vld [vmem:[%s13690_s10 + $0x21cc] ss:$48 sps:$4 sm:$0xff]   ;;  %v12095_v41 = vld [vmem:[%s13690_s10 + $0x1b68] ss:$48 sps:$4 sm:$0xff]  }
 0x1d9   : > { %7799 = vmatprep.subr.bf16.mxu1 %v12034_v42  ;;  %v12098_v42 = vld [vmem:[%s13690_s10 + $0x2168] ss:$48 sps:$4 sm:$0xff]  }
 0x1db   : > { %7759 = vmatpush1.bf16.msra.mxu0 %v12029_v23  ;;  %v12103_v23 = vld [vmem:[%s13690_s10 + $0x1b0c] ss:$48 sps:$4 sm:$0xff]  }
 0x1dc   : > { %7800 = vmatpush1.bf16.msra.mxu1 %v12032_v24  ;;  %7760 = vmatprep.subr.bf16.mxu0 %v12037_v43  ;;  %v12106_v24 = vld [vmem:[%s13690_s10 + $0x210c] ss:$48 sps:$4 sm:$0xff]   ;;  %v12101_v43 = vld [vmem:[%s13690_s10 + $0x1b08] ss:$48 sps:$4 sm:$0xff]  }
 0x1dd   : > { %7801 = vmatprep.subr.bf16.mxu1 %v12040_v44  ;;  %v12104_v44 = vld [vmem:[%s13690_s10 + $0x2108] ss:$48 sps:$4 sm:$0xff]  }
 0x1df   : > { %7761 = vmatpush1.bf16.msra.mxu0 %v12035_v45  ;;  %v12109_v45 = vld [vmem:[%s13690_s10 + $0x2b4] ss:$48 sps:$4 sm:$0xff]  }
 0x1e0   : > { %7802 = vmatpush1.bf16.msra.mxu1 %v12038_v46  ;;  %7762 = vmatprep.subr.bf16.mxu0 %v12043_v47  ;;  %v12112_v46 = vld [vmem:[%s13690_s10 + $0x8b4] ss:$48 sps:$4 sm:$0xff]   ;;  %v7459_v47 = vadd.f32 %v14117_v21, %v14045_v57 }
 0x1e1   : > { %7803 = vmatprep.subr.bf16.mxu1 %v12046_v49  ;;  %v12107_v49 = vld [vmem:[%s13690_s10 + $0x2b0] ss:$48 sps:$4 sm:$0xff]  }
 0x1e3   : > { %7763 = vmatpush1.bf16.msra.mxu0 %v12041_v50  ;;  %v12110_v50 = vld [vmem:[%s13690_s10 + $0x8b0] ss:$48 sps:$4 sm:$0xff]  }
 0x1e4   : > { %7804 = vmatpush1.bf16.msra.mxu1 %v12044_v51  ;;  %7764 = vmatprep.subr.bf16.mxu0 %v12049_v53  ;;  %v7461_v51 = vadd.f32 %v14123_v27, %v14051_v0  ;;  %v12115_v53 = vld [vmem:[%s13690_s10 + $0x254] ss:$48 sps:$4 sm:$0xff]  }
 0x1e5   : > { %7805 = vmatprep.subr.bf16.mxu1 %v12052_v54  ;;  %v12118_v54 = vld [vmem:[%s13690_s10 + $0x854] ss:$48 sps:$4 sm:$0xff]  }
 0x1e6   : > { %v7502_v0 = vadd.f32 %v14125_v28, %v7461_v51  ;;  %v12166_v51 = vld [vmem:[%s13690_s10 + $0xb54] ss:$48 sps:$4 sm:$0xff]  }
 0x1e7   : > { %7765 = vmatpush1.bf16.msra.mxu0 %v12047_v55  ;;  %v7500_v55 = vadd.f32 %v14119_v22, %v7459_v47  ;;  %v377_v22 = vld [vmem:[#allocation2] sm:$0xff] }
 0x1e8   : > { %7806 = vmatpush1.bf16.msra.mxu1 %v12050_v56  ;;  %7766 = vmatprep.subr.bf16.mxu0 %v12055_v58  ;;  %v12113_v56 = vld [vmem:[%s13690_s10 + $0x250] ss:$48 sps:$4 sm:$0xff]  }
 0x1e9   : > { %7807 = vmatprep.subr.bf16.mxu1 %v12058_v59  ;;  %v12116_v58 = vld [vmem:[%s13690_s10 + $0x850] ss:$48 sps:$4 sm:$0xff]  }
 0x1ea   : > { %v12155_v47 = vld [vmem:[%s13690_s10 + $0x5b0] ss:$48 sps:$4 sm:$0xff]  }
 0x1eb   : > { %7767 = vmatpush1.bf16.msra.mxu0 %v12053_v60  ;;  %v376_v60 = vld [vmem:[#allocation2 + $0x30] sm:$0xff] }
 0x1ec   : > { %7808 = vmatpush1.bf16.msra.mxu1 %v12056_v61  ;;  %7768 = vmatprep.subr.bf16.mxu0 %v12061_v62  ;;  %v12121_v62 = vld [vmem:[%s13690_s10 + $0x1f4] ss:$48 sps:$4 sm:$0xff]  }
 0x1ed   : > { %7809 = vmatprep.subr.bf16.mxu1 %v12064_v63  ;;  %v12124_v63 = vld [vmem:[%s13690_s10 + $0x7f4] ss:$48 sps:$4 sm:$0xff]  }
 0x1ef   : > { %7769 = vmatpush2.bf16.msra.mxu0 %v12059_v1 }
 0x1f0   : > { %7810 = vmatpush2.bf16.msra.mxu1 %v12062_v2  ;;  %7770 = vmatprep.subr.bf16.mxu0 %v12067_v3  ;;  %v12119_v3 = vld [vmem:[%s13690_s10 + $0x1f0] ss:$48 sps:$4 sm:$0xff]  }
 0x1f1   : > { %7811 = vmatprep.subr.bf16.mxu1 %v12070_v4  ;;  %v12122_v4 = vld [vmem:[%s13690_s10 + $0x7f0] ss:$48 sps:$4 sm:$0xff]  }
 0x1f3   : > { %7771 = vmatpush2.bf16.msra.mxu0 %v12065_v5 }
 0x1f4   : > { %7812 = vmatpush2.bf16.msra.mxu1 %v12068_v6  ;;  %7772 = vmatprep.subr.bf16.mxu0 %v12073_v9 }
 0x1f5   : > { %7813 = vmatprep.subr.bf16.mxu1 %v12076_v10 }
 0x1f7   : > { %7773 = vmatpush2.bf16.msra.mxu0 %v12071_v11 }
 0x1f8   : > { %7814 = vmatpush2.bf16.msra.mxu1 %v12074_v12  ;;  %7774 = vmatprep.subr.bf16.mxu0 %v12079_v13  ;;  %v12127_v12 = vld [vmem:[%s13690_s10 + $0x194] ss:$48 sps:$4 sm:$0xff]  }
 0x1f9   : > { %7815 = vmatprep.subr.bf16.mxu1 %v12082_v14  ;;  %v12130_v13 = vld [vmem:[%s13690_s10 + $0x794] ss:$48 sps:$4 sm:$0xff]  }
 0x1fb   : > { %7775 = vmatpush2.bf16.msra.mxu0 %v12077_v15  ;;  %v12125_v15 = vld [vmem:[%s13690_s10 + $0x190] ss:$48 sps:$4 sm:$0xff]  }
 0x1fc   : > { %7816 = vmatpush2.bf16.msra.mxu1 %v12080_v16  ;;  %7776 = vmatprep.subr.bf16.mxu0 %v12085_v19  ;;  %v12128_v16 = vld [vmem:[%s13690_s10 + $0x790] ss:$48 sps:$4 sm:$0xff]   ;;  %v12133_v19 = vld [vmem:[%s13690_s10 + $0x134] ss:$48 sps:$4 sm:$0xff]  }
 0x1fd   : > { %7817 = vmatprep.subr.bf16.mxu1 %v12088_v20  ;;  %v12136_v20 = vld [vmem:[%s13690_s10 + $0x734] ss:$48 sps:$4 sm:$0xff]  }
 0x1ff   : > { %7777 = vmatpush2.bf16.msra.mxu0 %v12083_v29  ;;  %v12131_v29 = vld [vmem:[%s13690_s10 + $0x130] ss:$48 sps:$4 sm:$0xff]  }
 0x200   : > { %7818 = vmatpush2.bf16.msra.mxu1 %v12086_v30  ;;  %7778 = vmatprep.subr.bf16.mxu0 %v12091_v31  ;;  %v12134_v30 = vld [vmem:[%s13690_s10 + $0x730] ss:$48 sps:$4 sm:$0xff]   ;;  %v12139_v31 = vld [vmem:[%s13690_s10 + $0xd4] ss:$48 sps:$4 sm:$0xff]  }
 0x201   : > { %7819 = vmatprep.subr.bf16.mxu1 %v12094_v32  ;;  %v12142_v32 = vld [vmem:[%s13690_s10 + $0x6d4] ss:$48 sps:$4 sm:$0xff]  }
 0x203   : > { %7779 = vmatpush2.bf16.msra.mxu0 %v12089_v33  ;;  %v12137_v33 = vld [vmem:[%s13690_s10 + $0xd0] ss:$48 sps:$4 sm:$0xff]  }
 0x204   : > { %7820 = vmatpush2.bf16.msra.mxu1 %v12092_v34  ;;  %7780 = vmatprep.subr.bf16.mxu0 %v12097_v39  ;;  %v12140_v34 = vld [vmem:[%s13690_s10 + $0x6d0] ss:$48 sps:$4 sm:$0xff]   ;;  %v12145_v39 = vld [vmem:[%s13690_s10 + $0x74] ss:$48 sps:$4 sm:$0xff]  }
 0x205   : > { %7821 = vmatprep.subr.bf16.mxu1 %v12100_v40  ;;  %v12148_v40 = vld [vmem:[%s13690_s10 + $0x674] ss:$48 sps:$4 sm:$0xff]  }
 0x207   : > { %7781 = vmatpush2.bf16.msra.mxu0 %v12095_v41  ;;  %v12143_v41 = vld [vmem:[%s13690_s10 + $0x70] ss:$48 sps:$4 sm:$0xff]  }
 0x208   : > { %7822 = vmatpush2.bf16.msra.mxu1 %v12098_v42  ;;  %7782 = vmatprep.subr.bf16.mxu0 %v12103_v23  ;;  %v12146_v42 = vld [vmem:[%s13690_s10 + $0x670] ss:$48 sps:$4 sm:$0xff]   ;;  %v12151_v23 = vld [vmem:[%s13690_s10 + $0x14] ss:$48 sps:$4 sm:$0xff]  }
 0x209   : > { %7823 = vmatprep.subr.bf16.mxu1 %v12106_v24  ;;  %v12154_v24 = vld [vmem:[%s13690_s10 + $0x614] ss:$48 sps:$4 sm:$0xff]  }
 0x20b   : > { %7783 = vmatpush2.bf16.msra.mxu0 %v12101_v43  ;;  %v12149_v43 = vld [vmem:[%s13690_s10 + $0x10] ss:$48 sps:$4 sm:$0xff]  }
 0x20c   : > { %7824 = vmatpush2.bf16.msra.mxu1 %v12104_v44  ;;  %7834 = vmatprep.subr.bf16.mxu0 %v12109_v45  ;;  %v12152_v44 = vld [vmem:[%s13690_s10 + $0x610] ss:$48 sps:$4 sm:$0xff]   ;;  %v12157_v45 = vld [vmem:[%s13690_s10 + $0x5b4] ss:$48 sps:$4 sm:$0xff]  }
 0x20d   : > { %7875 = vmatprep.subr.bf16.mxu1 %v12112_v46  ;;  %v12160_v46 = vld [vmem:[%s13690_s10 + $0xbb4] ss:$48 sps:$4 sm:$0xff]  }
 0x20e   : > { %v7540_v59 = vpop.f32.mrf.mxu0  ;;  %7785 = vmatmul.mubr.bf16.vlgmr.msra.gmra.mxu0 %v13965_v35 }
 0x20f   : > { %v7581_v57 = vpop.f32.mrf.mxu1  ;;  %7826 = vmatmul.mubr.bf16.vlgmr.msra.gmra.mxu1 %v13969_v36  ;;  %v7541_v21 = vadd.f32 %v7540_v59, %v7500_v55  ;;  %7835 = vmatpush1.bf16.msra.mxu0 %v12107_v49  ;;  %v12158_v49 = vld [vmem:[%s13690_s10 + $0xbb0] ss:$48 sps:$4 sm:$0xff]   ;;  %v12169_v55 = vld [vmem:[%s13690_s10 + $0x4f4] ss:$48 sps:$4 sm:$0xff]  }
 0x210   : > { %7876 = vmatpush1.bf16.msra.mxu1 %v12110_v50  ;;  %v7542_v27 = vpop.f32.mrf.mxu0  ;;  %7836 = vmatprep.subr.bf16.mxu0 %v12115_v53  ;;  %v12163_v50 = vld [vmem:[%s13690_s10 + $0x554] ss:$48 sps:$4 sm:$0xff]   ;;  %v12161_v53 = vld [vmem:[%s13690_s10 + $0x550] ss:$48 sps:$4 sm:$0xff]  }
 0x211   : > { %v7583_v61 = vpop.f32.mrf.mxu1  ;;  %7877 = vmatprep.subr.bf16.mxu1 %v12118_v54  ;;  %v7582_v1 = vadd.f32 %v7581_v57, %v7541_v21  ;;  %v7543_v2 = vadd.f32 %v7542_v27, %v7502_v0  ;;  %7866 = vmatprep.mubr.bf16.mxu0 %v13760_v48  ;;  %v12164_v54 = vld [vmem:[%s13690_s10 + $0xb50] ss:$48 sps:$4 sm:$0xff]   ;;  %v12178_v57 = vld [vmem:[%s13690_s10 + $0xa94] ss:$48 sps:$4 sm:$0xff]  }
 0x212   : > { %7907 = vmatprep.mubr.bf16.mxu1 %v13765_v52  ;;  %v7544_v28 = vpop.f32.mrf.mxu0  ;;  %v12170_v59 = vld [vmem:[%s13690_s10 + $0xaf0] ss:$48 sps:$4 sm:$0xff]   ;;  %v12181_v27 = vld [vmem:[%s13690_s10 + $0x434] ss:$48 sps:$4 sm:$0xff]  }
 0x213   : > { %v7585_v5 = vpop.f32.mrf.mxu1  ;;  %v8818_v6 = vadd.f32 %v7582_v1, %v376_v60  ;;  %v7584_v9 = vadd.f32 %v7583_v61, %v7543_v2  ;;  %7837 = vmatpush1.bf16.msra.mxu0 %v12113_v56  ;;  %v12172_v56 = vld [vmem:[%s13690_s10 + $0xaf4] ss:$48 sps:$4 sm:$0xff]   ;;  %v12173_v0 = vld [vmem:[%s13690_s10 + $0x490] ss:$48 sps:$4 sm:$0xff]  }
 0x214   : > { %7878 = vmatpush1.bf16.msra.mxu1 %v12116_v58  ;;  %v7545_v10 = vpop.f32.mrf.mxu0  ;;  %7838 = vmatprep.subr.bf16.mxu0 %v12121_v62  ;;  %v12167_v58 = vld [vmem:[%s13690_s10 + $0x4f0] ss:$48 sps:$4 sm:$0xff]   ;;  %v12175_v60 = vld [vmem:[%s13690_s10 + $0x494] ss:$48 sps:$4 sm:$0xff]  }
 0x215   : > { %v7586_v11 = vpop.f32.mrf.mxu1  ;;  %7879 = vmatprep.subr.bf16.mxu1 %v12124_v63  ;;  %8830 = vst [vmem:[#allocation2 + $0x30] sm:$0xff] %v8818_v6  ;;  %v8819_v14 = vadd.f32 %v7584_v9, %v377_v22  ;;  %v12176_v21 = vld [vmem:[%s13690_s10 + $0xa90] ss:$48 sps:$4 sm:$0xff]   ;;  %v12184_v22 = vld [vmem:[%s13690_s10 + $0xa34] ss:$48 sps:$4 sm:$0xff]  }
 0x216   : > { %v12179_v61 = vld [vmem:[%s13690_s10 + $0x430] ss:$48 sps:$4 sm:$0xff]   ;;  %v12187_v63 = vld [vmem:[%s13690_s10 + $0x3d4] ss:$48 sps:$4 sm:$0xff]  }
 0x217   : > { %8831 = vst [vmem:[#allocation2] sm:$0xff] %v8819_v14  ;;  %7839 = vmatpush1.bf16.msra.mxu0 %v12119_v3  ;;  %v12182_v62 = vld [vmem:[%s13690_s10 + $0xa30] ss:$48 sps:$4 sm:$0xff]   ;;  %v12190_v1 = vld [vmem:[%s13690_s10 + $0x9d4] ss:$48 sps:$4 sm:$0xff]  }
 0x218   : > { %7880 = vmatpush1.bf16.msra.mxu1 %v12122_v4  ;;  %7840 = vmatprep.subr.bf16.mxu0 %v12127_v12  ;;  %v12185_v2 = vld [vmem:[%s13690_s10 + $0x3d0] ss:$48 sps:$4 sm:$0xff]   ;;  %v12193_v4 = vld [vmem:[%s13690_s10 + $0x374] ss:$48 sps:$4 sm:$0xff]  }
 0x219   : > { %7881 = vmatprep.subr.bf16.mxu1 %v12130_v13  ;;  %v12188_v3 = vld [vmem:[%s13690_s10 + $0x9d0] ss:$48 sps:$4 sm:$0xff]   ;;  %v12196_v28 = vld [vmem:[%s13690_s10 + $0x974] ss:$48 sps:$4 sm:$0xff]  }
 0x21a   : > { %v12191_v5 = vld [vmem:[%s13690_s10 + $0x370] ss:$48 sps:$4 sm:$0xff]   ;;  %v12199_v9 = vld [vmem:[%s13690_s10 + $0x314] ss:$48 sps:$4 sm:$0xff]  }
 0x21b   : > { %7841 = vmatpush1.bf16.msra.mxu0 %v12125_v15  ;;  %v12194_v6 = vld [vmem:[%s13690_s10 + $0x970] ss:$48 sps:$4 sm:$0xff]   ;;  %v12202_v10 = vld [vmem:[%s13690_s10 + $0x914] ss:$48 sps:$4 sm:$0xff]  }
 0x21c   : > { %7882 = vmatpush1.bf16.msra.mxu1 %v12128_v16  ;;  %7842 = vmatprep.subr.bf16.mxu0 %v12133_v19  ;;  %v12197_v11 = vld [vmem:[%s13690_s10 + $0x310] ss:$48 sps:$4 sm:$0xff]   ;;  %v12205_v13 = vld [vmem:[%s13690_s10 + $0xeb4] ss:$48 sps:$4 sm:$0xff]  }
 0x21d   : > { %7883 = vmatprep.subr.bf16.mxu1 %v12136_v20  ;;  %v12200_v12 = vld [vmem:[%s13690_s10 + $0x910] ss:$48 sps:$4 sm:$0xff]   ;;  %v12208_v14 = vld [vmem:[%s13690_s10 + $0x14b4] ss:$48 sps:$4 sm:$0xff]  }
 0x21e   : > { %v12203_v15 = vld [vmem:[%s13690_s10 + $0xeb0] ss:$48 sps:$4 sm:$0xff]   ;;  %v12211_v19 = vld [vmem:[%s13690_s10 + $0xe54] ss:$48 sps:$4 sm:$0xff]  }
 0x21f   : > { %7843 = vmatpush1.bf16.msra.mxu0 %v12131_v29  ;;  %v12206_v16 = vld [vmem:[%s13690_s10 + $0x14b0] ss:$48 sps:$4 sm:$0xff]   ;;  %v12214_v20 = vld [vmem:[%s13690_s10 + $0x1454] ss:$48 sps:$4 sm:$0xff]  }
 0x220   : > { %7884 = vmatpush1.bf16.msra.mxu1 %v12134_v30  ;;  %7844 = vmatprep.subr.bf16.mxu0 %v12139_v31  ;;  %v12209_v29 = vld [vmem:[%s13690_s10 + $0xe50] ss:$48 sps:$4 sm:$0xff]  }
 0x221   : > { %7885 = vmatprep.subr.bf16.mxu1 %v12142_v32 }
 0x223   : > { %7845 = vmatpush1.bf16.msra.mxu0 %v12137_v33  ;;  %v12212_v33 = vld [vmem:[%s13690_s10 + $0x1450] ss:$48 sps:$4 sm:$0xff]  }
 0x224   : > { %7886 = vmatpush1.bf16.msra.mxu1 %v12140_v34  ;;  %7846 = vmatprep.subr.bf16.mxu0 %v12145_v39 }
 0x225   : > { %7887 = vmatprep.subr.bf16.mxu1 %v12148_v40  ;;  %v12217_v40 = vld [vmem:[%s13690_s10 + $0xdf4] ss:$48 sps:$4 sm:$0xff]  }
 0x227   : > { %7847 = vmatpush1.bf16.msra.mxu0 %v12143_v41  ;;  %v12220_v41 = vld [vmem:[%s13690_s10 + $0x13f4] ss:$48 sps:$4 sm:$0xff]  }
 0x228   : > { %7888 = vmatpush1.bf16.msra.mxu1 %v12146_v42  ;;  %7848 = vmatprep.subr.bf16.mxu0 %v12151_v23  ;;  %v12215_v23 = vld [vmem:[%s13690_s10 + $0xdf0] ss:$48 sps:$4 sm:$0xff]  }
 0x229   : > { %7889 = vmatprep.subr.bf16.mxu1 %v12154_v24  ;;  %v12218_v24 = vld [vmem:[%s13690_s10 + $0x13f0] ss:$48 sps:$4 sm:$0xff]  }
 0x22b   : > { %7849 = vmatpush1.bf16.msra.mxu0 %v12149_v43 }
 0x22c   : > { %7890 = vmatpush1.bf16.msra.mxu1 %v12152_v44  ;;  %7850 = vmatprep.subr.bf16.mxu0 %v12157_v45 }
 0x22d   : > { %7891 = vmatprep.subr.bf16.mxu1 %v12160_v46 }
 0x22f   : > { %7851 = vmatpush2.bf16.msra.mxu0 %v12155_v47  ;;  %v12223_v47 = vld [vmem:[%s13690_s10 + $0xd94] ss:$48 sps:$4 sm:$0xff]  }
 0x230   : > { %7892 = vmatpush2.bf16.msra.mxu1 %v12158_v49  ;;  %7852 = vmatprep.subr.bf16.mxu0 %v12163_v50  ;;  %v12226_v49 = vld [vmem:[%s13690_s10 + $0x1394] ss:$48 sps:$4 sm:$0xff]   ;;  %v12221_v50 = vld [vmem:[%s13690_s10 + $0xd90] ss:$48 sps:$4 sm:$0xff]  }
 0x231   : > { %7893 = vmatprep.subr.bf16.mxu1 %v12166_v51  ;;  %v12224_v51 = vld [vmem:[%s13690_s10 + $0x1390] ss:$48 sps:$4 sm:$0xff]  }
 0x233   : > { %7853 = vmatpush2.bf16.msra.mxu0 %v12161_v53  ;;  %v12229_v53 = vld [vmem:[%s13690_s10 + $0xd34] ss:$48 sps:$4 sm:$0xff]  }
 0x234   : > { %7894 = vmatpush2.bf16.msra.mxu1 %v12164_v54  ;;  %7854 = vmatprep.subr.bf16.mxu0 %v12169_v55  ;;  %v12232_v54 = vld [vmem:[%s13690_s10 + $0x1334] ss:$48 sps:$4 sm:$0xff]   ;;  %v12227_v55 = vld [vmem:[%s13690_s10 + $0xd30] ss:$48 sps:$4 sm:$0xff]  }
 0x235   : > { %7895 = vmatprep.subr.bf16.mxu1 %v12172_v56  ;;  %v12230_v56 = vld [vmem:[%s13690_s10 + $0x1330] ss:$48 sps:$4 sm:$0xff]  }
 0x237   : > { %7855 = vmatpush2.bf16.msra.mxu0 %v12167_v58  ;;  %v12235_v58 = vld [vmem:[%s13690_s10 + $0xcd4] ss:$48 sps:$4 sm:$0xff]  }
 0x238   : > { %7896 = vmatpush2.bf16.msra.mxu1 %v12170_v59  ;;  %7856 = vmatprep.subr.bf16.mxu0 %v12175_v60  ;;  %v12238_v59 = vld [vmem:[%s13690_s10 + $0x12d4] ss:$48 sps:$4 sm:$0xff]   ;;  %v12233_v60 = vld [vmem:[%s13690_s10 + $0xcd0] ss:$48 sps:$4 sm:$0xff]  }
 0x239   : > { %7897 = vmatprep.subr.bf16.mxu1 %v12178_v57  ;;  %v12236_v57 = vld [vmem:[%s13690_s10 + $0x12d0] ss:$48 sps:$4 sm:$0xff]  }
 0x23b   : > { %7857 = vmatpush2.bf16.msra.mxu0 %v12173_v0  ;;  %v12241_v0 = vld [vmem:[%s13690_s10 + $0xc74] ss:$48 sps:$4 sm:$0xff]  }
 0x23c   : > { %7898 = vmatpush2.bf16.msra.mxu1 %v12176_v21  ;;  %7858 = vmatprep.subr.bf16.mxu0 %v12181_v27  ;;  %v12244_v21 = vld [vmem:[%s13690_s10 + $0x1274] ss:$48 sps:$4 sm:$0xff]   ;;  %v12239_v27 = vld [vmem:[%s13690_s10 + $0xc70] ss:$48 sps:$4 sm:$0xff]  }
 0x23d   : > { %7899 = vmatprep.subr.bf16.mxu1 %v12184_v22  ;;  %v12242_v22 = vld [vmem:[%s13690_s10 + $0x1270] ss:$48 sps:$4 sm:$0xff]  }
 0x23f   : > { %7859 = vmatpush2.bf16.msra.mxu0 %v12179_v61  ;;  %v12247_v61 = vld [vmem:[%s13690_s10 + $0xc14] ss:$48 sps:$4 sm:$0xff]  }
 0x240   : > { %7900 = vmatpush2.bf16.msra.mxu1 %v12182_v62  ;;  %7860 = vmatprep.subr.bf16.mxu0 %v12187_v63  ;;  %v12250_v62 = vld [vmem:[%s13690_s10 + $0x1214] ss:$48 sps:$4 sm:$0xff]   ;;  %v12245_v63 = vld [vmem:[%s13690_s10 + $0xc10] ss:$48 sps:$4 sm:$0xff]  }
 0x241   : > { %7901 = vmatprep.subr.bf16.mxu1 %v12190_v1  ;;  %v12248_v1 = vld [vmem:[%s13690_s10 + $0x1210] ss:$48 sps:$4 sm:$0xff]  }
 0x243   : > { %7861 = vmatpush2.bf16.msra.mxu0 %v12185_v2  ;;  %v12253_v2 = vld [vmem:[%s13690_s10 + $0x11b4] ss:$48 sps:$4 sm:$0xff]  }
 0x244   : > { %7902 = vmatpush2.bf16.msra.mxu1 %v12188_v3  ;;  %7862 = vmatprep.subr.bf16.mxu0 %v12193_v4  ;;  %v12256_v3 = vld [vmem:[%s13690_s10 + $0x17b4] ss:$48 sps:$4 sm:$0xff]   ;;  %v12251_v4 = vld [vmem:[%s13690_s10 + $0x11b0] ss:$48 sps:$4 sm:$0xff]  }
 0x245   : > { %7903 = vmatprep.subr.bf16.mxu1 %v12196_v28  ;;  %v12254_v28 = vld [vmem:[%s13690_s10 + $0x17b0] ss:$48 sps:$4 sm:$0xff]  }
 0x247   : > { %7863 = vmatpush2.bf16.msra.mxu0 %v12191_v5  ;;  %v12259_v5 = vld [vmem:[%s13690_s10 + $0x1154] ss:$48 sps:$4 sm:$0xff]  }
 0x248   : > { %7904 = vmatpush2.bf16.msra.mxu1 %v12194_v6  ;;  %7864 = vmatprep.subr.bf16.mxu0 %v12199_v9  ;;  %v12262_v6 = vld [vmem:[%s13690_s10 + $0x1754] ss:$48 sps:$4 sm:$0xff]   ;;  %v12257_v9 = vld [vmem:[%s13690_s10 + $0x1150] ss:$48 sps:$4 sm:$0xff]  }
 0x249   : > { %7905 = vmatprep.subr.bf16.mxu1 %v12202_v10  ;;  %v12260_v10 = vld [vmem:[%s13690_s10 + $0x1750] ss:$48 sps:$4 sm:$0xff]  }
 0x24b   : > { %7865 = vmatpush2.bf16.msra.mxu0 %v12197_v11  ;;  %v12265_v11 = vld [vmem:[%s13690_s10 + $0x10f4] ss:$48 sps:$4 sm:$0xff]  }
 0x24c   : > { %7906 = vmatpush2.bf16.msra.mxu1 %v12200_v12  ;;  %7916 = vmatprep.subr.bf16.mxu0 %v12205_v13  ;;  %v12268_v12 = vld [vmem:[%s13690_s10 + $0x16f4] ss:$48 sps:$4 sm:$0xff]   ;;  %v12263_v13 = vld [vmem:[%s13690_s10 + $0x10f0] ss:$48 sps:$4 sm:$0xff]  }
 0x24d   : > { %7957 = vmatprep.subr.bf16.mxu1 %v12208_v14  ;;  %v12266_v14 = vld [vmem:[%s13690_s10 + $0x16f0] ss:$48 sps:$4 sm:$0xff]  }
 0x24e   : > { %v7622_v30 = vpop.f32.mrf.mxu0  ;;  %7867 = vmatmul.mubr.bf16.vlgmr.msra.gmra.mxu0 %v13787_v7 }
 0x24f   : > { %v7663_v31 = vpop.f32.mrf.mxu1  ;;  %7908 = vmatmul.mubr.bf16.vlgmr.msra.gmra.mxu1 %v13789_v8  ;;  %7917 = vmatpush1.bf16.msra.mxu0 %v12203_v15  ;;  %v12271_v15 = vld [vmem:[%s13690_s10 + $0x1094] ss:$48 sps:$4 sm:$0xff]  }
 0x250   : > { %v14268_v32 = vadd.f32 %v7663_v31, %v7622_v30  ;;  %7958 = vmatpush1.bf16.msra.mxu1 %v12206_v16  ;;  %v7624_v34 = vpop.f32.mrf.mxu0  ;;  %7918 = vmatprep.subr.bf16.mxu0 %v12211_v19  ;;  %v12274_v16 = vld [vmem:[%s13690_s10 + $0x1694] ss:$48 sps:$4 sm:$0xff]   ;;  %v12269_v19 = vld [vmem:[%s13690_s10 + $0x1090] ss:$48 sps:$4 sm:$0xff]  }
 0x251   : > { %v7665_v39 = vpop.f32.mrf.mxu1  ;;  %7959 = vmatprep.subr.bf16.mxu1 %v12214_v20  ;;  %7948 = vmatprep.mubr.bf16.mxu0 %v13827_v37  ;;  %v12272_v20 = vld [vmem:[%s13690_s10 + $0x1690] ss:$48 sps:$4 sm:$0xff]   ;;  %v12280_v30 = vld [vmem:[%s13690_s10 + $0x1634] ss:$48 sps:$4 sm:$0xff]  }
 0x252   : > { %v14273_v42 = vadd.f32 %v7665_v39, %v7624_v34  ;;  %7989 = vmatprep.mubr.bf16.mxu1 %v13831_v38  ;;  %v7626_v43 = vpop.f32.mrf.mxu0  ;;  %v12275_v31 = vld [vmem:[%s13690_s10 + $0x1030] ss:$48 sps:$4 sm:$0xff]   ;;  %v12283_v34 = vld [vmem:[%s13690_s10 + $0xfd4] ss:$48 sps:$4 sm:$0xff]  }
 0x253   : > { %v7667_v44 = vpop.f32.mrf.mxu1  ;;  %7919 = vmatpush1.bf16.msra.mxu0 %v12209_v29  ;;  %v12277_v29 = vld [vmem:[%s13690_s10 + $0x1034] ss:$48 sps:$4 sm:$0xff]   ;;  %v12287_v43 = vld [vmem:[%s13690_s10 + $0xf70] ss:$48 sps:$4 sm:$0xff]  }
 0x254   : > { %7960 = vmatpush1.bf16.msra.mxu1 %v12212_v33  ;;  %v7627_v45 = vpop.f32.mrf.mxu0  ;;  %7920 = vmatprep.subr.bf16.mxu0 %v12217_v40  ;;  %v12278_v33 = vld [vmem:[%s13690_s10 + $0x1630] ss:$48 sps:$4 sm:$0xff]   ;;  %v12286_v39 = vld [vmem:[%s13690_s10 + $0x15d4] ss:$48 sps:$4 sm:$0xff]  }
 0x255   : > { %v7668_v46 = vpop.f32.mrf.mxu1  ;;  %7961 = vmatprep.subr.bf16.mxu1 %v12220_v41  ;;  %v12281_v40 = vld [vmem:[%s13690_s10 + $0xfd0] ss:$48 sps:$4 sm:$0xff]   ;;  %v12295_v45 = vld [vmem:[%s13690_s10 + $0xf14] ss:$48 sps:$4 sm:$0xff]  }
 0x256   : > { %v12284_v41 = vld [vmem:[%s13690_s10 + $0x15d0] ss:$48 sps:$4 sm:$0xff]   ;;  %v12298_v46 = vld [vmem:[%s13690_s10 + $0x1514] ss:$48 sps:$4 sm:$0xff]  }
 0x257   : > { %7921 = vmatpush1.bf16.msra.mxu0 %v12215_v23  ;;  %v12289_v23 = vld [vmem:[%s13690_s10 + $0xf74] ss:$48 sps:$4 sm:$0xff]   ;;  %v12290_v44 = vld [vmem:[%s13690_s10 + $0x1570] ss:$48 sps:$4 sm:$0xff]  }
 0x258   : > { %7962 = vmatpush1.bf16.msra.mxu1 %v12218_v24  ;;  %7922 = vmatprep.subr.bf16.mxu0 %v12223_v47  ;;  %v12292_v24 = vld [vmem:[%s13690_s10 + $0x1574] ss:$48 sps:$4 sm:$0xff]   ;;  %v12293_v47 = vld [vmem:[%s13690_s10 + $0xf10] ss:$48 sps:$4 sm:$0xff]  }
 0x259   : > { %7963 = vmatprep.subr.bf16.mxu1 %v12226_v49  ;;  %v12296_v49 = vld [vmem:[%s13690_s10 + $0x1510] ss:$48 sps:$4 sm:$0xff]  }
 0x25b   : > { %7923 = vmatpush1.bf16.msra.mxu0 %v12221_v50  ;;  %v12301_v50 = vld [vmem:[%s13690_s10 + $0x1ab4] ss:$48 sps:$4 sm:$0xff]  }
 0x25c   : > { %7964 = vmatpush1.bf16.msra.mxu1 %v12224_v51  ;;  %7924 = vmatprep.subr.bf16.mxu0 %v12229_v53  ;;  %v12304_v51 = vld [vmem:[%s13690_s10 + $0x20b4] ss:$48 sps:$4 sm:$0xff]   ;;  %v12299_v53 = vld [vmem:[%s13690_s10 + $0x1ab0] ss:$48 sps:$4 sm:$0xff]  }
 0x25d   : > { %7965 = vmatprep.subr.bf16.mxu1 %v12232_v54  ;;  %v12302_v54 = vld [vmem:[%s13690_s10 + $0x20b0] ss:$48 sps:$4 sm:$0xff]  }
 0x25f   : > { %7925 = vmatpush1.bf16.msra.mxu0 %v12227_v55  ;;  %v12307_v55 = vld [vmem:[%s13690_s10 + $0x1a54] ss:$48 sps:$4 sm:$0xff]  }
 0x260   : > { %7966 = vmatpush1.bf16.msra.mxu1 %v12230_v56  ;;  %7926 = vmatprep.subr.bf16.mxu0 %v12235_v58  ;;  %v12310_v56 = vld [vmem:[%s13690_s10 + $0x2054] ss:$48 sps:$4 sm:$0xff]   ;;  %v12305_v58 = vld [vmem:[%s13690_s10 + $0x1a50] ss:$48 sps:$4 sm:$0xff]  }
 0x261   : > { %7967 = vmatprep.subr.bf16.mxu1 %v12238_v59  ;;  %v12308_v59 = vld [vmem:[%s13690_s10 + $0x2050] ss:$48 sps:$4 sm:$0xff]  }
 0x263   : > { %7927 = vmatpush1.bf16.msra.mxu0 %v12233_v60 }
 0x264   : > { %7968 = vmatpush1.bf16.msra.mxu1 %v12236_v57  ;;  %7928 = vmatprep.subr.bf16.mxu0 %v12241_v0 }
 0x265   : > { %7969 = vmatprep.subr.bf16.mxu1 %v12244_v21 }
 0x267   : > { %7929 = vmatpush1.bf16.msra.mxu0 %v12239_v27  ;;  %v12313_v27 = vld [vmem:[%s13690_s10 + $0x19f4] ss:$48 sps:$4 sm:$0xff]  }
 0x268   : > { %7970 = vmatpush1.bf16.msra.mxu1 %v12242_v22  ;;  %7930 = vmatprep.subr.bf16.mxu0 %v12247_v61  ;;  %v12316_v22 = vld [vmem:[%s13690_s10 + $0x1ff4] ss:$48 sps:$4 sm:$0xff]   ;;  %v12311_v61 = vld [vmem:[%s13690_s10 + $0x19f0] ss:$48 sps:$4 sm:$0xff]  }
 0x269   : > { %7971 = vmatprep.subr.bf16.mxu1 %v12250_v62  ;;  %v12314_v62 = vld [vmem:[%s13690_s10 + $0x1ff0] ss:$48 sps:$4 sm:$0xff]  }
 0x26b   : > { %7931 = vmatpush1.bf16.msra.mxu0 %v12245_v63 }
 0x26c   : > { %7972 = vmatpush1.bf16.msra.mxu1 %v12248_v1  ;;  %7932 = vmatprep.subr.bf16.mxu0 %v12253_v2 }
 0x26d   : > { %7973 = vmatprep.subr.bf16.mxu1 %v12256_v3 }
 0x26f   : > { %7933 = vmatpush2.bf16.msra.mxu0 %v12251_v4  ;;  %v12319_v4 = vld [vmem:[%s13690_s10 + $0x1994] ss:$48 sps:$4 sm:$0xff]  }
 0x270   : > { %7974 = vmatpush2.bf16.msra.mxu1 %v12254_v28  ;;  %7934 = vmatprep.subr.bf16.mxu0 %v12259_v5  ;;  %v12322_v28 = vld [vmem:[%s13690_s10 + $0x1f94] ss:$48 sps:$4 sm:$0xff]   ;;  %v12317_v5 = vld [vmem:[%s13690_s10 + $0x1990] ss:$48 sps:$4 sm:$0xff]  }
 0x271   : > { %7975 = vmatprep.subr.bf16.mxu1 %v12262_v6  ;;  %v12320_v6 = vld [vmem:[%s13690_s10 + $0x1f90] ss:$48 sps:$4 sm:$0xff]  }
 0x273   : > { %7935 = vmatpush2.bf16.msra.mxu0 %v12257_v9  ;;  %v12325_v9 = vld [vmem:[%s13690_s10 + $0x1934] ss:$48 sps:$4 sm:$0xff]  }
 0x274   : > { %7976 = vmatpush2.bf16.msra.mxu1 %v12260_v10  ;;  %7936 = vmatprep.subr.bf16.mxu0 %v12265_v11  ;;  %v12328_v10 = vld [vmem:[%s13690_s10 + $0x1f34] ss:$48 sps:$4 sm:$0xff]   ;;  %v12323_v11 = vld [vmem:[%s13690_s10 + $0x1930] ss:$48 sps:$4 sm:$0xff]  }
 0x275   : > { %7977 = vmatprep.subr.bf16.mxu1 %v12268_v12  ;;  %v12326_v12 = vld [vmem:[%s13690_s10 + $0x1f30] ss:$48 sps:$4 sm:$0xff]  }
 0x277   : > { %7937 = vmatpush2.bf16.msra.mxu0 %v12263_v13  ;;  %v12331_v13 = vld [vmem:[%s13690_s10 + $0x18d4] ss:$48 sps:$4 sm:$0xff]  }
 0x278   : > { %7978 = vmatpush2.bf16.msra.mxu1 %v12266_v14  ;;  %7938 = vmatprep.subr.bf16.mxu0 %v12271_v15  ;;  %v12334_v14 = vld [vmem:[%s13690_s10 + $0x1ed4] ss:$48 sps:$4 sm:$0xff]   ;;  %v12329_v15 = vld [vmem:[%s13690_s10 + $0x18d0] ss:$48 sps:$4 sm:$0xff]  }
 0x279   : > { %7979 = vmatprep.subr.bf16.mxu1 %v12274_v16  ;;  %v12332_v16 = vld [vmem:[%s13690_s10 + $0x1ed0] ss:$48 sps:$4 sm:$0xff]  }
 0x27b   : > { %7939 = vmatpush2.bf16.msra.mxu0 %v12269_v19  ;;  %v12337_v19 = vld [vmem:[%s13690_s10 + $0x1874] ss:$48 sps:$4 sm:$0xff]  }
 0x27c   : > { %7980 = vmatpush2.bf16.msra.mxu1 %v12272_v20  ;;  %7940 = vmatprep.subr.bf16.mxu0 %v12277_v29  ;;  %v12340_v20 = vld [vmem:[%s13690_s10 + $0x1e74] ss:$48 sps:$4 sm:$0xff]   ;;  %v12335_v29 = vld [vmem:[%s13690_s10 + $0x1870] ss:$48 sps:$4 sm:$0xff]  }
 0x27d   : > { %7981 = vmatprep.subr.bf16.mxu1 %v12280_v30  ;;  %v12338_v30 = vld [vmem:[%s13690_s10 + $0x1e70] ss:$48 sps:$4 sm:$0xff]  }
 0x27f   : > { %7941 = vmatpush2.bf16.msra.mxu0 %v12275_v31  ;;  %v12343_v31 = vld [vmem:[%s13690_s10 + $0x1814] ss:$48 sps:$4 sm:$0xff]  }
 0x280   : > { %7982 = vmatpush2.bf16.msra.mxu1 %v12278_v33  ;;  %7942 = vmatprep.subr.bf16.mxu0 %v12283_v34  ;;  %v12346_v33 = vld [vmem:[%s13690_s10 + $0x1e14] ss:$48 sps:$4 sm:$0xff]   ;;  %v12341_v34 = vld [vmem:[%s13690_s10 + $0x1810] ss:$48 sps:$4 sm:$0xff]  }
 0x281   : > { %7983 = vmatprep.subr.bf16.mxu1 %v12286_v39  ;;  %v12344_v39 = vld [vmem:[%s13690_s10 + $0x1e10] ss:$48 sps:$4 sm:$0xff]  }
 0x283   : > { %7943 = vmatpush2.bf16.msra.mxu0 %v12281_v40  ;;  %v12349_v40 = vld [vmem:[%s13690_s10 + $0x1db4] ss:$48 sps:$4 sm:$0xff]  }
 0x284   : > { %7984 = vmatpush2.bf16.msra.mxu1 %v12284_v41  ;;  %7944 = vmatprep.subr.bf16.mxu0 %v12289_v23  ;;  %v12352_v41 = vld [vmem:[%s13690_s10 + $0x23b4] ss:$48 sps:$4 sm:$0xff]   ;;  %v12347_v23 = vld [vmem:[%s13690_s10 + $0x1db0] ss:$48 sps:$4 sm:$0xff]  }
 0x285   : > { %7985 = vmatprep.subr.bf16.mxu1 %v12292_v24  ;;  %v12350_v24 = vld [vmem:[%s13690_s10 + $0x23b0] ss:$48 sps:$4 sm:$0xff]  }
 0x287   : > { %7945 = vmatpush2.bf16.msra.mxu0 %v12287_v43  ;;  %v12355_v43 = vld [vmem:[%s13690_s10 + $0x1d54] ss:$48 sps:$4 sm:$0xff]  }
 0x288   : > { %7986 = vmatpush2.bf16.msra.mxu1 %v12290_v44  ;;  %7946 = vmatprep.subr.bf16.mxu0 %v12295_v45  ;;  %v12358_v44 = vld [vmem:[%s13690_s10 + $0x2354] ss:$48 sps:$4 sm:$0xff]   ;;  %v12353_v45 = vld [vmem:[%s13690_s10 + $0x1d50] ss:$48 sps:$4 sm:$0xff]  }
 0x289   : > { %7987 = vmatprep.subr.bf16.mxu1 %v12298_v46  ;;  %v12356_v46 = vld [vmem:[%s13690_s10 + $0x2350] ss:$48 sps:$4 sm:$0xff]  }
 0x28b   : > { %7947 = vmatpush2.bf16.msra.mxu0 %v12293_v47  ;;  %v12361_v47 = vld [vmem:[%s13690_s10 + $0x1cf4] ss:$48 sps:$4 sm:$0xff]  }
 0x28c   : > { %7988 = vmatpush2.bf16.msra.mxu1 %v12296_v49  ;;  %7998 = vmatprep.subr.bf16.mxu0 %v12301_v50  ;;  %v12364_v49 = vld [vmem:[%s13690_s10 + $0x22f4] ss:$48 sps:$4 sm:$0xff]   ;;  %v12359_v50 = vld [vmem:[%s13690_s10 + $0x1cf0] ss:$48 sps:$4 sm:$0xff]  }
 0x28d   : > { %8039 = vmatprep.subr.bf16.mxu1 %v12304_v51  ;;  %v12362_v51 = vld [vmem:[%s13690_s10 + $0x22f0] ss:$48 sps:$4 sm:$0xff]  }
 0x28e   : > { %v14339_v60 = vpop.f32.mrf.mxu0  ;;  %7949 = vmatmul.mubr.bf16.vlgmr.msra.gmra.mxu0 %v13875_v17 }
 0x28f   : > { %v14341_v57 = vpop.f32.mrf.mxu1  ;;  %7990 = vmatmul.mubr.bf16.vlgmr.msra.gmra.mxu1 %v13879_v18  ;;  %7999 = vmatpush1.bf16.msra.mxu0 %v12299_v53  ;;  %v12367_v53 = vld [vmem:[%s13690_s10 + $0x1c94] ss:$48 sps:$4 sm:$0xff]  }
 0x290   : > { %8040 = vmatpush1.bf16.msra.mxu1 %v12302_v54  ;;  %v14345_v0 = vpop.f32.mrf.mxu0  ;;  %8000 = vmatprep.subr.bf16.mxu0 %v12307_v55  ;;  %v12370_v54 = vld [vmem:[%s13690_s10 + $0x2294] ss:$48 sps:$4 sm:$0xff]   ;;  %v12365_v55 = vld [vmem:[%s13690_s10 + $0x1c90] ss:$48 sps:$4 sm:$0xff]  }
 0x291   : > { %v14347_v21 = vpop.f32.mrf.mxu1  ;;  %8041 = vmatprep.subr.bf16.mxu1 %v12310_v56  ;;  %8030 = vmatprep.mubr.bf16.mxu0 %v13893_v25  ;;  %v12368_v56 = vld [vmem:[%s13690_s10 + $0x2290] ss:$48 sps:$4 sm:$0xff]  }
 0x292   : > { %8071 = vmatprep.mubr.bf16.mxu1 %v13897_v26  ;;  %v7708_v63 = vpop.f32.mrf.mxu0 }
 0x293   : > { %v7749_v1 = vpop.f32.mrf.mxu1  ;;  %8001 = vmatpush1.bf16.msra.mxu0 %v12305_v58  ;;  %v12373_v58 = vld [vmem:[%s13690_s10 + $0x1c34] ss:$48 sps:$4 sm:$0xff]   ;;  %v12377_v63 = vld [vmem:[%s13690_s10 + $0x1bd0] ss:$48 sps:$4 sm:$0xff]  }
 0x294   : > { %8042 = vmatpush1.bf16.msra.mxu1 %v12308_v59  ;;  %v7709_v2 = vpop.f32.mrf.mxu0  ;;  %8002 = vmatprep.subr.bf16.mxu0 %v12313_v27  ;;  %v12376_v59 = vld [vmem:[%s13690_s10 + $0x2234] ss:$48 sps:$4 sm:$0xff]   ;;  %v12371_v27 = vld [vmem:[%s13690_s10 + $0x1c30] ss:$48 sps:$4 sm:$0xff]  }
 0x295   : > { %v7750_v3 = vpop.f32.mrf.mxu1  ;;  %8043 = vmatprep.subr.bf16.mxu1 %v12316_v22  ;;  %v12374_v22 = vld [vmem:[%s13690_s10 + $0x2230] ss:$48 sps:$4 sm:$0xff]   ;;  %v12385_v2 = vld [vmem:[%s13690_s10 + $0x1b74] ss:$48 sps:$4 sm:$0xff]  }
 0x296   : > { %v12380_v1 = vld [vmem:[%s13690_s10 + $0x21d0] ss:$48 sps:$4 sm:$0xff]   ;;  %v12388_v3 = vld [vmem:[%s13690_s10 + $0x2174] ss:$48 sps:$4 sm:$0xff]  }
 0x297   : > { %8003 = vmatpush1.bf16.msra.mxu0 %v12311_v61  ;;  %v12379_v61 = vld [vmem:[%s13690_s10 + $0x1bd4] ss:$48 sps:$4 sm:$0xff]  }
 0x298   : > { %8044 = vmatpush1.bf16.msra.mxu1 %v12314_v62  ;;  %8004 = vmatprep.subr.bf16.mxu0 %v12319_v4  ;;  %v12382_v62 = vld [vmem:[%s13690_s10 + $0x21d4] ss:$48 sps:$4 sm:$0xff]   ;;  %v12383_v4 = vld [vmem:[%s13690_s10 + $0x1b70] ss:$48 sps:$4 sm:$0xff]  }
 0x299   : > { %8045 = vmatprep.subr.bf16.mxu1 %v12322_v28  ;;  %v12386_v28 = vld [vmem:[%s13690_s10 + $0x2170] ss:$48 sps:$4 sm:$0xff]  }
 0x29b   : > { %8005 = vmatpush1.bf16.msra.mxu0 %v12317_v5  ;;  %v12391_v5 = vld [vmem:[%s13690_s10 + $0x1b14] ss:$48 sps:$4 sm:$0xff]  }
 0x29c   : > { %8046 = vmatpush1.bf16.msra.mxu1 %v12320_v6  ;;  %8006 = vmatprep.subr.bf16.mxu0 %v12325_v9  ;;  %v12394_v6 = vld [vmem:[%s13690_s10 + $0x2114] ss:$48 sps:$4 sm:$0xff]   ;;  %v12389_v9 = vld [vmem:[%s13690_s10 + $0x1b10] ss:$48 sps:$4 sm:$0xff]  }
 0x29d   : > { %8047 = vmatprep.subr.bf16.mxu1 %v12328_v10  ;;  %v12392_v10 = vld [vmem:[%s13690_s10 + $0x2110] ss:$48 sps:$4 sm:$0xff]  }
 0x29f   : > { %8007 = vmatpush1.bf16.msra.mxu0 %v12323_v11  ;;  %v12397_v11 = vld [vmem:[%s13690_s10 + $0x2bc] ss:$48 sps:$4 sm:$0xff]  }
 0x2a0   : > { %8048 = vmatpush1.bf16.msra.mxu1 %v12326_v12  ;;  %8008 = vmatprep.subr.bf16.mxu0 %v12331_v13  ;;  %v12400_v12 = vld [vmem:[%s13690_s10 + $0x8bc] ss:$48 sps:$4 sm:$0xff]   ;;  %v7705_v13 = vadd.f32 %v14339_v60, %v14268_v32 }
 0x2a1   : > { %8049 = vmatprep.subr.bf16.mxu1 %v12334_v14  ;;  %v12395_v14 = vld [vmem:[%s13690_s10 + $0x2b8] ss:$48 sps:$4 sm:$0xff]  }
 0x2a3   : > { %8009 = vmatpush1.bf16.msra.mxu0 %v12329_v15  ;;  %v12398_v15 = vld [vmem:[%s13690_s10 + $0x8b8] ss:$48 sps:$4 sm:$0xff]  }
 0x2a4   : > { %8050 = vmatpush1.bf16.msra.mxu1 %v12332_v16  ;;  %8010 = vmatprep.subr.bf16.mxu0 %v12337_v19  ;;  %v7707_v16 = vadd.f32 %v14345_v0, %v14273_v42  ;;  %v12403_v19 = vld [vmem:[%s13690_s10 + $0x25c] ss:$48 sps:$4 sm:$0xff]  }
 0x2a5   : > { %8051 = vmatprep.subr.bf16.mxu1 %v12340_v20  ;;  %v12406_v20 = vld [vmem:[%s13690_s10 + $0x85c] ss:$48 sps:$4 sm:$0xff]  }
 0x2a6   : > { %v7748_v42 = vadd.f32 %v14347_v21, %v7707_v16  ;;  %v12454_v16 = vld [vmem:[%s13690_s10 + $0xb5c] ss:$48 sps:$4 sm:$0xff]  }
 0x2a7   : > { %8011 = vmatpush1.bf16.msra.mxu0 %v12335_v29  ;;  %v7746_v29 = vadd.f32 %v14341_v57, %v7705_v13  ;;  %v379_v57 = vld [vmem:[#allocation2 + $0x18] sm:$0xff] }
 0x2a8   : > { %8052 = vmatpush1.bf16.msra.mxu1 %v12338_v30  ;;  %8012 = vmatprep.subr.bf16.mxu0 %v12343_v31  ;;  %v12401_v30 = vld [vmem:[%s13690_s10 + $0x258] ss:$48 sps:$4 sm:$0xff]  }
 0x2a9   : > { %8053 = vmatprep.subr.bf16.mxu1 %v12346_v33  ;;  %v12404_v31 = vld [vmem:[%s13690_s10 + $0x858] ss:$48 sps:$4 sm:$0xff]  }
 0x2aa   : > { %v12443_v13 = vld [vmem:[%s13690_s10 + $0x5b8] ss:$48 sps:$4 sm:$0xff]  }
 0x2ab   : > { %8013 = vmatpush1.bf16.msra.mxu0 %v12341_v34  ;;  %v378_v34 = vld [vmem:[#allocation2 + $0x58] sm:$0xff] }
 0x2ac   : > { %8054 = vmatpush1.bf16.msra.mxu1 %v12344_v39  ;;  %8014 = vmatprep.subr.bf16.mxu0 %v12349_v40  ;;  %v12409_v40 = vld [vmem:[%s13690_s10 + $0x1fc] ss:$48 sps:$4 sm:$0xff]  }
 0x2ad   : > { %8055 = vmatprep.subr.bf16.mxu1 %v12352_v41  ;;  %v12412_v41 = vld [vmem:[%s13690_s10 + $0x7fc] ss:$48 sps:$4 sm:$0xff]  }
 0x2af   : > { %8015 = vmatpush2.bf16.msra.mxu0 %v12347_v23 }
 0x2b0   : > { %8056 = vmatpush2.bf16.msra.mxu1 %v12350_v24  ;;  %8016 = vmatprep.subr.bf16.mxu0 %v12355_v43  ;;  %v12407_v43 = vld [vmem:[%s13690_s10 + $0x1f8] ss:$48 sps:$4 sm:$0xff]  }
 0x2b1   : > { %8057 = vmatprep.subr.bf16.mxu1 %v12358_v44  ;;  %v12410_v44 = vld [vmem:[%s13690_s10 + $0x7f8] ss:$48 sps:$4 sm:$0xff]  }
 0x2b3   : > { %8017 = vmatpush2.bf16.msra.mxu0 %v12353_v45 }
 0x2b4   : > { %8058 = vmatpush2.bf16.msra.mxu1 %v12356_v46  ;;  %8018 = vmatprep.subr.bf16.mxu0 %v12361_v47 }
 0x2b5   : > { %8059 = vmatprep.subr.bf16.mxu1 %v12364_v49 }
 0x2b7   : > { %8019 = vmatpush2.bf16.msra.mxu0 %v12359_v50 }
 0x2b8   : > { %8060 = vmatpush2.bf16.msra.mxu1 %v12362_v51  ;;  %8020 = vmatprep.subr.bf16.mxu0 %v12367_v53  ;;  %v12415_v51 = vld [vmem:[%s13690_s10 + $0x19c] ss:$48 sps:$4 sm:$0xff]  }
 0x2b9   : > { %8061 = vmatprep.subr.bf16.mxu1 %v12370_v54  ;;  %v12418_v53 = vld [vmem:[%s13690_s10 + $0x79c] ss:$48 sps:$4 sm:$0xff]  }
 0x2bb   : > { %8021 = vmatpush2.bf16.msra.mxu0 %v12365_v55  ;;  %v12413_v55 = vld [vmem:[%s13690_s10 + $0x198] ss:$48 sps:$4 sm:$0xff]  }
 0x2bc   : > { %8062 = vmatpush2.bf16.msra.mxu1 %v12368_v56  ;;  %8022 = vmatprep.subr.bf16.mxu0 %v12373_v58  ;;  %v12416_v56 = vld [vmem:[%s13690_s10 + $0x798] ss:$48 sps:$4 sm:$0xff]   ;;  %v12421_v58 = vld [vmem:[%s13690_s10 + $0x13c] ss:$48 sps:$4 sm:$0xff]  }
 0x2bd   : > { %8063 = vmatprep.subr.bf16.mxu1 %v12376_v59  ;;  %v12424_v59 = vld [vmem:[%s13690_s10 + $0x73c] ss:$48 sps:$4 sm:$0xff]  }
 0x2bf   : > { %8023 = vmatpush2.bf16.msra.mxu0 %v12371_v27  ;;  %v12419_v27 = vld [vmem:[%s13690_s10 + $0x138] ss:$48 sps:$4 sm:$0xff]  }
 0x2c0   : > { %8064 = vmatpush2.bf16.msra.mxu1 %v12374_v22  ;;  %8024 = vmatprep.subr.bf16.mxu0 %v12379_v61  ;;  %v12422_v22 = vld [vmem:[%s13690_s10 + $0x738] ss:$48 sps:$4 sm:$0xff]   ;;  %v12427_v61 = vld [vmem:[%s13690_s10 + $0xdc] ss:$48 sps:$4 sm:$0xff]  }
 0x2c1   : > { %8065 = vmatprep.subr.bf16.mxu1 %v12382_v62  ;;  %v12430_v62 = vld [vmem:[%s13690_s10 + $0x6dc] ss:$48 sps:$4 sm:$0xff]  }
 0x2c3   : > { %8025 = vmatpush2.bf16.msra.mxu0 %v12377_v63  ;;  %v12425_v63 = vld [vmem:[%s13690_s10 + $0xd8] ss:$48 sps:$4 sm:$0xff]  }
 0x2c4   : > { %8066 = vmatpush2.bf16.msra.mxu1 %v12380_v1  ;;  %8026 = vmatprep.subr.bf16.mxu0 %v12385_v2  ;;  %v12428_v1 = vld [vmem:[%s13690_s10 + $0x6d8] ss:$48 sps:$4 sm:$0xff]   ;;  %v12433_v2 = vld [vmem:[%s13690_s10 + $0x7c] ss:$48 sps:$4 sm:$0xff]  }
 0x2c5   : > { %8067 = vmatprep.subr.bf16.mxu1 %v12388_v3  ;;  %v12436_v3 = vld [vmem:[%s13690_s10 + $0x67c] ss:$48 sps:$4 sm:$0xff]  }
 0x2c7   : > { %8027 = vmatpush2.bf16.msra.mxu0 %v12383_v4  ;;  %v12431_v4 = vld [vmem:[%s13690_s10 + $0x78] ss:$48 sps:$4 sm:$0xff]  }
 0x2c8   : > { %8068 = vmatpush2.bf16.msra.mxu1 %v12386_v28  ;;  %8028 = vmatprep.subr.bf16.mxu0 %v12391_v5  ;;  %v12434_v28 = vld [vmem:[%s13690_s10 + $0x678] ss:$48 sps:$4 sm:$0xff]   ;;  %v12439_v5 = vld [vmem:[%s13690_s10 + $0x1c] ss:$48 sps:$4 sm:$0xff]  }
 0x2c9   : > { %8069 = vmatprep.subr.bf16.mxu1 %v12394_v6  ;;  %v12442_v6 = vld [vmem:[%s13690_s10 + $0x61c] ss:$48 sps:$4 sm:$0xff]  }
 0x2cb   : > { %8029 = vmatpush2.bf16.msra.mxu0 %v12389_v9  ;;  %v12437_v9 = vld [vmem:[%s13690_s10 + $0x18] ss:$48 sps:$4 sm:$0xff]  }
 0x2cc   : > { %8070 = vmatpush2.bf16.msra.mxu1 %v12392_v10  ;;  %8080 = vmatprep.subr.bf16.mxu0 %v12397_v11  ;;  %v12440_v10 = vld [vmem:[%s13690_s10 + $0x618] ss:$48 sps:$4 sm:$0xff]   ;;  %v12445_v11 = vld [vmem:[%s13690_s10 + $0x5bc] ss:$48 sps:$4 sm:$0xff]  }
 0x2cd   : > { %8121 = vmatprep.subr.bf16.mxu1 %v12400_v12  ;;  %v12448_v12 = vld [vmem:[%s13690_s10 + $0xbbc] ss:$48 sps:$4 sm:$0xff]  }
 0x2ce   : > { %v7786_v33 = vpop.f32.mrf.mxu0  ;;  %8031 = vmatmul.mubr.bf16.vlgmr.msra.gmra.mxu0 %v13965_v35 }
 0x2cf   : > { %v7827_v32 = vpop.f32.mrf.mxu1  ;;  %8072 = vmatmul.mubr.bf16.vlgmr.msra.gmra.mxu1 %v13969_v36  ;;  %v7787_v60 = vadd.f32 %v7786_v33, %v7746_v29  ;;  %8081 = vmatpush1.bf16.msra.mxu0 %v12395_v14  ;;  %v12446_v14 = vld [vmem:[%s13690_s10 + $0xbb8] ss:$48 sps:$4 sm:$0xff]   ;;  %v12457_v29 = vld [vmem:[%s13690_s10 + $0x4fc] ss:$48 sps:$4 sm:$0xff]  }
 0x2d0   : > { %8122 = vmatpush1.bf16.msra.mxu1 %v12398_v15  ;;  %v7788_v0 = vpop.f32.mrf.mxu0  ;;  %8082 = vmatprep.subr.bf16.mxu0 %v12403_v19  ;;  %v12451_v15 = vld [vmem:[%s13690_s10 + $0x55c] ss:$48 sps:$4 sm:$0xff]   ;;  %v12449_v19 = vld [vmem:[%s13690_s10 + $0x558] ss:$48 sps:$4 sm:$0xff]  }
 0x2d1   : > { %v7829_v39 = vpop.f32.mrf.mxu1  ;;  %8123 = vmatprep.subr.bf16.mxu1 %v12406_v20  ;;  %v7828_v23 = vadd.f32 %v7827_v32, %v7787_v60  ;;  %v7789_v24 = vadd.f32 %v7788_v0, %v7748_v42  ;;  %8112 = vmatprep.mubr.bf16.mxu0 %v13760_v48  ;;  %v12452_v20 = vld [vmem:[%s13690_s10 + $0xb58] ss:$48 sps:$4 sm:$0xff]   ;;  %v12466_v32 = vld [vmem:[%s13690_s10 + $0xa9c] ss:$48 sps:$4 sm:$0xff]  }
 0x2d2   : > { %8153 = vmatprep.mubr.bf16.mxu1 %v13765_v52  ;;  %v7790_v21 = vpop.f32.mrf.mxu0  ;;  %v12458_v33 = vld [vmem:[%s13690_s10 + $0xaf8] ss:$48 sps:$4 sm:$0xff]   ;;  %v12469_v0 = vld [vmem:[%s13690_s10 + $0x43c] ss:$48 sps:$4 sm:$0xff]  }
 0x2d3   : > { %v7831_v45 = vpop.f32.mrf.mxu1  ;;  %v8820_v46 = vadd.f32 %v7828_v23, %v378_v34  ;;  %v7830_v47 = vadd.f32 %v7829_v39, %v7789_v24  ;;  %8083 = vmatpush1.bf16.msra.mxu0 %v12401_v30  ;;  %v12460_v30 = vld [vmem:[%s13690_s10 + $0xafc] ss:$48 sps:$4 sm:$0xff]   ;;  %v12461_v42 = vld [vmem:[%s13690_s10 + $0x498] ss:$48 sps:$4 sm:$0xff]  }
 0x2d4   : > { %8124 = vmatpush1.bf16.msra.mxu1 %v12404_v31  ;;  %v7791_v49 = vpop.f32.mrf.mxu0  ;;  %8084 = vmatprep.subr.bf16.mxu0 %v12409_v40  ;;  %v12455_v31 = vld [vmem:[%s13690_s10 + $0x4f8] ss:$48 sps:$4 sm:$0xff]   ;;  %v12463_v34 = vld [vmem:[%s13690_s10 + $0x49c] ss:$48 sps:$4 sm:$0xff]  }
 0x2d5   : > { %v7832_v50 = vpop.f32.mrf.mxu1  ;;  %8125 = vmatprep.subr.bf16.mxu1 %v12412_v41  ;;  %8832 = vst [vmem:[#allocation2 + $0x58] sm:$0xff] %v8820_v46  ;;  %v8821_v54 = vadd.f32 %v7830_v47, %v379_v57  ;;  %v12464_v60 = vld [vmem:[%s13690_s10 + $0xa98] ss:$48 sps:$4 sm:$0xff]   ;;  %v12472_v57 = vld [vmem:[%s13690_s10 + $0xa3c] ss:$48 sps:$4 sm:$0xff]  }
 0x2d6   : > { %v12467_v39 = vld [vmem:[%s13690_s10 + $0x438] ss:$48 sps:$4 sm:$0xff]   ;;  %v12475_v41 = vld [vmem:[%s13690_s10 + $0x3dc] ss:$48 sps:$4 sm:$0xff]  }
 0x2d7   : > { %8833 = vst [vmem:[#allocation2 + $0x18] sm:$0xff] %v8821_v54  ;;  %8085 = vmatpush1.bf16.msra.mxu0 %v12407_v43  ;;  %v12470_v40 = vld [vmem:[%s13690_s10 + $0xa38] ss:$48 sps:$4 sm:$0xff]   ;;  %v12478_v23 = vld [vmem:[%s13690_s10 + $0x9dc] ss:$48 sps:$4 sm:$0xff]  }
 0x2d8   : > { %8126 = vmatpush1.bf16.msra.mxu1 %v12410_v44  ;;  %8086 = vmatprep.subr.bf16.mxu0 %v12415_v51  ;;  %v12473_v24 = vld [vmem:[%s13690_s10 + $0x3d8] ss:$48 sps:$4 sm:$0xff]   ;;  %v12481_v44 = vld [vmem:[%s13690_s10 + $0x37c] ss:$48 sps:$4 sm:$0xff]  }
 0x2d9   : > { %8127 = vmatprep.subr.bf16.mxu1 %v12418_v53  ;;  %v12476_v43 = vld [vmem:[%s13690_s10 + $0x9d8] ss:$48 sps:$4 sm:$0xff]   ;;  %v12484_v21 = vld [vmem:[%s13690_s10 + $0x97c] ss:$48 sps:$4 sm:$0xff]  }
 0x2da   : > { %v12479_v45 = vld [vmem:[%s13690_s10 + $0x378] ss:$48 sps:$4 sm:$0xff]   ;;  %v12487_v47 = vld [vmem:[%s13690_s10 + $0x31c] ss:$48 sps:$4 sm:$0xff]  }
 0x2db   : > { %8087 = vmatpush1.bf16.msra.mxu0 %v12413_v55  ;;  %v12482_v46 = vld [vmem:[%s13690_s10 + $0x978] ss:$48 sps:$4 sm:$0xff]   ;;  %v12490_v49 = vld [vmem:[%s13690_s10 + $0x91c] ss:$48 sps:$4 sm:$0xff]  }
 0x2dc   : > { %8128 = vmatpush1.bf16.msra.mxu1 %v12416_v56  ;;  %8088 = vmatprep.subr.bf16.mxu0 %v12421_v58  ;;  %v12485_v50 = vld [vmem:[%s13690_s10 + $0x318] ss:$48 sps:$4 sm:$0xff]   ;;  %v12493_v53 = vld [vmem:[%s13690_s10 + $0xebc] ss:$48 sps:$4 sm:$0xff]  }
 0x2dd   : > { %8129 = vmatprep.subr.bf16.mxu1 %v12424_v59  ;;  %v12488_v51 = vld [vmem:[%s13690_s10 + $0x918] ss:$48 sps:$4 sm:$0xff]   ;;  %v12496_v54 = vld [vmem:[%s13690_s10 + $0x14bc] ss:$48 sps:$4 sm:$0xff]  }
 0x2de   : > { %v12491_v55 = vld [vmem:[%s13690_s10 + $0xeb8] ss:$48 sps:$4 sm:$0xff]   ;;  %v12499_v58 = vld [vmem:[%s13690_s10 + $0xe5c] ss:$48 sps:$4 sm:$0xff]  }
 0x2df   : > { %8089 = vmatpush1.bf16.msra.mxu0 %v12419_v27  ;;  %v12494_v56 = vld [vmem:[%s13690_s10 + $0x14b8] ss:$48 sps:$4 sm:$0xff]   ;;  %v12502_v59 = vld [vmem:[%s13690_s10 + $0x145c] ss:$48 sps:$4 sm:$0xff]  }
 0x2e0   : > { %8130 = vmatpush1.bf16.msra.mxu1 %v12422_v22  ;;  %8090 = vmatprep.subr.bf16.mxu0 %v12427_v61  ;;  %v12497_v27 = vld [vmem:[%s13690_s10 + $0xe58] ss:$48 sps:$4 sm:$0xff]  }
 0x2e1   : > { %8131 = vmatprep.subr.bf16.mxu1 %v12430_v62 }
 0x2e3   : > { %8091 = vmatpush1.bf16.msra.mxu0 %v12425_v63  ;;  %v12500_v63 = vld [vmem:[%s13690_s10 + $0x1458] ss:$48 sps:$4 sm:$0xff]  }
 0x2e4   : > { %8132 = vmatpush1.bf16.msra.mxu1 %v12428_v1  ;;  %8092 = vmatprep.subr.bf16.mxu0 %v12433_v2 }
 0x2e5   : > { %8133 = vmatprep.subr.bf16.mxu1 %v12436_v3  ;;  %v12505_v3 = vld [vmem:[%s13690_s10 + $0xdfc] ss:$48 sps:$4 sm:$0xff]  }
 0x2e7   : > { %8093 = vmatpush1.bf16.msra.mxu0 %v12431_v4  ;;  %v12508_v4 = vld [vmem:[%s13690_s10 + $0x13fc] ss:$48 sps:$4 sm:$0xff]  }
 0x2e8   : > { %8134 = vmatpush1.bf16.msra.mxu1 %v12434_v28  ;;  %8094 = vmatprep.subr.bf16.mxu0 %v12439_v5 }
 0x2e9   : > { %8135 = vmatprep.subr.bf16.mxu1 %v12442_v6 }
 0x2eb   : > { %8095 = vmatpush1.bf16.msra.mxu0 %v12437_v9  ;;  %v12503_v9 = vld [vmem:[%s13690_s10 + $0xdf8] ss:$48 sps:$4 sm:$0xff]  }
 0x2ec   : > { %8136 = vmatpush1.bf16.msra.mxu1 %v12440_v10  ;;  %8096 = vmatprep.subr.bf16.mxu0 %v12445_v11  ;;  %v12506_v10 = vld [vmem:[%s13690_s10 + $0x13f8] ss:$48 sps:$4 sm:$0xff]  }
 0x2ed   : > { %8137 = vmatprep.subr.bf16.mxu1 %v12448_v12 }
 0x2ef   : > { %8097 = vmatpush2.bf16.msra.mxu0 %v12443_v13  ;;  %v12511_v13 = vld [vmem:[%s13690_s10 + $0xd9c] ss:$48 sps:$4 sm:$0xff]  }
 0x2f0   : > { %8138 = vmatpush2.bf16.msra.mxu1 %v12446_v14  ;;  %8098 = vmatprep.subr.bf16.mxu0 %v12451_v15  ;;  %v12514_v14 = vld [vmem:[%s13690_s10 + $0x139c] ss:$48 sps:$4 sm:$0xff]   ;;  %v12509_v15 = vld [vmem:[%s13690_s10 + $0xd98] ss:$48 sps:$4 sm:$0xff]  }
 0x2f1   : > { %8139 = vmatprep.subr.bf16.mxu1 %v12454_v16  ;;  %v12512_v16 = vld [vmem:[%s13690_s10 + $0x1398] ss:$48 sps:$4 sm:$0xff]  }
 0x2f3   : > { %8099 = vmatpush2.bf16.msra.mxu0 %v12449_v19  ;;  %v12517_v19 = vld [vmem:[%s13690_s10 + $0xd3c] ss:$48 sps:$4 sm:$0xff]  }
 0x2f4   : > { %8140 = vmatpush2.bf16.msra.mxu1 %v12452_v20  ;;  %8100 = vmatprep.subr.bf16.mxu0 %v12457_v29  ;;  %v12520_v20 = vld [vmem:[%s13690_s10 + $0x133c] ss:$48 sps:$4 sm:$0xff]   ;;  %v12515_v29 = vld [vmem:[%s13690_s10 + $0xd38] ss:$48 sps:$4 sm:$0xff]  }
 0x2f5   : > { %8141 = vmatprep.subr.bf16.mxu1 %v12460_v30  ;;  %v12518_v30 = vld [vmem:[%s13690_s10 + $0x1338] ss:$48 sps:$4 sm:$0xff]  }
 0x2f7   : > { %8101 = vmatpush2.bf16.msra.mxu0 %v12455_v31  ;;  %v12523_v31 = vld [vmem:[%s13690_s10 + $0xcdc] ss:$48 sps:$4 sm:$0xff]  }
 0x2f8   : > { %8142 = vmatpush2.bf16.msra.mxu1 %v12458_v33  ;;  %8102 = vmatprep.subr.bf16.mxu0 %v12463_v34  ;;  %v12526_v33 = vld [vmem:[%s13690_s10 + $0x12dc] ss:$48 sps:$4 sm:$0xff]   ;;  %v12521_v34 = vld [vmem:[%s13690_s10 + $0xcd8] ss:$48 sps:$4 sm:$0xff]  }
 0x2f9   : > { %8143 = vmatprep.subr.bf16.mxu1 %v12466_v32  ;;  %v12524_v32 = vld [vmem:[%s13690_s10 + $0x12d8] ss:$48 sps:$4 sm:$0xff]  }
 0x2fb   : > { %8103 = vmatpush2.bf16.msra.mxu0 %v12461_v42  ;;  %v12529_v42 = vld [vmem:[%s13690_s10 + $0xc7c] ss:$48 sps:$4 sm:$0xff]  }
 0x2fc   : > { %8144 = vmatpush2.bf16.msra.mxu1 %v12464_v60  ;;  %8104 = vmatprep.subr.bf16.mxu0 %v12469_v0  ;;  %v12532_v60 = vld [vmem:[%s13690_s10 + $0x127c] ss:$48 sps:$4 sm:$0xff]   ;;  %v12527_v0 = vld [vmem:[%s13690_s10 + $0xc78] ss:$48 sps:$4 sm:$0xff]  }
 0x2fd   : > { %8145 = vmatprep.subr.bf16.mxu1 %v12472_v57  ;;  %v12530_v57 = vld [vmem:[%s13690_s10 + $0x1278] ss:$48 sps:$4 sm:$0xff]  }
 0x2ff   : > { %8105 = vmatpush2.bf16.msra.mxu0 %v12467_v39  ;;  %v12535_v39 = vld [vmem:[%s13690_s10 + $0xc1c] ss:$48 sps:$4 sm:$0xff]  }
 0x300   : > { %8146 = vmatpush2.bf16.msra.mxu1 %v12470_v40  ;;  %8106 = vmatprep.subr.bf16.mxu0 %v12475_v41  ;;  %v12538_v40 = vld [vmem:[%s13690_s10 + $0x121c] ss:$48 sps:$4 sm:$0xff]   ;;  %v12533_v41 = vld [vmem:[%s13690_s10 + $0xc18] ss:$48 sps:$4 sm:$0xff]  }
 0x301   : > { %8147 = vmatprep.subr.bf16.mxu1 %v12478_v23  ;;  %v12536_v23 = vld [vmem:[%s13690_s10 + $0x1218] ss:$48 sps:$4 sm:$0xff]  }
 0x303   : > { %8107 = vmatpush2.bf16.msra.mxu0 %v12473_v24  ;;  %v12541_v24 = vld [vmem:[%s13690_s10 + $0x11bc] ss:$48 sps:$4 sm:$0xff]  }
 0x304   : > { %8148 = vmatpush2.bf16.msra.mxu1 %v12476_v43  ;;  %8108 = vmatprep.subr.bf16.mxu0 %v12481_v44  ;;  %v12544_v43 = vld [vmem:[%s13690_s10 + $0x17bc] ss:$48 sps:$4 sm:$0xff]   ;;  %v12539_v44 = vld [vmem:[%s13690_s10 + $0x11b8] ss:$48 sps:$4 sm:$0xff]  }
 0x305   : > { %8149 = vmatprep.subr.bf16.mxu1 %v12484_v21  ;;  %v12542_v21 = vld [vmem:[%s13690_s10 + $0x17b8] ss:$48 sps:$4 sm:$0xff]  }
 0x307   : > { %8109 = vmatpush2.bf16.msra.mxu0 %v12479_v45  ;;  %v12547_v45 = vld [vmem:[%s13690_s10 + $0x115c] ss:$48 sps:$4 sm:$0xff]  }
 0x308   : > { %8150 = vmatpush2.bf16.msra.mxu1 %v12482_v46  ;;  %8110 = vmatprep.subr.bf16.mxu0 %v12487_v47  ;;  %v12550_v46 = vld [vmem:[%s13690_s10 + $0x175c] ss:$48 sps:$4 sm:$0xff]   ;;  %v12545_v47 = vld [vmem:[%s13690_s10 + $0x1158] ss:$48 sps:$4 sm:$0xff]  }
 0x309   : > { %8151 = vmatprep.subr.bf16.mxu1 %v12490_v49  ;;  %v12548_v49 = vld [vmem:[%s13690_s10 + $0x1758] ss:$48 sps:$4 sm:$0xff]  }
 0x30b   : > { %8111 = vmatpush2.bf16.msra.mxu0 %v12485_v50  ;;  %v12553_v50 = vld [vmem:[%s13690_s10 + $0x10fc] ss:$48 sps:$4 sm:$0xff]  }
 0x30c   : > { %8152 = vmatpush2.bf16.msra.mxu1 %v12488_v51  ;;  %8162 = vmatprep.subr.bf16.mxu0 %v12493_v53  ;;  %v12556_v51 = vld [vmem:[%s13690_s10 + $0x16fc] ss:$48 sps:$4 sm:$0xff]   ;;  %v12551_v53 = vld [vmem:[%s13690_s10 + $0x10f8] ss:$48 sps:$4 sm:$0xff]  }
 0x30d   : > { %8203 = vmatprep.subr.bf16.mxu1 %v12496_v54  ;;  %v12554_v54 = vld [vmem:[%s13690_s10 + $0x16f8] ss:$48 sps:$4 sm:$0xff]  }
 0x30e   : > { %v7868_v22 = vpop.f32.mrf.mxu0  ;;  %8113 = vmatmul.mubr.bf16.vlgmr.msra.gmra.mxu0 %v13787_v7 }
 0x30f   : > { %v7909_v61 = vpop.f32.mrf.mxu1  ;;  %8154 = vmatmul.mubr.bf16.vlgmr.msra.gmra.mxu1 %v13789_v8  ;;  %8163 = vmatpush1.bf16.msra.mxu0 %v12491_v55  ;;  %v12559_v55 = vld [vmem:[%s13690_s10 + $0x109c] ss:$48 sps:$4 sm:$0xff]  }
 0x310   : > { %v14490_v62 = vadd.f32 %v7909_v61, %v7868_v22  ;;  %8204 = vmatpush1.bf16.msra.mxu1 %v12494_v56  ;;  %v7870_v1 = vpop.f32.mrf.mxu0  ;;  %8164 = vmatprep.subr.bf16.mxu0 %v12499_v58  ;;  %v12562_v56 = vld [vmem:[%s13690_s10 + $0x169c] ss:$48 sps:$4 sm:$0xff]   ;;  %v12557_v58 = vld [vmem:[%s13690_s10 + $0x1098] ss:$48 sps:$4 sm:$0xff]  }
 0x311   : > { %v7911_v2 = vpop.f32.mrf.mxu1  ;;  %8205 = vmatprep.subr.bf16.mxu1 %v12502_v59  ;;  %8194 = vmatprep.mubr.bf16.mxu0 %v13827_v37  ;;  %v12560_v59 = vld [vmem:[%s13690_s10 + $0x1698] ss:$48 sps:$4 sm:$0xff]   ;;  %v12568_v22 = vld [vmem:[%s13690_s10 + $0x163c] ss:$48 sps:$4 sm:$0xff]  }
 0x312   : > { %v14495_v28 = vadd.f32 %v7911_v2, %v7870_v1  ;;  %8235 = vmatprep.mubr.bf16.mxu1 %v13831_v38  ;;  %v7872_v5 = vpop.f32.mrf.mxu0  ;;  %v12563_v61 = vld [vmem:[%s13690_s10 + $0x1038] ss:$48 sps:$4 sm:$0xff]   ;;  %v12571_v1 = vld [vmem:[%s13690_s10 + $0xfdc] ss:$48 sps:$4 sm:$0xff]  }
 0x313   : > { %v7913_v6 = vpop.f32.mrf.mxu1  ;;  %8165 = vmatpush1.bf16.msra.mxu0 %v12497_v27  ;;  %v12565_v27 = vld [vmem:[%s13690_s10 + $0x103c] ss:$48 sps:$4 sm:$0xff]  }
 0x314   : > { %8206 = vmatpush1.bf16.msra.mxu1 %v12500_v63  ;;  %v7873_v11 = vpop.f32.mrf.mxu0  ;;  %8166 = vmatprep.subr.bf16.mxu0 %v12505_v3  ;;  %v12566_v63 = vld [vmem:[%s13690_s10 + $0x1638] ss:$48 sps:$4 sm:$0xff]   ;;  %v12574_v2 = vld [vmem:[%s13690_s10 + $0x15dc] ss:$48 sps:$4 sm:$0xff]  }
 0x315   : > { %v7914_v12 = vpop.f32.mrf.mxu1  ;;  %8207 = vmatprep.subr.bf16.mxu1 %v12508_v4  ;;  %v12569_v3 = vld [vmem:[%s13690_s10 + $0xfd8] ss:$48 sps:$4 sm:$0xff]   ;;  %v12577_v5 = vld [vmem:[%s13690_s10 + $0xf7c] ss:$48 sps:$4 sm:$0xff]  }
 0x316   : > { %v12572_v4 = vld [vmem:[%s13690_s10 + $0x15d8] ss:$48 sps:$4 sm:$0xff]   ;;  %v12580_v6 = vld [vmem:[%s13690_s10 + $0x157c] ss:$48 sps:$4 sm:$0xff]  }
 0x317   : > { %8167 = vmatpush1.bf16.msra.mxu0 %v12503_v9  ;;  %v12575_v9 = vld [vmem:[%s13690_s10 + $0xf78] ss:$48 sps:$4 sm:$0xff]   ;;  %v12583_v11 = vld [vmem:[%s13690_s10 + $0xf1c] ss:$48 sps:$4 sm:$0xff]  }
 0x318   : > { %8208 = vmatpush1.bf16.msra.mxu1 %v12506_v10  ;;  %8168 = vmatprep.subr.bf16.mxu0 %v12511_v13  ;;  %v12578_v10 = vld [vmem:[%s13690_s10 + $0x1578] ss:$48 sps:$4 sm:$0xff]   ;;  %v12586_v12 = vld [vmem:[%s13690_s10 + $0x151c] ss:$48 sps:$4 sm:$0xff]  }
 0x319   : > { %8209 = vmatprep.subr.bf16.mxu1 %v12514_v14  ;;  %v12581_v13 = vld [vmem:[%s13690_s10 + $0xf18] ss:$48 sps:$4 sm:$0xff]  }
 0x31a   : > { %v12584_v14 = vld [vmem:[%s13690_s10 + $0x1518] ss:$48 sps:$4 sm:$0xff]  }
 0x31b   : > { %8169 = vmatpush1.bf16.msra.mxu0 %v12509_v15  ;;  %v12589_v15 = vld [vmem:[%s13690_s10 + $0x1abc] ss:$48 sps:$4 sm:$0xff]  }
 0x31c   : > { %8210 = vmatpush1.bf16.msra.mxu1 %v12512_v16  ;;  %8170 = vmatprep.subr.bf16.mxu0 %v12517_v19  ;;  %v12592_v16 = vld [vmem:[%s13690_s10 + $0x20bc] ss:$48 sps:$4 sm:$0xff]   ;;  %v12587_v19 = vld [vmem:[%s13690_s10 + $0x1ab8] ss:$48 sps:$4 sm:$0xff]  }
 0x31d   : > { %8211 = vmatprep.subr.bf16.mxu1 %v12520_v20  ;;  %v12590_v20 = vld [vmem:[%s13690_s10 + $0x20b8] ss:$48 sps:$4 sm:$0xff]  }
 0x31f   : > { %8171 = vmatpush1.bf16.msra.mxu0 %v12515_v29  ;;  %v12595_v29 = vld [vmem:[%s13690_s10 + $0x1a5c] ss:$48 sps:$4 sm:$0xff]  }
 0x320   : > { %8212 = vmatpush1.bf16.msra.mxu1 %v12518_v30  ;;  %8172 = vmatprep.subr.bf16.mxu0 %v12523_v31  ;;  %v12598_v30 = vld [vmem:[%s13690_s10 + $0x205c] ss:$48 sps:$4 sm:$0xff]  }
 0x321   : > { %8213 = vmatprep.subr.bf16.mxu1 %v12526_v33 }
 0x323   : > { %8173 = vmatpush1.bf16.msra.mxu0 %v12521_v34  ;;  %v12593_v34 = vld [vmem:[%s13690_s10 + $0x1a58] ss:$48 sps:$4 sm:$0xff]  }
 0x324   : > { %8214 = vmatpush1.bf16.msra.mxu1 %v12524_v32  ;;  %8174 = vmatprep.subr.bf16.mxu0 %v12529_v42  ;;  %v12596_v32 = vld [vmem:[%s13690_s10 + $0x2058] ss:$48 sps:$4 sm:$0xff]  }
 0x325   : > { %8215 = vmatprep.subr.bf16.mxu1 %v12532_v60 }
 0x327   : > { %8175 = vmatpush1.bf16.msra.mxu0 %v12527_v0  ;;  %v12601_v0 = vld [vmem:[%s13690_s10 + $0x19fc] ss:$48 sps:$4 sm:$0xff]  }
 0x328   : > { %8216 = vmatpush1.bf16.msra.mxu1 %v12530_v57  ;;  %8176 = vmatprep.subr.bf16.mxu0 %v12535_v39  ;;  %v12604_v57 = vld [vmem:[%s13690_s10 + $0x1ffc] ss:$48 sps:$4 sm:$0xff]  }
 0x329   : > { %8217 = vmatprep.subr.bf16.mxu1 %v12538_v40 }
 0x32b   : > { %8177 = vmatpush1.bf16.msra.mxu0 %v12533_v41  ;;  %v12599_v41 = vld [vmem:[%s13690_s10 + $0x19f8] ss:$48 sps:$4 sm:$0xff]  }
 0x32c   : > { %8218 = vmatpush1.bf16.msra.mxu1 %v12536_v23  ;;  %8178 = vmatprep.subr.bf16.mxu0 %v12541_v24  ;;  %v12602_v23 = vld [vmem:[%s13690_s10 + $0x1ff8] ss:$48 sps:$4 sm:$0xff]  }
 0x32d   : > { %8219 = vmatprep.subr.bf16.mxu1 %v12544_v43 }
 0x32f   : > { %8179 = vmatpush2.bf16.msra.mxu0 %v12539_v44  ;;  %v12607_v44 = vld [vmem:[%s13690_s10 + $0x199c] ss:$48 sps:$4 sm:$0xff]  }
 0x330   : > { %8220 = vmatpush2.bf16.msra.mxu1 %v12542_v21  ;;  %8180 = vmatprep.subr.bf16.mxu0 %v12547_v45  ;;  %v12610_v21 = vld [vmem:[%s13690_s10 + $0x1f9c] ss:$48 sps:$4 sm:$0xff]   ;;  %v12605_v45 = vld [vmem:[%s13690_s10 + $0x1998] ss:$48 sps:$4 sm:$0xff]  }
 0x331   : > { %8221 = vmatprep.subr.bf16.mxu1 %v12550_v46  ;;  %v12608_v46 = vld [vmem:[%s13690_s10 + $0x1f98] ss:$48 sps:$4 sm:$0xff]  }
 0x333   : > { %8181 = vmatpush2.bf16.msra.mxu0 %v12545_v47  ;;  %v12613_v47 = vld [vmem:[%s13690_s10 + $0x193c] ss:$48 sps:$4 sm:$0xff]  }
 0x334   : > { %8222 = vmatpush2.bf16.msra.mxu1 %v12548_v49  ;;  %8182 = vmatprep.subr.bf16.mxu0 %v12553_v50  ;;  %v12616_v49 = vld [vmem:[%s13690_s10 + $0x1f3c] ss:$48 sps:$4 sm:$0xff]   ;;  %v12611_v50 = vld [vmem:[%s13690_s10 + $0x1938] ss:$48 sps:$4 sm:$0xff]  }
 0x335   : > { %8223 = vmatprep.subr.bf16.mxu1 %v12556_v51  ;;  %v12614_v51 = vld [vmem:[%s13690_s10 + $0x1f38] ss:$48 sps:$4 sm:$0xff]  }
 0x337   : > { %8183 = vmatpush2.bf16.msra.mxu0 %v12551_v53  ;;  %v12619_v53 = vld [vmem:[%s13690_s10 + $0x18dc] ss:$48 sps:$4 sm:$0xff]  }
 0x338   : > { %8224 = vmatpush2.bf16.msra.mxu1 %v12554_v54  ;;  %8184 = vmatprep.subr.bf16.mxu0 %v12559_v55  ;;  %v12622_v54 = vld [vmem:[%s13690_s10 + $0x1edc] ss:$48 sps:$4 sm:$0xff]   ;;  %v12617_v55 = vld [vmem:[%s13690_s10 + $0x18d8] ss:$48 sps:$4 sm:$0xff]  }
 0x339   : > { %8225 = vmatprep.subr.bf16.mxu1 %v12562_v56  ;;  %v12620_v56 = vld [vmem:[%s13690_s10 + $0x1ed8] ss:$48 sps:$4 sm:$0xff]  }
 0x33b   : > { %8185 = vmatpush2.bf16.msra.mxu0 %v12557_v58  ;;  %v12625_v58 = vld [vmem:[%s13690_s10 + $0x187c] ss:$48 sps:$4 sm:$0xff]  }
 0x33c   : > { %8226 = vmatpush2.bf16.msra.mxu1 %v12560_v59  ;;  %8186 = vmatprep.subr.bf16.mxu0 %v12565_v27  ;;  %v12628_v59 = vld [vmem:[%s13690_s10 + $0x1e7c] ss:$48 sps:$4 sm:$0xff]   ;;  %v12623_v27 = vld [vmem:[%s13690_s10 + $0x1878] ss:$48 sps:$4 sm:$0xff]  }
 0x33d   : > { %8227 = vmatprep.subr.bf16.mxu1 %v12568_v22  ;;  %v12626_v22 = vld [vmem:[%s13690_s10 + $0x1e78] ss:$48 sps:$4 sm:$0xff]  }
 0x33f   : > { %8187 = vmatpush2.bf16.msra.mxu0 %v12563_v61  ;;  %v12631_v61 = vld [vmem:[%s13690_s10 + $0x181c] ss:$48 sps:$4 sm:$0xff]  }
 0x340   : > { %8228 = vmatpush2.bf16.msra.mxu1 %v12566_v63  ;;  %8188 = vmatprep.subr.bf16.mxu0 %v12571_v1  ;;  %v12634_v63 = vld [vmem:[%s13690_s10 + $0x1e1c] ss:$48 sps:$4 sm:$0xff]   ;;  %v12629_v1 = vld [vmem:[%s13690_s10 + $0x1818] ss:$48 sps:$4 sm:$0xff]  }
 0x341   : > { %8229 = vmatprep.subr.bf16.mxu1 %v12574_v2  ;;  %v12632_v2 = vld [vmem:[%s13690_s10 + $0x1e18] ss:$48 sps:$4 sm:$0xff]  }
 0x343   : > { %8189 = vmatpush2.bf16.msra.mxu0 %v12569_v3  ;;  %v12637_v3 = vld [vmem:[%s13690_s10 + $0x1dbc] ss:$48 sps:$4 sm:$0xff]  }
 0x344   : > { %8230 = vmatpush2.bf16.msra.mxu1 %v12572_v4  ;;  %8190 = vmatprep.subr.bf16.mxu0 %v12577_v5  ;;  %v12640_v4 = vld [vmem:[%s13690_s10 + $0x23bc] ss:$48 sps:$4 sm:$0xff]   ;;  %v12635_v5 = vld [vmem:[%s13690_s10 + $0x1db8] ss:$48 sps:$4 sm:$0xff]  }
 0x345   : > { %8231 = vmatprep.subr.bf16.mxu1 %v12580_v6  ;;  %v12638_v6 = vld [vmem:[%s13690_s10 + $0x23b8] ss:$48 sps:$4 sm:$0xff]  }
 0x347   : > { %8191 = vmatpush2.bf16.msra.mxu0 %v12575_v9  ;;  %v12643_v9 = vld [vmem:[%s13690_s10 + $0x1d5c] ss:$48 sps:$4 sm:$0xff]  }
 0x348   : > { %8232 = vmatpush2.bf16.msra.mxu1 %v12578_v10  ;;  %8192 = vmatprep.subr.bf16.mxu0 %v12583_v11  ;;  %v12646_v10 = vld [vmem:[%s13690_s10 + $0x235c] ss:$48 sps:$4 sm:$0xff]   ;;  %v12641_v11 = vld [vmem:[%s13690_s10 + $0x1d58] ss:$48 sps:$4 sm:$0xff]  }
 0x349   : > { %8233 = vmatprep.subr.bf16.mxu1 %v12586_v12  ;;  %v12644_v12 = vld [vmem:[%s13690_s10 + $0x2358] ss:$48 sps:$4 sm:$0xff]  }
 0x34b   : > { %8193 = vmatpush2.bf16.msra.mxu0 %v12581_v13  ;;  %v12649_v13 = vld [vmem:[%s13690_s10 + $0x1cfc] ss:$48 sps:$4 sm:$0xff]  }
 0x34c   : > { %8234 = vmatpush2.bf16.msra.mxu1 %v12584_v14  ;;  %8244 = vmatprep.subr.bf16.mxu0 %v12589_v15  ;;  %v12652_v14 = vld [vmem:[%s13690_s10 + $0x22fc] ss:$48 sps:$4 sm:$0xff]   ;;  %v12647_v15 = vld [vmem:[%s13690_s10 + $0x1cf8] ss:$48 sps:$4 sm:$0xff]  }
 0x34d   : > { %8285 = vmatprep.subr.bf16.mxu1 %v12592_v16  ;;  %v12650_v16 = vld [vmem:[%s13690_s10 + $0x22f8] ss:$48 sps:$4 sm:$0xff]  }
 0x34e   : > { %v14559_v31 = vpop.f32.mrf.mxu0  ;;  %8195 = vmatmul.mubr.bf16.vlgmr.msra.gmra.mxu0 %v13875_v17 }
 0x34f   : > { %v14561_v33 = vpop.f32.mrf.mxu1  ;;  %8236 = vmatmul.mubr.bf16.vlgmr.msra.gmra.mxu1 %v13879_v18  ;;  %8245 = vmatpush1.bf16.msra.mxu0 %v12587_v19  ;;  %v12655_v19 = vld [vmem:[%s13690_s10 + $0x1c9c] ss:$48 sps:$4 sm:$0xff]  }
 0x350   : > { %8286 = vmatpush1.bf16.msra.mxu1 %v12590_v20  ;;  %v14567_v42 = vpop.f32.mrf.mxu0  ;;  %8246 = vmatprep.subr.bf16.mxu0 %v12595_v29  ;;  %v12658_v20 = vld [vmem:[%s13690_s10 + $0x229c] ss:$48 sps:$4 sm:$0xff]   ;;  %v12653_v29 = vld [vmem:[%s13690_s10 + $0x1c98] ss:$48 sps:$4 sm:$0xff]  }
 0x351   : > { %v14569_v60 = vpop.f32.mrf.mxu1  ;;  %8287 = vmatprep.subr.bf16.mxu1 %v12598_v30  ;;  %8276 = vmatprep.mubr.bf16.mxu0 %v13893_v25  ;;  %v12656_v30 = vld [vmem:[%s13690_s10 + $0x2298] ss:$48 sps:$4 sm:$0xff]  }
 0x352   : > { %8317 = vmatprep.mubr.bf16.mxu1 %v13897_v26  ;;  %v7954_v39 = vpop.f32.mrf.mxu0 }
 0x353   : > { %v7995_v40 = vpop.f32.mrf.mxu1  ;;  %8247 = vmatpush1.bf16.msra.mxu0 %v12593_v34  ;;  %v12661_v34 = vld [vmem:[%s13690_s10 + $0x1c3c] ss:$48 sps:$4 sm:$0xff]  }
 0x354   : > { %8288 = vmatpush1.bf16.msra.mxu1 %v12596_v32  ;;  %v7955_v24 = vpop.f32.mrf.mxu0  ;;  %8248 = vmatprep.subr.bf16.mxu0 %v12601_v0  ;;  %v12664_v32 = vld [vmem:[%s13690_s10 + $0x223c] ss:$48 sps:$4 sm:$0xff]   ;;  %v12659_v0 = vld [vmem:[%s13690_s10 + $0x1c38] ss:$48 sps:$4 sm:$0xff]  }
 0x355   : > { %v7996_v43 = vpop.f32.mrf.mxu1  ;;  %8289 = vmatprep.subr.bf16.mxu1 %v12604_v57  ;;  %v12662_v57 = vld [vmem:[%s13690_s10 + $0x2238] ss:$48 sps:$4 sm:$0xff]   ;;  %v12667_v39 = vld [vmem:[%s13690_s10 + $0x1bdc] ss:$48 sps:$4 sm:$0xff]  }
 0x356   : > { %v12670_v40 = vld [vmem:[%s13690_s10 + $0x21dc] ss:$48 sps:$4 sm:$0xff]  }
 0x357   : > { %8249 = vmatpush1.bf16.msra.mxu0 %v12599_v41  ;;  %v12665_v41 = vld [vmem:[%s13690_s10 + $0x1bd8] ss:$48 sps:$4 sm:$0xff]   ;;  %v12673_v24 = vld [vmem:[%s13690_s10 + $0x1b7c] ss:$48 sps:$4 sm:$0xff]  }
 0x358   : > { %8290 = vmatpush1.bf16.msra.mxu1 %v12602_v23  ;;  %8250 = vmatprep.subr.bf16.mxu0 %v12607_v44  ;;  %v12668_v23 = vld [vmem:[%s13690_s10 + $0x21d8] ss:$48 sps:$4 sm:$0xff]   ;;  %v12676_v43 = vld [vmem:[%s13690_s10 + $0x217c] ss:$48 sps:$4 sm:$0xff]  }
 0x359   : > { %8291 = vmatprep.subr.bf16.mxu1 %v12610_v21  ;;  %v12671_v44 = vld [vmem:[%s13690_s10 + $0x1b78] ss:$48 sps:$4 sm:$0xff]  }
 0x35a   : > { %v12674_v21 = vld [vmem:[%s13690_s10 + $0x2178] ss:$48 sps:$4 sm:$0xff]  }
 0x35b   : > { %8251 = vmatpush1.bf16.msra.mxu0 %v12605_v45  ;;  %v12679_v45 = vld [vmem:[%s13690_s10 + $0x1b1c] ss:$48 sps:$4 sm:$0xff]  }
 0x35c   : > { %8292 = vmatpush1.bf16.msra.mxu1 %v12608_v46  ;;  %8252 = vmatprep.subr.bf16.mxu0 %v12613_v47  ;;  %v12682_v46 = vld [vmem:[%s13690_s10 + $0x211c] ss:$48 sps:$4 sm:$0xff]   ;;  %v12677_v47 = vld [vmem:[%s13690_s10 + $0x1b18] ss:$48 sps:$4 sm:$0xff]  }
 0x35d   : > { %8293 = vmatprep.subr.bf16.mxu1 %v12616_v49  ;;  %v12680_v49 = vld [vmem:[%s13690_s10 + $0x2118] ss:$48 sps:$4 sm:$0xff]  }
 0x35f   : > { %8253 = vmatpush1.bf16.msra.mxu0 %v12611_v50  ;;  %v12685_v50 = vld [vmem:[%s13690_s10 + $0x2c4] ss:$48 sps:$4 sm:$0xff]  }
 0x360   : > { %8294 = vmatpush1.bf16.msra.mxu1 %v12614_v51  ;;  %8254 = vmatprep.subr.bf16.mxu0 %v12619_v53  ;;  %v12688_v51 = vld [vmem:[%s13690_s10 + $0x8c4] ss:$48 sps:$4 sm:$0xff]   ;;  %v7951_v53 = vadd.f32 %v14559_v31, %v14490_v62  ;;  %v12689_v31 = vld [vmem:[%s13690_s10 + $0x260] ss:$48 sps:$4 sm:$0xff]  }
 0x361   : > { %8295 = vmatprep.subr.bf16.mxu1 %v12622_v54  ;;  %v7953_v54 = vadd.f32 %v14567_v42, %v14495_v28  ;;  %v12692_v42 = vld [vmem:[%s13690_s10 + $0x860] ss:$48 sps:$4 sm:$0xff]  }
 0x363   : > { %8255 = vmatpush1.bf16.msra.mxu0 %v12617_v55  ;;  %v12683_v55 = vld [vmem:[%s13690_s10 + $0x2c0] ss:$48 sps:$4 sm:$0xff]   ;;  %v7994_v62 = vadd.f32 %v14569_v60, %v7953_v54 }
 0x364   : > { %8296 = vmatpush1.bf16.msra.mxu1 %v12620_v56  ;;  %8256 = vmatprep.subr.bf16.mxu0 %v12625_v58  ;;  %v12686_v56 = vld [vmem:[%s13690_s10 + $0x8c0] ss:$48 sps:$4 sm:$0xff]   ;;  %v12691_v58 = vld [vmem:[%s13690_s10 + $0x264] ss:$48 sps:$4 sm:$0xff]  }
 0x365   : > { %8297 = vmatprep.subr.bf16.mxu1 %v12628_v59  ;;  %v12694_v59 = vld [vmem:[%s13690_s10 + $0x864] ss:$48 sps:$4 sm:$0xff]   ;;  %v12734_v54 = vld [vmem:[%s13690_s10 + $0xbc0] ss:$48 sps:$4 sm:$0xff]  }
 0x366   : > { %v381_v60 = vld [vmem:[#allocation2 + $0x20] sm:$0xff] }
 0x367   : > { %8257 = vmatpush1.bf16.msra.mxu0 %v12623_v27  ;;  %v7992_v27 = vadd.f32 %v14561_v33, %v7951_v53  ;;  %v12697_v33 = vld [vmem:[%s13690_s10 + $0x204] ss:$48 sps:$4 sm:$0xff]   ;;  %v12731_v53 = vld [vmem:[%s13690_s10 + $0x5c0] ss:$48 sps:$4 sm:$0xff]  }
 0x368   : > { %8298 = vmatpush1.bf16.msra.mxu1 %v12626_v22  ;;  %8258 = vmatprep.subr.bf16.mxu0 %v12631_v61 }
 0x369   : > { %8299 = vmatprep.subr.bf16.mxu1 %v12634_v63  ;;  %v380_v63 = vld [vmem:[#allocation2 + $0x50] sm:$0xff] }
 0x36b   : > { %8259 = vmatpush1.bf16.msra.mxu0 %v12629_v1 }
 0x36c   : > { %8300 = vmatpush1.bf16.msra.mxu1 %v12632_v2  ;;  %8260 = vmatprep.subr.bf16.mxu0 %v12637_v3  ;;  %v12700_v3 = vld [vmem:[%s13690_s10 + $0x804] ss:$48 sps:$4 sm:$0xff]  }
 0x36d   : > { %8301 = vmatprep.subr.bf16.mxu1 %v12640_v4 }
 0x36f   : > { %8261 = vmatpush2.bf16.msra.mxu0 %v12635_v5 }
 0x370   : > { %8302 = vmatpush2.bf16.msra.mxu1 %v12638_v6  ;;  %8262 = vmatprep.subr.bf16.mxu0 %v12643_v9 }
 0x371   : > { %8303 = vmatprep.subr.bf16.mxu1 %v12646_v10 }
 0x373   : > { %8263 = vmatpush2.bf16.msra.mxu0 %v12641_v11 }
 0x374   : > { %8304 = vmatpush2.bf16.msra.mxu1 %v12644_v12  ;;  %8264 = vmatprep.subr.bf16.mxu0 %v12649_v13  ;;  %v12695_v12 = vld [vmem:[%s13690_s10 + $0x200] ss:$48 sps:$4 sm:$0xff]  }
 0x375   : > { %8305 = vmatprep.subr.bf16.mxu1 %v12652_v14  ;;  %v12698_v13 = vld [vmem:[%s13690_s10 + $0x800] ss:$48 sps:$4 sm:$0xff]  }
 0x377   : > { %8265 = vmatpush2.bf16.msra.mxu0 %v12647_v15 }
 0x378   : > { %8306 = vmatpush2.bf16.msra.mxu1 %v12650_v16  ;;  %8266 = vmatprep.subr.bf16.mxu0 %v12655_v19  ;;  %v12703_v16 = vld [vmem:[%s13690_s10 + $0x1a4] ss:$48 sps:$4 sm:$0xff]  }
 0x379   : > { %8307 = vmatprep.subr.bf16.mxu1 %v12658_v20  ;;  %v12706_v19 = vld [vmem:[%s13690_s10 + $0x7a4] ss:$48 sps:$4 sm:$0xff]  }
 0x37b   : > { %8267 = vmatpush2.bf16.msra.mxu0 %v12653_v29  ;;  %v12701_v29 = vld [vmem:[%s13690_s10 + $0x1a0] ss:$48 sps:$4 sm:$0xff]  }
 0x37c   : > { %8308 = vmatpush2.bf16.msra.mxu1 %v12656_v30  ;;  %8268 = vmatprep.subr.bf16.mxu0 %v12661_v34  ;;  %v12704_v30 = vld [vmem:[%s13690_s10 + $0x7a0] ss:$48 sps:$4 sm:$0xff]   ;;  %v12709_v34 = vld [vmem:[%s13690_s10 + $0x144] ss:$48 sps:$4 sm:$0xff]  }
 0x37d   : > { %8309 = vmatprep.subr.bf16.mxu1 %v12664_v32  ;;  %v12712_v32 = vld [vmem:[%s13690_s10 + $0x744] ss:$48 sps:$4 sm:$0xff]  }
 0x37f   : > { %8269 = vmatpush2.bf16.msra.mxu0 %v12659_v0  ;;  %v12707_v0 = vld [vmem:[%s13690_s10 + $0x140] ss:$48 sps:$4 sm:$0xff]  }
 0x380   : > { %8310 = vmatpush2.bf16.msra.mxu1 %v12662_v57  ;;  %8270 = vmatprep.subr.bf16.mxu0 %v12667_v39  ;;  %v12710_v57 = vld [vmem:[%s13690_s10 + $0x740] ss:$48 sps:$4 sm:$0xff]   ;;  %v12715_v39 = vld [vmem:[%s13690_s10 + $0xe4] ss:$48 sps:$4 sm:$0xff]  }
 0x381   : > { %8311 = vmatprep.subr.bf16.mxu1 %v12670_v40  ;;  %v12718_v40 = vld [vmem:[%s13690_s10 + $0x6e4] ss:$48 sps:$4 sm:$0xff]  }
 0x383   : > { %8271 = vmatpush2.bf16.msra.mxu0 %v12665_v41  ;;  %v12713_v41 = vld [vmem:[%s13690_s10 + $0xe0] ss:$48 sps:$4 sm:$0xff]  }
 0x384   : > { %8312 = vmatpush2.bf16.msra.mxu1 %v12668_v23  ;;  %8272 = vmatprep.subr.bf16.mxu0 %v12673_v24  ;;  %v12716_v23 = vld [vmem:[%s13690_s10 + $0x6e0] ss:$48 sps:$4 sm:$0xff]   ;;  %v12721_v24 = vld [vmem:[%s13690_s10 + $0x84] ss:$48 sps:$4 sm:$0xff]  }
 0x385   : > { %8313 = vmatprep.subr.bf16.mxu1 %v12676_v43  ;;  %v12724_v43 = vld [vmem:[%s13690_s10 + $0x684] ss:$48 sps:$4 sm:$0xff]  }
 0x387   : > { %8273 = vmatpush2.bf16.msra.mxu0 %v12671_v44  ;;  %v12719_v44 = vld [vmem:[%s13690_s10 + $0x80] ss:$48 sps:$4 sm:$0xff]  }
 0x388   : > { %8314 = vmatpush2.bf16.msra.mxu1 %v12674_v21  ;;  %8274 = vmatprep.subr.bf16.mxu0 %v12679_v45  ;;  %v12722_v21 = vld [vmem:[%s13690_s10 + $0x680] ss:$48 sps:$4 sm:$0xff]   ;;  %v12727_v45 = vld [vmem:[%s13690_s10 + $0x24] ss:$48 sps:$4 sm:$0xff]  }
 0x389   : > { %8315 = vmatprep.subr.bf16.mxu1 %v12682_v46  ;;  %v12730_v46 = vld [vmem:[%s13690_s10 + $0x624] ss:$48 sps:$4 sm:$0xff]  }
 0x38b   : > { %8275 = vmatpush2.bf16.msra.mxu0 %v12677_v47  ;;  %v12725_v47 = vld [vmem:[%s13690_s10 + $0x20] ss:$48 sps:$4 sm:$0xff]  }
 0x38c   : > { %8316 = vmatpush2.bf16.msra.mxu1 %v12680_v49  ;;  %8326 = vmatprep.subr.bf16.mxu0 %v12685_v50  ;;  %v12728_v49 = vld [vmem:[%s13690_s10 + $0x620] ss:$48 sps:$4 sm:$0xff]   ;;  %v12733_v50 = vld [vmem:[%s13690_s10 + $0x5c4] ss:$48 sps:$4 sm:$0xff]  }
 0x38d   : > { %8367 = vmatprep.subr.bf16.mxu1 %v12688_v51  ;;  %v12736_v51 = vld [vmem:[%s13690_s10 + $0xbc4] ss:$48 sps:$4 sm:$0xff]  }
 0x38e   : > { %v8032_v22 = vpop.f32.mrf.mxu0  ;;  %8277 = vmatmul.mubr.bf16.vlgmr.msra.gmra.mxu0 %v13965_v35 }
 0x38f   : > { %v8073_v61 = vpop.f32.mrf.mxu1  ;;  %8318 = vmatmul.mubr.bf16.vlgmr.msra.gmra.mxu1 %v13969_v36  ;;  %v8033_v28 = vadd.f32 %v8032_v22, %v7992_v27  ;;  %8327 = vmatpush1.bf16.msra.mxu0 %v12683_v55  ;;  %v12739_v55 = vld [vmem:[%s13690_s10 + $0x564] ss:$48 sps:$4 sm:$0xff]  }
 0x390   : > { %8368 = vmatpush1.bf16.msra.mxu1 %v12686_v56  ;;  %v8034_v1 = vpop.f32.mrf.mxu0  ;;  %8328 = vmatprep.subr.bf16.mxu0 %v12691_v58  ;;  %v12742_v56 = vld [vmem:[%s13690_s10 + $0xb64] ss:$48 sps:$4 sm:$0xff]   ;;  %v12737_v58 = vld [vmem:[%s13690_s10 + $0x560] ss:$48 sps:$4 sm:$0xff]  }
 0x391   : > { %v8075_v2 = vpop.f32.mrf.mxu1  ;;  %8369 = vmatprep.subr.bf16.mxu1 %v12694_v59  ;;  %v8074_v4 = vadd.f32 %v8073_v61, %v8033_v28  ;;  %v8035_v5 = vadd.f32 %v8034_v1, %v7994_v62  ;;  %8358 = vmatprep.mubr.bf16.mxu0 %v13760_v48  ;;  %v12740_v59 = vld [vmem:[%s13690_s10 + $0xb60] ss:$48 sps:$4 sm:$0xff]   ;;  %v12745_v27 = vld [vmem:[%s13690_s10 + $0x504] ss:$48 sps:$4 sm:$0xff]  }
 0x392   : > { %8399 = vmatprep.mubr.bf16.mxu1 %v13765_v52  ;;  %v8036_v6 = vpop.f32.mrf.mxu0  ;;  %v12748_v22 = vld [vmem:[%s13690_s10 + $0xb04] ss:$48 sps:$4 sm:$0xff]   ;;  %v12743_v61 = vld [vmem:[%s13690_s10 + $0x500] ss:$48 sps:$4 sm:$0xff]  }
 0x393   : > { %v8077_v9 = vpop.f32.mrf.mxu1  ;;  %v8822_v10 = vadd.f32 %v8074_v4, %v380_v63  ;;  %v8076_v11 = vadd.f32 %v8075_v2, %v8035_v5  ;;  %8329 = vmatpush1.bf16.msra.mxu0 %v12689_v31  ;;  %v12746_v62 = vld [vmem:[%s13690_s10 + $0xb00] ss:$48 sps:$4 sm:$0xff]   ;;  %v12751_v28 = vld [vmem:[%s13690_s10 + $0x4a4] ss:$48 sps:$4 sm:$0xff]  }
 0x394   : > { %8370 = vmatpush1.bf16.msra.mxu1 %v12692_v42  ;;  %v8037_v14 = vpop.f32.mrf.mxu0  ;;  %8330 = vmatprep.subr.bf16.mxu0 %v12697_v33  ;;  %v12754_v31 = vld [vmem:[%s13690_s10 + $0xaa4] ss:$48 sps:$4 sm:$0xff]   ;;  %v12749_v42 = vld [vmem:[%s13690_s10 + $0x4a0] ss:$48 sps:$4 sm:$0xff]  }
 0x395   : > { %v8078_v15 = vpop.f32.mrf.mxu1  ;;  %8371 = vmatprep.subr.bf16.mxu1 %v12700_v3  ;;  %8834 = vst [vmem:[#allocation2 + $0x50] sm:$0xff] %v8822_v10  ;;  %v8823_v20 = vadd.f32 %v8076_v11, %v381_v60  ;;  %v12752_v63 = vld [vmem:[%s13690_s10 + $0xaa0] ss:$48 sps:$4 sm:$0xff]   ;;  %v12757_v1 = vld [vmem:[%s13690_s10 + $0x444] ss:$48 sps:$4 sm:$0xff]  }
 0x396   : > { %v12760_v2 = vld [vmem:[%s13690_s10 + $0xa44] ss:$48 sps:$4 sm:$0xff]   ;;  %v12755_v33 = vld [vmem:[%s13690_s10 + $0x440] ss:$48 sps:$4 sm:$0xff]  }
 0x397   : > { %8835 = vst [vmem:[#allocation2 + $0x20] sm:$0xff] %v8823_v20  ;;  %8331 = vmatpush1.bf16.msra.mxu0 %v12695_v12  ;;  %v12758_v3 = vld [vmem:[%s13690_s10 + $0xa40] ss:$48 sps:$4 sm:$0xff]   ;;  %v12763_v4 = vld [vmem:[%s13690_s10 + $0x3e4] ss:$48 sps:$4 sm:$0xff]  }
 0x398   : > { %8372 = vmatpush1.bf16.msra.mxu1 %v12698_v13  ;;  %8332 = vmatprep.subr.bf16.mxu0 %v12703_v16  ;;  %v12766_v5 = vld [vmem:[%s13690_s10 + $0x9e4] ss:$48 sps:$4 sm:$0xff]   ;;  %v12761_v60 = vld [vmem:[%s13690_s10 + $0x3e0] ss:$48 sps:$4 sm:$0xff]  }
 0x399   : > { %8373 = vmatprep.subr.bf16.mxu1 %v12706_v19  ;;  %v12764_v6 = vld [vmem:[%s13690_s10 + $0x9e0] ss:$48 sps:$4 sm:$0xff]   ;;  %v12769_v9 = vld [vmem:[%s13690_s10 + $0x384] ss:$48 sps:$4 sm:$0xff]  }
 0x39a   : > { %v12772_v10 = vld [vmem:[%s13690_s10 + $0x984] ss:$48 sps:$4 sm:$0xff]   ;;  %v12767_v11 = vld [vmem:[%s13690_s10 + $0x380] ss:$48 sps:$4 sm:$0xff]  }
 0x39b   : > { %8333 = vmatpush1.bf16.msra.mxu0 %v12701_v29  ;;  %v12770_v12 = vld [vmem:[%s13690_s10 + $0x980] ss:$48 sps:$4 sm:$0xff]   ;;  %v12775_v13 = vld [vmem:[%s13690_s10 + $0x324] ss:$48 sps:$4 sm:$0xff]  }
 0x39c   : > { %8374 = vmatpush1.bf16.msra.mxu1 %v12704_v30  ;;  %8334 = vmatprep.subr.bf16.mxu0 %v12709_v34  ;;  %v12778_v14 = vld [vmem:[%s13690_s10 + $0x924] ss:$48 sps:$4 sm:$0xff]   ;;  %v12773_v15 = vld [vmem:[%s13690_s10 + $0x320] ss:$48 sps:$4 sm:$0xff]  }
 0x39d   : > { %8375 = vmatprep.subr.bf16.mxu1 %v12712_v32  ;;  %v12776_v16 = vld [vmem:[%s13690_s10 + $0x920] ss:$48 sps:$4 sm:$0xff]   ;;  %v12781_v19 = vld [vmem:[%s13690_s10 + $0xec4] ss:$48 sps:$4 sm:$0xff]  }
 0x39e   : > { %v12784_v20 = vld [vmem:[%s13690_s10 + $0x14c4] ss:$48 sps:$4 sm:$0xff]   ;;  %v12779_v29 = vld [vmem:[%s13690_s10 + $0xec0] ss:$48 sps:$4 sm:$0xff]  }
 0x39f   : > { %8335 = vmatpush1.bf16.msra.mxu0 %v12707_v0  ;;  %v12782_v30 = vld [vmem:[%s13690_s10 + $0x14c0] ss:$48 sps:$4 sm:$0xff]   ;;  %v12787_v34 = vld [vmem:[%s13690_s10 + $0xe64] ss:$48 sps:$4 sm:$0xff]  }
 0x3a0   : > { %8376 = vmatpush1.bf16.msra.mxu1 %v12710_v57  ;;  %8336 = vmatprep.subr.bf16.mxu0 %v12715_v39  ;;  %v12790_v32 = vld [vmem:[%s13690_s10 + $0x1464] ss:$48 sps:$4 sm:$0xff]  }
 0x3a1   : > { %8377 = vmatprep.subr.bf16.mxu1 %v12718_v40  ;;  %v12785_v40 = vld [vmem:[%s13690_s10 + $0xe60] ss:$48 sps:$4 sm:$0xff]  }
 0x3a3   : > { %8337 = vmatpush1.bf16.msra.mxu0 %v12713_v41  ;;  %v12788_v41 = vld [vmem:[%s13690_s10 + $0x1460] ss:$48 sps:$4 sm:$0xff]  }
 0x3a4   : > { %8378 = vmatpush1.bf16.msra.mxu1 %v12716_v23  ;;  %8338 = vmatprep.subr.bf16.mxu0 %v12721_v24 }
 0x3a5   : > { %8379 = vmatprep.subr.bf16.mxu1 %v12724_v43  ;;  %v12793_v43 = vld [vmem:[%s13690_s10 + $0xe04] ss:$48 sps:$4 sm:$0xff]  }
 0x3a7   : > { %8339 = vmatpush1.bf16.msra.mxu0 %v12719_v44  ;;  %v12796_v44 = vld [vmem:[%s13690_s10 + $0x1404] ss:$48 sps:$4 sm:$0xff]  }
 0x3a8   : > { %8380 = vmatpush1.bf16.msra.mxu1 %v12722_v21  ;;  %8340 = vmatprep.subr.bf16.mxu0 %v12727_v45 }
 0x3a9   : > { %8381 = vmatprep.subr.bf16.mxu1 %v12730_v46 }
 0x3ab   : > { %8341 = vmatpush1.bf16.msra.mxu0 %v12725_v47  ;;  %v12791_v47 = vld [vmem:[%s13690_s10 + $0xe00] ss:$48 sps:$4 sm:$0xff]  }
 0x3ac   : > { %8382 = vmatpush1.bf16.msra.mxu1 %v12728_v49  ;;  %8342 = vmatprep.subr.bf16.mxu0 %v12733_v50  ;;  %v12794_v49 = vld [vmem:[%s13690_s10 + $0x1400] ss:$48 sps:$4 sm:$0xff]  }
 0x3ad   : > { %8383 = vmatprep.subr.bf16.mxu1 %v12736_v51 }
 0x3af   : > { %8343 = vmatpush2.bf16.msra.mxu0 %v12731_v53  ;;  %v12799_v53 = vld [vmem:[%s13690_s10 + $0xda4] ss:$48 sps:$4 sm:$0xff]  }
 0x3b0   : > { %8384 = vmatpush2.bf16.msra.mxu1 %v12734_v54  ;;  %8344 = vmatprep.subr.bf16.mxu0 %v12739_v55  ;;  %v12802_v54 = vld [vmem:[%s13690_s10 + $0x13a4] ss:$48 sps:$4 sm:$0xff]   ;;  %v12797_v55 = vld [vmem:[%s13690_s10 + $0xda0] ss:$48 sps:$4 sm:$0xff]  }
 0x3b1   : > { %8385 = vmatprep.subr.bf16.mxu1 %v12742_v56  ;;  %v12800_v56 = vld [vmem:[%s13690_s10 + $0x13a0] ss:$48 sps:$4 sm:$0xff]  }
 0x3b3   : > { %8345 = vmatpush2.bf16.msra.mxu0 %v12737_v58  ;;  %v12805_v58 = vld [vmem:[%s13690_s10 + $0xd44] ss:$48 sps:$4 sm:$0xff]  }
 0x3b4   : > { %8386 = vmatpush2.bf16.msra.mxu1 %v12740_v59  ;;  %8346 = vmatprep.subr.bf16.mxu0 %v12745_v27  ;;  %v12808_v59 = vld [vmem:[%s13690_s10 + $0x1344] ss:$48 sps:$4 sm:$0xff]   ;;  %v12803_v27 = vld [vmem:[%s13690_s10 + $0xd40] ss:$48 sps:$4 sm:$0xff]  }
 0x3b5   : > { %8387 = vmatprep.subr.bf16.mxu1 %v12748_v22  ;;  %v12806_v22 = vld [vmem:[%s13690_s10 + $0x1340] ss:$48 sps:$4 sm:$0xff]  }
 0x3b7   : > { %8347 = vmatpush2.bf16.msra.mxu0 %v12743_v61  ;;  %v12811_v61 = vld [vmem:[%s13690_s10 + $0xce4] ss:$48 sps:$4 sm:$0xff]  }
 0x3b8   : > { %8388 = vmatpush2.bf16.msra.mxu1 %v12746_v62  ;;  %8348 = vmatprep.subr.bf16.mxu0 %v12751_v28  ;;  %v12814_v62 = vld [vmem:[%s13690_s10 + $0x12e4] ss:$48 sps:$4 sm:$0xff]   ;;  %v12809_v28 = vld [vmem:[%s13690_s10 + $0xce0] ss:$48 sps:$4 sm:$0xff]  }
 0x3b9   : > { %8389 = vmatprep.subr.bf16.mxu1 %v12754_v31  ;;  %v12812_v31 = vld [vmem:[%s13690_s10 + $0x12e0] ss:$48 sps:$4 sm:$0xff]  }
 0x3bb   : > { %8349 = vmatpush2.bf16.msra.mxu0 %v12749_v42  ;;  %v12817_v42 = vld [vmem:[%s13690_s10 + $0xc84] ss:$48 sps:$4 sm:$0xff]  }
 0x3bc   : > { %8390 = vmatpush2.bf16.msra.mxu1 %v12752_v63  ;;  %8350 = vmatprep.subr.bf16.mxu0 %v12757_v1  ;;  %v12820_v63 = vld [vmem:[%s13690_s10 + $0x1284] ss:$48 sps:$4 sm:$0xff]   ;;  %v12815_v1 = vld [vmem:[%s13690_s10 + $0xc80] ss:$48 sps:$4 sm:$0xff]  }
 0x3bd   : > { %8391 = vmatprep.subr.bf16.mxu1 %v12760_v2  ;;  %v12818_v2 = vld [vmem:[%s13690_s10 + $0x1280] ss:$48 sps:$4 sm:$0xff]  }
 0x3bf   : > { %8351 = vmatpush2.bf16.msra.mxu0 %v12755_v33  ;;  %v12823_v33 = vld [vmem:[%s13690_s10 + $0xc24] ss:$48 sps:$4 sm:$0xff]  }
 0x3c0   : > { %8392 = vmatpush2.bf16.msra.mxu1 %v12758_v3  ;;  %8352 = vmatprep.subr.bf16.mxu0 %v12763_v4  ;;  %v12826_v3 = vld [vmem:[%s13690_s10 + $0x1224] ss:$48 sps:$4 sm:$0xff]   ;;  %v12821_v4 = vld [vmem:[%s13690_s10 + $0xc20] ss:$48 sps:$4 sm:$0xff]  }
 0x3c1   : > { %8393 = vmatprep.subr.bf16.mxu1 %v12766_v5  ;;  %v12824_v5 = vld [vmem:[%s13690_s10 + $0x1220] ss:$48 sps:$4 sm:$0xff]  }
 0x3c3   : > { %8353 = vmatpush2.bf16.msra.mxu0 %v12761_v60  ;;  %v12829_v60 = vld [vmem:[%s13690_s10 + $0x11c4] ss:$48 sps:$4 sm:$0xff]  }
 0x3c4   : > { %8394 = vmatpush2.bf16.msra.mxu1 %v12764_v6  ;;  %8354 = vmatprep.subr.bf16.mxu0 %v12769_v9  ;;  %v12832_v6 = vld [vmem:[%s13690_s10 + $0x17c4] ss:$48 sps:$4 sm:$0xff]   ;;  %v12827_v9 = vld [vmem:[%s13690_s10 + $0x11c0] ss:$48 sps:$4 sm:$0xff]  }
 0x3c5   : > { %8395 = vmatprep.subr.bf16.mxu1 %v12772_v10  ;;  %v12830_v10 = vld [vmem:[%s13690_s10 + $0x17c0] ss:$48 sps:$4 sm:$0xff]  }
 0x3c7   : > { %8355 = vmatpush2.bf16.msra.mxu0 %v12767_v11  ;;  %v12835_v11 = vld [vmem:[%s13690_s10 + $0x1164] ss:$48 sps:$4 sm:$0xff]  }
 0x3c8   : > { %8396 = vmatpush2.bf16.msra.mxu1 %v12770_v12  ;;  %8356 = vmatprep.subr.bf16.mxu0 %v12775_v13  ;;  %v12838_v12 = vld [vmem:[%s13690_s10 + $0x1764] ss:$48 sps:$4 sm:$0xff]   ;;  %v12833_v13 = vld [vmem:[%s13690_s10 + $0x1160] ss:$48 sps:$4 sm:$0xff]  }
 0x3c9   : > { %8397 = vmatprep.subr.bf16.mxu1 %v12778_v14  ;;  %v12836_v14 = vld [vmem:[%s13690_s10 + $0x1760] ss:$48 sps:$4 sm:$0xff]  }
 0x3cb   : > { %8357 = vmatpush2.bf16.msra.mxu0 %v12773_v15  ;;  %v12841_v15 = vld [vmem:[%s13690_s10 + $0x1104] ss:$48 sps:$4 sm:$0xff]  }
 0x3cc   : > { %8398 = vmatpush2.bf16.msra.mxu1 %v12776_v16  ;;  %8408 = vmatprep.subr.bf16.mxu0 %v12781_v19  ;;  %v12844_v16 = vld [vmem:[%s13690_s10 + $0x1704] ss:$48 sps:$4 sm:$0xff]   ;;  %v12839_v19 = vld [vmem:[%s13690_s10 + $0x1100] ss:$48 sps:$4 sm:$0xff]  }
 0x3cd   : > { %8449 = vmatprep.subr.bf16.mxu1 %v12784_v20  ;;  %v12842_v20 = vld [vmem:[%s13690_s10 + $0x1700] ss:$48 sps:$4 sm:$0xff]  }
 0x3ce   : > { %v8114_v0 = vpop.f32.mrf.mxu0  ;;  %8359 = vmatmul.mubr.bf16.vlgmr.msra.gmra.mxu0 %v13787_v7 }
 0x3cf   : > { %v8155_v57 = vpop.f32.mrf.mxu1  ;;  %8400 = vmatmul.mubr.bf16.vlgmr.msra.gmra.mxu1 %v13789_v8  ;;  %8409 = vmatpush1.bf16.msra.mxu0 %v12779_v29  ;;  %v12847_v29 = vld [vmem:[%s13690_s10 + $0x10a4] ss:$48 sps:$4 sm:$0xff]  }
 0x3d0   : > { %v14711_v39 = vadd.f32 %v8155_v57, %v8114_v0  ;;  %8450 = vmatpush1.bf16.msra.mxu1 %v12782_v30  ;;  %v8116_v23 = vpop.f32.mrf.mxu0  ;;  %8410 = vmatprep.subr.bf16.mxu0 %v12787_v34  ;;  %v12850_v30 = vld [vmem:[%s13690_s10 + $0x16a4] ss:$48 sps:$4 sm:$0xff]   ;;  %v12845_v34 = vld [vmem:[%s13690_s10 + $0x10a0] ss:$48 sps:$4 sm:$0xff]  }
 0x3d1   : > { %v8157_v24 = vpop.f32.mrf.mxu1  ;;  %8451 = vmatprep.subr.bf16.mxu1 %v12790_v32  ;;  %8440 = vmatprep.mubr.bf16.mxu0 %v13827_v37  ;;  %v12848_v32 = vld [vmem:[%s13690_s10 + $0x16a0] ss:$48 sps:$4 sm:$0xff]   ;;  %v12853_v0 = vld [vmem:[%s13690_s10 + $0x1044] ss:$48 sps:$4 sm:$0xff]  }
 0x3d2   : > { %v14717_v21 = vadd.f32 %v8157_v24, %v8116_v23  ;;  %8481 = vmatprep.mubr.bf16.mxu1 %v13831_v38  ;;  %v8118_v45 = vpop.f32.mrf.mxu0  ;;  %v12856_v57 = vld [vmem:[%s13690_s10 + $0x1644] ss:$48 sps:$4 sm:$0xff]  }
 0x3d3   : > { %v8159_v46 = vpop.f32.mrf.mxu1  ;;  %8411 = vmatpush1.bf16.msra.mxu0 %v12785_v40  ;;  %v12851_v40 = vld [vmem:[%s13690_s10 + $0x1040] ss:$48 sps:$4 sm:$0xff]   ;;  %v12859_v23 = vld [vmem:[%s13690_s10 + $0xfe4] ss:$48 sps:$4 sm:$0xff]  }
 0x3d4   : > { %8452 = vmatpush1.bf16.msra.mxu1 %v12788_v41  ;;  %v8119_v50 = vpop.f32.mrf.mxu0  ;;  %8412 = vmatprep.subr.bf16.mxu0 %v12793_v43  ;;  %v12854_v41 = vld [vmem:[%s13690_s10 + $0x1640] ss:$48 sps:$4 sm:$0xff]   ;;  %v12862_v24 = vld [vmem:[%s13690_s10 + $0x15e4] ss:$48 sps:$4 sm:$0xff]  }
 0x3d5   : > { %v8160_v51 = vpop.f32.mrf.mxu1  ;;  %8453 = vmatprep.subr.bf16.mxu1 %v12796_v44  ;;  %v12857_v43 = vld [vmem:[%s13690_s10 + $0xfe0] ss:$48 sps:$4 sm:$0xff]   ;;  %v12865_v45 = vld [vmem:[%s13690_s10 + $0xf84] ss:$48 sps:$4 sm:$0xff]  }
 0x3d6   : > { %v12860_v44 = vld [vmem:[%s13690_s10 + $0x15e0] ss:$48 sps:$4 sm:$0xff]   ;;  %v12868_v46 = vld [vmem:[%s13690_s10 + $0x1584] ss:$48 sps:$4 sm:$0xff]  }
 0x3d7   : > { %8413 = vmatpush1.bf16.msra.mxu0 %v12791_v47  ;;  %v12863_v47 = vld [vmem:[%s13690_s10 + $0xf80] ss:$48 sps:$4 sm:$0xff]   ;;  %v12871_v50 = vld [vmem:[%s13690_s10 + $0xf24] ss:$48 sps:$4 sm:$0xff]  }
 0x3d8   : > { %8454 = vmatpush1.bf16.msra.mxu1 %v12794_v49  ;;  %8414 = vmatprep.subr.bf16.mxu0 %v12799_v53  ;;  %v12866_v49 = vld [vmem:[%s13690_s10 + $0x1580] ss:$48 sps:$4 sm:$0xff]   ;;  %v12874_v51 = vld [vmem:[%s13690_s10 + $0x1524] ss:$48 sps:$4 sm:$0xff]  }
 0x3d9   : > { %8455 = vmatprep.subr.bf16.mxu1 %v12802_v54  ;;  %v12869_v53 = vld [vmem:[%s13690_s10 + $0xf20] ss:$48 sps:$4 sm:$0xff]  }
 0x3da   : > { %v12872_v54 = vld [vmem:[%s13690_s10 + $0x1520] ss:$48 sps:$4 sm:$0xff]  }
 0x3db   : > { %8415 = vmatpush1.bf16.msra.mxu0 %v12797_v55  ;;  %v12877_v55 = vld [vmem:[%s13690_s10 + $0x1ac4] ss:$48 sps:$4 sm:$0xff]  }
 0x3dc   : > { %8456 = vmatpush1.bf16.msra.mxu1 %v12800_v56  ;;  %8416 = vmatprep.subr.bf16.mxu0 %v12805_v58  ;;  %v12880_v56 = vld [vmem:[%s13690_s10 + $0x20c4] ss:$48 sps:$4 sm:$0xff]   ;;  %v12875_v58 = vld [vmem:[%s13690_s10 + $0x1ac0] ss:$48 sps:$4 sm:$0xff]  }
 0x3dd   : > { %8457 = vmatprep.subr.bf16.mxu1 %v12808_v59  ;;  %v12878_v59 = vld [vmem:[%s13690_s10 + $0x20c0] ss:$48 sps:$4 sm:$0xff]  }
 0x3df   : > { %8417 = vmatpush1.bf16.msra.mxu0 %v12803_v27  ;;  %v12883_v27 = vld [vmem:[%s13690_s10 + $0x1a64] ss:$48 sps:$4 sm:$0xff]  }
 0x3e0   : > { %8458 = vmatpush1.bf16.msra.mxu1 %v12806_v22  ;;  %8418 = vmatprep.subr.bf16.mxu0 %v12811_v61  ;;  %v12886_v22 = vld [vmem:[%s13690_s10 + $0x2064] ss:$48 sps:$4 sm:$0xff]  }
 0x3e1   : > { %8459 = vmatprep.subr.bf16.mxu1 %v12814_v62 }
 0x3e3   : > { %8419 = vmatpush1.bf16.msra.mxu0 %v12809_v28  ;;  %v12881_v28 = vld [vmem:[%s13690_s10 + $0x1a60] ss:$48 sps:$4 sm:$0xff]  }
 0x3e4   : > { %8460 = vmatpush1.bf16.msra.mxu1 %v12812_v31  ;;  %8420 = vmatprep.subr.bf16.mxu0 %v12817_v42  ;;  %v12884_v31 = vld [vmem:[%s13690_s10 + $0x2060] ss:$48 sps:$4 sm:$0xff]  }
 0x3e5   : > { %8461 = vmatprep.subr.bf16.mxu1 %v12820_v63 }
 0x3e7   : > { %8421 = vmatpush1.bf16.msra.mxu0 %v12815_v1  ;;  %v12889_v1 = vld [vmem:[%s13690_s10 + $0x1a04] ss:$48 sps:$4 sm:$0xff]  }
 0x3e8   : > { %8462 = vmatpush1.bf16.msra.mxu1 %v12818_v2  ;;  %8422 = vmatprep.subr.bf16.mxu0 %v12823_v33  ;;  %v12892_v2 = vld [vmem:[%s13690_s10 + $0x2004] ss:$48 sps:$4 sm:$0xff]  }
 0x3e9   : > { %8463 = vmatprep.subr.bf16.mxu1 %v12826_v3 }
 0x3eb   : > { %8423 = vmatpush1.bf16.msra.mxu0 %v12821_v4  ;;  %v12887_v4 = vld [vmem:[%s13690_s10 + $0x1a00] ss:$48 sps:$4 sm:$0xff]  }
 0x3ec   : > { %8464 = vmatpush1.bf16.msra.mxu1 %v12824_v5  ;;  %8424 = vmatprep.subr.bf16.mxu0 %v12829_v60  ;;  %v12890_v5 = vld [vmem:[%s13690_s10 + $0x2000] ss:$48 sps:$4 sm:$0xff]  }
 0x3ed   : > { %8465 = vmatprep.subr.bf16.mxu1 %v12832_v6 }
 0x3ef   : > { %8425 = vmatpush2.bf16.msra.mxu0 %v12827_v9  ;;  %v12895_v9 = vld [vmem:[%s13690_s10 + $0x19a4] ss:$48 sps:$4 sm:$0xff]  }
 0x3f0   : > { %8466 = vmatpush2.bf16.msra.mxu1 %v12830_v10  ;;  %8426 = vmatprep.subr.bf16.mxu0 %v12835_v11  ;;  %v12898_v10 = vld [vmem:[%s13690_s10 + $0x1fa4] ss:$48 sps:$4 sm:$0xff]   ;;  %v12893_v11 = vld [vmem:[%s13690_s10 + $0x19a0] ss:$48 sps:$4 sm:$0xff]  }
 0x3f1   : > { %8467 = vmatprep.subr.bf16.mxu1 %v12838_v12  ;;  %v12896_v12 = vld [vmem:[%s13690_s10 + $0x1fa0] ss:$48 sps:$4 sm:$0xff]  }
 0x3f3   : > { %8427 = vmatpush2.bf16.msra.mxu0 %v12833_v13  ;;  %v12901_v13 = vld [vmem:[%s13690_s10 + $0x1944] ss:$48 sps:$4 sm:$0xff]  }
 0x3f4   : > { %8468 = vmatpush2.bf16.msra.mxu1 %v12836_v14  ;;  %8428 = vmatprep.subr.bf16.mxu0 %v12841_v15  ;;  %v12904_v14 = vld [vmem:[%s13690_s10 + $0x1f44] ss:$48 sps:$4 sm:$0xff]   ;;  %v12899_v15 = vld [vmem:[%s13690_s10 + $0x1940] ss:$48 sps:$4 sm:$0xff]  }
 0x3f5   : > { %8469 = vmatprep.subr.bf16.mxu1 %v12844_v16  ;;  %v12902_v16 = vld [vmem:[%s13690_s10 + $0x1f40] ss:$48 sps:$4 sm:$0xff]  }
 0x3f7   : > { %8429 = vmatpush2.bf16.msra.mxu0 %v12839_v19  ;;  %v12907_v19 = vld [vmem:[%s13690_s10 + $0x18e4] ss:$48 sps:$4 sm:$0xff]  }
 0x3f8   : > { %8470 = vmatpush2.bf16.msra.mxu1 %v12842_v20  ;;  %8430 = vmatprep.subr.bf16.mxu0 %v12847_v29  ;;  %v12910_v20 = vld [vmem:[%s13690_s10 + $0x1ee4] ss:$48 sps:$4 sm:$0xff]   ;;  %v12905_v29 = vld [vmem:[%s13690_s10 + $0x18e0] ss:$48 sps:$4 sm:$0xff]  }
 0x3f9   : > { %8471 = vmatprep.subr.bf16.mxu1 %v12850_v30  ;;  %v12908_v30 = vld [vmem:[%s13690_s10 + $0x1ee0] ss:$48 sps:$4 sm:$0xff]  }
 0x3fb   : > { %8431 = vmatpush2.bf16.msra.mxu0 %v12845_v34  ;;  %v12913_v34 = vld [vmem:[%s13690_s10 + $0x1884] ss:$48 sps:$4 sm:$0xff]  }
 0x3fc   : > { %8472 = vmatpush2.bf16.msra.mxu1 %v12848_v32  ;;  %8432 = vmatprep.subr.bf16.mxu0 %v12853_v0  ;;  %v12916_v32 = vld [vmem:[%s13690_s10 + $0x1e84] ss:$48 sps:$4 sm:$0xff]   ;;  %v12911_v0 = vld [vmem:[%s13690_s10 + $0x1880] ss:$48 sps:$4 sm:$0xff]  }
 0x3fd   : > { %8473 = vmatprep.subr.bf16.mxu1 %v12856_v57  ;;  %v12914_v57 = vld [vmem:[%s13690_s10 + $0x1e80] ss:$48 sps:$4 sm:$0xff]  }
 0x3ff   : > { %8433 = vmatpush2.bf16.msra.mxu0 %v12851_v40  ;;  %v12919_v40 = vld [vmem:[%s13690_s10 + $0x1824] ss:$48 sps:$4 sm:$0xff]  }
 0x400   : > { %8474 = vmatpush2.bf16.msra.mxu1 %v12854_v41  ;;  %8434 = vmatprep.subr.bf16.mxu0 %v12859_v23  ;;  %v12922_v41 = vld [vmem:[%s13690_s10 + $0x1e24] ss:$48 sps:$4 sm:$0xff]   ;;  %v12917_v23 = vld [vmem:[%s13690_s10 + $0x1820] ss:$48 sps:$4 sm:$0xff]  }
 0x401   : > { %8475 = vmatprep.subr.bf16.mxu1 %v12862_v24  ;;  %v12920_v24 = vld [vmem:[%s13690_s10 + $0x1e20] ss:$48 sps:$4 sm:$0xff]  }
 0x403   : > { %8435 = vmatpush2.bf16.msra.mxu0 %v12857_v43  ;;  %v12925_v43 = vld [vmem:[%s13690_s10 + $0x1dc4] ss:$48 sps:$4 sm:$0xff]  }
 0x404   : > { %8476 = vmatpush2.bf16.msra.mxu1 %v12860_v44  ;;  %8436 = vmatprep.subr.bf16.mxu0 %v12865_v45  ;;  %v12928_v44 = vld [vmem:[%s13690_s10 + $0x23c4] ss:$48 sps:$4 sm:$0xff]   ;;  %v12923_v45 = vld [vmem:[%s13690_s10 + $0x1dc0] ss:$48 sps:$4 sm:$0xff]  }
 0x405   : > { %8477 = vmatprep.subr.bf16.mxu1 %v12868_v46  ;;  %v12926_v46 = vld [vmem:[%s13690_s10 + $0x23c0] ss:$48 sps:$4 sm:$0xff]  }
 0x407   : > { %8437 = vmatpush2.bf16.msra.mxu0 %v12863_v47  ;;  %v12931_v47 = vld [vmem:[%s13690_s10 + $0x1d64] ss:$48 sps:$4 sm:$0xff]  }
 0x408   : > { %8478 = vmatpush2.bf16.msra.mxu1 %v12866_v49  ;;  %8438 = vmatprep.subr.bf16.mxu0 %v12871_v50  ;;  %v12934_v49 = vld [vmem:[%s13690_s10 + $0x2364] ss:$48 sps:$4 sm:$0xff]   ;;  %v12929_v50 = vld [vmem:[%s13690_s10 + $0x1d60] ss:$48 sps:$4 sm:$0xff]  }
 0x409   : > { %8479 = vmatprep.subr.bf16.mxu1 %v12874_v51  ;;  %v12932_v51 = vld [vmem:[%s13690_s10 + $0x2360] ss:$48 sps:$4 sm:$0xff]  }
 0x40b   : > { %8439 = vmatpush2.bf16.msra.mxu0 %v12869_v53  ;;  %v12937_v53 = vld [vmem:[%s13690_s10 + $0x1d04] ss:$48 sps:$4 sm:$0xff]  }
 0x40c   : > { %8480 = vmatpush2.bf16.msra.mxu1 %v12872_v54  ;;  %8490 = vmatprep.subr.bf16.mxu0 %v12877_v55  ;;  %v12940_v54 = vld [vmem:[%s13690_s10 + $0x2304] ss:$48 sps:$4 sm:$0xff]   ;;  %v12935_v55 = vld [vmem:[%s13690_s10 + $0x1d00] ss:$48 sps:$4 sm:$0xff]  }
 0x40d   : > { %8531 = vmatprep.subr.bf16.mxu1 %v12880_v56  ;;  %v12938_v56 = vld [vmem:[%s13690_s10 + $0x2300] ss:$48 sps:$4 sm:$0xff]  }
 0x40e   : > { %v14781_v61 = vpop.f32.mrf.mxu0  ;;  %8441 = vmatmul.mubr.bf16.vlgmr.msra.gmra.mxu0 %v13875_v17 }
 0x40f   : > { %v14783_v62 = vpop.f32.mrf.mxu1  ;;  %8482 = vmatmul.mubr.bf16.vlgmr.msra.gmra.mxu1 %v13879_v18  ;;  %8491 = vmatpush1.bf16.msra.mxu0 %v12875_v58  ;;  %v12943_v58 = vld [vmem:[%s13690_s10 + $0x1ca4] ss:$48 sps:$4 sm:$0xff]  }
 0x410   : > { %8532 = vmatpush1.bf16.msra.mxu1 %v12878_v59  ;;  %v14789_v42 = vpop.f32.mrf.mxu0  ;;  %8492 = vmatprep.subr.bf16.mxu0 %v12883_v27  ;;  %v12946_v59 = vld [vmem:[%s13690_s10 + $0x22a4] ss:$48 sps:$4 sm:$0xff]   ;;  %v12941_v27 = vld [vmem:[%s13690_s10 + $0x1ca0] ss:$48 sps:$4 sm:$0xff]  }
 0x411   : > { %v14791_v63 = vpop.f32.mrf.mxu1  ;;  %8533 = vmatprep.subr.bf16.mxu1 %v12886_v22  ;;  %8522 = vmatprep.mubr.bf16.mxu0 %v13893_v25  ;;  %v12944_v22 = vld [vmem:[%s13690_s10 + $0x22a0] ss:$48 sps:$4 sm:$0xff]  }
 0x412   : > { %8563 = vmatprep.mubr.bf16.mxu1 %v13897_v26  ;;  %v8200_v33 = vpop.f32.mrf.mxu0 }
 0x413   : > { %v8241_v3 = vpop.f32.mrf.mxu1  ;;  %8493 = vmatpush1.bf16.msra.mxu0 %v12881_v28  ;;  %v12949_v28 = vld [vmem:[%s13690_s10 + $0x1c44] ss:$48 sps:$4 sm:$0xff]  }
 0x414   : > { %8534 = vmatpush1.bf16.msra.mxu1 %v12884_v31  ;;  %v8201_v60 = vpop.f32.mrf.mxu0  ;;  %8494 = vmatprep.subr.bf16.mxu0 %v12889_v1  ;;  %v12952_v31 = vld [vmem:[%s13690_s10 + $0x2244] ss:$48 sps:$4 sm:$0xff]   ;;  %v12947_v1 = vld [vmem:[%s13690_s10 + $0x1c40] ss:$48 sps:$4 sm:$0xff]  }
 0x415   : > { %v8242_v6 = vpop.f32.mrf.mxu1  ;;  %8535 = vmatprep.subr.bf16.mxu1 %v12892_v2  ;;  %v12950_v2 = vld [vmem:[%s13690_s10 + $0x2240] ss:$48 sps:$4 sm:$0xff]   ;;  %v12955_v33 = vld [vmem:[%s13690_s10 + $0x1be4] ss:$48 sps:$4 sm:$0xff]  }
 0x416   : > { %v12958_v3 = vld [vmem:[%s13690_s10 + $0x21e4] ss:$48 sps:$4 sm:$0xff]  }
 0x417   : > { %8495 = vmatpush1.bf16.msra.mxu0 %v12887_v4  ;;  %v12953_v4 = vld [vmem:[%s13690_s10 + $0x1be0] ss:$48 sps:$4 sm:$0xff]   ;;  %v12961_v60 = vld [vmem:[%s13690_s10 + $0x1b84] ss:$48 sps:$4 sm:$0xff]  }
 0x418   : > { %8536 = vmatpush1.bf16.msra.mxu1 %v12890_v5  ;;  %8496 = vmatprep.subr.bf16.mxu0 %v12895_v9  ;;  %v12956_v5 = vld [vmem:[%s13690_s10 + $0x21e0] ss:$48 sps:$4 sm:$0xff]   ;;  %v12964_v6 = vld [vmem:[%s13690_s10 + $0x2184] ss:$48 sps:$4 sm:$0xff]  }
 0x419   : > { %8537 = vmatprep.subr.bf16.mxu1 %v12898_v10  ;;  %v12959_v9 = vld [vmem:[%s13690_s10 + $0x1b80] ss:$48 sps:$4 sm:$0xff]  }
 0x41a   : > { %v12962_v10 = vld [vmem:[%s13690_s10 + $0x2180] ss:$48 sps:$4 sm:$0xff]  }
 0x41b   : > { %8497 = vmatpush1.bf16.msra.mxu0 %v12893_v11  ;;  %v12967_v11 = vld [vmem:[%s13690_s10 + $0x1b24] ss:$48 sps:$4 sm:$0xff]  }
 0x41c   : > { %8538 = vmatpush1.bf16.msra.mxu1 %v12896_v12  ;;  %8498 = vmatprep.subr.bf16.mxu0 %v12901_v13  ;;  %v12970_v12 = vld [vmem:[%s13690_s10 + $0x2124] ss:$48 sps:$4 sm:$0xff]   ;;  %v12965_v13 = vld [vmem:[%s13690_s10 + $0x1b20] ss:$48 sps:$4 sm:$0xff]  }
 0x41d   : > { %8539 = vmatprep.subr.bf16.mxu1 %v12904_v14  ;;  %v12968_v14 = vld [vmem:[%s13690_s10 + $0x2120] ss:$48 sps:$4 sm:$0xff]  }
 0x41f   : > { %8499 = vmatpush1.bf16.msra.mxu0 %v12899_v15  ;;  %v12973_v15 = vld [vmem:[%s13690_s10 + $0x2cc] ss:$48 sps:$4 sm:$0xff]  }
 0x420   : > { %8540 = vmatpush1.bf16.msra.mxu1 %v12902_v16  ;;  %8500 = vmatprep.subr.bf16.mxu0 %v12907_v19  ;;  %v12976_v16 = vld [vmem:[%s13690_s10 + $0x8cc] ss:$48 sps:$4 sm:$0xff]   ;;  %v8197_v19 = vadd.f32 %v14781_v61, %v14711_v39  ;;  %v12977_v61 = vld [vmem:[%s13690_s10 + $0x268] ss:$48 sps:$4 sm:$0xff]  }
 0x421   : > { %8541 = vmatprep.subr.bf16.mxu1 %v12910_v20  ;;  %v8199_v20 = vadd.f32 %v14789_v42, %v14717_v21  ;;  %v12980_v42 = vld [vmem:[%s13690_s10 + $0x868] ss:$48 sps:$4 sm:$0xff]  }
 0x423   : > { %8501 = vmatpush1.bf16.msra.mxu0 %v12905_v29  ;;  %v12971_v29 = vld [vmem:[%s13690_s10 + $0x2c8] ss:$48 sps:$4 sm:$0xff]   ;;  %v8240_v39 = vadd.f32 %v14791_v63, %v8199_v20  ;;  %v13030_v20 = vld [vmem:[%s13690_s10 + $0xb6c] ss:$48 sps:$4 sm:$0xff]  }
 0x424   : > { %8542 = vmatpush1.bf16.msra.mxu1 %v12908_v30  ;;  %8502 = vmatprep.subr.bf16.mxu0 %v12913_v34  ;;  %v12974_v30 = vld [vmem:[%s13690_s10 + $0x8c8] ss:$48 sps:$4 sm:$0xff]   ;;  %v12979_v34 = vld [vmem:[%s13690_s10 + $0x26c] ss:$48 sps:$4 sm:$0xff]  }
 0x425   : > { %8543 = vmatprep.subr.bf16.mxu1 %v12916_v32  ;;  %v12982_v32 = vld [vmem:[%s13690_s10 + $0x86c] ss:$48 sps:$4 sm:$0xff]  }
 0x426   : > { %v383_v63 = vld [vmem:[#allocation2 + $0x38] sm:$0xff] }
 0x427   : > { %8503 = vmatpush1.bf16.msra.mxu0 %v12911_v0  ;;  %v8238_v0 = vadd.f32 %v14783_v62, %v8197_v19  ;;  %v12985_v62 = vld [vmem:[%s13690_s10 + $0x20c] ss:$48 sps:$4 sm:$0xff]  }
 0x428   : > { %8544 = vmatpush1.bf16.msra.mxu1 %v12914_v57  ;;  %8504 = vmatprep.subr.bf16.mxu0 %v12919_v40  ;;  %v13027_v19 = vld [vmem:[%s13690_s10 + $0x56c] ss:$48 sps:$4 sm:$0xff]  }
 0x429   : > { %8545 = vmatprep.subr.bf16.mxu1 %v12922_v41  ;;  %v382_v41 = vld [vmem:[#allocation2 + $0x8] sm:$0xff] }
 0x42b   : > { %8505 = vmatpush1.bf16.msra.mxu0 %v12917_v23 }
 0x42c   : > { %8546 = vmatpush1.bf16.msra.mxu1 %v12920_v24  ;;  %8506 = vmatprep.subr.bf16.mxu0 %v12925_v43  ;;  %v12988_v43 = vld [vmem:[%s13690_s10 + $0x80c] ss:$48 sps:$4 sm:$0xff]  }
 0x42d   : > { %8547 = vmatprep.subr.bf16.mxu1 %v12928_v44 }
 0x42f   : > { %8507 = vmatpush2.bf16.msra.mxu0 %v12923_v45 }
 0x430   : > { %8548 = vmatpush2.bf16.msra.mxu1 %v12926_v46  ;;  %8508 = vmatprep.subr.bf16.mxu0 %v12931_v47 }
 0x431   : > { %8549 = vmatprep.subr.bf16.mxu1 %v12934_v49 }
 0x433   : > { %8509 = vmatpush2.bf16.msra.mxu0 %v12929_v50 }
 0x434   : > { %8550 = vmatpush2.bf16.msra.mxu1 %v12932_v51  ;;  %8510 = vmatprep.subr.bf16.mxu0 %v12937_v53  ;;  %v12983_v51 = vld [vmem:[%s13690_s10 + $0x208] ss:$48 sps:$4 sm:$0xff]  }
 0x435   : > { %8551 = vmatprep.subr.bf16.mxu1 %v12940_v54  ;;  %v12986_v53 = vld [vmem:[%s13690_s10 + $0x808] ss:$48 sps:$4 sm:$0xff]  }
 0x437   : > { %8511 = vmatpush2.bf16.msra.mxu0 %v12935_v55 }
 0x438   : > { %8552 = vmatpush2.bf16.msra.mxu1 %v12938_v56  ;;  %8512 = vmatprep.subr.bf16.mxu0 %v12943_v58  ;;  %v12989_v58 = vld [vmem:[%s13690_s10 + $0x1a8] ss:$48 sps:$4 sm:$0xff]  }
 0x439   : > { %8553 = vmatprep.subr.bf16.mxu1 %v12946_v59  ;;  %v12992_v59 = vld [vmem:[%s13690_s10 + $0x7a8] ss:$48 sps:$4 sm:$0xff]  }
 0x43b   : > { %8513 = vmatpush2.bf16.msra.mxu0 %v12941_v27  ;;  %v12997_v27 = vld [vmem:[%s13690_s10 + $0x14c] ss:$48 sps:$4 sm:$0xff]  }
 0x43c   : > { %8554 = vmatpush2.bf16.msra.mxu1 %v12944_v22  ;;  %8514 = vmatprep.subr.bf16.mxu0 %v12949_v28  ;;  %v13000_v22 = vld [vmem:[%s13690_s10 + $0x74c] ss:$48 sps:$4 sm:$0xff]   ;;  %v12995_v28 = vld [vmem:[%s13690_s10 + $0x148] ss:$48 sps:$4 sm:$0xff]  }
 0x43d   : > { %8555 = vmatprep.subr.bf16.mxu1 %v12952_v31  ;;  %v12998_v31 = vld [vmem:[%s13690_s10 + $0x748] ss:$48 sps:$4 sm:$0xff]  }
 0x43f   : > { %8515 = vmatpush2.bf16.msra.mxu0 %v12947_v1  ;;  %v13003_v1 = vld [vmem:[%s13690_s10 + $0xec] ss:$48 sps:$4 sm:$0xff]  }
 0x440   : > { %8556 = vmatpush2.bf16.msra.mxu1 %v12950_v2  ;;  %8516 = vmatprep.subr.bf16.mxu0 %v12955_v33  ;;  %v13006_v2 = vld [vmem:[%s13690_s10 + $0x6ec] ss:$48 sps:$4 sm:$0xff]   ;;  %v13001_v33 = vld [vmem:[%s13690_s10 + $0xe8] ss:$48 sps:$4 sm:$0xff]  }
 0x441   : > { %8557 = vmatprep.subr.bf16.mxu1 %v12958_v3  ;;  %v13004_v3 = vld [vmem:[%s13690_s10 + $0x6e8] ss:$48 sps:$4 sm:$0xff]  }
 0x443   : > { %8517 = vmatpush2.bf16.msra.mxu0 %v12953_v4  ;;  %v13009_v4 = vld [vmem:[%s13690_s10 + $0x8c] ss:$48 sps:$4 sm:$0xff]  }
 0x444   : > { %8558 = vmatpush2.bf16.msra.mxu1 %v12956_v5  ;;  %8518 = vmatprep.subr.bf16.mxu0 %v12961_v60  ;;  %v13012_v5 = vld [vmem:[%s13690_s10 + $0x68c] ss:$48 sps:$4 sm:$0xff]   ;;  %v13007_v60 = vld [vmem:[%s13690_s10 + $0x88] ss:$48 sps:$4 sm:$0xff]  }
 0x445   : > { %8559 = vmatprep.subr.bf16.mxu1 %v12964_v6  ;;  %v13010_v6 = vld [vmem:[%s13690_s10 + $0x688] ss:$48 sps:$4 sm:$0xff]  }
 0x447   : > { %8519 = vmatpush2.bf16.msra.mxu0 %v12959_v9  ;;  %v13015_v9 = vld [vmem:[%s13690_s10 + $0x2c] ss:$48 sps:$4 sm:$0xff]  }
 0x448   : > { %8560 = vmatpush2.bf16.msra.mxu1 %v12962_v10  ;;  %8520 = vmatprep.subr.bf16.mxu0 %v12967_v11  ;;  %v13018_v10 = vld [vmem:[%s13690_s10 + $0x62c] ss:$48 sps:$4 sm:$0xff]   ;;  %v13013_v11 = vld [vmem:[%s13690_s10 + $0x28] ss:$48 sps:$4 sm:$0xff]  }
 0x449   : > { %8561 = vmatprep.subr.bf16.mxu1 %v12970_v12  ;;  %v13016_v12 = vld [vmem:[%s13690_s10 + $0x628] ss:$48 sps:$4 sm:$0xff]  }
 0x44b   : > { %8521 = vmatpush2.bf16.msra.mxu0 %v12965_v13  ;;  %v13021_v13 = vld [vmem:[%s13690_s10 + $0x5cc] ss:$48 sps:$4 sm:$0xff]  }
 0x44c   : > { %8562 = vmatpush2.bf16.msra.mxu1 %v12968_v14  ;;  %8572 = vmatprep.subr.bf16.mxu0 %v12973_v15  ;;  %v13024_v14 = vld [vmem:[%s13690_s10 + $0xbcc] ss:$48 sps:$4 sm:$0xff]   ;;  %v13019_v15 = vld [vmem:[%s13690_s10 + $0x5c8] ss:$48 sps:$4 sm:$0xff]  }
 0x44d   : > { %8613 = vmatprep.subr.bf16.mxu1 %v12976_v16  ;;  %v13022_v16 = vld [vmem:[%s13690_s10 + $0xbc8] ss:$48 sps:$4 sm:$0xff]  }
 0x44e   : > { %v8278_v57 = vpop.f32.mrf.mxu0  ;;  %8523 = vmatmul.mubr.bf16.vlgmr.msra.gmra.mxu0 %v13965_v35 }
 0x44f   : > { %v8319_v40 = vpop.f32.mrf.mxu1  ;;  %8564 = vmatmul.mubr.bf16.vlgmr.msra.gmra.mxu1 %v13969_v36  ;;  %v8279_v21 = vadd.f32 %v8278_v57, %v8238_v0  ;;  %8573 = vmatpush1.bf16.msra.mxu0 %v12971_v29  ;;  %v13025_v29 = vld [vmem:[%s13690_s10 + $0x568] ss:$48 sps:$4 sm:$0xff]  }
 0x450   : > { %8614 = vmatpush1.bf16.msra.mxu1 %v12974_v30  ;;  %v8280_v23 = vpop.f32.mrf.mxu0  ;;  %8574 = vmatprep.subr.bf16.mxu0 %v12979_v34  ;;  %v13028_v30 = vld [vmem:[%s13690_s10 + $0xb68] ss:$48 sps:$4 sm:$0xff]   ;;  %v13033_v34 = vld [vmem:[%s13690_s10 + $0x50c] ss:$48 sps:$4 sm:$0xff]  }
 0x451   : > { %v8321_v24 = vpop.f32.mrf.mxu1  ;;  %8615 = vmatprep.subr.bf16.mxu1 %v12982_v32  ;;  %v8320_v44 = vadd.f32 %v8319_v40, %v8279_v21  ;;  %v8281_v45 = vadd.f32 %v8280_v23, %v8240_v39  ;;  %8604 = vmatprep.mubr.bf16.mxu0 %v13760_v48  ;;  %v12991_v48 = vld [vmem:[%s13690_s10 + $0x1ac] ss:$48 sps:$4 sm:$0xff]   ;;  %v13031_v0 = vld [vmem:[%s13690_s10 + $0x508] ss:$48 sps:$4 sm:$0xff]  }
 0x452   : > { %8645 = vmatprep.mubr.bf16.mxu1 %v13765_v52  ;;  %v8282_v46 = vpop.f32.mrf.mxu0  ;;  %v12994_v52 = vld [vmem:[%s13690_s10 + $0x7ac] ss:$48 sps:$4 sm:$0xff]   ;;  %v13034_v57 = vld [vmem:[%s13690_s10 + $0xb08] ss:$48 sps:$4 sm:$0xff]  }
 0x453   : > { %v8323_v47 = vpop.f32.mrf.mxu1  ;;  %v8824_v49 = vadd.f32 %v8320_v44, %v382_v41  ;;  %v8322_v50 = vadd.f32 %v8321_v24, %v8281_v45  ;;  %8575 = vmatpush1.bf16.msra.mxu0 %v12977_v61  ;;  %v13036_v32 = vld [vmem:[%s13690_s10 + $0xb0c] ss:$48 sps:$4 sm:$0xff]   ;;  %v13037_v21 = vld [vmem:[%s13690_s10 + $0x4a8] ss:$48 sps:$4 sm:$0xff]  }
 0x454   : > { %8616 = vmatpush1.bf16.msra.mxu1 %v12980_v42  ;;  %v8283_v54 = vpop.f32.mrf.mxu0  ;;  %8576 = vmatprep.subr.bf16.mxu0 %v12985_v62  ;;  %v13039_v40 = vld [vmem:[%s13690_s10 + $0x4ac] ss:$48 sps:$4 sm:$0xff]   ;;  %v13040_v61 = vld [vmem:[%s13690_s10 + $0xaa8] ss:$48 sps:$4 sm:$0xff]  }
 0x455   : > { %v8324_v55 = vpop.f32.mrf.mxu1  ;;  %8617 = vmatprep.subr.bf16.mxu1 %v12988_v43  ;;  %8836 = vst [vmem:[#allocation2 + $0x8] sm:$0xff] %v8824_v49  ;;  %v8825_v56 = vadd.f32 %v8322_v50, %v383_v63  ;;  %v13042_v39 = vld [vmem:[%s13690_s10 + $0xaac] ss:$48 sps:$4 sm:$0xff]   ;;  %v13043_v23 = vld [vmem:[%s13690_s10 + $0x448] ss:$48 sps:$4 sm:$0xff]  }
 0x456   : > { %v13045_v42 = vld [vmem:[%s13690_s10 + $0x44c] ss:$48 sps:$4 sm:$0xff]   ;;  %v13046_v24 = vld [vmem:[%s13690_s10 + $0xa48] ss:$48 sps:$4 sm:$0xff]  }
 0x457   : > { %8837 = vst [vmem:[#allocation2 + $0x38] sm:$0xff] %v8825_v56  ;;  %8577 = vmatpush1.bf16.msra.mxu0 %v12983_v51  ;;  %v13048_v41 = vld [vmem:[%s13690_s10 + $0xa4c] ss:$48 sps:$4 sm:$0xff]   ;;  %v13049_v44 = vld [vmem:[%s13690_s10 + $0x3e8] ss:$48 sps:$4 sm:$0xff]  }
 0x458   : > { %8618 = vmatpush1.bf16.msra.mxu1 %v12986_v53  ;;  %8578 = vmatprep.subr.bf16.mxu0 %v12991_v48  ;;  %v13051_v62 = vld [vmem:[%s13690_s10 + $0x3ec] ss:$48 sps:$4 sm:$0xff]   ;;  %v13052_v45 = vld [vmem:[%s13690_s10 + $0x9e8] ss:$48 sps:$4 sm:$0xff]  }
 0x459   : > { %8619 = vmatprep.subr.bf16.mxu1 %v12994_v52  ;;  %v13054_v43 = vld [vmem:[%s13690_s10 + $0x9ec] ss:$48 sps:$4 sm:$0xff]   ;;  %v13055_v47 = vld [vmem:[%s13690_s10 + $0x388] ss:$48 sps:$4 sm:$0xff]  }
 0x45a   : > { %v13057_v63 = vld [vmem:[%s13690_s10 + $0x38c] ss:$48 sps:$4 sm:$0xff]   ;;  %v13058_v49 = vld [vmem:[%s13690_s10 + $0x988] ss:$48 sps:$4 sm:$0xff]  }
 0x45b   : > { %8579 = vmatpush1.bf16.msra.mxu0 %v12989_v58  ;;  %v13060_v46 = vld [vmem:[%s13690_s10 + $0x98c] ss:$48 sps:$4 sm:$0xff]   ;;  %v13061_v53 = vld [vmem:[%s13690_s10 + $0x328] ss:$48 sps:$4 sm:$0xff]  }
 0x45c   : > { %8620 = vmatpush1.bf16.msra.mxu1 %v12992_v59  ;;  %8580 = vmatprep.subr.bf16.mxu0 %v12997_v27  ;;  %v13063_v50 = vld [vmem:[%s13690_s10 + $0x32c] ss:$48 sps:$4 sm:$0xff]   ;;  %v13064_v54 = vld [vmem:[%s13690_s10 + $0x928] ss:$48 sps:$4 sm:$0xff]  }
 0x45d   : > { %8621 = vmatprep.subr.bf16.mxu1 %v13000_v22  ;;  %v13066_v51 = vld [vmem:[%s13690_s10 + $0x92c] ss:$48 sps:$4 sm:$0xff]   ;;  %v13067_v52 = vld [vmem:[%s13690_s10 + $0xec8] ss:$48 sps:$4 sm:$0xff]  }
 0x45e   : > { %v13069_v55 = vld [vmem:[%s13690_s10 + $0xecc] ss:$48 sps:$4 sm:$0xff]   ;;  %v13070_v56 = vld [vmem:[%s13690_s10 + $0x14c8] ss:$48 sps:$4 sm:$0xff]  }
 0x45f   : > { %8581 = vmatpush1.bf16.msra.mxu0 %v12995_v28  ;;  %v13072_v48 = vld [vmem:[%s13690_s10 + $0x14cc] ss:$48 sps:$4 sm:$0xff]  }
 0x460   : > { %8622 = vmatpush1.bf16.msra.mxu1 %v12998_v31  ;;  %8582 = vmatprep.subr.bf16.mxu0 %v13003_v1  ;;  %v13075_v58 = vld [vmem:[%s13690_s10 + $0xe6c] ss:$48 sps:$4 sm:$0xff]   ;;  %v13073_v31 = vld [vmem:[%s13690_s10 + $0xe68] ss:$48 sps:$4 sm:$0xff]  }
 0x461   : > { %8623 = vmatprep.subr.bf16.mxu1 %v13006_v2  ;;  %v13078_v59 = vld [vmem:[%s13690_s10 + $0x146c] ss:$48 sps:$4 sm:$0xff]   ;;  %v13076_v1 = vld [vmem:[%s13690_s10 + $0x1468] ss:$48 sps:$4 sm:$0xff]  }
 0x463   : > { %8583 = vmatpush1.bf16.msra.mxu0 %v13001_v33 }
 0x464   : > { %8624 = vmatpush1.bf16.msra.mxu1 %v13004_v3  ;;  %8584 = vmatprep.subr.bf16.mxu0 %v13009_v4  ;;  %v13081_v3 = vld [vmem:[%s13690_s10 + $0xe0c] ss:$48 sps:$4 sm:$0xff]  }
 0x465   : > { %8625 = vmatprep.subr.bf16.mxu1 %v13012_v5  ;;  %v13084_v4 = vld [vmem:[%s13690_s10 + $0x140c] ss:$48 sps:$4 sm:$0xff]  }
 0x467   : > { %8585 = vmatpush1.bf16.msra.mxu0 %v13007_v60  ;;  %v13079_v60 = vld [vmem:[%s13690_s10 + $0xe08] ss:$48 sps:$4 sm:$0xff]  }
 0x468   : > { %8626 = vmatpush1.bf16.msra.mxu1 %v13010_v6  ;;  %8586 = vmatprep.subr.bf16.mxu0 %v13015_v9  ;;  %v13082_v6 = vld [vmem:[%s13690_s10 + $0x1408] ss:$48 sps:$4 sm:$0xff]  }
 0x469   : > { %8627 = vmatprep.subr.bf16.mxu1 %v13018_v10 }
 0x46b   : > { %8587 = vmatpush1.bf16.msra.mxu0 %v13013_v11  ;;  %v13087_v11 = vld [vmem:[%s13690_s10 + $0xdac] ss:$48 sps:$4 sm:$0xff]  }
 0x46c   : > { %8628 = vmatpush1.bf16.msra.mxu1 %v13016_v12  ;;  %8588 = vmatprep.subr.bf16.mxu0 %v13021_v13  ;;  %v13088_v12 = vld [vmem:[%s13690_s10 + $0x13a8] ss:$48 sps:$4 sm:$0xff]   ;;  %v13093_v13 = vld [vmem:[%s13690_s10 + $0xd4c] ss:$48 sps:$4 sm:$0xff]  }
 0x46d   : > { %8629 = vmatprep.subr.bf16.mxu1 %v13024_v14  ;;  %v13096_v14 = vld [vmem:[%s13690_s10 + $0x134c] ss:$48 sps:$4 sm:$0xff]  }
 0x46f   : > { %8589 = vmatpush2.bf16.msra.mxu0 %v13019_v15  ;;  %v13091_v15 = vld [vmem:[%s13690_s10 + $0xd48] ss:$48 sps:$4 sm:$0xff]  }
 0x470   : > { %8630 = vmatpush2.bf16.msra.mxu1 %v13022_v16  ;;  %8590 = vmatprep.subr.bf16.mxu0 %v13027_v19  ;;  %v13094_v16 = vld [vmem:[%s13690_s10 + $0x1348] ss:$48 sps:$4 sm:$0xff]   ;;  %v13099_v19 = vld [vmem:[%s13690_s10 + $0xcec] ss:$48 sps:$4 sm:$0xff]  }
 0x471   : > { %8631 = vmatprep.subr.bf16.mxu1 %v13030_v20  ;;  %v13102_v20 = vld [vmem:[%s13690_s10 + $0x12ec] ss:$48 sps:$4 sm:$0xff]  }
 0x473   : > { %8591 = vmatpush2.bf16.msra.mxu0 %v13025_v29  ;;  %v13097_v29 = vld [vmem:[%s13690_s10 + $0xce8] ss:$48 sps:$4 sm:$0xff]  }
 0x474   : > { %8632 = vmatpush2.bf16.msra.mxu1 %v13028_v30  ;;  %8592 = vmatprep.subr.bf16.mxu0 %v13033_v34  ;;  %v13100_v30 = vld [vmem:[%s13690_s10 + $0x12e8] ss:$48 sps:$4 sm:$0xff]   ;;  %v13105_v34 = vld [vmem:[%s13690_s10 + $0xc8c] ss:$48 sps:$4 sm:$0xff]  }
 0x475   : > { %8633 = vmatprep.subr.bf16.mxu1 %v13036_v32  ;;  %v13108_v32 = vld [vmem:[%s13690_s10 + $0x128c] ss:$48 sps:$4 sm:$0xff]  }
 0x477   : > { %8593 = vmatpush2.bf16.msra.mxu0 %v13031_v0  ;;  %v13103_v0 = vld [vmem:[%s13690_s10 + $0xc88] ss:$48 sps:$4 sm:$0xff]  }
 0x478   : > { %8634 = vmatpush2.bf16.msra.mxu1 %v13034_v57  ;;  %8594 = vmatprep.subr.bf16.mxu0 %v13039_v40  ;;  %v13106_v57 = vld [vmem:[%s13690_s10 + $0x1288] ss:$48 sps:$4 sm:$0xff]   ;;  %v13111_v40 = vld [vmem:[%s13690_s10 + $0xc2c] ss:$48 sps:$4 sm:$0xff]  }
 0x479   : > { %8635 = vmatprep.subr.bf16.mxu1 %v13042_v39  ;;  %v13114_v39 = vld [vmem:[%s13690_s10 + $0x122c] ss:$48 sps:$4 sm:$0xff]  }
 0x47b   : > { %8595 = vmatpush2.bf16.msra.mxu0 %v13037_v21  ;;  %v13109_v21 = vld [vmem:[%s13690_s10 + $0xc28] ss:$48 sps:$4 sm:$0xff]  }
 0x47c   : > { %8636 = vmatpush2.bf16.msra.mxu1 %v13040_v61  ;;  %8596 = vmatprep.subr.bf16.mxu0 %v13045_v42  ;;  %v13112_v61 = vld [vmem:[%s13690_s10 + $0x1228] ss:$48 sps:$4 sm:$0xff]   ;;  %v13117_v42 = vld [vmem:[%s13690_s10 + $0x11cc] ss:$48 sps:$4 sm:$0xff]  }
 0x47d   : > { %8637 = vmatprep.subr.bf16.mxu1 %v13048_v41  ;;  %v13120_v41 = vld [vmem:[%s13690_s10 + $0x17cc] ss:$48 sps:$4 sm:$0xff]  }
 0x47f   : > { %8597 = vmatpush2.bf16.msra.mxu0 %v13043_v23  ;;  %v13115_v23 = vld [vmem:[%s13690_s10 + $0x11c8] ss:$48 sps:$4 sm:$0xff]  }
 0x480   : > { %8638 = vmatpush2.bf16.msra.mxu1 %v13046_v24  ;;  %8598 = vmatprep.subr.bf16.mxu0 %v13051_v62  ;;  %v13118_v24 = vld [vmem:[%s13690_s10 + $0x17c8] ss:$48 sps:$4 sm:$0xff]   ;;  %v13123_v62 = vld [vmem:[%s13690_s10 + $0x116c] ss:$48 sps:$4 sm:$0xff]  }
 0x481   : > { %8639 = vmatprep.subr.bf16.mxu1 %v13054_v43  ;;  %v13126_v43 = vld [vmem:[%s13690_s10 + $0x176c] ss:$48 sps:$4 sm:$0xff]  }
 0x483   : > { %8599 = vmatpush2.bf16.msra.mxu0 %v13049_v44  ;;  %v13121_v44 = vld [vmem:[%s13690_s10 + $0x1168] ss:$48 sps:$4 sm:$0xff]  }
 0x484   : > { %8640 = vmatpush2.bf16.msra.mxu1 %v13052_v45  ;;  %8600 = vmatprep.subr.bf16.mxu0 %v13057_v63  ;;  %v13124_v45 = vld [vmem:[%s13690_s10 + $0x1768] ss:$48 sps:$4 sm:$0xff]   ;;  %v13129_v63 = vld [vmem:[%s13690_s10 + $0x110c] ss:$48 sps:$4 sm:$0xff]  }
 0x485   : > { %8641 = vmatprep.subr.bf16.mxu1 %v13060_v46  ;;  %v13132_v46 = vld [vmem:[%s13690_s10 + $0x170c] ss:$48 sps:$4 sm:$0xff]  }
 0x487   : > { %8601 = vmatpush2.bf16.msra.mxu0 %v13055_v47  ;;  %v13127_v47 = vld [vmem:[%s13690_s10 + $0x1108] ss:$48 sps:$4 sm:$0xff]  }
 0x488   : > { %8642 = vmatpush2.bf16.msra.mxu1 %v13058_v49  ;;  %8602 = vmatprep.subr.bf16.mxu0 %v13063_v50  ;;  %v13130_v49 = vld [vmem:[%s13690_s10 + $0x1708] ss:$48 sps:$4 sm:$0xff]   ;;  %v13135_v50 = vld [vmem:[%s13690_s10 + $0x10ac] ss:$48 sps:$4 sm:$0xff]  }
 0x489   : > { %8643 = vmatprep.subr.bf16.mxu1 %v13066_v51  ;;  %v13138_v51 = vld [vmem:[%s13690_s10 + $0x16ac] ss:$48 sps:$4 sm:$0xff]  }
 0x48b   : > { %8603 = vmatpush2.bf16.msra.mxu0 %v13061_v53  ;;  %v13133_v53 = vld [vmem:[%s13690_s10 + $0x10a8] ss:$48 sps:$4 sm:$0xff]  }
 0x48c   : > { %8644 = vmatpush2.bf16.msra.mxu1 %v13064_v54  ;;  %8654 = vmatprep.subr.bf16.mxu0 %v13069_v55  ;;  %v13136_v54 = vld [vmem:[%s13690_s10 + $0x16a8] ss:$48 sps:$4 sm:$0xff]   ;;  %v13141_v55 = vld [vmem:[%s13690_s10 + $0x104c] ss:$48 sps:$4 sm:$0xff]  }
 0x48d   : > { %8695 = vmatprep.subr.bf16.mxu1 %v13072_v48  ;;  %v13144_v48 = vld [vmem:[%s13690_s10 + $0x164c] ss:$48 sps:$4 sm:$0xff]  }
 0x48e   : > { %v8360_v27 = vpop.f32.mrf.mxu0  ;;  %8605 = vmatmul.mubr.bf16.vlgmr.msra.gmra.mxu0 %v13787_v7 }
 0x48f   : > { %v8401_v22 = vpop.f32.mrf.mxu1  ;;  %8646 = vmatmul.mubr.bf16.vlgmr.msra.gmra.mxu1 %v13789_v8  ;;  %8655 = vmatpush1.bf16.msra.mxu0 %v13067_v52  ;;  %v13139_v52 = vld [vmem:[%s13690_s10 + $0x1048] ss:$48 sps:$4 sm:$0xff]  }
 0x490   : > { %v14933_v28 = vadd.f32 %v8401_v22, %v8360_v27  ;;  %8696 = vmatpush1.bf16.msra.mxu1 %v13070_v56  ;;  %v8362_v2 = vpop.f32.mrf.mxu0  ;;  %8656 = vmatprep.subr.bf16.mxu0 %v13075_v58  ;;  %v13142_v56 = vld [vmem:[%s13690_s10 + $0x1648] ss:$48 sps:$4 sm:$0xff]   ;;  %v13147_v58 = vld [vmem:[%s13690_s10 + $0xfec] ss:$48 sps:$4 sm:$0xff]  }
 0x491   : > { %v8403_v33 = vpop.f32.mrf.mxu1  ;;  %8697 = vmatprep.subr.bf16.mxu1 %v13078_v59  ;;  %8686 = vmatprep.mubr.bf16.mxu0 %v13827_v37  ;;  %v13090_v37 = vld [vmem:[%s13690_s10 + $0x13ac] ss:$48 sps:$4 sm:$0xff]   ;;  %v13145_v27 = vld [vmem:[%s13690_s10 + $0xfe8] ss:$48 sps:$4 sm:$0xff]  }
 0x492   : > { %v14939_v5 = vadd.f32 %v8403_v33, %v8362_v2  ;;  %8727 = vmatprep.mubr.bf16.mxu1 %v13831_v38  ;;  %v8364_v7 = vpop.f32.mrf.mxu0  ;;  %v13085_v38 = vld [vmem:[%s13690_s10 + $0xda8] ss:$48 sps:$4 sm:$0xff]   ;;  %v13150_v59 = vld [vmem:[%s13690_s10 + $0x15ec] ss:$48 sps:$4 sm:$0xff]  }
 0x493   : > { %v8405_v8 = vpop.f32.mrf.mxu1  ;;  %8657 = vmatpush1.bf16.msra.mxu0 %v13073_v31  ;;  %v13148_v22 = vld [vmem:[%s13690_s10 + $0x15e8] ss:$48 sps:$4 sm:$0xff]   ;;  %v13153_v31 = vld [vmem:[%s13690_s10 + $0xf8c] ss:$48 sps:$4 sm:$0xff]  }
 0x494   : > { %8698 = vmatpush1.bf16.msra.mxu1 %v13076_v1  ;;  %v8365_v9 = vpop.f32.mrf.mxu0  ;;  %8658 = vmatprep.subr.bf16.mxu0 %v13081_v3  ;;  %v13156_v1 = vld [vmem:[%s13690_s10 + $0x158c] ss:$48 sps:$4 sm:$0xff]   ;;  %v13151_v2 = vld [vmem:[%s13690_s10 + $0xf88] ss:$48 sps:$4 sm:$0xff]  }
 0x495   : > { %v8406_v10 = vpop.f32.mrf.mxu1  ;;  %8699 = vmatprep.subr.bf16.mxu1 %v13084_v4  ;;  %v13154_v33 = vld [vmem:[%s13690_s10 + $0x1588] ss:$48 sps:$4 sm:$0xff]   ;;  %v13159_v3 = vld [vmem:[%s13690_s10 + $0xf2c] ss:$48 sps:$4 sm:$0xff]  }
 0x496   : > { %v13162_v4 = vld [vmem:[%s13690_s10 + $0x152c] ss:$48 sps:$4 sm:$0xff]   ;;  %v13157_v7 = vld [vmem:[%s13690_s10 + $0xf28] ss:$48 sps:$4 sm:$0xff]  }
 0x497   : > { %8659 = vmatpush1.bf16.msra.mxu0 %v13079_v60  ;;  %v13160_v8 = vld [vmem:[%s13690_s10 + $0x1528] ss:$48 sps:$4 sm:$0xff]   ;;  %v13165_v60 = vld [vmem:[%s13690_s10 + $0x1acc] ss:$48 sps:$4 sm:$0xff]  }
 0x498   : > { %8700 = vmatpush1.bf16.msra.mxu1 %v13082_v6  ;;  %8660 = vmatprep.subr.bf16.mxu0 %v13087_v11  ;;  %v13168_v6 = vld [vmem:[%s13690_s10 + $0x20cc] ss:$48 sps:$4 sm:$0xff]   ;;  %v13163_v9 = vld [vmem:[%s13690_s10 + $0x1ac8] ss:$48 sps:$4 sm:$0xff]  }
 0x499   : > { %8701 = vmatprep.subr.bf16.mxu1 %v13090_v37  ;;  %v13166_v10 = vld [vmem:[%s13690_s10 + $0x20c8] ss:$48 sps:$4 sm:$0xff]   ;;  %v13171_v11 = vld [vmem:[%s13690_s10 + $0x1a6c] ss:$48 sps:$4 sm:$0xff]  }
 0x49a   : > { %v13174_v37 = vld [vmem:[%s13690_s10 + $0x206c] ss:$48 sps:$4 sm:$0xff]  }
 0x49b   : > { %8661 = vmatpush1.bf16.msra.mxu0 %v13085_v38 }
 0x49c   : > { %8702 = vmatpush1.bf16.msra.mxu1 %v13088_v12  ;;  %8662 = vmatprep.subr.bf16.mxu0 %v13093_v13  ;;  %v13169_v13 = vld [vmem:[%s13690_s10 + $0x1a68] ss:$48 sps:$4 sm:$0xff]  }
 0x49d   : > { %8703 = vmatprep.subr.bf16.mxu1 %v13096_v14  ;;  %v13172_v14 = vld [vmem:[%s13690_s10 + $0x2068] ss:$48 sps:$4 sm:$0xff]  }
 0x49f   : > { %8663 = vmatpush1.bf16.msra.mxu0 %v13091_v15 }
 0x4a0   : > { %8704 = vmatpush1.bf16.msra.mxu1 %v13094_v16  ;;  %8664 = vmatprep.subr.bf16.mxu0 %v13099_v19  ;;  %v13177_v19 = vld [vmem:[%s13690_s10 + $0x1a0c] ss:$48 sps:$4 sm:$0xff]  }
 0x4a1   : > { %8705 = vmatprep.subr.bf16.mxu1 %v13102_v20  ;;  %v13180_v20 = vld [vmem:[%s13690_s10 + $0x200c] ss:$48 sps:$4 sm:$0xff]  }
 0x4a3   : > { %8665 = vmatpush1.bf16.msra.mxu0 %v13097_v29  ;;  %v13175_v29 = vld [vmem:[%s13690_s10 + $0x1a08] ss:$48 sps:$4 sm:$0xff]  }
 0x4a4   : > { %8706 = vmatpush1.bf16.msra.mxu1 %v13100_v30  ;;  %8666 = vmatprep.subr.bf16.mxu0 %v13105_v34  ;;  %v13178_v30 = vld [vmem:[%s13690_s10 + $0x2008] ss:$48 sps:$4 sm:$0xff]  }
 0x4a5   : > { %8707 = vmatprep.subr.bf16.mxu1 %v13108_v32 }
 0x4a7   : > { %8667 = vmatpush1.bf16.msra.mxu0 %v13103_v0  ;;  %v13183_v0 = vld [vmem:[%s13690_s10 + $0x19ac] ss:$48 sps:$4 sm:$0xff]  }
 0x4a8   : > { %8708 = vmatpush1.bf16.msra.mxu1 %v13106_v57  ;;  %8668 = vmatprep.subr.bf16.mxu0 %v13111_v40  ;;  %v13184_v57 = vld [vmem:[%s13690_s10 + $0x1fa8] ss:$48 sps:$4 sm:$0xff]   ;;  %v13189_v40 = vld [vmem:[%s13690_s10 + $0x194c] ss:$48 sps:$4 sm:$0xff]  }
 0x4a9   : > { %8709 = vmatprep.subr.bf16.mxu1 %v13114_v39  ;;  %v13192_v39 = vld [vmem:[%s13690_s10 + $0x1f4c] ss:$48 sps:$4 sm:$0xff]  }
 0x4ab   : > { %8669 = vmatpush1.bf16.msra.mxu0 %v13109_v21  ;;  %v13187_v21 = vld [vmem:[%s13690_s10 + $0x1948] ss:$48 sps:$4 sm:$0xff]  }
 0x4ac   : > { %8710 = vmatpush1.bf16.msra.mxu1 %v13112_v61  ;;  %8670 = vmatprep.subr.bf16.mxu0 %v13117_v42  ;;  %v13190_v61 = vld [vmem:[%s13690_s10 + $0x1f48] ss:$48 sps:$4 sm:$0xff]   ;;  %v13195_v42 = vld [vmem:[%s13690_s10 + $0x18ec] ss:$48 sps:$4 sm:$0xff]  }
 0x4ad   : > { %8711 = vmatprep.subr.bf16.mxu1 %v13120_v41  ;;  %v13198_v41 = vld [vmem:[%s13690_s10 + $0x1eec] ss:$48 sps:$4 sm:$0xff]  }
 0x4af   : > { %8671 = vmatpush2.bf16.msra.mxu0 %v13115_v23  ;;  %v13193_v23 = vld [vmem:[%s13690_s10 + $0x18e8] ss:$48 sps:$4 sm:$0xff]  }
 0x4b0   : > { %8712 = vmatpush2.bf16.msra.mxu1 %v13118_v24  ;;  %8672 = vmatprep.subr.bf16.mxu0 %v13123_v62  ;;  %v13196_v24 = vld [vmem:[%s13690_s10 + $0x1ee8] ss:$48 sps:$4 sm:$0xff]   ;;  %v13201_v62 = vld [vmem:[%s13690_s10 + $0x188c] ss:$48 sps:$4 sm:$0xff]  }
 0x4b1   : > { %8713 = vmatprep.subr.bf16.mxu1 %v13126_v43  ;;  %v13204_v43 = vld [vmem:[%s13690_s10 + $0x1e8c] ss:$48 sps:$4 sm:$0xff]  }
 0x4b3   : > { %8673 = vmatpush2.bf16.msra.mxu0 %v13121_v44  ;;  %v13199_v44 = vld [vmem:[%s13690_s10 + $0x1888] ss:$48 sps:$4 sm:$0xff]  }
 0x4b4   : > { %8714 = vmatpush2.bf16.msra.mxu1 %v13124_v45  ;;  %8674 = vmatprep.subr.bf16.mxu0 %v13129_v63  ;;  %v13202_v45 = vld [vmem:[%s13690_s10 + $0x1e88] ss:$48 sps:$4 sm:$0xff]   ;;  %v13207_v63 = vld [vmem:[%s13690_s10 + $0x182c] ss:$48 sps:$4 sm:$0xff]  }
 0x4b5   : > { %8715 = vmatprep.subr.bf16.mxu1 %v13132_v46  ;;  %v13210_v46 = vld [vmem:[%s13690_s10 + $0x1e2c] ss:$48 sps:$4 sm:$0xff]  }
 0x4b7   : > { %8675 = vmatpush2.bf16.msra.mxu0 %v13127_v47  ;;  %v13205_v47 = vld [vmem:[%s13690_s10 + $0x1828] ss:$48 sps:$4 sm:$0xff]  }
 0x4b8   : > { %8716 = vmatpush2.bf16.msra.mxu1 %v13130_v49  ;;  %8676 = vmatprep.subr.bf16.mxu0 %v13135_v50  ;;  %v13208_v49 = vld [vmem:[%s13690_s10 + $0x1e28] ss:$48 sps:$4 sm:$0xff]   ;;  %v13213_v50 = vld [vmem:[%s13690_s10 + $0x1dcc] ss:$48 sps:$4 sm:$0xff]  }
 0x4b9   : > { %8717 = vmatprep.subr.bf16.mxu1 %v13138_v51  ;;  %v13216_v51 = vld [vmem:[%s13690_s10 + $0x23cc] ss:$48 sps:$4 sm:$0xff]  }
 0x4bb   : > { %8677 = vmatpush2.bf16.msra.mxu0 %v13133_v53  ;;  %v13211_v53 = vld [vmem:[%s13690_s10 + $0x1dc8] ss:$48 sps:$4 sm:$0xff]  }
 0x4bc   : > { %8718 = vmatpush2.bf16.msra.mxu1 %v13136_v54  ;;  %8678 = vmatprep.subr.bf16.mxu0 %v13141_v55  ;;  %v13214_v54 = vld [vmem:[%s13690_s10 + $0x23c8] ss:$48 sps:$4 sm:$0xff]   ;;  %v13219_v55 = vld [vmem:[%s13690_s10 + $0x1d6c] ss:$48 sps:$4 sm:$0xff]  }
 0x4bd   : > { %8719 = vmatprep.subr.bf16.mxu1 %v13144_v48  ;;  %v13222_v48 = vld [vmem:[%s13690_s10 + $0x236c] ss:$48 sps:$4 sm:$0xff]  }
 0x4bf   : > { %8679 = vmatpush2.bf16.msra.mxu0 %v13139_v52  ;;  %v13217_v52 = vld [vmem:[%s13690_s10 + $0x1d68] ss:$48 sps:$4 sm:$0xff]  }
 0x4c0   : > { %8720 = vmatpush2.bf16.msra.mxu1 %v13142_v56  ;;  %8680 = vmatprep.subr.bf16.mxu0 %v13147_v58  ;;  %v13220_v56 = vld [vmem:[%s13690_s10 + $0x2368] ss:$48 sps:$4 sm:$0xff]   ;;  %v13225_v58 = vld [vmem:[%s13690_s10 + $0x1d0c] ss:$48 sps:$4 sm:$0xff]  }
 0x4c1   : > { %8721 = vmatprep.subr.bf16.mxu1 %v13150_v59  ;;  %v13228_v59 = vld [vmem:[%s13690_s10 + $0x230c] ss:$48 sps:$4 sm:$0xff]  }
 0x4c3   : > { %8681 = vmatpush2.bf16.msra.mxu0 %v13145_v27  ;;  %v13223_v27 = vld [vmem:[%s13690_s10 + $0x1d08] ss:$48 sps:$4 sm:$0xff]  }
 0x4c4   : > { %8722 = vmatpush2.bf16.msra.mxu1 %v13148_v22  ;;  %8682 = vmatprep.subr.bf16.mxu0 %v13153_v31  ;;  %v13226_v22 = vld [vmem:[%s13690_s10 + $0x2308] ss:$48 sps:$4 sm:$0xff]   ;;  %v13231_v31 = vld [vmem:[%s13690_s10 + $0x1cac] ss:$48 sps:$4 sm:$0xff]  }
 0x4c5   : > { %8723 = vmatprep.subr.bf16.mxu1 %v13156_v1  ;;  %v13234_v1 = vld [vmem:[%s13690_s10 + $0x22ac] ss:$48 sps:$4 sm:$0xff]  }
 0x4c7   : > { %8683 = vmatpush2.bf16.msra.mxu0 %v13151_v2  ;;  %v13229_v2 = vld [vmem:[%s13690_s10 + $0x1ca8] ss:$48 sps:$4 sm:$0xff]  }
 0x4c8   : > { %8724 = vmatpush2.bf16.msra.mxu1 %v13154_v33  ;;  %8684 = vmatprep.subr.bf16.mxu0 %v13159_v3  ;;  %v13232_v33 = vld [vmem:[%s13690_s10 + $0x22a8] ss:$48 sps:$4 sm:$0xff]   ;;  %v13237_v3 = vld [vmem:[%s13690_s10 + $0x1c4c] ss:$48 sps:$4 sm:$0xff]  }
 0x4c9   : > { %8725 = vmatprep.subr.bf16.mxu1 %v13162_v4  ;;  %v13240_v4 = vld [vmem:[%s13690_s10 + $0x224c] ss:$48 sps:$4 sm:$0xff]  }
 0x4cb   : > { %8685 = vmatpush2.bf16.msra.mxu0 %v13157_v7  ;;  %v13235_v7 = vld [vmem:[%s13690_s10 + $0x1c48] ss:$48 sps:$4 sm:$0xff]  }
 0x4cc   : > { %8726 = vmatpush2.bf16.msra.mxu1 %v13160_v8  ;;  %8736 = vmatprep.subr.bf16.mxu0 %v13165_v60  ;;  %v13238_v8 = vld [vmem:[%s13690_s10 + $0x2248] ss:$48 sps:$4 sm:$0xff]   ;;  %v13243_v60 = vld [vmem:[%s13690_s10 + $0x1bec] ss:$48 sps:$4 sm:$0xff]  }
 0x4cd   : > { %8777 = vmatprep.subr.bf16.mxu1 %v13168_v6  ;;  %v13246_v6 = vld [vmem:[%s13690_s10 + $0x21ec] ss:$48 sps:$4 sm:$0xff]  }
 0x4ce   : > { %v15003_v38 = vpop.f32.mrf.mxu0  ;;  %8687 = vmatmul.mubr.bf16.vlgmr.msra.gmra.mxu0 %v13875_v17 }
 0x4cf   : > { %v15005_v12 = vpop.f32.mrf.mxu1  ;;  %8728 = vmatmul.mubr.bf16.vlgmr.msra.gmra.mxu1 %v13879_v18  ;;  %8737 = vmatpush1.bf16.msra.mxu0 %v13163_v9  ;;  %v13241_v9 = vld [vmem:[%s13690_s10 + $0x1be8] ss:$48 sps:$4 sm:$0xff]  }
 0x4d0   : > { %8778 = vmatpush1.bf16.msra.mxu1 %v13166_v10  ;;  %v15011_v15 = vpop.f32.mrf.mxu0  ;;  %8738 = vmatprep.subr.bf16.mxu0 %v13171_v11  ;;  %v13244_v10 = vld [vmem:[%s13690_s10 + $0x21e8] ss:$48 sps:$4 sm:$0xff]   ;;  %v13249_v11 = vld [vmem:[%s13690_s10 + $0x1b8c] ss:$48 sps:$4 sm:$0xff]  }
 0x4d1   : > { %v15013_v16 = vpop.f32.mrf.mxu1  ;;  %8779 = vmatprep.subr.bf16.mxu1 %v13174_v37  ;;  %8768 = vmatprep.mubr.bf16.mxu0 %v13893_v25  ;;  %v13186_v25 = vld [vmem:[%s13690_s10 + $0x1fac] ss:$48 sps:$4 sm:$0xff]  }
 0x4d2   : > { %8809 = vmatprep.mubr.bf16.mxu1 %v13897_v26  ;;  %v8446_v17 = vpop.f32.mrf.mxu0  ;;  %v13181_v26 = vld [vmem:[%s13690_s10 + $0x19a8] ss:$48 sps:$4 sm:$0xff]   ;;  %v13252_v37 = vld [vmem:[%s13690_s10 + $0x218c] ss:$48 sps:$4 sm:$0xff]  }
 0x4d3   : > { %v8487_v18 = vpop.f32.mrf.mxu1  ;;  %8739 = vmatpush1.bf16.msra.mxu0 %v13169_v13  ;;  %v13247_v13 = vld [vmem:[%s13690_s10 + $0x1b88] ss:$48 sps:$4 sm:$0xff]  }
 0x4d4   : > { %8780 = vmatpush1.bf16.msra.mxu1 %v13172_v14  ;;  %v8447_v34 = vpop.f32.mrf.mxu0  ;;  %8740 = vmatprep.subr.bf16.mxu0 %v13177_v19  ;;  %v13250_v14 = vld [vmem:[%s13690_s10 + $0x2188] ss:$48 sps:$4 sm:$0xff]   ;;  %v13255_v19 = vld [vmem:[%s13690_s10 + $0x1b2c] ss:$48 sps:$4 sm:$0xff]  }
 0x4d5   : > { %v8488_v32 = vpop.f32.mrf.mxu1  ;;  %8781 = vmatprep.subr.bf16.mxu1 %v13180_v20  ;;  %v13258_v20 = vld [vmem:[%s13690_s10 + $0x212c] ss:$48 sps:$4 sm:$0xff]   ;;  %v13253_v17 = vld [vmem:[%s13690_s10 + $0x1b28] ss:$48 sps:$4 sm:$0xff]  }
 0x4d6   : > { %v13256_v18 = vld [vmem:[%s13690_s10 + $0x2128] ss:$48 sps:$4 sm:$0xff]  }
 0x4d7   : > { %8741 = vmatpush1.bf16.msra.mxu0 %v13175_v29  ;;  %v8443_v29 = vadd.f32 %v15003_v38, %v14933_v28 }
 0x4d8   : > { %8782 = vmatpush1.bf16.msra.mxu1 %v13178_v30  ;;  %8742 = vmatprep.subr.bf16.mxu0 %v13183_v0  ;;  %v8445_v30 = vadd.f32 %v15011_v15, %v14939_v5 }
 0x4d9   : > { %8783 = vmatprep.subr.bf16.mxu1 %v13186_v25  ;;  %v8484_v34 = vadd.f32 %v15005_v12, %v8443_v29 }
 0x4da   : > { %v8486_v25 = vadd.f32 %v15013_v16, %v8445_v30 }
 0x4db   : > { %8743 = vmatpush1.bf16.msra.mxu0 %v13181_v26 }
 0x4dc   : > { %8784 = vmatpush1.bf16.msra.mxu1 %v13184_v57  ;;  %8744 = vmatprep.subr.bf16.mxu0 %v13189_v40  ;;  %v384_v57 = vld [vmem:[#allocation2 + $0x28] sm:$0xff] }
 0x4dd   : > { %8785 = vmatprep.subr.bf16.mxu1 %v13192_v39 }
 0x4df   : > { %8745 = vmatpush1.bf16.msra.mxu0 %v13187_v21  ;;  %v385_v21 = vld [vmem:[#allocation2 + $0x48] sm:$0xff] }
 0x4e0   : > { %8786 = vmatpush1.bf16.msra.mxu1 %v13190_v61  ;;  %8746 = vmatprep.subr.bf16.mxu0 %v13195_v42 }
 0x4e1   : > { %8787 = vmatprep.subr.bf16.mxu1 %v13198_v41 }
 0x4e3   : > { %8747 = vmatpush1.bf16.msra.mxu0 %v13193_v23 }
 0x4e4   : > { %8788 = vmatpush1.bf16.msra.mxu1 %v13196_v24  ;;  %8748 = vmatprep.subr.bf16.mxu0 %v13201_v62 }
 0x4e5   : > { %8789 = vmatprep.subr.bf16.mxu1 %v13204_v43 }
 0x4e7   : > { %8749 = vmatpush1.bf16.msra.mxu0 %v13199_v44 }
 0x4e8   : > { %8790 = vmatpush1.bf16.msra.mxu1 %v13202_v45  ;;  %8750 = vmatprep.subr.bf16.mxu0 %v13207_v63 }
 0x4e9   : > { %8791 = vmatprep.subr.bf16.mxu1 %v13210_v46 }
 0x4eb   : > { %8751 = vmatpush1.bf16.msra.mxu0 %v13205_v47 }
 0x4ec   : > { %8792 = vmatpush1.bf16.msra.mxu1 %v13208_v49  ;;  %8752 = vmatprep.subr.bf16.mxu0 %v13213_v50 }
 0x4ed   : > { %8793 = vmatprep.subr.bf16.mxu1 %v13216_v51 }
 0x4ef   : > { %8753 = vmatpush2.bf16.msra.mxu0 %v13211_v53 }
 0x4f0   : > { %8794 = vmatpush2.bf16.msra.mxu1 %v13214_v54  ;;  %8754 = vmatprep.subr.bf16.mxu0 %v13219_v55 }
 0x4f1   : > { %8795 = vmatprep.subr.bf16.mxu1 %v13222_v48 }
 0x4f3   : > { %8755 = vmatpush2.bf16.msra.mxu0 %v13217_v52 }
 0x4f4   : > { %8796 = vmatpush2.bf16.msra.mxu1 %v13220_v56  ;;  %8756 = vmatprep.subr.bf16.mxu0 %v13225_v58 }
 0x4f5   : > { %8797 = vmatprep.subr.bf16.mxu1 %v13228_v59 }
 0x4f7   : > { %8757 = vmatpush2.bf16.msra.mxu0 %v13223_v27 }
 0x4f8   : > { %8798 = vmatpush2.bf16.msra.mxu1 %v13226_v22  ;;  %8758 = vmatprep.subr.bf16.mxu0 %v13231_v31 }
 0x4f9   : > { %8799 = vmatprep.subr.bf16.mxu1 %v13234_v1  ;;  %v386_v1 = vld [vmem:[#allocation2 + $0x10] sm:$0xff] }
 0x4fb   : > { %8759 = vmatpush2.bf16.msra.mxu0 %v13229_v2 }
 0x4fc   : > { %8800 = vmatpush2.bf16.msra.mxu1 %v13232_v33  ;;  %8760 = vmatprep.subr.bf16.mxu0 %v13237_v3 }
 0x4fd   : > { %8801 = vmatprep.subr.bf16.mxu1 %v13240_v4 }
 0x4ff   : > { %8761 = vmatpush2.bf16.msra.mxu0 %v13235_v7  ;;  %v387_v7 = vld [vmem:[#allocation2 + $0x40] sm:$0xff] }
 0x500   : > { %8802 = vmatpush2.bf16.msra.mxu1 %v13238_v8  ;;  %8762 = vmatprep.subr.bf16.mxu0 %v13243_v60 }
 0x501   : > { %8803 = vmatprep.subr.bf16.mxu1 %v13246_v6 }
 0x503   : > { %8763 = vmatpush2.bf16.msra.mxu0 %v13241_v9 }
 0x504   : > { %8804 = vmatpush2.bf16.msra.mxu1 %v13244_v10  ;;  %8764 = vmatprep.subr.bf16.mxu0 %v13249_v11 }
 0x505   : > { %8805 = vmatprep.subr.bf16.mxu1 %v13252_v37 }
 0x507   : > { %8765 = vmatpush2.bf16.msra.mxu0 %v13247_v13 }
 0x508   : > { %8806 = vmatpush2.bf16.msra.mxu1 %v13250_v14  ;;  %8766 = vmatprep.subr.bf16.mxu0 %v13255_v19 }
 0x509   : > { %8807 = vmatprep.subr.bf16.mxu1 %v13258_v20 }
 0x50b   : > { %8767 = vmatpush2.bf16.msra.mxu0 %v13253_v17 }
 0x50c   : > { %8808 = vmatpush2.bf16.msra.mxu1 %v13256_v18 }
 0x50e   : > { %v8524_v32 = vpop.f32.mrf.mxu0  ;;  %8769 = vmatmul.mubr.bf16.vlgmr.msra.gmra.mxu0 %v13965_v35 }
 0x50f   : > { %v8565_v0 = vpop.f32.mrf.mxu1  ;;  %8810 = vmatmul.mubr.bf16.vlgmr.msra.gmra.mxu1 %v13969_v36  ;;  %v8525_v26 = vadd.f32 %v8524_v32, %v8484_v34 }
 0x510   : > { %v8526_v40 = vpop.f32.mrf.mxu0 }
 0x511   : > { %v8567_v39 = vpop.f32.mrf.mxu1  ;;  %v8566_v28 = vadd.f32 %v8565_v0, %v8525_v26  ;;  %v8527_v38 = vadd.f32 %v8526_v40, %v8486_v25 }
 0x512   : > { %v8528_v5 = vpop.f32.mrf.mxu0 }
 0x513   : > { %v8569_v15 = vpop.f32.mrf.mxu1  ;;  %v8826_v61 = vadd.f32 %v8566_v28, %v384_v57  ;;  %v8568_v42 = vadd.f32 %v8567_v39, %v8527_v38 }
 0x514   : > { %v8529_v12 = vpop.f32.mrf.mxu0 }
 0x515   : > { %v8570_v41 = vpop.f32.mrf.mxu1  ;;  %8838 = vst [vmem:[#allocation2 + $0x28] sm:$0xff] %v8826_v61  ;;  %v8827_v23 = vadd.f32 %v8568_v42, %v385_v21 }
 0x517   : > { %8839 = vst [vmem:[#allocation2 + $0x48] sm:$0xff] %v8827_v23 }
 0x54e   : > { %v8606_v35 = vpop.f32.mrf.mxu0 }
 0x54f   : > { %v8647_v36 = vpop.f32.mrf.mxu1 }
 0x550   : > { %v8648_v24 = vadd.f32 %v8647_v36, %v8606_v35  ;;  %v8608_v16 = vpop.f32.mrf.mxu0 }
 0x551   : > { %v8649_v62 = vpop.f32.mrf.mxu1 }
 0x552   : > { %v8650_v43 = vadd.f32 %v8649_v62, %v8608_v16  ;;  %v8610_v44 = vpop.f32.mrf.mxu0 }
 0x553   : > { %v8651_v45 = vpop.f32.mrf.mxu1 }
 0x554   : > { %v8611_v63 = vpop.f32.mrf.mxu0 }
 0x555   : > { %v8652_v46 = vpop.f32.mrf.mxu1 }
 0x58e   : > { %v8688_v47 = vpop.f32.mrf.mxu0 }
 0x58f   : > { %v8729_v49 = vpop.f32.mrf.mxu1  ;;  %v8689_v52 = vadd.f32 %v8688_v47, %v8648_v24 }
 0x590   : > { %v8690_v50 = vpop.f32.mrf.mxu0 }
 0x591   : > { %v8731_v51 = vpop.f32.mrf.mxu1  ;;  %v8691_v56 = vadd.f32 %v8690_v50, %v8650_v43  ;;  %v8730_v58 = vadd.f32 %v8729_v49, %v8689_v52 }
 0x592   : > { %v8692_v53 = vpop.f32.mrf.mxu0 }
 0x593   : > { %v8733_v54 = vpop.f32.mrf.mxu1  ;;  %v8732_v22 = vadd.f32 %v8731_v51, %v8691_v56 }
 0x594   : > { %v8693_v55 = vpop.f32.mrf.mxu0 }
 0x595   : > { %v8734_v48 = vpop.f32.mrf.mxu1 }
 0x5ce   : > { %v8770_v59 = vpop.f32.mrf.mxu0 }
 0x5cf   : > { %v8811_v27 = vpop.f32.mrf.mxu1  ;;  %v8771_v31 = vadd.f32 %v8770_v59, %v8730_v58 }
 0x5d0   : > { %v8772_v2 = vpop.f32.mrf.mxu0 }
 0x5d1   : > { %v8813_v33 = vpop.f32.mrf.mxu1  ;;  %v8812_v3 = vadd.f32 %v8811_v27, %v8771_v31  ;;  %v8773_v4 = vadd.f32 %v8772_v2, %v8732_v22 }
 0x5d2   : > { %v8774_v8 = vpop.f32.mrf.mxu0 }
 0x5d3   : > { %v8815_v60 = vpop.f32.mrf.mxu1  ;;  %v8828_v6 = vadd.f32 %v8812_v3, %v386_v1  ;;  %v8814_v9 = vadd.f32 %v8813_v33, %v8773_v4  ;;  %8845 = sbr.rel (%p11208_p12) target bundleno = 1843 (0x733), region = 80 }
 0x5d4   : > { %v8775_v10 = vpop.f32.mrf.mxu0 }
 0x5d5   : > { %v8816_v11 = vpop.f32.mrf.mxu1  ;;  %8840 = vst [vmem:[#allocation2 + $0x10] sm:$0xff] %v8828_v6  ;;  %v8829_v37 = vadd.f32 %v8814_v9, %v387_v7 }
 0x5d7   : > { %8841 = vst [vmem:[#allocation2 + $0x40] sm:$0xff] %v8829_v37 }
 0x5d8   : > { %v9346_v13 = vld [vmem:[%s15882_s5 + $0xf8] sm:$0xff]  ;;  %v9345_v17 = vld [vmem:[%s15882_s5 + $0xf0] sm:$0xff]  ;;  %v9344_v34 = vld [vmem:[%s15882_s5 + $0xe8] sm:$0xff]  ;;  %v8862_v35 = vlaneseq  ;;  %vm9934_vm0 = vcmask 15360  }
 0x5d9   : > { %v9378_v14 = vld [vmem:[%s15882_s5 + $0x1f8] sm:$0xff]  ;;  %11212 = vmatprep.subr.mxu0 %v9346_v13  ;;  %v9377_v18 = vld [vmem:[%s15882_s5 + $0x1f0] sm:$0xff]  ;;  %v9376_v32 = vld [vmem:[%s15882_s5 + $0x1e8] sm:$0xff] }
 0x5da   : > { %v9330_v19 = vld [vmem:[%s15882_s5 + $0x78] sm:$0xff]  ;;  %11247 = vmatprep.subr.mxu1 %v9378_v14  ;;  %v9329_v29 = vld [vmem:[%s15882_s5 + $0x70] sm:$0xff]  ;;  %v9328_v0 = vld [vmem:[%s15882_s5 + $0x68] sm:$0xff]  ;;  %v15184_v46 = vshrl.u32 %v8862_v35, 7 }
 0x5db   : > { %v9362_v20 = vld [vmem:[%s15882_s5 + $0x178] sm:$0xff]  ;;  %11213 = vmatpush3.msra.mxu0 %v9330_v19  ;;  %v9361_v30 = vld [vmem:[%s15882_s5 + $0x170] sm:$0xff]  ;;  %v9360_v25 = vld [vmem:[%s15882_s5 + $0x168] sm:$0xff] }
 0x5dc   : > { %11248 = vmatpush3.msra.mxu1 %v9362_v20  ;;  %11214 = vmatprep.subr.mxu0 %v9345_v17  ;;  %v9343_v26 = vld [vmem:[%s15882_s5 + $0xe0] sm:$0xff]  ;;  %v9342_v28 = vld [vmem:[%s15882_s5 + $0xd8] sm:$0xff]  ;;  %v9341_v15 = vld [vmem:[%s15882_s5 + $0xd0] sm:$0xff]  ;;  %v15211_v52 = vsub.s32 1, %v15184_v46  ;;  %v15214_v56 = vsub.s32 3, %v15184_v46  ;;  %v15217_v58 = vsub.s32 0, %v15184_v46 }
 0x5dd   : > { %11249 = vmatprep.subr.mxu1 %v9377_v18  ;;  %11215 = vmatpush3.msra.mxu0 %v9329_v29  ;;  %v9375_v57 = vld [vmem:[%s15882_s5 + $0x1e0] sm:$0xff]  ;;  %v9374_v38 = vld [vmem:[%s15882_s5 + $0x1d8] sm:$0xff]  ;;  %v9373_v61 = vld [vmem:[%s15882_s5 + $0x1d0] sm:$0xff]  ;;  %v15252_v10 = vsub.s32 2, %v15184_v46 }
 0x5de   : > { %11250 = vmatpush3.msra.mxu1 %v9361_v30  ;;  %11216 = vmatprep.subr.mxu0 %v9344_v34  ;;  %v9327_v40 = vld [vmem:[%s15882_s5 + $0x60] sm:$0xff]  ;;  %v9326_v21 = vld [vmem:[%s15882_s5 + $0x58] sm:$0xff]  ;;  %v9325_v42 = vld [vmem:[%s15882_s5 + $0x50] sm:$0xff] }
 0x5df   : > { %11251 = vmatprep.subr.mxu1 %v9376_v32  ;;  %v9359_v39 = vld [vmem:[%s15882_s5 + $0x160] sm:$0xff]  ;;  %11217 = vmatpush3.msra.mxu0 %v9328_v0  ;;  %v9358_v5 = vld [vmem:[%s15882_s5 + $0x158] sm:$0xff]  ;;  %v9357_v12 = vld [vmem:[%s15882_s5 + $0x150] sm:$0xff] }
 0x5e0   : > { %11252 = vmatpush3.msra.mxu1 %v9360_v25  ;;  %11218 = vmatprep.subr.mxu0 %v9343_v26  ;;  %v9340_v41 = vld [vmem:[%s15882_s5 + $0xc8] sm:$0xff]  ;;  %v9339_v16 = vld [vmem:[%s15882_s5 + $0xc0] sm:$0xff]  ;;  %v9338_v45 = vld [vmem:[%s15882_s5 + $0xb8] sm:$0xff] }
 0x5e1   : > { %11253 = vmatprep.subr.mxu1 %v9375_v57  ;;  %11219 = vmatpush3.msra.mxu0 %v9327_v40  ;;  %v9372_v23 = vld [vmem:[%s15882_s5 + $0x1c8] sm:$0xff]  ;;  %v9371_v62 = vld [vmem:[%s15882_s5 + $0x1c0] sm:$0xff]  ;;  %v9370_v63 = vld [vmem:[%s15882_s5 + $0x1b8] sm:$0xff] }
 0x5e2   : > { %11254 = vmatpush3.msra.mxu1 %v9359_v39  ;;  %11220 = vmatprep.subr.mxu0 %v9342_v28  ;;  %v9324_v36 = vld [vmem:[%s15882_s5 + $0x48] sm:$0xff]  ;;  %v9323_v43 = vld [vmem:[%s15882_s5 + $0x40] sm:$0xff]  ;;  %v9322_v47 = vld [vmem:[%s15882_s5 + $0x38] sm:$0xff] }
 0x5e3   : > { %11255 = vmatprep.subr.mxu1 %v9374_v38  ;;  %11221 = vmatpush3.msra.mxu0 %v9326_v21  ;;  %v9356_v24 = vld [vmem:[%s15882_s5 + $0x148] sm:$0xff]  ;;  %v9355_v44 = vld [vmem:[%s15882_s5 + $0x140] sm:$0xff]  ;;  %v9354_v49 = vld [vmem:[%s15882_s5 + $0x138] sm:$0xff] }
 0x5e4   : > { %11256 = vmatpush3.msra.mxu1 %v9358_v5  ;;  %11222 = vmatprep.subr.mxu0 %v9341_v15  ;;  %v9337_v50 = vld [vmem:[%s15882_s5 + $0xb0] sm:$0xff]  ;;  %v9336_v55 = vld [vmem:[%s15882_s5 + $0xa8] sm:$0xff]  ;;  %v9335_v22 = vld [vmem:[%s15882_s5 + $0xa0] sm:$0xff] }
 0x5e5   : > { %11257 = vmatprep.subr.mxu1 %v9373_v61  ;;  %11223 = vmatpush3.msra.mxu0 %v9325_v42  ;;  %v9369_v51 = vld [vmem:[%s15882_s5 + $0x1b0] sm:$0xff]  ;;  %v9368_v48 = vld [vmem:[%s15882_s5 + $0x1a8] sm:$0xff]  ;;  %v9367_v31 = vld [vmem:[%s15882_s5 + $0x1a0] sm:$0xff] }
 0x5e6   : > { %11258 = vmatpush3.msra.mxu1 %v9357_v12  ;;  %11224 = vmatprep.subr.mxu0 %v9340_v41  ;;  %v9321_v53 = vld [vmem:[%s15882_s5 + $0x30] sm:$0xff]  ;;  %v9320_v59 = vld [vmem:[%s15882_s5 + $0x28] sm:$0xff]  ;;  %v9319_v1 = vld [vmem:[%s15882_s5 + $0x20] sm:$0xff] }
 0x5e7   : > { %11259 = vmatprep.subr.mxu1 %v9372_v23  ;;  %11225 = vmatpush3.msra.mxu0 %v9324_v36  ;;  %v9353_v54 = vld [vmem:[%s15882_s5 + $0x130] sm:$0xff]  ;;  %v9352_v27 = vld [vmem:[%s15882_s5 + $0x128] sm:$0xff]  ;;  %v9351_v2 = vld [vmem:[%s15882_s5 + $0x120] sm:$0xff] }
 0x5e8   : > { %11260 = vmatpush3.msra.mxu1 %v9356_v24  ;;  %11226 = vmatprep.subr.mxu0 %v9339_v16  ;;  %v8847_v33 = vld [vmem:[#allocation2] sm:$0xff]  ;;  %v9334_v4 = vld [vmem:[%s15882_s5 + $0x98] sm:$0xff]  ;;  %v8846_v13 = vld [vmem:[#allocation2 + $0x30] sm:$0xff] }
 0x5e9   : > { %11261 = vmatprep.subr.mxu1 %v9371_v62  ;;  %11227 = vmatpush3.msra.mxu0 %v9323_v43  ;;  %v15237_v3 = vld [vmem:[#allocation7] sm:$0xff]  ;;  %v9366_v7 = vld [vmem:[%s15882_s5 + $0x198] sm:$0xff]  ;;  %v9333_v14 = vld [vmem:[%s15882_s5 + $0x90] sm:$0xff] }
 0x5ea   : > { %11262 = vmatpush3.msra.mxu1 %v9355_v44  ;;  %11228 = vmatprep.subr.mxu0 %v9338_v45  ;;  %v8869_v8 = vrot.slane %v15237_v3, %v15211_v52  ;;  %v8849_v60 = vld [vmem:[#allocation2 + $0x18] sm:$0xff]  ;;  %v8877_v6 = vrot.slane %v15237_v3, %v15214_v56  ;;  %v8865_v9 = vrot.slane %v15237_v3, %v15217_v58  ;;  %v9365_v19 = vld [vmem:[%s15882_s5 + $0x190] sm:$0xff]  ;;  %v9332_v32 = vld [vmem:[%s15882_s5 + $0x88] sm:$0xff] }
 0x5eb   : > { %11263 = vmatprep.subr.mxu1 %v9370_v63  ;;  %11229 = vmatpush3.msra.mxu0 %v9322_v47  ;;  %v9318_v11 = vld [vmem:[%s15882_s5 + $0x18] sm:$0xff]  ;;  %v9317_v18 = vld [vmem:[%s15882_s5 + $0x10] sm:$0xff]  ;;  %v9364_v0 = vld [vmem:[%s15882_s5 + $0x188] sm:$0xff]  ;;  %v8873_v57 = vrot.slane %v15237_v3, %v15252_v10 }
 0x5ec   : > { %11264 = vmatpush3.msra.mxu1 %v9354_v49  ;;  %11230 = vmatprep.subr.mxu0 %v9337_v50  ;;  %v9350_v37 = vld [vmem:[%s15882_s5 + $0x118] sm:$0xff]  ;;  %v15266_v20 = vadd.f32 %v8869_v8, %v8847_v33  ;;  %v15268_v17 = vadd.f32 %v8877_v6, %v8849_v60  ;;  %v9349_v29 = vld [vmem:[%s15882_s5 + $0x110] sm:$0xff]  ;;  %v15276_v30 = vadd.f32 %v8865_v9, %v8846_v13  ;;  %v9316_v40 = vld [vmem:[%s15882_s5 + $0x8] sm:$0xff]  ;;  %v15323_v33 = vsub.s32 7, %v15184_v46 }
 0x5ed   : > { %11265 = vmatprep.subr.mxu1 %v9369_v51  ;;  %11231 = vmatpush3.msra.mxu0 %v9321_v53  ;;  %v8848_v34 = vld [vmem:[#allocation2 + $0x58] sm:$0xff]  ;;  %v9348_v39 = vld [vmem:[%s15882_s5 + $0x108] sm:$0xff]  ;;  %v9331_v38 = vld [vmem:[%s15882_s5 + $0x80] sm:$0xff] }
 0x5ee   : > { %11266 = vmatpush3.msra.mxu1 %v9353_v54  ;;  %11232 = vmatprep.subr.mxu0 %v9336_v55  ;;  %v8940_v25 = vrot.slane %v15266_v20, 4  ;;  %v8952_v26 = vrot.slane %v15268_v17, 4  ;;  %v8934_v28 = vrot.slane %v15276_v30, 4  ;;  %v9363_v21 = vld [vmem:[%s15882_s5 + $0x180] sm:$0xff]  ;;  %v8924_v61 = vadd.f32 %v8873_v57, %v8848_v34  ;;  %v9410_v36 = vld [vmem:[%s15882_s5 + $0x2f8] sm:$0xff] }
 0x5ef   : > { %11267 = vmatprep.subr.mxu1 %v9368_v48  ;;  %11233 = vmatpush3.msra.mxu0 %v9320_v59  ;;  %v9315_v42 = vld [vmem:[%s15882_s5] sm:$0xff]  ;;  %v9442_v24 = vld [vmem:[%s15882_s5 + $0x3f8] sm:$0xff]  ;;  %v15317_v59 = vsub.s32 5, %v15184_v46 }
 0x5f0   : > { %11268 = vmatpush3.msra.mxu1 %v9352_v27  ;;  %11234 = vmatprep.subr.mxu0 %v9335_v22  ;;  %v8941_v5 = vadd.f32 %v8940_v25, %v15266_v20  ;;  %v8953_v15 = vadd.f32 %v8952_v26, %v15268_v17  ;;  %v9347_v12 = vld [vmem:[%s15882_s5 + $0x100] sm:$0xff]  ;;  %v8935_v41 = vadd.f32 %v8934_v28, %v15276_v30  ;;  %v8946_v16 = vrot.slane %v8924_v61, 4  ;;  %v8853_v25 = vld [vmem:[#allocation2 + $0x38] sm:$0xff]  ;;  %v8852_v28 = vld [vmem:[#allocation2 + $0x8] sm:$0xff] }
 0x5f1   : > { %11269 = vmatprep.subr.mxu1 %v9367_v31  ;;  %11235 = vmatpush3.msra.mxu0 %v9319_v1  ;;  %v15320_v1 = vsub.s32 4, %v15184_v46  ;;  %v8885_v9 = vrot.slane %v15237_v3, %v15317_v59 }
 0x5f2   : > { %11270 = vmatpush3.msra.mxu1 %v9351_v2  ;;  %11236 = vmatprep.subr.mxu0 %v9334_v4  ;;  %v8942_v23 = vrot.slane %v8941_v5, 2  ;;  %v8954_v35 = vrot.slane %v8953_v15, 2  ;;  %v8936_v62 = vrot.slane %v8935_v41, 2  ;;  %v8947_v45 = vadd.f32 %v8946_v16, %v8924_v61 }
 0x5f3   : > { %11271 = vmatprep.subr.mxu1 %v9366_v7  ;;  %11237 = vmatpush3.msra.mxu0 %v9318_v11  ;;  %v15326_v4 = vsub.s32 6, %v15184_v46  ;;  %v8881_v13 = vrot.slane %v15237_v3, %v15320_v1 }
 0x5f4   : > { %11272 = vmatpush3.msra.mxu1 %v9350_v37  ;;  %11238 = vmatprep.subr.mxu0 %v9333_v14  ;;  %v8943_v43 = vadd.f32 %v8942_v23, %v8941_v5  ;;  %v8955_v44 = vadd.f32 %v8954_v35, %v8953_v15  ;;  %v8937_v63 = vadd.f32 %v8936_v62, %v8935_v41  ;;  %v8948_v50 = vrot.slane %v8947_v45, 2 }
 0x5f5   : > { %11273 = vmatprep.subr.mxu1 %v9365_v19  ;;  %11239 = vmatpush3.msra.mxu0 %v9317_v18  ;;  %v8893_v19 = vrot.slane %v15237_v3, %v15323_v33 }
 0x5f6   : > { %11274 = vmatpush3.msra.mxu1 %v9349_v29  ;;  %11240 = vmatprep.subr.mxu0 %v9332_v32  ;;  %v8944_v47 = vrot.slane %v8943_v43, 1  ;;  %v8956_v49 = vrot.slane %v8955_v44, 1  ;;  %v8938_v51 = vrot.slane %v8937_v63, 1  ;;  %v8949_v55 = vadd.f32 %v8948_v50, %v8947_v45 }
 0x5f7   : > { %11275 = vmatprep.subr.mxu1 %v9364_v0  ;;  %11241 = vmatpush3.msra.mxu0 %v9316_v40  ;;  %v8850_v0 = vld [vmem:[#allocation2 + $0x50] sm:$0xff] }
 0x5f8   : > { %11276 = vmatpush3.msra.mxu1 %v9348_v39  ;;  %11242 = vmatprep.subr.mxu0 %v9331_v38  ;;  %v8945_v53 = vadd.f32 %v8944_v47, %v8943_v43  ;;  %v8957_v54 = vadd.f32 %v8956_v49, %v8955_v44  ;;  %v8939_v48 = vadd.f32 %v8938_v51, %v8937_v63  ;;  %v8950_v31 = vrot.slane %v8949_v55, 1 }
 0x5f9   : > { %11277 = vmatprep.subr.mxu1 %v9363_v21  ;;  %11243 = vmatpush3.msra.mxu0 %v9315_v42  ;;  %v15357_v39 = vadd.f32 %v8881_v13, %v8850_v0  ;;  %v8929_v21 = vadd.f32 %v8893_v19, %v8853_v25 }
 0x5fa   : > { %11278 = vmatpush3.msra.mxu1 %v9347_v12  ;;  %11282 = vmatprep.subr.mxu0 %v9410_v36  ;;  %v9008_v27 = vmul.f32 0.125, %v8945_v53  ;;  %v9010_v22 = vmul.f32 0.125, %v8957_v54  ;;  %v9007_v2 = vmul.f32 0.125, %v8939_v48  ;;  %v8951_v60 = vadd.f32 %v8950_v31, %v8949_v55 }
 0x5fb   : > { %11317 = vmatprep.subr.mxu1 %v9442_v24  ;;  %v8958_v12 = vrot.slane %v15357_v39, 4  ;;  %v8976_v35 = vrot.slane %v8929_v21, 4 }
 0x5fc   : > { %v15329_v7 = vsub.f32 %v15266_v20, %v9008_v27  ;;  %v15332_v8 = vsub.f32 %v15268_v17, %v9010_v22  ;;  %v15335_v6 = vsub.f32 %v15276_v30, %v9007_v2  ;;  %v9009_v37 = vmul.f32 0.125, %v8951_v60  ;;  %v8851_v30 = vld [vmem:[#allocation2 + $0x20] sm:$0xff] }
 0x5fd   : > { %v8889_v20 = vrot.slane %v15237_v3, %v15326_v4  ;;  %v15353_v32 = vadd.f32 %v8885_v9, %v8851_v30  ;;  %v8959_v43 = vadd.f32 %v8958_v12, %v15357_v39  ;;  %v8977_v63 = vadd.f32 %v8976_v35, %v8929_v21 }
 0x5fe   : > { %v9032_v11 = vmul.f32 %v15329_v7, %v15329_v7  ;;  %v9034_v46 = vmul.f32 %v15332_v8, %v15332_v8  ;;  %v9031_v14 = vmul.f32 %v15335_v6, %v15335_v6  ;;  %v15351_v29 = vsub.f32 %v8924_v61, %v9009_v37 }
 0x5ff   : > { %v8964_v3 = vrot.slane %v15353_v32, 4  ;;  %v8928_v5 = vadd.f32 %v8889_v20, %v8852_v28  ;;  %v8960_v53 = vrot.slane %v8959_v43, 2  ;;  %v8978_v48 = vrot.slane %v8977_v63, 2 }
 0x600   : > { %v9049_v17 = vrot.slane %v9032_v11, 4  ;;  %v9061_v18 = vrot.slane %v9034_v46, 4  ;;  %v9043_v34 = vrot.slane %v9031_v14, 4  ;;  %v9033_v40 = vmul.f32 %v15351_v29, %v15351_v29 }
 0x601   : > { %v8965_v23 = vadd.f32 %v8964_v3, %v15353_v32  ;;  %v8970_v36 = vrot.slane %v8928_v5, 4  ;;  %v8961_v60 = vadd.f32 %v8960_v53, %v8959_v43  ;;  %v15379_v43 = vld [vmem:[#allocation10] sm:$0xff] }
 0x602   : > { %v9050_v26 = vadd.f32 %v9049_v17, %v9032_v11  ;;  %v9062_v57 = vadd.f32 %v9061_v18, %v9034_v46  ;;  %v9044_v38 = vadd.f32 %v9043_v34, %v9031_v14  ;;  %v9055_v42 = vrot.slane %v9033_v40, 4 }
 0x603   : > { %v8966_v45 = vrot.slane %v8965_v23, 2  ;;  %v8971_v47 = vadd.f32 %v8970_v36, %v8928_v5  ;;  %v8979_v46 = vadd.f32 %v8978_v48, %v8977_v63  ;;  %v8962_v20 = vrot.slane %v8961_v60, 1 }
 0x604   : > { %v9051_v15 = vrot.slane %v9050_v26, 2  ;;  %v9063_v61 = vrot.slane %v9062_v57, 2  ;;  %v9045_v41 = vrot.slane %v9044_v38, 2  ;;  %v9056_v62 = vadd.f32 %v9055_v42, %v9033_v40 }
 0x605   : > { %v8967_v55 = vadd.f32 %v8966_v45, %v8965_v23  ;;  %v8972_v27 = vrot.slane %v8971_v47, 2  ;;  %v8980_v30 = vrot.slane %v8979_v46, 1 }
 0x606   : > { %v9052_v24 = vadd.f32 %v9051_v15, %v9050_v26  ;;  %v9064_v16 = vadd.f32 %v9063_v61, %v9062_v57  ;;  %v9046_v44 = vadd.f32 %v9045_v41, %v9044_v38  ;;  %v9057_v51 = vrot.slane %v9056_v62, 2 }
 0x607   : > { %v8968_v11 = vrot.slane %v8967_v55, 1  ;;  %v8973_v37 = vadd.f32 %v8972_v27, %v8971_v47  ;;  %v8963_v57 = vadd.f32 %v8962_v20, %v8961_v60  ;;  %v8981_v38 = vadd.f32 %v8980_v30, %v8979_v46  ;;  %v8855_v27 = vld [vmem:[#allocation2 + $0x48] sm:$0xff] }
 0x608   : > { %v9053_v49 = vrot.slane %v9052_v24, 1  ;;  %v9065_v50 = vrot.slane %v9064_v16, 1  ;;  %v9047_v54 = vrot.slane %v9046_v44, 1  ;;  %v9058_v2 = vadd.f32 %v9057_v51, %v9056_v62 }
 0x609   : > { %v8969_v18 = vadd.f32 %v8968_v11, %v8967_v55  ;;  %v8974_v34 = vrot.slane %v8973_v37, 1  ;;  %v9011_v61 = vmul.f32 0.125, %v8963_v57  ;;  %v9014_v12 = vmul.f32 0.125, %v8981_v38 }
 0x60a   : > { %v9054_v22 = vadd.f32 %v9053_v49, %v9052_v24  ;;  %v9066_v31 = vadd.f32 %v9065_v50, %v9064_v16  ;;  %v9048_v9 = vadd.f32 %v9047_v54, %v9046_v44  ;;  %v9059_v19 = vrot.slane %v9058_v2, 1 }
 0x60b   : > { %v9012_v28 = vmul.f32 0.125, %v8969_v18  ;;  %v8975_v3 = vadd.f32 %v8974_v34, %v8973_v37  ;;  %v15367_v35 = vsub.f32 %v15357_v39, %v9011_v61  ;;  %v15371_v24 = vsub.f32 %v8929_v21, %v9014_v12 }
 0x60c   : > { %v9116_v13 = vmul.f32 0.125, %v9054_v22  ;;  %v9118_v14 = vmul.f32 0.125, %v9066_v31  ;;  %v9115_v17 = vmul.f32 0.125, %v9048_v9  ;;  %v9060_v26 = vadd.f32 %v9059_v19, %v9058_v2  ;;  %v15391_v22 = vld [vmem:[#allocation7 + $0x8] sm:$0xf]  ;;  %v8857_v9 = vld [vmem:[#allocation2 + $0x40] sm:$0xff] }
 0x60d   : > { %v15364_v42 = vsub.f32 %v15353_v32, %v9012_v28  ;;  %v9013_v41 = vmul.f32 0.125, %v8975_v3  ;;  %v9035_v62 = vmul.f32 %v15367_v35, %v15367_v35  ;;  %v15377_v32 = vld [vmem:[#allocation8] sm:$0xff]  ;;  %v9038_v39 = vmul.f32 %v15371_v24, %v15371_v24 }
 0x60e   : > { %v9128_v0 = vadd.f32 1e-05, %v9116_v13  ;;  %v9130_v25 = vadd.f32 1e-05, %v9118_v14  ;;  %v9127_v40 = vadd.f32 1e-05, %v9115_v17  ;;  %v9174_v49 = vrot.slane %v15377_v32, %v15211_v52 }
 0x60f   : > { %v9117_v15 = vmul.f32 0.125, %v9060_v26  ;;  %v9036_v36 = vmul.f32 %v15364_v42, %v15364_v42  ;;  %v15373_v16 = vsub.f32 %v8928_v5, %v9013_v41  ;;  %v9067_v63 = vrot.slane %v9035_v62, 4 }
 0x610   : > { %13259 = vrsqrt.f32 %v9128_v0  ;;  %v9085_v47 = vrot.slane %v9038_v39, 4  ;;  %v9250_v50 = vrot.slane %v15379_v43, %v15211_v52  ;;  %v9182_v53 = vrot.slane %v15377_v32, %v15214_v56 }
 0x611   : > { %13261 = vrsqrt.f32 %v9130_v25  ;;  %v9129_v23 = vadd.f32 1e-05, %v9117_v15  ;;  %v9073_v44 = vrot.slane %v9036_v36, 4  ;;  %v9037_v45 = vmul.f32 %v15373_v16, %v15373_v16 }
 0x612   : > { %13263 = vrsqrt.f32 %v9127_v40  ;;  %v9068_v51 = vadd.f32 %v9067_v63, %v9035_v62  ;;  %v9086_v55 = vadd.f32 %v9085_v47, %v9038_v39  ;;  %v9258_v31 = vrot.slane %v15379_v43, %v15214_v56 }
 0x613   : > { %13265 = vrsqrt.f32 %v9129_v23  ;;  %v9074_v21 = vadd.f32 %v9073_v44, %v9036_v36  ;;  %v9079_v5 = vrot.slane %v9037_v45, 4  ;;  %v8901_v60 = vrot.slane %v15391_v22, %v15211_v52 }
 0x614   : > { %v9069_v2 = vrot.slane %v9068_v51, 2  ;;  %v8909_v11 = vrot.slane %v15391_v22, %v15214_v56  ;;  %v9170_v46 = vrot.slane %v15377_v32, %v15217_v58  ;;  %v9087_v13 = vrot.slane %v9086_v55, 2 }
 0x615   : > { %v9075_v54 = vrot.slane %v9074_v21, 2  ;;  %v9080_v48 = vadd.f32 %v9079_v5, %v9037_v45  ;;  %v9246_v19 = vrot.slane %v15379_v43, %v15217_v58  ;;  %v9178_v20 = vrot.slane %v15377_v32, %v15252_v10 }
 0x616   : > { %v9070_v17 = vadd.f32 %v9069_v2, %v9068_v51  ;;  %v15405_v18 = vadd.f32 %v8901_v60, %v8855_v27  ;;  %v9088_v0 = vadd.f32 %v9087_v13, %v9086_v55  ;;  %v15407_v26 = vadd.f32 %v8909_v11, %v8857_v9  ;;  %v8854_v9 = vld [vmem:[#allocation2 + $0x28] sm:$0xff]  ;;  %v9426_v11 = vld [vmem:[%s15882_s5 + $0x378] sm:$0xff] }
 0x617   : > { %v9076_v37 = vadd.f32 %v9075_v54, %v9074_v21  ;;  %v9081_v14 = vrot.slane %v9080_v48, 2  ;;  %v9254_v28 = vrot.slane %v15379_v43, %v15252_v10 }
 0x618   : > { %v9071_v38 = vrot.slane %v9070_v17, 1  ;;  %v8988_v3 = vrot.slane %v15405_v18, 4  ;;  %v9089_v41 = vrot.slane %v9088_v0, 1  ;;  %v9000_v47 = vrot.slane %v15407_v26, 4 }
 0x619   : > { %v9077_v34 = vrot.slane %v9076_v37, 1  ;;  %v9082_v25 = vadd.f32 %v9081_v14, %v9080_v48  ;;  %v8897_v14 = vrot.slane %v15391_v22, %v15217_v58 }
 0x61a   : > { %v9072_v44 = vadd.f32 %v9071_v38, %v9070_v17  ;;  %v8989_v39 = vadd.f32 %v8988_v3, %v15405_v18  ;;  %v9090_v63 = vadd.f32 %v9089_v41, %v9088_v0  ;;  %v9425_v0 = vld [vmem:[%s15882_s5 + $0x370] sm:$0xff]  ;;  %v8905_v38 = vrot.slane %v15391_v22, %v15252_v10  ;;  %v9440_v3 = vld [vmem:[%s15882_s5 + $0x3e8] sm:$0xff]  ;;  %v9391_v22 = vld [vmem:[%s15882_s5 + $0x260] sm:$0xff] }
 0x61b   : > { %v9078_v12 = vadd.f32 %v9077_v34, %v9076_v37  ;;  %v9083_v23 = vrot.slane %v9082_v25, 1  ;;  %v8856_v34 = vld [vmem:[#allocation2 + $0x10] sm:$0xff]  ;;  %v9424_v41 = vld [vmem:[%s15882_s5 + $0x368] sm:$0xff] }
 0x61c   : > { %v9119_v48 = vmul.f32 0.125, %v9072_v44  ;;  %v9122_v2 = vmul.f32 0.125, %v9090_v63  ;;  %v9439_v44 = vld [vmem:[%s15882_s5 + $0x3e0] sm:$0xff]  ;;  %v9390_v63 = vld [vmem:[%s15882_s5 + $0x258] sm:$0xff] }
 0x61d   : > { %v13260_v30 = vpop.eup %13259  ;;  %v9084_v21 = vadd.f32 %v9083_v23, %v9082_v25  ;;  %v9392_v25 = vld [vmem:[%s15882_s5 + $0x268] sm:$0xff] }
 0x61e   : > { %v13262_v57 = vpop.eup %13261  ;;  %v9152_v40 = vmul.f32 %v13260_v30, %v15329_v7  ;;  %v9131_v17 = vadd.f32 1e-05, %v9119_v48  ;;  %v9389_v48 = vld [vmem:[%s15882_s5 + $0x250] sm:$0xff] }
 0x61f   : > { %v13264_v15 = vpop.eup %13263  ;;  %v9154_v61 = vmul.f32 %v13262_v57, %v15332_v8  ;;  %v9120_v8 = vmul.f32 0.125, %v9078_v12  ;;  %v9121_v60 = vmul.f32 0.125, %v9084_v21  ;;  %v9134_v57 = vadd.f32 1e-05, %v9122_v2  ;;  %v9437_v2 = vld [vmem:[%s15882_s5 + $0x3d0] sm:$0xff] }
 0x620   : > { %v9228_v36 = vmul.f32 %v9174_v49, %v9152_v40  ;;  %v9151_v62 = vmul.f32 %v13264_v15, %v15335_v6  ;;  %v13266_v45 = vpop.eup %13265  ;;  %v9394_v6 = vld [vmem:[%s15882_s5 + $0x278] sm:$0xff]  ;;  %v9407_v15 = vld [vmem:[%s15882_s5 + $0x2e0] sm:$0xff] }
 0x621   : > { %v9230_v7 = vmul.f32 %v9182_v53, %v9154_v61  ;;  %v9153_v54 = vmul.f32 %v13266_v45, %v15351_v29  ;;  %v8990_v53 = vrot.slane %v8989_v39, 2  ;;  %v9001_v29 = vadd.f32 %v9000_v47, %v15407_v26 }
 0x622   : > { %v9304_v5 = vadd.f32 %v9250_v50, %v9228_v36  ;;  %v9227_v51 = vmul.f32 %v9170_v46, %v9151_v62  ;;  %v9409_v50 = vld [vmem:[%s15882_s5 + $0x2f0] sm:$0xff]  ;;  %v9132_v37 = vadd.f32 1e-05, %v9120_v8  ;;  %v9133_v61 = vadd.f32 1e-05, %v9121_v60  ;;  %v9388_v60 = vld [vmem:[%s15882_s5 + $0x248] sm:$0xff] }
 0x623   : > { %v9306_v55 = vadd.f32 %v9258_v31, %v9230_v7  ;;  %v9229_v27 = vmul.f32 %v9178_v20, %v9153_v54  ;;  %v9393_v46 = vld [vmem:[%s15882_s5 + $0x270] sm:$0xff]  ;;  %v8991_v13 = vadd.f32 %v8990_v53, %v8989_v39  ;;  %v9408_v20 = vld [vmem:[%s15882_s5 + $0x2e8] sm:$0xff]  ;;  %v9002_v30 = vrot.slane %v9001_v29, 2  ;;  %v9406_v39 = vld [vmem:[%s15882_s5 + $0x2d8] sm:$0xff] }
 0x624   : > { %9578 = vmatprep.mubr.f32.mxu0 %v9304_v5  ;;  %v9303_v49 = vadd.f32 %v9246_v19, %v9227_v51  ;;  %v9441_v19 = vld [vmem:[%s15882_s5 + $0x3f0] sm:$0xff]  ;;  %13267 = vrsqrt.f32 %v9132_v37  ;;  %v15462_v62 = vadd.f32 %v8905_v38, %v8856_v34  ;;  %v9423_v7 = vld [vmem:[%s15882_s5 + $0x360] sm:$0xff]  ;;  %v9438_v51 = vld [vmem:[%s15882_s5 + $0x3d8] sm:$0xff] }
 0x625   : > { %9648 = vmatprep.mubr.f32.mxu1 %v9306_v55  ;;  %v9305_v31 = vadd.f32 %v9254_v28, %v9229_v27  ;;  %v8992_v40 = vrot.slane %v8991_v13, 1  ;;  %v15445_v28 = vadd.f32 %v8897_v14, %v8854_v9  ;;  %v9003_v12 = vadd.f32 %v9002_v30, %v9001_v29  ;;  %v9405_v54 = vld [vmem:[%s15882_s5 + $0x2d0] sm:$0xff]  ;;  %v9422_v55 = vld [vmem:[%s15882_s5 + $0x358] sm:$0xff]  ;;  %v9404_v53 = vld [vmem:[%s15882_s5 + $0x2c8] sm:$0xff] }
 0x626   : > { %9579 = vmatmul.mubr.f32.vlgmr.msra.gmra.mxu0 %v9303_v49  ;;  %13269 = vrsqrt.f32 %v9131_v17  ;;  %v8994_v5 = vrot.slane %v15462_v62, 4  ;;  %v9387_v14 = vld [vmem:[%s15882_s5 + $0x240] sm:$0xff]  ;;  %v9402_v30 = vld [vmem:[%s15882_s5 + $0x2b8] sm:$0xff] }
 0x627   : > { %11283 = vmatpush3.msra.mxu0 %v9394_v6  ;;  %9649 = vmatmul.mubr.f32.vlgmr.msra.gmra.mxu1 %v9305_v31  ;;  %v8993_v23 = vadd.f32 %v8992_v40, %v8991_v13  ;;  %v8982_v36 = vrot.slane %v15445_v28, 4  ;;  %v9004_v45 = vrot.slane %v9003_v12, 1  ;;  %13271 = vrsqrt.f32 %v9134_v57  ;;  %v9420_v13 = vld [vmem:[%s15882_s5 + $0x348] sm:$0xff]  ;;  %v9434_v38 = vld [vmem:[%s15882_s5 + $0x3b8] sm:$0xff] }
 0x628   : > { %11284 = vmatprep.subr.mxu0 %v9409_v50  ;;  %11318 = vmatpush3.msra.mxu1 %v9426_v11  ;;  %13273 = vrsqrt.f32 %v9133_v61  ;;  %v8995_v6 = vadd.f32 %v8994_v5, %v15462_v62  ;;  %v9436_v11 = vld [vmem:[%s15882_s5 + $0x3c8] sm:$0xff] }
 0x629   : > { %11285 = vmatpush3.msra.mxu0 %v9393_v46  ;;  %11319 = vmatprep.subr.mxu1 %v9441_v19  ;;  %v9016_v21 = vmul.f32 0.125, %v8993_v23  ;;  %v8983_v47 = vadd.f32 %v8982_v36, %v15445_v28  ;;  %v9005_v8 = vadd.f32 %v9004_v45, %v9003_v12  ;;  %v9403_v46 = vld [vmem:[%s15882_s5 + $0x2c0] sm:$0xff]  ;;  %v9418_v12 = vld [vmem:[%s15882_s5 + $0x338] sm:$0xff] }
 0x62a   : > { %11286 = vmatprep.subr.mxu0 %v9408_v20  ;;  %11320 = vmatpush3.msra.mxu1 %v9425_v0  ;;  %v8996_v31 = vrot.slane %v8995_v6, 2  ;;  %v9419_v0 = vld [vmem:[%s15882_s5 + $0x340] sm:$0xff] }
 0x62b   : > { %11287 = vmatpush3.msra.mxu0 %v9392_v25  ;;  %11321 = vmatprep.subr.mxu1 %v9440_v3  ;;  %v15491_v49 = vsub.f32 %v15405_v18, %v9016_v21  ;;  %v8984_v27 = vrot.slane %v8983_v47, 2  ;;  %v9018_v50 = vmul.f32 0.125, %v9005_v8  ;;  %v9421_v18 = vld [vmem:[%s15882_s5 + $0x350] sm:$0xff]  ;;  %v9386_v25 = vld [vmem:[%s15882_s5 + $0x238] sm:$0xff]  ;;  %v9384_v21 = vld [vmem:[%s15882_s5 + $0x228] sm:$0xff]  ;;  %v9190_v8 = vrot.slane %v15377_v32, %v15317_v59 }
 0x62c   : > { %11288 = vmatprep.subr.mxu0 %v9407_v15  ;;  %11322 = vmatpush3.msra.mxu1 %v9424_v41  ;;  %v8997_v17 = vadd.f32 %v8996_v31, %v8995_v6  ;;  %v9401_v3 = vld [vmem:[%s15882_s5 + $0x2b0] sm:$0xff] }
 0x62d   : > { %11289 = vmatpush3.msra.mxu0 %v9391_v22  ;;  %11323 = vmatprep.subr.mxu1 %v9439_v44  ;;  %v9040_v29 = vmul.f32 %v15491_v49, %v15491_v49  ;;  %v8985_v9 = vadd.f32 %v8984_v27, %v8983_v47  ;;  %v15515_v37 = vsub.f32 %v15407_v26, %v9018_v50  ;;  %v9435_v26 = vld [vmem:[%s15882_s5 + $0x3c0] sm:$0xff]  ;;  %v9385_v41 = vld [vmem:[%s15882_s5 + $0x230] sm:$0xff] }
 0x62e   : > { %11290 = vmatprep.subr.mxu0 %v9406_v39  ;;  %11324 = vmatpush3.msra.mxu1 %v9423_v7  ;;  %v8998_v61 = vrot.slane %v8997_v17, 1  ;;  %v9433_v44 = vld [vmem:[%s15882_s5 + $0x3b0] sm:$0xff]  ;;  %v9400_v39 = vld [vmem:[%s15882_s5 + $0x2a8] sm:$0xff] }
 0x62f   : > { %11291 = vmatpush3.msra.mxu0 %v9390_v63  ;;  %11325 = vmatprep.subr.mxu1 %v9438_v51  ;;  %v9097_v19 = vrot.slane %v9040_v29, 4  ;;  %v8986_v20 = vrot.slane %v8985_v9, 1  ;;  %v9042_v34 = vmul.f32 %v15515_v37, %v15515_v37  ;;  %v9417_v63 = vld [vmem:[%s15882_s5 + $0x330] sm:$0xff]  ;;  %v9432_v51 = vld [vmem:[%s15882_s5 + $0x3a8] sm:$0xff] }
 0x630   : > { %11292 = vmatprep.subr.mxu0 %v9405_v54  ;;  %11326 = vmatpush3.msra.mxu1 %v9422_v55  ;;  %v9399_v54 = vld [vmem:[%s15882_s5 + $0x2a0] sm:$0xff]  ;;  %v8999_v27 = vadd.f32 %v8998_v61, %v8997_v17  ;;  %v9397_v17 = vld [vmem:[%s15882_s5 + $0x290] sm:$0xff] }
 0x631   : > { %11293 = vmatpush3.msra.mxu0 %v9389_v48  ;;  %11327 = vmatprep.subr.mxu1 %v9437_v2  ;;  %v9098_v57 = vadd.f32 %v9097_v19, %v9040_v29  ;;  %v8987_v40 = vadd.f32 %v8986_v20, %v8985_v9  ;;  %v9109_v15 = vrot.slane %v9042_v34, 4  ;;  %v13268_v36 = vpop.eup %13267  ;;  %v9416_v2 = vld [vmem:[%s15882_s5 + $0x328] sm:$0xff]  ;;  %v9398_v29 = vld [vmem:[%s15882_s5 + $0x298] sm:$0xff] }
 0x632   : > { %11294 = vmatprep.subr.mxu0 %v9404_v53  ;;  %11328 = vmatpush3.msra.mxu1 %v9421_v18  ;;  %v9383_v53 = vld [vmem:[%s15882_s5 + $0x220] sm:$0xff]  ;;  %v9156_v50 = vmul.f32 %v13268_v36, %v15364_v42  ;;  %v9266_v18 = vrot.slane %v15379_v43, %v15317_v59  ;;  %v9017_v59 = vmul.f32 0.125, %v8999_v27  ;;  %v9430_v20 = vld [vmem:[%s15882_s5 + $0x398] sm:$0xff] }
 0x633   : > { %11295 = vmatpush3.msra.mxu0 %v9388_v60  ;;  %11329 = vmatprep.subr.mxu1 %v9436_v11  ;;  %v9099_v22 = vrot.slane %v9098_v57, 2  ;;  %v9015_v23 = vmul.f32 0.125, %v8987_v40  ;;  %v9110_v45 = vadd.f32 %v9109_v15, %v9042_v34  ;;  %v13270_v7 = vpop.eup %13269  ;;  %v9431_v60 = vld [vmem:[%s15882_s5 + $0x3a0] sm:$0xff]  ;;  %v9396_v40 = vld [vmem:[%s15882_s5 + $0x288] sm:$0xff] }
 0x634   : > { %11296 = vmatprep.subr.mxu0 %v9403_v46  ;;  %11330 = vmatpush3.msra.mxu1 %v9420_v13  ;;  %v13272_v5 = vpop.eup %13271  ;;  %v9155_v9 = vmul.f32 %v13270_v7, %v15367_v35  ;;  %v9415_v11 = vld [vmem:[%s15882_s5 + $0x320] sm:$0xff]  ;;  %v9382_v46 = vld [vmem:[%s15882_s5 + $0x218] sm:$0xff]  ;;  %v9198_v35 = vrot.slane %v15377_v32, %v15323_v33  ;;  %v15611_v34 = vsub.f32 %v15462_v62, %v9017_v59  ;;  %v9429_v62 = vld [vmem:[%s15882_s5 + $0x390] sm:$0xff] }
 0x635   : > { %11297 = vmatpush3.msra.mxu0 %v9387_v14  ;;  %11331 = vmatprep.subr.mxu1 %v9435_v26  ;;  %v9100_v47 = vadd.f32 %v9099_v22, %v9098_v57  ;;  %v9111_v55 = vrot.slane %v9110_v45, 2  ;;  %v15570_v48 = vsub.f32 %v15445_v28, %v9015_v23  ;;  %v13274_v6 = vpop.eup %13273  ;;  %v9186_v28 = vrot.slane %v15377_v32, %v15320_v1  ;;  %v9428_v22 = vld [vmem:[%s15882_s5 + $0x388] sm:$0xff]  ;;  %v9395_v23 = vld [vmem:[%s15882_s5 + $0x280] sm:$0xff]  ;;  %v9457_v59 = vld [vmem:[%s15882_s5 + $0x470] sm:$0xff] }
 0x636   : > { %11298 = vmatprep.subr.mxu0 %v9402_v30  ;;  %11332 = vmatpush3.msra.mxu1 %v9419_v0  ;;  %v9158_v13 = vmul.f32 %v13272_v5, %v15371_v24  ;;  %v9194_v14 = vrot.slane %v15377_v32, %v15326_v4  ;;  %v9157_v26 = vmul.f32 %v13274_v6, %v15373_v16  ;;  %v9414_v32 = vld [vmem:[%s15882_s5 + $0x318] sm:$0xff]  ;;  %v9381_v0 = vld [vmem:[%s15882_s5 + $0x210] sm:$0xff] }
 0x637   : > { %11299 = vmatpush3.msra.mxu0 %v9386_v25  ;;  %11333 = vmatprep.subr.mxu1 %v9434_v38  ;;  %v9112_v31 = vadd.f32 %v9111_v55, %v9110_v45  ;;  %v9039_v42 = vmul.f32 %v15570_v48, %v15570_v48  ;;  %v9101_v19 = vrot.slane %v9100_v47, 1  ;;  %v9232_v25 = vmul.f32 %v9190_v8, %v9156_v50  ;;  %v9474_v55 = vld [vmem:[%s15882_s5 + $0x4f8] sm:$0xff] }
 0x638   : > { %11300 = vmatprep.subr.mxu0 %v9401_v3  ;;  %11334 = vmatpush3.msra.mxu1 %v9418_v12  ;;  %v9262_v57 = vrot.slane %v15379_v43, %v15320_v1  ;;  %v9274_v16 = vrot.slane %v15379_v43, %v15323_v33  ;;  %v9231_v38 = vmul.f32 %v9186_v28, %v9155_v9  ;;  %v9413_v1 = vld [vmem:[%s15882_s5 + $0x310] sm:$0xff]  ;;  %v9380_v33 = vld [vmem:[%s15882_s5 + $0x208] sm:$0xff]  ;;  %v9506_v50 = vld [vmem:[%s15882_s5 + $0x5f8] sm:$0xff] }
 0x639   : > { %11301 = vmatpush3.msra.mxu0 %v9385_v41  ;;  %11335 = vmatprep.subr.mxu1 %v9433_v44  ;;  %v9113_v24 = vrot.slane %v9112_v31, 1  ;;  %v9091_v30 = vrot.slane %v9039_v42, 4  ;;  %v9041_v15 = vmul.f32 %v15611_v34, %v15611_v34  ;;  %v9234_v61 = vmul.f32 %v9198_v35, %v9158_v13  ;;  %v9490_v28 = vld [vmem:[%s15882_s5 + $0x578] sm:$0xff]  ;;  %v9473_v9 = vld [vmem:[%s15882_s5 + $0x4f0] sm:$0xff] }
 0x63a   : > { %11302 = vmatprep.subr.mxu0 %v9400_v39  ;;  %11336 = vmatpush3.msra.mxu1 %v9417_v63  ;;  %v9270_v12 = vrot.slane %v15379_v43, %v15326_v4  ;;  %v9102_v41 = vadd.f32 %v9101_v19, %v9100_v47  ;;  %v9233_v36 = vmul.f32 %v9194_v14, %v9157_v26  ;;  %v9412_v4 = vld [vmem:[%s15882_s5 + $0x308] sm:$0xff]  ;;  %v9379_v43 = vld [vmem:[%s15882_s5 + $0x200] sm:$0xff] }
 0x63b   : > { %11303 = vmatpush3.msra.mxu0 %v9384_v21  ;;  %11337 = vmatprep.subr.mxu1 %v9432_v51  ;;  %v9092_v3 = vadd.f32 %v9091_v30, %v9039_v42  ;;  %v9114_v44 = vadd.f32 %v9113_v24, %v9112_v31  ;;  %v9103_v45 = vrot.slane %v9041_v15, 4  ;;  %v9308_v7 = vadd.f32 %v9266_v18, %v9232_v25  ;;  %v9427_v63 = vld [vmem:[%s15882_s5 + $0x380] sm:$0xff]  ;;  %v9458_v18 = vld [vmem:[%s15882_s5 + $0x478] sm:$0xff]  ;;  %v9505_v31 = vld [vmem:[%s15882_s5 + $0x5f0] sm:$0xff] }
 0x63c   : > { %11304 = vmatprep.subr.mxu0 %v9399_v54  ;;  %11338 = vmatpush3.msra.mxu1 %v9416_v2  ;;  %v9307_v21 = vadd.f32 %v9262_v57, %v9231_v38  ;;  %v9411_v51 = vld [vmem:[%s15882_s5 + $0x300] sm:$0xff]  ;;  %v9310_v54 = vadd.f32 %v9274_v16, %v9234_v61  ;;  %v9124_v8 = vmul.f32 0.125, %v9102_v41  ;;  %v9309_v27 = vadd.f32 %v9270_v12, %v9233_v36  ;;  %v9472_v14 = vld [vmem:[%s15882_s5 + $0x4e8] sm:$0xff]  ;;  %v9470_v16 = vld [vmem:[%s15882_s5 + $0x4d8] sm:$0xff] }
 0x63d   : > { %11305 = vmatpush3.msra.mxu0 %v9383_v53  ;;  %11339 = vmatprep.subr.mxu1 %v9431_v60  ;;  %v9093_v39 = vrot.slane %v9092_v3, 2  ;;  %v9104_v5 = vadd.f32 %v9103_v45, %v9041_v15  ;;  %v9126_v6 = vmul.f32 0.125, %v9114_v44  ;;  %v9504_v19 = vld [vmem:[%s15882_s5 + $0x5e8] sm:$0xff]  ;;  %v9471_v30 = vld [vmem:[%s15882_s5 + $0x4e0] sm:$0xff]  ;;  %v9486_v38 = vld [vmem:[%s15882_s5 + $0x558] sm:$0xff] }
 0x63e   : > { %11306 = vmatprep.subr.mxu0 %v9398_v29  ;;  %11340 = vmatpush3.msra.mxu1 %v9415_v11  ;;  %v9136_v42 = vadd.f32 1e-05, %v9124_v8  ;;  %v9489_v11 = vld [vmem:[%s15882_s5 + $0x570] sm:$0xff]  ;;  %v9487_v25 = vld [vmem:[%s15882_s5 + $0x560] sm:$0xff]  ;;  %v9468_v12 = vld [vmem:[%s15882_s5 + $0x4c8] sm:$0xff] }
 0x63f   : > { %11307 = vmatpush3.msra.mxu0 %v9382_v46  ;;  %11341 = vmatprep.subr.mxu1 %v9430_v20  ;;  %v9094_v47 = vadd.f32 %v9093_v39, %v9092_v3  ;;  %v9105_v53 = vrot.slane %v9104_v5, 2  ;;  %v9138_v46 = vadd.f32 1e-05, %v9126_v6  ;;  %v9456_v20 = vld [vmem:[%s15882_s5 + $0x468] sm:$0xff]  ;;  %v9469_v15 = vld [vmem:[%s15882_s5 + $0x4d0] sm:$0xff]  ;;  %v9467_v36 = vld [vmem:[%s15882_s5 + $0x4c0] sm:$0xff] }
 0x640   : > { %11308 = vmatprep.subr.mxu0 %v9397_v17  ;;  %11342 = vmatpush3.msra.mxu1 %v9414_v32  ;;  %v9488_v17 = vld [vmem:[%s15882_s5 + $0x568] sm:$0xff]  ;;  %v9503_v32 = vld [vmem:[%s15882_s5 + $0x5e0] sm:$0xff]  ;;  %13275 = vrsqrt.f32 %v9136_v42  ;;  %v9485_v61 = vld [vmem:[%s15882_s5 + $0x550] sm:$0xff] }
 0x641   : > { %11309 = vmatpush3.msra.mxu0 %v9381_v0  ;;  %11343 = vmatprep.subr.mxu1 %v9429_v62  ;;  %v9095_v2 = vrot.slane %v9094_v47, 1  ;;  %v9106_v29 = vadd.f32 %v9105_v53, %v9104_v5  ;;  %v9455_v0 = vld [vmem:[%s15882_s5 + $0x460] sm:$0xff]  ;;  %13277 = vrsqrt.f32 %v9138_v46  ;;  %v9502_v62 = vld [vmem:[%s15882_s5 + $0x5d8] sm:$0xff]  ;;  %v9500_v41 = vld [vmem:[%s15882_s5 + $0x5c8] sm:$0xff] }
 0x642   : > { %11310 = vmatprep.subr.mxu0 %v9396_v40  ;;  %11344 = vmatpush3.msra.mxu1 %v9413_v1  ;;  %v9454_v40 = vld [vmem:[%s15882_s5 + $0x458] sm:$0xff]  ;;  %v9501_v1 = vld [vmem:[%s15882_s5 + $0x5d0] sm:$0xff]  ;;  %v9499_v44 = vld [vmem:[%s15882_s5 + $0x5c0] sm:$0xff] }
 0x643   : > { %11311 = vmatpush3.msra.mxu0 %v9380_v33  ;;  %11345 = vmatprep.subr.mxu1 %v9428_v22  ;;  %v9096_v60 = vadd.f32 %v9095_v2, %v9094_v47  ;;  %v9107_v35 = vrot.slane %v9106_v29, 1  ;;  %v9453_v33 = vld [vmem:[%s15882_s5 + $0x450] sm:$0xff]  ;;  %v9452_v22 = vld [vmem:[%s15882_s5 + $0x448] sm:$0xff]  ;;  %v9451_v39 = vld [vmem:[%s15882_s5 + $0x440] sm:$0xff] }
 0x644   : > { %11312 = vmatprep.subr.mxu0 %v9395_v23  ;;  %11346 = vmatpush3.msra.mxu1 %v9412_v4  ;;  %v9484_v23 = vld [vmem:[%s15882_s5 + $0x548] sm:$0xff]  ;;  %v9483_v45 = vld [vmem:[%s15882_s5 + $0x540] sm:$0xff]  ;;  %v9466_v4 = vld [vmem:[%s15882_s5 + $0x4b8] sm:$0xff] }
 0x645   : > { %11313 = vmatpush3.msra.mxu0 %v9379_v43  ;;  %11347 = vmatprep.subr.mxu1 %v9427_v63  ;;  %v9123_v13 = vmul.f32 0.125, %v9096_v60  ;;  %v9108_v24 = vadd.f32 %v9107_v35, %v9106_v29  ;;  %v9498_v43 = vld [vmem:[%s15882_s5 + $0x5b8] sm:$0xff]  ;;  %v9497_v47 = vld [vmem:[%s15882_s5 + $0x5b0] sm:$0xff]  ;;  %v9496_v6 = vld [vmem:[%s15882_s5 + $0x5a8] sm:$0xff] }
 0x646   : > { %9718 = vmatprep.mubr.f32.mxu0 %v9308_v7  ;;  %11348 = vmatpush3.msra.mxu1 %v9411_v51  ;;  %v9450_v7 = vld [vmem:[%s15882_s5 + $0x438] sm:$0xff]  ;;  %v9449_v51 = vld [vmem:[%s15882_s5 + $0x430] sm:$0xff]  ;;  %v9448_v53 = vld [vmem:[%s15882_s5 + $0x428] sm:$0xff] }
 0x647   : > { %9719 = vmatmul.mubr.f32.vlgmr.msra.gmra.mxu0 %v9307_v21  ;;  %9788 = vmatprep.mubr.f32.mxu1 %v9310_v54  ;;  %v9135_v26 = vadd.f32 1e-05, %v9123_v13  ;;  %v9125_v57 = vmul.f32 0.125, %v9108_v24  ;;  %v9482_v63 = vld [vmem:[%s15882_s5 + $0x538] sm:$0xff]  ;;  %v9465_v21 = vld [vmem:[%s15882_s5 + $0x4b0] sm:$0xff] }
 0x648   : > { %11352 = vmatprep.subr.mxu0 %v9474_v55  ;;  %11387 = vmatprep.subr.mxu1 %v9506_v50  ;;  %v9481_v54 = vld [vmem:[%s15882_s5 + $0x530] sm:$0xff]  ;;  %v9480_v50 = vld [vmem:[%s15882_s5 + $0x528] sm:$0xff]  ;;  %v9240_v42 = vld [vmem:[#allocation10 + $0x8] sm:$0xf] }
 0x649   : > { %9789 = vmatmul.mubr.f32.vlgmr.msra.gmra.mxu1 %v9309_v27  ;;  %11353 = vmatpush3.msra.mxu0 %v9458_v18  ;;  %13279 = vrsqrt.f32 %v9135_v26  ;;  %v9137_v3 = vadd.f32 1e-05, %v9125_v57  ;;  %v9164_v8 = vld [vmem:[#allocation8 + $0x8] sm:$0xf]  ;;  %v9464_v27 = vld [vmem:[%s15882_s5 + $0x4a8] sm:$0xff]  ;;  %v9463_v18 = vld [vmem:[%s15882_s5 + $0x4a0] sm:$0xff]  ;;  %v9278_v57 = vrot.slane %v9240_v42, %v15217_v58 }
 0x64a   : > { %11388 = vmatpush3.msra.mxu1 %v9490_v28  ;;  %11354 = vmatprep.subr.mxu0 %v9473_v9  ;;  %v9495_v28 = vld [vmem:[%s15882_s5 + $0x5a0] sm:$0xff]  ;;  %v9206_v29 = vrot.slane %v9164_v8, %v15211_v52  ;;  %v9494_v13 = vld [vmem:[%s15882_s5 + $0x598] sm:$0xff]  ;;  %v9493_v26 = vld [vmem:[%s15882_s5 + $0x590] sm:$0xff] }
 0x64b   : > { %11389 = vmatprep.subr.mxu1 %v9505_v31  ;;  %11355 = vmatpush3.msra.mxu0 %v9457_v59  ;;  %13281 = vrsqrt.f32 %v9137_v3  ;;  %v9447_v9 = vld [vmem:[%s15882_s5 + $0x420] sm:$0xff] }
 0x64c   : > { %11390 = vmatpush3.msra.mxu1 %v9489_v11  ;;  %11356 = vmatprep.subr.mxu0 %v9472_v14  ;;  %v9479_v31 = vld [vmem:[%s15882_s5 + $0x520] sm:$0xff]  ;;  %v9214_v11 = vrot.slane %v9164_v8, %v15214_v56  ;;  %v9202_v14 = vrot.slane %v9164_v8, %v15217_v58  ;;  %v9476_v58 = vld [vmem:[%s15882_s5 + $0x508] sm:$0xff] }
 0x64d   : > { %11391 = vmatprep.subr.mxu1 %v9504_v19  ;;  %11357 = vmatpush3.msra.mxu0 %v9456_v20  ;;  %v13276_v5 = vpop.eup %13275  ;;  %v9210_v19 = vrot.slane %v9164_v8, %v15252_v10  ;;  %v9478_v20 = vld [vmem:[%s15882_s5 + $0x518] sm:$0xff]  ;;  %v9459_v3 = vld [vmem:[%s15882_s5 + $0x480] sm:$0xff] }
 0x64e   : > { %11392 = vmatpush3.msra.mxu1 %v9488_v17  ;;  %11358 = vmatprep.subr.mxu0 %v9471_v30  ;;  %v13278_v55 = vpop.eup %13277  ;;  %v9160_v60 = vmul.f32 %v13276_v5, %v15491_v49  ;;  %v9462_v49 = vld [vmem:[%s15882_s5 + $0x498] sm:$0xff]  ;;  %v9282_v30 = vrot.slane %v9240_v42, %v15211_v52  ;;  %v9460_v52 = vld [vmem:[%s15882_s5 + $0x488] sm:$0xff] }
 0x64f   : > { %11393 = vmatprep.subr.mxu1 %v9503_v32  ;;  %11359 = vmatpush3.msra.mxu0 %v9455_v0  ;;  %v9162_v59 = vmul.f32 %v13278_v55, %v15515_v37  ;;  %v9446_v37 = vld [vmem:[%s15882_s5 + $0x418] sm:$0xff]  ;;  %v9445_v32 = vld [vmem:[%s15882_s5 + $0x410] sm:$0xff] }
 0x650   : > { %11394 = vmatpush3.msra.mxu1 %v9487_v25  ;;  %11360 = vmatprep.subr.mxu0 %v9470_v16  ;;  %v9236_v24 = vmul.f32 %v9206_v29, %v9160_v60  ;;  %v9290_v25 = vrot.slane %v9240_v42, %v15214_v56  ;;  %v9492_v16 = vld [vmem:[%s15882_s5 + $0x588] sm:$0xff] }
 0x651   : > { %11395 = vmatprep.subr.mxu1 %v9502_v62  ;;  %11361 = vmatpush3.msra.mxu0 %v9454_v40  ;;  %v9238_v0 = vmul.f32 %v9214_v11, %v9162_v59  ;;  %v9444_v56 = vld [vmem:[%s15882_s5 + $0x408] sm:$0xff] }
 0x652   : > { %11396 = vmatpush3.msra.mxu1 %v9486_v38  ;;  %11362 = vmatprep.subr.mxu0 %v9469_v15  ;;  %v9286_v38 = vrot.slane %v9240_v42, %v15252_v10  ;;  %v9491_v10 = vld [vmem:[%s15882_s5 + $0x580] sm:$0xff]  ;;  %v9312_v15 = vadd.f32 %v9282_v30, %v9236_v24 }
 0x653   : > { %11397 = vmatprep.subr.mxu1 %v9501_v1  ;;  %11363 = vmatpush3.msra.mxu0 %v9453_v33  ;;  %v9443_v1 = vld [vmem:[%s15882_s5 + $0x400] sm:$0xff]  ;;  %v9314_v33 = vadd.f32 %v9290_v25, %v9238_v0 }
 0x654   : > { %11398 = vmatpush3.msra.mxu1 %v9485_v61  ;;  %11364 = vmatprep.subr.mxu0 %v9468_v12  ;;  %v9475_v61 = vld [vmem:[%s15882_s5 + $0x500] sm:$0xff] }
 0x655   : > { %11399 = vmatprep.subr.mxu1 %v9500_v41  ;;  %11365 = vmatpush3.msra.mxu0 %v9452_v22 }
 0x656   : > { %11400 = vmatpush3.msra.mxu1 %v9484_v23  ;;  %11366 = vmatprep.subr.mxu0 %v9467_v36  ;;  %v13280_v2 = vpop.eup %13279 }
 0x657   : > { %11401 = vmatprep.subr.mxu1 %v9499_v44  ;;  %11367 = vmatpush3.msra.mxu0 %v9451_v39  ;;  %v9159_v35 = vmul.f32 %v13280_v2, %v15570_v48  ;;  %v9461_v48 = vld [vmem:[%s15882_s5 + $0x490] sm:$0xff] }
 0x658   : > { %11402 = vmatpush3.msra.mxu1 %v9483_v45  ;;  %11368 = vmatprep.subr.mxu0 %v9466_v4  ;;  %v13282_v46 = vpop.eup %13281  ;;  %v11209_v45 = vld [vmem:[#allocation11] ss:$0 sm:$0xff] }
 0x659   : > { %11403 = vmatprep.subr.mxu1 %v9498_v43  ;;  %11369 = vmatpush3.msra.mxu0 %v9450_v7  ;;  %v9161_v17 = vmul.f32 %v13282_v46, %v15611_v34  ;;  %v9477_v34 = vld [vmem:[%s15882_s5 + $0x510] sm:$0xff]  ;;  %v9235_v62 = vmul.f32 %v9202_v14, %v9159_v35 }
 0x65a   : > { %11404 = vmatpush3.msra.mxu1 %v9482_v63  ;;  %11370 = vmatprep.subr.mxu0 %v9465_v21 }
 0x65b   : > { %11405 = vmatprep.subr.mxu1 %v9497_v47  ;;  %11371 = vmatpush3.msra.mxu0 %v9449_v51  ;;  %v9237_v40 = vmul.f32 %v9210_v19, %v9161_v17  ;;  %v9311_v12 = vadd.f32 %v9278_v57, %v9235_v62 }
 0x65c   : > { %11406 = vmatpush3.msra.mxu1 %v9481_v54  ;;  %11372 = vmatprep.subr.mxu0 %v9464_v27 }
 0x65d   : > { %11407 = vmatprep.subr.mxu1 %v9496_v6  ;;  %11373 = vmatpush3.msra.mxu0 %v9448_v53  ;;  %v9313_v41 = vadd.f32 %v9286_v38, %v9237_v40 }
 0x65e   : > { %11408 = vmatpush3.msra.mxu1 %v9480_v50  ;;  %11374 = vmatprep.subr.mxu0 %v9463_v18 }
 0x65f   : > { %11409 = vmatprep.subr.mxu1 %v9495_v28  ;;  %11375 = vmatpush3.msra.mxu0 %v9447_v9 }
 0x660   : > { %11410 = vmatpush3.msra.mxu1 %v9479_v31  ;;  %11376 = vmatprep.subr.mxu0 %v9462_v49 }
 0x661   : > { %11411 = vmatprep.subr.mxu1 %v9494_v13  ;;  %11377 = vmatpush3.msra.mxu0 %v9446_v37 }
 0x662   : > { %11412 = vmatpush3.msra.mxu1 %v9478_v20  ;;  %11378 = vmatprep.subr.mxu0 %v9461_v48 }
 0x663   : > { %11413 = vmatprep.subr.mxu1 %v9493_v26  ;;  %11379 = vmatpush3.msra.mxu0 %v9445_v32 }
 0x664   : > { %11414 = vmatpush3.msra.mxu1 %v9477_v34  ;;  %11380 = vmatprep.subr.mxu0 %v9460_v52 }
 0x665   : > { %11415 = vmatprep.subr.mxu1 %v9492_v16  ;;  %11381 = vmatpush3.msra.mxu0 %v9444_v56 }
 0x666   : > { %11416 = vmatpush3.msra.mxu1 %v9476_v58  ;;  %11382 = vmatprep.subr.mxu0 %v9459_v3 }
 0x667   : > { %11417 = vmatprep.subr.mxu1 %v9491_v10  ;;  %11383 = vmatpush3.msra.mxu0 %v9443_v1 }
 0x668   : > { %9858 = vmatprep.mubr.f32.mxu0 %v9312_v15  ;;  %11418 = vmatpush3.msra.mxu1 %v9475_v61 }
 0x669   : > { %9928 = vmatprep.mubr.f32.mxu1 %v9314_v33  ;;  %9859 = vmatmul.mubr.f32.vlgmr.msra.gmra.mxu0 %v9311_v12 }
 0x66a   : > { %9929 = vmatmul.mubr.f32.vlgmr.msra.gmra.mxu1 %v9313_v41 }
 0x6e6   : > { %v11244_v22 = vpop.f32.mrf.mxu0 }
 0x6e7   : > { %v11279_v23 = vpop.f32.mrf.mxu1 }
 0x6e8   : > { %v11245_v36 = vpop.f32.mrf.mxu0 }
 0x6e9   : > { %v11246_v39 = vadd.f32 %v11245_v36, %v11244_v22  ;;  %v11280_v4 = vpop.f32.mrf.mxu1 }
 0x6ea   : > { %v11281_v21 = vadd.f32 %v11280_v4, %v11279_v23 }
 0x6eb   : > { %v9581_v63 = vadd.f32 %v11246_v39, %v11209_v45 }
 0x6ed   : > { %v9651_v51 = vadd.f32 %v11281_v21, %v9581_v63 }
 0x707   : > { %v11314_v44 = vpop.f32.mrf.mxu0 }
 0x709   : > { %v11349_v43 = vpop.f32.mrf.mxu1  ;;  %v11315_v7 = vpop.f32.mrf.mxu0 }
 0x70a   : > { %v11316_v47 = vadd.f32 %v11315_v7, %v11314_v44 }
 0x70b   : > { %v11350_v5 = vpop.f32.mrf.mxu1 }
 0x70c   : > { %v9721_v54 = vadd.f32 %v11316_v47, %v9651_v51  ;;  %v11351_v8 = vadd.f32 %v11350_v5, %v11349_v43 }
 0x70e   : > { %v9791_v53 = vadd.f32 %v11351_v8, %v9721_v54 }
 0x729   : > { %v11384_v55 = vpop.f32.mrf.mxu0 }
 0x72a   : > { %v11419_v27 = vpop.f32.mrf.mxu1 }
 0x72b   : > { %v11385_v6 = vpop.f32.mrf.mxu0 }
 0x72c   : > { %v11420_v2 = vpop.f32.mrf.mxu1  ;;  %v11386_v50 = vadd.f32 %v11385_v6, %v11384_v55 }
 0x72d   : > { %v11421_v28 = vadd.f32 %v11420_v2, %v11419_v27 }
 0x72e   : > { %v9861_v18 = vadd.f32 %v11386_v50, %v9791_v53 }
 0x730   : > { %v9931_v60 = vadd.f32 %v11421_v28, %v9861_v18 }
 0x732   : > { %9935 = vst.msk [vmem:[%s15884_s7] sm:$0xff] %vm9934_vm0, %v9931_v60 }
 0x733 PF: > { %p20_p8 = scmp.ge.s32.totalorder %s13635_s15, 4   ;;  %s15904_s24 = smov %s13483_s25 }
 0x734   : > { %s15905_s25 = smov %s13487_s26  ;;  %s15906_s26 = smov %s13644_s22 }
 0x735   : > { %s15907_s27 = smov %s13635_s15  ;;  %22 = sbr.rel (!%p20_p8) target bundleno = 6 (0x6), region = 114 }
 0x73a   :  { %9947 = vsyncpa [#allocation4], 1 }
 0x73b   :  { %9949 = vsyncpa [#allocation4 + $0x1], 1 }
 0x73c   :  { %9950 = vsyncpa [#allocation6], 1 }
 0x73d   :  { %9952 = vsyncpa [#allocation6 + $0x1], 1 }
 0x73e   :  { %9953 = vsyncpa [#allocation9], 1 }
 0x73f   :  { %9954 = vsyncpa [#allocation12], 1 }

</bundles_post_ra>
